<compile_context>
chip_gen: v7x
topology: tpu7x:2x2x1
jax: 0.10.0
libtpu: 0.0.40
codegen_flags: <defaults>
</compile_context>

<pallas_src>
import functools

import numpy as np

import jax
import jax.numpy as jnp
from jax import lax
from jax.experimental import pallas as pl
from jax.experimental.pallas import tpu as pltpu

_PAR = pltpu.CompilerParams(dimension_semantics=("parallel",))
_EPS = 1e-5


# ---------------------------------------------------------------------------
# Pallas kernels (one grid step == one batch element)
# ---------------------------------------------------------------------------

def _stage1_kernel(x_ref, w1_ref, y_ref, s_ref, q_ref):
    # conv1: 1x1x1, no bias.  x: (Cin, S), w1: (P, Cin) -> y: (P, S)
    y = jnp.dot(w1_ref[...], x_ref[...], preferred_element_type=jnp.float32)
    y_ref[...] = y.astype(y_ref.dtype)
    s_ref[...] = jnp.sum(y, axis=1, keepdims=True)          # BN1 per-batch partials
    q_ref[...] = jnp.sum(y * y, axis=1, keepdims=True)


def _stage2_kernel(y1_ref, sc_ref, sh_ref, w2_ref, m_ref, y_ref, s_ref, q_ref,
                   *, offs):
    # bn1+relu fused with conv2 (3x3x3, padding=dilation, stride=1, no bias).
    # y1: (P, S); sc/sh: (P, 1); w2: (27, P, P); m: (27, 1, S) {0,1} validity masks.
    h = jnp.maximum(y1_ref[...] * sc_ref[...] + sh_ref[...], 0.0)        # (P, S)
    S = h.shape[-1]
    acc = jnp.zeros_like(h)
    for t, off in enumerate(offs):
        # h at flattened position (s + off); masked to 0 where the 3-D neighbour
        # falls outside the (zero-padded) volume -> exact 'same' zero padding.
        shifted = h if off == 0 else pltpu.roll(h, (-off) % S, 1)
        acc = acc + jnp.dot(w2_ref[t], shifted * m_ref[t],
                            preferred_element_type=jnp.float32)
    y_ref[...] = acc.astype(y_ref.dtype)
    s_ref[...] = jnp.sum(acc, axis=1, keepdims=True)          # BN2 per-batch partials
    q_ref[...] = jnp.sum(acc * acc, axis=1, keepdims=True)


def _stage3_kernel(y2_ref, sc_ref, sh_ref, w3_ref, y_ref, s_ref, q_ref):
    # bn2+relu fused with conv3 (1x1x1, no bias).  y2: (P, S), w3: (4P, P).
    h = jnp.maximum(y2_ref[...] * sc_ref[...] + sh_ref[...], 0.0)
    y = jnp.dot(w3_ref[...], h, preferred_element_type=jnp.float32)
    y_ref[...] = y.astype(y_ref.dtype)
    s_ref[...] = jnp.sum(y, axis=1, keepdims=True)            # BN3 per-batch partials
    q_ref[...] = jnp.sum(y * y, axis=1, keepdims=True)


def _stage4_kernel(y3_ref, x_ref, sc_ref, sh_ref, o_ref):
    # bn3 + residual add + relu as one fused elementwise epilogue pass.
    o_ref[...] = jnp.maximum(
        y3_ref[...] * sc_ref[...] + sh_ref[...] + x_ref[...], 0.0
    ).astype(o_ref.dtype)


# ---------------------------------------------------------------------------
# pallas_call wrappers
# ---------------------------------------------------------------------------

def _row_spec(C, S):
    return pl.BlockSpec((None, C, S), lambda b: (b, 0, 0))


def _stat_spec(C):
    return pl.BlockSpec((None, C, 1), lambda b: (b, 0, 0))


def _const_spec(shape):
    nd = len(shape)
    return pl.BlockSpec(shape, lambda b: (0,) * nd)


def _stage1(xf, w1):
    B, Cin, S = xf.shape
    P = w1.shape[0]
    return pl.pallas_call(
        _stage1_kernel,
        out_shape=(jax.ShapeDtypeStruct((B, P, S), jnp.float32),
                   jax.ShapeDtypeStruct((B, P, 1), jnp.float32),
                   jax.ShapeDtypeStruct((B, P, 1), jnp.float32)),
        grid=(B,),
        in_specs=[_row_spec(Cin, S), _const_spec((P, Cin))],
        out_specs=(_row_spec(P, S), _stat_spec(P), _stat_spec(P)),
        compiler_params=_PAR,
    )(xf, w1)


def _stage2(y1, sc, sh, w2t, masks, offs):
    B, P, S = y1.shape
    return pl.pallas_call(
        functools.partial(_stage2_kernel, offs=tuple(offs)),
        out_shape=(jax.ShapeDtypeStruct((B, P, S), jnp.float32),
                   jax.ShapeDtypeStruct((B, P, 1), jnp.float32),
                   jax.ShapeDtypeStruct((B, P, 1), jnp.float32)),
        grid=(B,),
        in_specs=[_row_spec(P, S),
                  _const_spec((P, 1)), _const_spec((P, 1)),
                  _const_spec((27, P, P)), _const_spec((27, 1, S))],
        out_specs=(_row_spec(P, S), _stat_spec(P), _stat_spec(P)),
        compiler_params=_PAR,
    )(y1, sc, sh, w2t, masks)


def _stage3(y2, sc, sh, w3):
    B, P, S = y2.shape
    Pe = w3.shape[0]
    return pl.pallas_call(
        _stage3_kernel,
        out_shape=(jax.ShapeDtypeStruct((B, Pe, S), jnp.float32),
                   jax.ShapeDtypeStruct((B, Pe, 1), jnp.float32),
                   jax.ShapeDtypeStruct((B, Pe, 1), jnp.float32)),
        grid=(B,),
        in_specs=[_row_spec(P, S),
                  _const_spec((P, 1)), _const_spec((P, 1)),
                  _const_spec((Pe, P))],
        out_specs=(_row_spec(Pe, S), _stat_spec(Pe), _stat_spec(Pe)),
        compiler_params=_PAR,
    )(y2, sc, sh, w3)


def _stage4(y3, xf, sc, sh):
    B, Pe, S = y3.shape
    return pl.pallas_call(
        _stage4_kernel,
        out_shape=jax.ShapeDtypeStruct((B, Pe, S), jnp.float32),
        grid=(B,),
        in_specs=[_row_spec(Pe, S), _row_spec(Pe, S),
                  _const_spec((Pe, 1)), _const_spec((Pe, 1))],
        out_specs=_row_spec(Pe, S),
        compiler_params=_PAR,
    )(y3, xf, sc, sh)


# ---------------------------------------------------------------------------
# BN folding + conv2 tap tables (plain JAX / host-side, all tiny)
# ---------------------------------------------------------------------------

def _bn_scale_shift(ssum, ssq, count, gamma, beta):
    # Fold training-mode BatchNorm (batch stats, biased variance) into scale/shift.
    # TODO(synk): SynchronizedBatchNorm3d cross-device stat sync is reduced to
    # single-device batch statistics (identical on one device); eval-mode running
    # stats are not modelled.
    tot = jnp.sum(ssum[:, :, 0], axis=0)
    tot2 = jnp.sum(ssq[:, :, 0], axis=0)
    mean = tot / count
    var = tot2 / count - mean * mean
    scale = gamma * lax.rsqrt(var + _EPS)
    shift = beta - mean * scale
    return scale[:, None], shift[:, None]


def _conv3x3x3_taps(H, W, D, dilation):
    """Static flat-index offsets + {0,1} validity masks for a 3^3 'same' conv."""
    hh, ww, dd = np.meshgrid(np.arange(H), np.arange(W), np.arange(D), indexing="ij")
    offs, masks = [], []
    for ki in range(3):
        for kj in range(3):
            for kk in range(3):
                dh = (ki - 1) * dilation
                dw = (kj - 1) * dilation
                dz = (kk - 1) * dilation
                valid = ((hh + dh >= 0) & (hh + dh < H) &
                         (ww + dw >= 0) & (ww + dw < W) &
                         (dd + dz >= 0) & (dd + dz < D))
                offs.append(dh * W * D + dw * D + dz)
                masks.append(valid.reshape(-1).astype(np.float32))
    return tuple(offs), jnp.asarray(np.stack(masks)[:, None, :])      # (27, 1, S)


# ---------------------------------------------------------------------------
# Bottleneck forward
# ---------------------------------------------------------------------------

def bottleneck_forward(x, params, *, dilation=1):
    """Bottleneck.forward with stride=1, downsample=None, training-mode BN."""
    B, Cin, H, W, D = x.shape
    S = H * W * D
    P = params['w2'].shape[0]
    # TODO(synk): stride > 1 (and the downsample branch) is not implemented — with
    # downsample=None the residual add requires stride == 1 / inplanes == 4*planes anyway.
    # TODO(synk): for production activation sizes, add an S-tiling grid axis (with halos
    # in stage 2) and raise vmem_limit_bytes deliberately (v7x has only 64 MiB VMEM).
    xf = x.reshape(B, Cin, S)                                  # metadata-only flatten

    y1, s1, q1 = _stage1(xf, params['w1'])
    sc1, sh1 = _bn_scale_shift(s1, q1, B * S, params['g1'], params['b1'])

    offs, masks = _conv3x3x3_taps(H, W, D, dilation)
    w2t = params['w2'].transpose(2, 3, 4, 0, 1).reshape(27, P, P)
    y2, s2, q2 = _stage2(y1, sc1, sh1, w2t, masks, offs)
    sc2, sh2 = _bn_scale_shift(s2, q2, B * S, params['g2'], params['b2'])

    y3, s3, q3 = _stage3(y2, sc2, sh2, params['w3'])
    sc3, sh3 = _bn_scale_shift(s3, q3, B * S, params['g3'], params['b3'])

    out = _stage4(y3, xf, sc3, sh3)
    return out.reshape(B, Cin, H, W, D)


# ---------------------------------------------------------------------------
# Pure-JAX reference (mirrors the PyTorch module, training-mode BN)
# ---------------------------------------------------------------------------

def _reference_forward(x, params, *, dilation=1):
    dn = ("NCHWD", "OIHWD", "NCHWD")

    def bn(t, g, b):
        mean = jnp.mean(t, axis=(0, 2, 3, 4), keepdims=True)
        var = jnp.mean((t - mean) ** 2, axis=(0, 2, 3, 4), keepdims=True)
        return ((t - mean) * lax.rsqrt(var + _EPS) * g.reshape(1, -1, 1, 1, 1)
                + b.reshape(1, -1, 1, 1, 1))

    w1 = params['w1'][:, :, None, None, None]
    w3 = params['w3'][:, :, None, None, None]
    y = lax.conv_general_dilated(x, w1, (1, 1, 1), [(0, 0)] * 3,
                                 dimension_numbers=dn)
    y = jnp.maximum(bn(y, params['g1'], params['b1']), 0.0)
    y = lax.conv_general_dilated(y, params['w2'], (1, 1, 1),
                                 [(dilation, dilation)] * 3,
                                 rhs_dilation=(dilation,) * 3,
                                 dimension_numbers=dn)
    y = jnp.maximum(bn(y, params['g2'], params['b2']), 0.0)
    y = lax.conv_general_dilated(y, w3, (1, 1, 1), [(0, 0)] * 3,
                                 dimension_numbers=dn)
    y = bn(y, params['g3'], params['b3'])
    return jnp.maximum(y + x, 0.0)


# ---------------------------------------------------------------------------

if __name__ == "__main__":
    planes = 8
    inplanes = planes * 4            # downsample=None => residual needs matching channels
    B, H, W, D = 2, 16, 16, 8        # S = H*W*D = 2048 = 16 * 128 lanes (lane-dense)

    key = jax.random.PRNGKey(0)
    ks = jax.random.split(key, 10)
    x = jax.random.normal(ks[0], (B, inplanes, H, W, D), jnp.float32)
    params = {
        'w1': 0.1 * jax.random.normal(ks[1], (planes, inplanes), jnp.float32),
        'w2': 0.1 * jax.random.normal(ks[2], (planes, planes, 3, 3, 3), jnp.float32),
        'w3': 0.1 * jax.random.normal(ks[3], (planes * 4, planes), jnp.float32),
        'g1': 1.0 + 0.1 * jax.random.normal(ks[4], (planes,), jnp.float32),
        'b1': 0.1 * jax.random.normal(ks[5], (planes,), jnp.float32),
        'g2': 1.0 + 0.1 * jax.random.normal(ks[6], (planes,), jnp.float32),
        'b2': 0.1 * jax.random.normal(ks[7], (planes,), jnp.float32),
        'g3': 1.0 + 0.1 * jax.random.normal(ks[8], (planes * 4,), jnp.float32),
        'b3': 0.1 * jax.random.normal(ks[9], (planes * 4,), jnp.float32),
    }

    out = jax.jit(bottleneck_forward)(x, params)
    jax.block_until_ready(out)
    assert out.shape == x.shape
    assert bool(jnp.all(jnp.isfinite(out)))

    ref = _reference_forward(x, params)
    err = float(jnp.max(jnp.abs(out - ref)))
    assert err < 1e-1, f"mismatch vs pure-JAX reference: max abs err = {err}"

    print("KERNEL_OK")
</pallas_src>

<mosaic_0001>
module attributes {stable_mosaic.version = 11 : i64} {
  func.func @_stage1_kernel(%arg0: i32, %arg1: memref<1x32x2048xf32, #tpu.memory_space<vmem>>, %arg2: memref<8x32xf32, #tpu.memory_space<vmem>>, %arg3: memref<1x8x2048xf32, #tpu.memory_space<vmem>>, %arg4: memref<1x8x1xf32, #tpu.memory_space<vmem>>, %arg5: memref<1x8x1xf32, #tpu.memory_space<vmem>>) attributes {dimension_semantics = [#tpu.dimension_semantics<parallel>], iteration_bounds = array<i64: 2>, scalar_prefetch = 0 : i64, scratch_operands = 0 : i64, tpu.core_type = #tpu.core_type<tc>, window_params = [{transform_indices = @transform_0, window_bounds = array<i64: 1, 32, 2048>}, {pipeline_mode = #tpu.pipeline_mode<synchronous>, transform_indices = @transform_1, window_bounds = array<i64: 8, 32>}, {transform_indices = @transform_2, window_bounds = array<i64: 1, 8, 2048>}, {transform_indices = @transform_3, window_bounds = array<i64: 1, 8, 1>}, {transform_indices = @transform_4, window_bounds = array<i64: 1, 8, 1>}]} {
    %c0 = arith.constant 0 : index
    %c0_0 = arith.constant 0 : index
    %0 = vector.load %arg2[%c0, %c0_0] : memref<8x32xf32, #tpu.memory_space<vmem>>, vector<8x32xf32>
    %c0_1 = arith.constant 0 : index
    %c0_2 = arith.constant 0 : index
    %c0_3 = arith.constant 0 : index
    %1 = vector.load %arg1[%c0_1, %c0_2, %c0_3] : memref<1x32x2048xf32, #tpu.memory_space<vmem>>, vector<1x32x2048xf32>
    %2 = vector.shape_cast %1 : vector<1x32x2048xf32> to vector<32x2048xf32>
    %cst = arith.constant dense<0.000000e+00> : vector<8x2048xf32>
    %3 = tpu.matmul %0, %2, %cst {dimension_numbers = #tpu.dot_dimension_numbers<[1], [0], [0], [1], [0, 0, 1, 1], [], []>} : vector<8x32xf32>, vector<32x2048xf32>, vector<8x2048xf32> -> vector<8x2048xf32>
    %c0_4 = arith.constant 0 : index
    %c0_5 = arith.constant 0 : index
    %c0_6 = arith.constant 0 : index
    %4 = vector.load %arg3[%c0_4, %c0_5, %c0_6] : memref<1x8x2048xf32, #tpu.memory_space<vmem>>, vector<1x8x2048xf32>
    %5 = vector.shape_cast %4 : vector<1x8x2048xf32> to vector<8x2048xf32>
    %6 = vector.shape_cast %3 : vector<8x2048xf32> to vector<1x8x2048xf32>
    tpu.vector_store %arg3[%c0_4, %c0_5, %c0_6], %6 {strides = array<i32>} : memref<1x8x2048xf32, #tpu.memory_space<vmem>>, vector<1x8x2048xf32>,
    %cst_7 = arith.constant dense<0.000000e+00> : vector<8xf32>
    %7 = vector.multi_reduction <add>, %3, %cst_7 [1] : vector<8x2048xf32> to vector<8xf32>
    %8 = vector.shape_cast %7 : vector<8xf32> to vector<8x1xf32>
    %c0_8 = arith.constant 0 : index
    %c0_9 = arith.constant 0 : index
    %c0_10 = arith.constant 0 : index
    %9 = vector.load %arg4[%c0_8, %c0_9, %c0_10] : memref<1x8x1xf32, #tpu.memory_space<vmem>>, vector<1x8x1xf32>
    %10 = vector.shape_cast %9 : vector<1x8x1xf32> to vector<8x1xf32>
    %11 = vector.shape_cast %8 : vector<8x1xf32> to vector<1x8x1xf32>
    tpu.vector_store %arg4[%c0_8, %c0_9, %c0_10], %11 {strides = array<i32>} : memref<1x8x1xf32, #tpu.memory_space<vmem>>, vector<1x8x1xf32>,
    %12 = arith.mulf %3, %3 : vector<8x2048xf32>
    %cst_11 = arith.constant dense<0.000000e+00> : vector<8xf32>
    %13 = vector.multi_reduction <add>, %12, %cst_11 [1] : vector<8x2048xf32> to vector<8xf32>
    %14 = vector.shape_cast %13 : vector<8xf32> to vector<8x1xf32>
    %c0_12 = arith.constant 0 : index
    %c0_13 = arith.constant 0 : index
    %c0_14 = arith.constant 0 : index
    %15 = vector.load %arg5[%c0_12, %c0_13, %c0_14] : memref<1x8x1xf32, #tpu.memory_space<vmem>>, vector<1x8x1xf32>
    %16 = vector.shape_cast %15 : vector<1x8x1xf32> to vector<8x1xf32>
    %17 = vector.shape_cast %14 : vector<8x1xf32> to vector<1x8x1xf32>
    tpu.vector_store %arg5[%c0_12, %c0_13, %c0_14], %17 {strides = array<i32>} : memref<1x8x1xf32, #tpu.memory_space<vmem>>, vector<1x8x1xf32>,
    return
  }
  func.func @transform_0(%arg0: i32) -> (i32, i32, i32) {
    %c0_i32 = arith.constant 0 : i32
    %c0_i32_0 = arith.constant 0 : i32
    %c0_i32_1 = arith.constant 0 : i32
    return %arg0, %c0_i32, %c0_i32_0 : i32, i32, i32
  }
  func.func @transform_1(%arg0: i32) -> (i32, i32) {
    %c0_i32 = arith.constant 0 : i32
    %c0_i32_0 = arith.constant 0 : i32
    %c0_i32_1 = arith.constant 0 : i32
    return %c0_i32, %c0_i32_0 : i32, i32
  }
  func.func @transform_2(%arg0: i32) -> (i32, i32, i32) {
    %c0_i32 = arith.constant 0 : i32
    %c0_i32_0 = arith.constant 0 : i32
    %c0_i32_1 = arith.constant 0 : i32
    return %arg0, %c0_i32, %c0_i32_0 : i32, i32, i32
  }
  func.func @transform_3(%arg0: i32) -> (i32, i32, i32) {
    %c0_i32 = arith.constant 0 : i32
    %c0_i32_0 = arith.constant 0 : i32
    %c0_i32_1 = arith.constant 0 : i32
    return %arg0, %c0_i32, %c0_i32_0 : i32, i32, i32
  }
  func.func @transform_4(%arg0: i32) -> (i32, i32, i32) {
    %c0_i32 = arith.constant 0 : i32
    %c0_i32_0 = arith.constant 0 : i32
    %c0_i32_1 = arith.constant 0 : i32
    return %arg0, %c0_i32, %c0_i32_0 : i32, i32, i32
  }
}

module attributes {stable_mosaic.version = 11 : i64} {
  func.func @_stage3_kernel(%arg0: i32, %arg1: memref<1x8x2048xf32, #tpu.memory_space<vmem>>, %arg2: memref<8x1xf32, #tpu.memory_space<vmem>>, %arg3: memref<8x1xf32, #tpu.memory_space<vmem>>, %arg4: memref<32x8xf32, #tpu.memory_space<vmem>>, %arg5: memref<1x32x2048xf32, #tpu.memory_space<vmem>>, %arg6: memref<1x32x1xf32, #tpu.memory_space<vmem>>, %arg7: memref<1x32x1xf32, #tpu.memory_space<vmem>>) attributes {dimension_semantics = [#tpu.dimension_semantics<parallel>], iteration_bounds = array<i64: 2>, scalar_prefetch = 0 : i64, scratch_operands = 0 : i64, tpu.core_type = #tpu.core_type<tc>, window_params = [{transform_indices = @transform_0, window_bounds = array<i64: 1, 8, 2048>}, {pipeline_mode = #tpu.pipeline_mode<synchronous>, transform_indices = @transform_1, window_bounds = array<i64: 8, 1>}, {pipeline_mode = #tpu.pipeline_mode<synchronous>, transform_indices = @transform_2, window_bounds = array<i64: 8, 1>}, {pipeline_mode = #tpu.pipeline_mode<synchronous>, transform_indices = @transform_3, window_bounds = array<i64: 32, 8>}, {transform_indices = @transform_4, window_bounds = array<i64: 1, 32, 2048>}, {transform_indices = @transform_5, window_bounds = array<i64: 1, 32, 1>}, {transform_indices = @transform_6, window_bounds = array<i64: 1, 32, 1>}]} {
    %c0 = arith.constant 0 : index
    %c0_0 = arith.constant 0 : index
    %c0_1 = arith.constant 0 : index
    %0 = vector.load %arg1[%c0, %c0_0, %c0_1] : memref<1x8x2048xf32, #tpu.memory_space<vmem>>, vector<1x8x2048xf32>
    %1 = vector.shape_cast %0 : vector<1x8x2048xf32> to vector<8x2048xf32>
    %c0_2 = arith.constant 0 : index
    %c0_3 = arith.constant 0 : index
    %2 = vector.load %arg2[%c0_2, %c0_3] : memref<8x1xf32, #tpu.memory_space<vmem>>, vector<8x1xf32>
    %3 = vector.broadcast %2 : vector<8x1xf32> to vector<8x2048xf32>
    %4 = arith.mulf %1, %3 : vector<8x2048xf32>
    %c0_4 = arith.constant 0 : index
    %c0_5 = arith.constant 0 : index
    %5 = vector.load %arg3[%c0_4, %c0_5] : memref<8x1xf32, #tpu.memory_space<vmem>>, vector<8x1xf32>
    %6 = vector.broadcast %5 : vector<8x1xf32> to vector<8x2048xf32>
    %7 = arith.addf %4, %6 : vector<8x2048xf32>
    %cst = arith.constant 0.000000e+00 : f32
    %8 = vector.broadcast %cst : f32 to vector<8x2048xf32>
    %9 = arith.maximumf %7, %8 : vector<8x2048xf32>
    %c0_6 = arith.constant 0 : index
    %c0_7 = arith.constant 0 : index
    %10 = vector.load %arg4[%c0_6, %c0_7] : memref<32x8xf32, #tpu.memory_space<vmem>>, vector<32x8xf32>
    %cst_8 = arith.constant dense<0.000000e+00> : vector<32x2048xf32>
    %11 = tpu.matmul %10, %9, %cst_8 {dimension_numbers = #tpu.dot_dimension_numbers<[1], [0], [0], [1], [0, 0, 1, 1], [], []>} : vector<32x8xf32>, vector<8x2048xf32>, vector<32x2048xf32> -> vector<32x2048xf32>
    %c0_9 = arith.constant 0 : index
    %c0_10 = arith.constant 0 : index
    %c0_11 = arith.constant 0 : index
    %12 = vector.load %arg5[%c0_9, %c0_10, %c0_11] : memref<1x32x2048xf32, #tpu.memory_space<vmem>>, vector<1x32x2048xf32>
    %13 = vector.shape_cast %12 : vector<1x32x2048xf32> to vector<32x2048xf32>
    %14 = vector.shape_cast %11 : vector<32x2048xf32> to vector<1x32x2048xf32>
    tpu.vector_store %arg5[%c0_9, %c0_10, %c0_11], %14 {strides = array<i32>} : memref<1x32x2048xf32, #tpu.memory_space<vmem>>, vector<1x32x2048xf32>,
    %cst_12 = arith.constant dense<0.000000e+00> : vector<32xf32>
    %15 = vector.multi_reduction <add>, %11, %cst_12 [1] : vector<32x2048xf32> to vector<32xf32>
    %16 = vector.shape_cast %15 : vector<32xf32> to vector<32x1xf32>
    %c0_13 = arith.constant 0 : index
    %c0_14 = arith.constant 0 : index
    %c0_15 = arith.constant 0 : index
    %17 = vector.load %arg6[%c0_13, %c0_14, %c0_15] : memref<1x32x1xf32, #tpu.memory_space<vmem>>, vector<1x32x1xf32>
    %18 = vector.shape_cast %17 : vector<1x32x1xf32> to vector<32x1xf32>
    %19 = vector.shape_cast %16 : vector<32x1xf32> to vector<1x32x1xf32>
    tpu.vector_store %arg6[%c0_13, %c0_14, %c0_15], %19 {strides = array<i32>} : memref<1x32x1xf32, #tpu.memory_space<vmem>>, vector<1x32x1xf32>,
    %20 = arith.mulf %11, %11 : vector<32x2048xf32>
    %cst_16 = arith.constant dense<0.000000e+00> : vector<32xf32>
    %21 = vector.multi_reduction <add>, %20, %cst_16 [1] : vector<32x2048xf32> to vector<32xf32>
    %22 = vector.shape_cast %21 : vector<32xf32> to vector<32x1xf32>
    %c0_17 = arith.constant 0 : index
    %c0_18 = arith.constant 0 : index
    %c0_19 = arith.constant 0 : index
    %23 = vector.load %arg7[%c0_17, %c0_18, %c0_19] : memref<1x32x1xf32, #tpu.memory_space<vmem>>, vector<1x32x1xf32>
    %24 = vector.shape_cast %23 : vector<1x32x1xf32> to vector<32x1xf32>
    %25 = vector.shape_cast %22 : vector<32x1xf32> to vector<1x32x1xf32>
    tpu.vector_store %arg7[%c0_17, %c0_18, %c0_19], %25 {strides = array<i32>} : memref<1x32x1xf32, #tpu.memory_space<vmem>>, vector<1x32x1xf32>,
    return
  }
  func.func @transform_0(%arg0: i32) -> (i32, i32, i32) {
    %c0_i32 = arith.constant 0 : i32
    %c0_i32_0 = arith.constant 0 : i32
    %c0_i32_1 = arith.constant 0 : i32
    return %arg0, %c0_i32, %c0_i32_0 : i32, i32, i32
  }
  func.func @transform_1(%arg0: i32) -> (i32, i32) {
    %c0_i32 = arith.constant 0 : i32
    %c0_i32_0 = arith.constant 0 : i32
    %c0_i32_1 = arith.constant 0 : i32
    return %c0_i32, %c0_i32_0 : i32, i32
  }
  func.func @transform_2(%arg0: i32) -> (i32, i32) {
    %c0_i32 = arith.constant 0 : i32
    %c0_i32_0 = arith.constant 0 : i32
    %c0_i32_1 = arith.constant 0 : i32
    return %c0_i32, %c0_i32_0 : i32, i32
  }
  func.func @transform_3(%arg0: i32) -> (i32, i32) {
    %c0_i32 = arith.constant 0 : i32
    %c0_i32_0 = arith.constant 0 : i32
    %c0_i32_1 = arith.constant 0 : i32
    return %c0_i32, %c0_i32_0 : i32, i32
  }
  func.func @transform_4(%arg0: i32) -> (i32, i32, i32) {
    %c0_i32 = arith.constant 0 : i32
    %c0_i32_0 = arith.constant 0 : i32
    %c0_i32_1 = arith.constant 0 : i32
    return %arg0, %c0_i32, %c0_i32_0 : i32, i32, i32
  }
  func.func @transform_5(%arg0: i32) -> (i32, i32, i32) {
    %c0_i32 = arith.constant 0 : i32
    %c0_i32_0 = arith.constant 0 : i32
    %c0_i32_1 = arith.constant 0 : i32
    return %arg0, %c0_i32, %c0_i32_0 : i32, i32, i32
  }
  func.func @transform_6(%arg0: i32) -> (i32, i32, i32) {
    %c0_i32 = arith.constant 0 : i32
    %c0_i32_0 = arith.constant 0 : i32
    %c0_i32_1 = arith.constant 0 : i32
    return %arg0, %c0_i32, %c0_i32_0 : i32, i32, i32
  }
}

module attributes {stable_mosaic.version = 11 : i64} {
  func.func @_stage2_kernel(%arg0: i32, %arg1: memref<1x8x2048xf32, #tpu.memory_space<vmem>>, %arg2: memref<8x1xf32, #tpu.memory_space<vmem>>, %arg3: memref<8x1xf32, #tpu.memory_space<vmem>>, %arg4: memref<27x8x8xf32, #tpu.memory_space<vmem>>, %arg5: memref<27x1x2048xf32, #tpu.memory_space<vmem>>, %arg6: memref<1x8x2048xf32, #tpu.memory_space<vmem>>, %arg7: memref<1x8x1xf32, #tpu.memory_space<vmem>>, %arg8: memref<1x8x1xf32, #tpu.memory_space<vmem>>) attributes {dimension_semantics = [#tpu.dimension_semantics<parallel>], iteration_bounds = array<i64: 2>, scalar_prefetch = 0 : i64, scratch_operands = 0 : i64, tpu.core_type = #tpu.core_type<tc>, window_params = [{transform_indices = @transform_0, window_bounds = array<i64: 1, 8, 2048>}, {pipeline_mode = #tpu.pipeline_mode<synchronous>, transform_indices = @transform_1, window_bounds = array<i64: 8, 1>}, {pipeline_mode = #tpu.pipeline_mode<synchronous>, transform_indices = @transform_2, window_bounds = array<i64: 8, 1>}, {pipeline_mode = #tpu.pipeline_mode<synchronous>, transform_indices = @transform_3, window_bounds = array<i64: 27, 8, 8>}, {pipeline_mode = #tpu.pipeline_mode<synchronous>, transform_indices = @transform_4, window_bounds = array<i64: 27, 1, 2048>}, {transform_indices = @transform_5, window_bounds = array<i64: 1, 8, 2048>}, {transform_indices = @transform_6, window_bounds = array<i64: 1, 8, 1>}, {transform_indices = @transform_7, window_bounds = array<i64: 1, 8, 1>}]} {
    %c0 = arith.constant 0 : index
    %c0_0 = arith.constant 0 : index
    %c0_1 = arith.constant 0 : index
    %0 = vector.load %arg1[%c0, %c0_0, %c0_1] : memref<1x8x2048xf32, #tpu.memory_space<vmem>>, vector<1x8x2048xf32>
    %1 = vector.shape_cast %0 : vector<1x8x2048xf32> to vector<8x2048xf32>
    %c0_2 = arith.constant 0 : index
    %c0_3 = arith.constant 0 : index
    %2 = vector.load %arg2[%c0_2, %c0_3] : memref<8x1xf32, #tpu.memory_space<vmem>>, vector<8x1xf32>
    %3 = vector.broadcast %2 : vector<8x1xf32> to vector<8x2048xf32>
    %4 = arith.mulf %1, %3 : vector<8x2048xf32>
    %c0_4 = arith.constant 0 : index
    %c0_5 = arith.constant 0 : index
    %5 = vector.load %arg3[%c0_4, %c0_5] : memref<8x1xf32, #tpu.memory_space<vmem>>, vector<8x1xf32>
    %6 = vector.broadcast %5 : vector<8x1xf32> to vector<8x2048xf32>
    %7 = arith.addf %4, %6 : vector<8x2048xf32>
    %cst = arith.constant 0.000000e+00 : f32
    %8 = vector.broadcast %cst : f32 to vector<8x2048xf32>
    %9 = arith.maximumf %7, %8 : vector<8x2048xf32>
    %cst_6 = arith.constant 0.000000e+00 : f32
    %10 = vector.broadcast %cst_6 : f32 to vector<8x2048xf32>
    %c137_i32 = arith.constant 137 : i32
    %11 = tpu.dynamic_rotate %9 by %c137_i32 dim 1 : vector<8x2048xf32>, i32 -> vector<8x2048xf32>
    %c0_7 = arith.constant 0 : index
    %c0_8 = arith.constant 0 : index
    %c0_9 = arith.constant 0 : index
    %12 = vector.load %arg4[%c0_7, %c0_8, %c0_9] : memref<27x8x8xf32, #tpu.memory_space<vmem>>, vector<1x8x8xf32>
    %13 = vector.shape_cast %12 : vector<1x8x8xf32> to vector<8x8xf32>
    %c0_10 = arith.constant 0 : index
    %c0_11 = arith.constant 0 : index
    %c0_12 = arith.constant 0 : index
    %14 = vector.load %arg5[%c0_10, %c0_11, %c0_12] : memref<27x1x2048xf32, #tpu.memory_space<vmem>>, vector<1x1x2048xf32>
    %15 = vector.shape_cast %14 : vector<1x1x2048xf32> to vector<1x2048xf32>
    %16 = vector.broadcast %15 : vector<1x2048xf32> to vector<8x2048xf32>
    %17 = arith.mulf %11, %16 : vector<8x2048xf32>
    %cst_13 = arith.constant dense<0.000000e+00> : vector<8x2048xf32>
    %18 = tpu.matmul %13, %17, %cst_13 {dimension_numbers = #tpu.dot_dimension_numbers<[1], [0], [0], [1], [0, 0, 1, 1], [], []>} : vector<8x8xf32>, vector<8x2048xf32>, vector<8x2048xf32> -> vector<8x2048xf32>
    %19 = arith.addf %10, %18 : vector<8x2048xf32>
    %c136_i32 = arith.constant 136 : i32
    %20 = tpu.dynamic_rotate %9 by %c136_i32 dim 1 : vector<8x2048xf32>, i32 -> vector<8x2048xf32>
    %c1 = arith.constant 1 : index
    %c0_14 = arith.constant 0 : index
    %c0_15 = arith.constant 0 : index
    %21 = vector.load %arg4[%c1, %c0_14, %c0_15] : memref<27x8x8xf32, #tpu.memory_space<vmem>>, vector<1x8x8xf32>
    %22 = vector.shape_cast %21 : vector<1x8x8xf32> to vector<8x8xf32>
    %c1_16 = arith.constant 1 : index
    %c0_17 = arith.constant 0 : index
    %c0_18 = arith.constant 0 : index
    %23 = vector.load %arg5[%c1_16, %c0_17, %c0_18] : memref<27x1x2048xf32, #tpu.memory_space<vmem>>, vector<1x1x2048xf32>
    %24 = vector.shape_cast %23 : vector<1x1x2048xf32> to vector<1x2048xf32>
    %25 = vector.broadcast %24 : vector<1x2048xf32> to vector<8x2048xf32>
    %26 = arith.mulf %20, %25 : vector<8x2048xf32>
    %cst_19 = arith.constant dense<0.000000e+00> : vector<8x2048xf32>
    %27 = tpu.matmul %22, %26, %cst_19 {dimension_numbers = #tpu.dot_dimension_numbers<[1], [0], [0], [1], [0, 0, 1, 1], [], []>} : vector<8x8xf32>, vector<8x2048xf32>, vector<8x2048xf32> -> vector<8x2048xf32>
    %28 = arith.addf %19, %27 : vector<8x2048xf32>
    %c135_i32 = arith.constant 135 : i32
    %29 = tpu.dynamic_rotate %9 by %c135_i32 dim 1 : vector<8x2048xf32>, i32 -> vector<8x2048xf32>
    %c2 = arith.constant 2 : index
    %c0_20 = arith.constant 0 : index
    %c0_21 = arith.constant 0 : index
    %30 = vector.load %arg4[%c2, %c0_20, %c0_21] : memref<27x8x8xf32, #tpu.memory_space<vmem>>, vector<1x8x8xf32>
    %31 = vector.shape_cast %30 : vector<1x8x8xf32> to vector<8x8xf32>
    %c2_22 = arith.constant 2 : index
    %c0_23 = arith.constant 0 : index
    %c0_24 = arith.constant 0 : index
    %32 = vector.load %arg5[%c2_22, %c0_23, %c0_24] : memref<27x1x2048xf32, #tpu.memory_space<vmem>>, vector<1x1x2048xf32>
    %33 = vector.shape_cast %32 : vector<1x1x2048xf32> to vector<1x2048xf32>
    %34 = vector.broadcast %33 : vector<1x2048xf32> to vector<8x2048xf32>
    %35 = arith.mulf %29, %34 : vector<8x2048xf32>
    %cst_25 = arith.constant dense<0.000000e+00> : vector<8x2048xf32>
    %36 = tpu.matmul %31, %35, %cst_25 {dimension_numbers = #tpu.dot_dimension_numbers<[1], [0], [0], [1], [0, 0, 1, 1], [], []>} : vector<8x8xf32>, vector<8x2048xf32>, vector<8x2048xf32> -> vector<8x2048xf32>
    %37 = arith.addf %28, %36 : vector<8x2048xf32>
    %c129_i32 = arith.constant 129 : i32
    %38 = tpu.dynamic_rotate %9 by %c129_i32 dim 1 : vector<8x2048xf32>, i32 -> vector<8x2048xf32>
    %c3 = arith.constant 3 : index
    %c0_26 = arith.constant 0 : index
    %c0_27 = arith.constant 0 : index
    %39 = vector.load %arg4[%c3, %c0_26, %c0_27] : memref<27x8x8xf32, #tpu.memory_space<vmem>>, vector<1x8x8xf32>
    %40 = vector.shape_cast %39 : vector<1x8x8xf32> to vector<8x8xf32>
    %c3_28 = arith.constant 3 : index
    %c0_29 = arith.constant 0 : index
    %c0_30 = arith.constant 0 : index
    %41 = vector.load %arg5[%c3_28, %c0_29, %c0_30] : memref<27x1x2048xf32, #tpu.memory_space<vmem>>, vector<1x1x2048xf32>
    %42 = vector.shape_cast %41 : vector<1x1x2048xf32> to vector<1x2048xf32>
    %43 = vector.broadcast %42 : vector<1x2048xf32> to vector<8x2048xf32>
    %44 = arith.mulf %38, %43 : vector<8x2048xf32>
    %cst_31 = arith.constant dense<0.000000e+00> : vector<8x2048xf32>
    %45 = tpu.matmul %40, %44, %cst_31 {dimension_numbers = #tpu.dot_dimension_numbers<[1], [0], [0], [1], [0, 0, 1, 1], [], []>} : vector<8x8xf32>, vector<8x2048xf32>, vector<8x2048xf32> -> vector<8x2048xf32>
    %46 = arith.addf %37, %45 : vector<8x2048xf32>
    %c128_i32 = arith.constant 128 : i32
    %47 = tpu.dynamic_rotate %9 by %c128_i32 dim 1 : vector<8x2048xf32>, i32 -> vector<8x2048xf32>
    %c4 = arith.constant 4 : index
    %c0_32 = arith.constant 0 : index
    %c0_33 = arith.constant 0 : index
    %48 = vector.load %arg4[%c4, %c0_32, %c0_33] : memref<27x8x8xf32, #tpu.memory_space<vmem>>, vector<1x8x8xf32>
    %49 = vector.shape_cast %48 : vector<1x8x8xf32> to vector<8x8xf32>
    %c4_34 = arith.constant 4 : index
    %c0_35 = arith.constant 0 : index
    %c0_36 = arith.constant 0 : index
    %50 = vector.load %arg5[%c4_34, %c0_35, %c0_36] : memref<27x1x2048xf32, #tpu.memory_space<vmem>>, vector<1x1x2048xf32>
    %51 = vector.shape_cast %50 : vector<1x1x2048xf32> to vector<1x2048xf32>
    %52 = vector.broadcast %51 : vector<1x2048xf32> to vector<8x2048xf32>
    %53 = arith.mulf %47, %52 : vector<8x2048xf32>
    %cst_37 = arith.constant dense<0.000000e+00> : vector<8x2048xf32>
    %54 = tpu.matmul %49, %53, %cst_37 {dimension_numbers = #tpu.dot_dimension_numbers<[1], [0], [0], [1], [0, 0, 1, 1], [], []>} : vector<8x8xf32>, vector<8x2048xf32>, vector<8x2048xf32> -> vector<8x2048xf32>
    %55 = arith.addf %46, %54 : vector<8x2048xf32>
    %c127_i32 = arith.constant 127 : i32
    %56 = tpu.dynamic_rotate %9 by %c127_i32 dim 1 : vector<8x2048xf32>, i32 -> vector<8x2048xf32>
    %c5 = arith.constant 5 : index
    %c0_38 = arith.constant 0 : index
    %c0_39 = arith.constant 0 : index
    %57 = vector.load %arg4[%c5, %c0_38, %c0_39] : memref<27x8x8xf32, #tpu.memory_space<vmem>>, vector<1x8x8xf32>
    %58 = vector.shape_cast %57 : vector<1x8x8xf32> to vector<8x8xf32>
    %c5_40 = arith.constant 5 : index
    %c0_41 = arith.constant 0 : index
    %c0_42 = arith.constant 0 : index
    %59 = vector.load %arg5[%c5_40, %c0_41, %c0_42] : memref<27x1x2048xf32, #tpu.memory_space<vmem>>, vector<1x1x2048xf32>
    %60 = vector.shape_cast %59 : vector<1x1x2048xf32> to vector<1x2048xf32>
    %61 = vector.broadcast %60 : vector<1x2048xf32> to vector<8x2048xf32>
    %62 = arith.mulf %56, %61 : vector<8x2048xf32>
    %cst_43 = arith.constant dense<0.000000e+00> : vector<8x2048xf32>
    %63 = tpu.matmul %58, %62, %cst_43 {dimension_numbers = #tpu.dot_dimension_numbers<[1], [0], [0], [1], [0, 0, 1, 1], [], []>} : vector<8x8xf32>, vector<8x2048xf32>, vector<8x2048xf32> -> vector<8x2048xf32>
    %64 = arith.addf %55, %63 : vector<8x2048xf32>
    %c121_i32 = arith.constant 121 : i32
    %65 = tpu.dynamic_rotate %9 by %c121_i32 dim 1 : vector<8x2048xf32>, i32 -> vector<8x2048xf32>
    %c6 = arith.constant 6 : index
    %c0_44 = arith.constant 0 : index
    %c0_45 = arith.constant 0 : index
    %66 = vector.load %arg4[%c6, %c0_44, %c0_45] : memref<27x8x8xf32, #tpu.memory_space<vmem>>, vector<1x8x8xf32>
    %67 = vector.shape_cast %66 : vector<1x8x8xf32> to vector<8x8xf32>
    %c6_46 = arith.constant 6 : index
    %c0_47 = arith.constant 0 : index
    %c0_48 = arith.constant 0 : index
    %68 = vector.load %arg5[%c6_46, %c0_47, %c0_48] : memref<27x1x2048xf32, #tpu.memory_space<vmem>>, vector<1x1x2048xf32>
    %69 = vector.shape_cast %68 : vector<1x1x2048xf32> to vector<1x2048xf32>
    %70 = vector.broadcast %69 : vector<1x2048xf32> to vector<8x2048xf32>
    %71 = arith.mulf %65, %70 : vector<8x2048xf32>
    %cst_49 = arith.constant dense<0.000000e+00> : vector<8x2048xf32>
    %72 = tpu.matmul %67, %71, %cst_49 {dimension_numbers = #tpu.dot_dimension_numbers<[1], [0], [0], [1], [0, 0, 1, 1], [], []>} : vector<8x8xf32>, vector<8x2048xf32>, vector<8x2048xf32> -> vector<8x2048xf32>
    %73 = arith.addf %64, %72 : vector<8x2048xf32>
    %c120_i32 = arith.constant 120 : i32
    %74 = tpu.dynamic_rotate %9 by %c120_i32 dim 1 : vector<8x2048xf32>, i32 -> vector<8x2048xf32>
    %c7 = arith.constant 7 : index
    %c0_50 = arith.constant 0 : index
    %c0_51 = arith.constant 0 : index
    %75 = vector.load %arg4[%c7, %c0_50, %c0_51] : memref<27x8x8xf32, #tpu.memory_space<vmem>>, vector<1x8x8xf32>
    %76 = vector.shape_cast %75 : vector<1x8x8xf32> to vector<8x8xf32>
    %c7_52 = arith.constant 7 : index
    %c0_53 = arith.constant 0 : index
    %c0_54 = arith.constant 0 : index
    %77 = vector.load %arg5[%c7_52, %c0_53, %c0_54] : memref<27x1x2048xf32, #tpu.memory_space<vmem>>, vector<1x1x2048xf32>
    %78 = vector.shape_cast %77 : vector<1x1x2048xf32> to vector<1x2048xf32>
    %79 = vector.broadcast %78 : vector<1x2048xf32> to vector<8x2048xf32>
    %80 = arith.mulf %74, %79 : vector<8x2048xf32>
    %cst_55 = arith.constant dense<0.000000e+00> : vector<8x2048xf32>
    %81 = tpu.matmul %76, %80, %cst_55 {dimension_numbers = #tpu.dot_dimension_numbers<[1], [0], [0], [1], [0, 0, 1, 1], [], []>} : vector<8x8xf32>, vector<8x2048xf32>, vector<8x2048xf32> -> vector<8x2048xf32>
    %82 = arith.addf %73, %81 : vector<8x2048xf32>
    %c119_i32 = arith.constant 119 : i32
    %83 = tpu.dynamic_rotate %9 by %c119_i32 dim 1 : vector<8x2048xf32>, i32 -> vector<8x2048xf32>
    %c8 = arith.constant 8 : index
    %c0_56 = arith.constant 0 : index
    %c0_57 = arith.constant 0 : index
    %84 = vector.load %arg4[%c8, %c0_56, %c0_57] : memref<27x8x8xf32, #tpu.memory_space<vmem>>, vector<1x8x8xf32>
    %85 = vector.shape_cast %84 : vector<1x8x8xf32> to vector<8x8xf32>
    %c8_58 = arith.constant 8 : index
    %c0_59 = arith.constant 0 : index
    %c0_60 = arith.constant 0 : index
    %86 = vector.load %arg5[%c8_58, %c0_59, %c0_60] : memref<27x1x2048xf32, #tpu.memory_space<vmem>>, vector<1x1x2048xf32>
    %87 = vector.shape_cast %86 : vector<1x1x2048xf32> to vector<1x2048xf32>
    %88 = vector.broadcast %87 : vector<1x2048xf32> to vector<8x2048xf32>
    %89 = arith.mulf %83, %88 : vector<8x2048xf32>
    %cst_61 = arith.constant dense<0.000000e+00> : vector<8x2048xf32>
    %90 = tpu.matmul %85, %89, %cst_61 {dimension_numbers = #tpu.dot_dimension_numbers<[1], [0], [0], [1], [0, 0, 1, 1], [], []>} : vector<8x8xf32>, vector<8x2048xf32>, vector<8x2048xf32> -> vector<8x2048xf32>
    %91 = arith.addf %82, %90 : vector<8x2048xf32>
    %c9_i32 = arith.constant 9 : i32
    %92 = tpu.dynamic_rotate %9 by %c9_i32 dim 1 : vector<8x2048xf32>, i32 -> vector<8x2048xf32>
    %c9 = arith.constant 9 : index
    %c0_62 = arith.constant 0 : index
    %c0_63 = arith.constant 0 : index
    %93 = vector.load %arg4[%c9, %c0_62, %c0_63] : memref<27x8x8xf32, #tpu.memory_space<vmem>>, vector<1x8x8xf32>
    %94 = vector.shape_cast %93 : vector<1x8x8xf32> to vector<8x8xf32>
    %c9_64 = arith.constant 9 : index
    %c0_65 = arith.constant 0 : index
    %c0_66 = arith.constant 0 : index
    %95 = vector.load %arg5[%c9_64, %c0_65, %c0_66] : memref<27x1x2048xf32, #tpu.memory_space<vmem>>, vector<1x1x2048xf32>
    %96 = vector.shape_cast %95 : vector<1x1x2048xf32> to vector<1x2048xf32>
    %97 = vector.broadcast %96 : vector<1x2048xf32> to vector<8x2048xf32>
    %98 = arith.mulf %92, %97 : vector<8x2048xf32>
    %cst_67 = arith.constant dense<0.000000e+00> : vector<8x2048xf32>
    %99 = tpu.matmul %94, %98, %cst_67 {dimension_numbers = #tpu.dot_dimension_numbers<[1], [0], [0], [1], [0, 0, 1, 1], [], []>} : vector<8x8xf32>, vector<8x2048xf32>, vector<8x2048xf32> -> vector<8x2048xf32>
    %100 = arith.addf %91, %99 : vector<8x2048xf32>
    %c8_i32 = arith.constant 8 : i32
    %101 = tpu.dynamic_rotate %9 by %c8_i32 dim 1 : vector<8x2048xf32>, i32 -> vector<8x2048xf32>
    %c10 = arith.constant 10 : index
    %c0_68 = arith.constant 0 : index
    %c0_69 = arith.constant 0 : index
    %102 = vector.load %arg4[%c10, %c0_68, %c0_69] : memref<27x8x8xf32, #tpu.memory_space<vmem>>, vector<1x8x8xf32>
    %103 = vector.shape_cast %102 : vector<1x8x8xf32> to vector<8x8xf32>
    %c10_70 = arith.constant 10 : index
    %c0_71 = arith.constant 0 : index
    %c0_72 = arith.constant 0 : index
    %104 = vector.load %arg5[%c10_70, %c0_71, %c0_72] : memref<27x1x2048xf32, #tpu.memory_space<vmem>>, vector<1x1x2048xf32>
    %105 = vector.shape_cast %104 : vector<1x1x2048xf32> to vector<1x2048xf32>
    %106 = vector.broadcast %105 : vector<1x2048xf32> to vector<8x2048xf32>
    %107 = arith.mulf %101, %106 : vector<8x2048xf32>
    %cst_73 = arith.constant dense<0.000000e+00> : vector<8x2048xf32>
    %108 = tpu.matmul %103, %107, %cst_73 {dimension_numbers = #tpu.dot_dimension_numbers<[1], [0], [0], [1], [0, 0, 1, 1], [], []>} : vector<8x8xf32>, vector<8x2048xf32>, vector<8x2048xf32> -> vector<8x2048xf32>
    %109 = arith.addf %100, %108 : vector<8x2048xf32>
    %c7_i32 = arith.constant 7 : i32
    %110 = tpu.dynamic_rotate %9 by %c7_i32 dim 1 : vector<8x2048xf32>, i32 -> vector<8x2048xf32>
    %c11 = arith.constant 11 : index
    %c0_74 = arith.constant 0 : index
    %c0_75 = arith.constant 0 : index
    %111 = vector.load %arg4[%c11, %c0_74, %c0_75] : memref<27x8x8xf32, #tpu.memory_space<vmem>>, vector<1x8x8xf32>
    %112 = vector.shape_cast %111 : vector<1x8x8xf32> to vector<8x8xf32>
    %c11_76 = arith.constant 11 : index
    %c0_77 = arith.constant 0 : index
    %c0_78 = arith.constant 0 : index
    %113 = vector.load %arg5[%c11_76, %c0_77, %c0_78] : memref<27x1x2048xf32, #tpu.memory_space<vmem>>, vector<1x1x2048xf32>
    %114 = vector.shape_cast %113 : vector<1x1x2048xf32> to vector<1x2048xf32>
    %115 = vector.broadcast %114 : vector<1x2048xf32> to vector<8x2048xf32>
    %116 = arith.mulf %110, %115 : vector<8x2048xf32>
    %cst_79 = arith.constant dense<0.000000e+00> : vector<8x2048xf32>
    %117 = tpu.matmul %112, %116, %cst_79 {dimension_numbers = #tpu.dot_dimension_numbers<[1], [0], [0], [1], [0, 0, 1, 1], [], []>} : vector<8x8xf32>, vector<8x2048xf32>, vector<8x2048xf32> -> vector<8x2048xf32>
    %118 = arith.addf %109, %117 : vector<8x2048xf32>
    %c1_i32 = arith.constant 1 : i32
    %119 = tpu.dynamic_rotate %9 by %c1_i32 dim 1 : vector<8x2048xf32>, i32 -> vector<8x2048xf32>
    %c12 = arith.constant 12 : index
    %c0_80 = arith.constant 0 : index
    %c0_81 = arith.constant 0 : index
    %120 = vector.load %arg4[%c12, %c0_80, %c0_81] : memref<27x8x8xf32, #tpu.memory_space<vmem>>, vector<1x8x8xf32>
    %121 = vector.shape_cast %120 : vector<1x8x8xf32> to vector<8x8xf32>
    %c12_82 = arith.constant 12 : index
    %c0_83 = arith.constant 0 : index
    %c0_84 = arith.constant 0 : index
    %122 = vector.load %arg5[%c12_82, %c0_83, %c0_84] : memref<27x1x2048xf32, #tpu.memory_space<vmem>>, vector<1x1x2048xf32>
    %123 = vector.shape_cast %122 : vector<1x1x2048xf32> to vector<1x2048xf32>
    %124 = vector.broadcast %123 : vector<1x2048xf32> to vector<8x2048xf32>
    %125 = arith.mulf %119, %124 : vector<8x2048xf32>
    %cst_85 = arith.constant dense<0.000000e+00> : vector<8x2048xf32>
    %126 = tpu.matmul %121, %125, %cst_85 {dimension_numbers = #tpu.dot_dimension_numbers<[1], [0], [0], [1], [0, 0, 1, 1], [], []>} : vector<8x8xf32>, vector<8x2048xf32>, vector<8x2048xf32> -> vector<8x2048xf32>
    %127 = arith.addf %118, %126 : vector<8x2048xf32>
    %c13 = arith.constant 13 : index
    %c0_86 = arith.constant 0 : index
    %c0_87 = arith.constant 0 : index
    %128 = vector.load %arg4[%c13, %c0_86, %c0_87] : memref<27x8x8xf32, #tpu.memory_space<vmem>>, vector<1x8x8xf32>
    %129 = vector.shape_cast %128 : vector<1x8x8xf32> to vector<8x8xf32>
    %c13_88 = arith.constant 13 : index
    %c0_89 = arith.constant 0 : index
    %c0_90 = arith.constant 0 : index
    %130 = vector.load %arg5[%c13_88, %c0_89, %c0_90] : memref<27x1x2048xf32, #tpu.memory_space<vmem>>, vector<1x1x2048xf32>
    %131 = vector.shape_cast %130 : vector<1x1x2048xf32> to vector<1x2048xf32>
    %132 = vector.broadcast %131 : vector<1x2048xf32> to vector<8x2048xf32>
    %133 = arith.mulf %9, %132 : vector<8x2048xf32>
    %cst_91 = arith.constant dense<0.000000e+00> : vector<8x2048xf32>
    %134 = tpu.matmul %129, %133, %cst_91 {dimension_numbers = #tpu.dot_dimension_numbers<[1], [0], [0], [1], [0, 0, 1, 1], [], []>} : vector<8x8xf32>, vector<8x2048xf32>, vector<8x2048xf32> -> vector<8x2048xf32>
    %135 = arith.addf %127, %134 : vector<8x2048xf32>
    %c2047_i32 = arith.constant 2047 : i32
    %136 = tpu.dynamic_rotate %9 by %c2047_i32 dim 1 : vector<8x2048xf32>, i32 -> vector<8x2048xf32>
    %c14 = arith.constant 14 : index
    %c0_92 = arith.constant 0 : index
    %c0_93 = arith.constant 0 : index
    %137 = vector.load %arg4[%c14, %c0_92, %c0_93] : memref<27x8x8xf32, #tpu.memory_space<vmem>>, vector<1x8x8xf32>
    %138 = vector.shape_cast %137 : vector<1x8x8xf32> to vector<8x8xf32>
    %c14_94 = arith.constant 14 : index
    %c0_95 = arith.constant 0 : index
    %c0_96 = arith.constant 0 : index
    %139 = vector.load %arg5[%c14_94, %c0_95, %c0_96] : memref<27x1x2048xf32, #tpu.memory_space<vmem>>, vector<1x1x2048xf32>
    %140 = vector.shape_cast %139 : vector<1x1x2048xf32> to vector<1x2048xf32>
    %141 = vector.broadcast %140 : vector<1x2048xf32> to vector<8x2048xf32>
    %142 = arith.mulf %136, %141 : vector<8x2048xf32>
    %cst_97 = arith.constant dense<0.000000e+00> : vector<8x2048xf32>
    %143 = tpu.matmul %138, %142, %cst_97 {dimension_numbers = #tpu.dot_dimension_numbers<[1], [0], [0], [1], [0, 0, 1, 1], [], []>} : vector<8x8xf32>, vector<8x2048xf32>, vector<8x2048xf32> -> vector<8x2048xf32>
    %144 = arith.addf %135, %143 : vector<8x2048xf32>
    %c2041_i32 = arith.constant 2041 : i32
    %145 = tpu.dynamic_rotate %9 by %c2041_i32 dim 1 : vector<8x2048xf32>, i32 -> vector<8x2048xf32>
    %c15 = arith.constant 15 : index
    %c0_98 = arith.constant 0 : index
    %c0_99 = arith.constant 0 : index
    %146 = vector.load %arg4[%c15, %c0_98, %c0_99] : memref<27x8x8xf32, #tpu.memory_space<vmem>>, vector<1x8x8xf32>
    %147 = vector.shape_cast %146 : vector<1x8x8xf32> to vector<8x8xf32>
    %c15_100 = arith.constant 15 : index
    %c0_101 = arith.constant 0 : index
    %c0_102 = arith.constant 0 : index
    %148 = vector.load %arg5[%c15_100, %c0_101, %c0_102] : memref<27x1x2048xf32, #tpu.memory_space<vmem>>, vector<1x1x2048xf32>
    %149 = vector.shape_cast %148 : vector<1x1x2048xf32> to vector<1x2048xf32>
    %150 = vector.broadcast %149 : vector<1x2048xf32> to vector<8x2048xf32>
    %151 = arith.mulf %145, %150 : vector<8x2048xf32>
    %cst_103 = arith.constant dense<0.000000e+00> : vector<8x2048xf32>
    %152 = tpu.matmul %147, %151, %cst_103 {dimension_numbers = #tpu.dot_dimension_numbers<[1], [0], [0], [1], [0, 0, 1, 1], [], []>} : vector<8x8xf32>, vector<8x2048xf32>, vector<8x2048xf32> -> vector<8x2048xf32>
    %153 = arith.addf %144, %152 : vector<8x2048xf32>
    %c2040_i32 = arith.constant 2040 : i32
    %154 = tpu.dynamic_rotate %9 by %c2040_i32 dim 1 : vector<8x2048xf32>, i32 -> vector<8x2048xf32>
    %c16 = arith.constant 16 : index
    %c0_104 = arith.constant 0 : index
    %c0_105 = arith.constant 0 : index
    %155 = vector.load %arg4[%c16, %c0_104, %c0_105] : memref<27x8x8xf32, #tpu.memory_space<vmem>>, vector<1x8x8xf32>
    %156 = vector.shape_cast %155 : vector<1x8x8xf32> to vector<8x8xf32>
    %c16_106 = arith.constant 16 : index
    %c0_107 = arith.constant 0 : index
    %c0_108 = arith.constant 0 : index
    %157 = vector.load %arg5[%c16_106, %c0_107, %c0_108] : memref<27x1x2048xf32, #tpu.memory_space<vmem>>, vector<1x1x2048xf32>
    %158 = vector.shape_cast %157 : vector<1x1x2048xf32> to vector<1x2048xf32>
    %159 = vector.broadcast %158 : vector<1x2048xf32> to vector<8x2048xf32>
    %160 = arith.mulf %154, %159 : vector<8x2048xf32>
    %cst_109 = arith.constant dense<0.000000e+00> : vector<8x2048xf32>
    %161 = tpu.matmul %156, %160, %cst_109 {dimension_numbers = #tpu.dot_dimension_numbers<[1], [0], [0], [1], [0, 0, 1, 1], [], []>} : vector<8x8xf32>, vector<8x2048xf32>, vector<8x2048xf32> -> vector<8x2048xf32>
    %162 = arith.addf %153, %161 : vector<8x2048xf32>
    %c2039_i32 = arith.constant 2039 : i32
    %163 = tpu.dynamic_rotate %9 by %c2039_i32 dim 1 : vector<8x2048xf32>, i32 -> vector<8x2048xf32>
    %c17 = arith.constant 17 : index
    %c0_110 = arith.constant 0 : index
    %c0_111 = arith.constant 0 : index
    %164 = vector.load %arg4[%c17, %c0_110, %c0_111] : memref<27x8x8xf32, #tpu.memory_space<vmem>>, vector<1x8x8xf32>
    %165 = vector.shape_cast %164 : vector<1x8x8xf32> to vector<8x8xf32>
    %c17_112 = arith.constant 17 : index
    %c0_113 = arith.constant 0 : index
    %c0_114 = arith.constant 0 : index
    %166 = vector.load %arg5[%c17_112, %c0_113, %c0_114] : memref<27x1x2048xf32, #tpu.memory_space<vmem>>, vector<1x1x2048xf32>
    %167 = vector.shape_cast %166 : vector<1x1x2048xf32> to vector<1x2048xf32>
    %168 = vector.broadcast %167 : vector<1x2048xf32> to vector<8x2048xf32>
    %169 = arith.mulf %163, %168 : vector<8x2048xf32>
    %cst_115 = arith.constant dense<0.000000e+00> : vector<8x2048xf32>
    %170 = tpu.matmul %165, %169, %cst_115 {dimension_numbers = #tpu.dot_dimension_numbers<[1], [0], [0], [1], [0, 0, 1, 1], [], []>} : vector<8x8xf32>, vector<8x2048xf32>, vector<8x2048xf32> -> vector<8x2048xf32>
    %171 = arith.addf %162, %170 : vector<8x2048xf32>
    %c1929_i32 = arith.constant 1929 : i32
    %172 = tpu.dynamic_rotate %9 by %c1929_i32 dim 1 : vector<8x2048xf32>, i32 -> vector<8x2048xf32>
    %c18 = arith.constant 18 : index
    %c0_116 = arith.constant 0 : index
    %c0_117 = arith.constant 0 : index
    %173 = vector.load %arg4[%c18, %c0_116, %c0_117] : memref<27x8x8xf32, #tpu.memory_space<vmem>>, vector<1x8x8xf32>
    %174 = vector.shape_cast %173 : vector<1x8x8xf32> to vector<8x8xf32>
    %c18_118 = arith.constant 18 : index
    %c0_119 = arith.constant 0 : index
    %c0_120 = arith.constant 0 : index
    %175 = vector.load %arg5[%c18_118, %c0_119, %c0_120] : memref<27x1x2048xf32, #tpu.memory_space<vmem>>, vector<1x1x2048xf32>
    %176 = vector.shape_cast %175 : vector<1x1x2048xf32> to vector<1x2048xf32>
    %177 = vector.broadcast %176 : vector<1x2048xf32> to vector<8x2048xf32>
    %178 = arith.mulf %172, %177 : vector<8x2048xf32>
    %cst_121 = arith.constant dense<0.000000e+00> : vector<8x2048xf32>
    %179 = tpu.matmul %174, %178, %cst_121 {dimension_numbers = #tpu.dot_dimension_numbers<[1], [0], [0], [1], [0, 0, 1, 1], [], []>} : vector<8x8xf32>, vector<8x2048xf32>, vector<8x2048xf32> -> vector<8x2048xf32>
    %180 = arith.addf %171, %179 : vector<8x2048xf32>
    %c1928_i32 = arith.constant 1928 : i32
    %181 = tpu.dynamic_rotate %9 by %c1928_i32 dim 1 : vector<8x2048xf32>, i32 -> vector<8x2048xf32>
    %c19 = arith.constant 19 : index
    %c0_122 = arith.constant 0 : index
    %c0_123 = arith.constant 0 : index
    %182 = vector.load %arg4[%c19, %c0_122, %c0_123] : memref<27x8x8xf32, #tpu.memory_space<vmem>>, vector<1x8x8xf32>
    %183 = vector.shape_cast %182 : vector<1x8x8xf32> to vector<8x8xf32>
    %c19_124 = arith.constant 19 : index
    %c0_125 = arith.constant 0 : index
    %c0_126 = arith.constant 0 : index
    %184 = vector.load %arg5[%c19_124, %c0_125, %c0_126] : memref<27x1x2048xf32, #tpu.memory_space<vmem>>, vector<1x1x2048xf32>
    %185 = vector.shape_cast %184 : vector<1x1x2048xf32> to vector<1x2048xf32>
    %186 = vector.broadcast %185 : vector<1x2048xf32> to vector<8x2048xf32>
    %187 = arith.mulf %181, %186 : vector<8x2048xf32>
    %cst_127 = arith.constant dense<0.000000e+00> : vector<8x2048xf32>
    %188 = tpu.matmul %183, %187, %cst_127 {dimension_numbers = #tpu.dot_dimension_numbers<[1], [0], [0], [1], [0, 0, 1, 1], [], []>} : vector<8x8xf32>, vector<8x2048xf32>, vector<8x2048xf32> -> vector<8x2048xf32>
    %189 = arith.addf %180, %188 : vector<8x2048xf32>
    %c1927_i32 = arith.constant 1927 : i32
    %190 = tpu.dynamic_rotate %9 by %c1927_i32 dim 1 : vector<8x2048xf32>, i32 -> vector<8x2048xf32>
    %c20 = arith.constant 20 : index
    %c0_128 = arith.constant 0 : index
    %c0_129 = arith.constant 0 : index
    %191 = vector.load %arg4[%c20, %c0_128, %c0_129] : memref<27x8x8xf32, #tpu.memory_space<vmem>>, vector<1x8x8xf32>
    %192 = vector.shape_cast %191 : vector<1x8x8xf32> to vector<8x8xf32>
    %c20_130 = arith.constant 20 : index
    %c0_131 = arith.constant 0 : index
    %c0_132 = arith.constant 0 : index
    %193 = vector.load %arg5[%c20_130, %c0_131, %c0_132] : memref<27x1x2048xf32, #tpu.memory_space<vmem>>, vector<1x1x2048xf32>
    %194 = vector.shape_cast %193 : vector<1x1x2048xf32> to vector<1x2048xf32>
    %195 = vector.broadcast %194 : vector<1x2048xf32> to vector<8x2048xf32>
    %196 = arith.mulf %190, %195 : vector<8x2048xf32>
    %cst_133 = arith.constant dense<0.000000e+00> : vector<8x2048xf32>
    %197 = tpu.matmul %192, %196, %cst_133 {dimension_numbers = #tpu.dot_dimension_numbers<[1], [0], [0], [1], [0, 0, 1, 1], [], []>} : vector<8x8xf32>, vector<8x2048xf32>, vector<8x2048xf32> -> vector<8x2048xf32>
    %198 = arith.addf %189, %197 : vector<8x2048xf32>
    %c1921_i32 = arith.constant 1921 : i32
    %199 = tpu.dynamic_rotate %9 by %c1921_i32 dim 1 : vector<8x2048xf32>, i32 -> vector<8x2048xf32>
    %c21 = arith.constant 21 : index
    %c0_134 = arith.constant 0 : index
    %c0_135 = arith.constant 0 : index
    %200 = vector.load %arg4[%c21, %c0_134, %c0_135] : memref<27x8x8xf32, #tpu.memory_space<vmem>>, vector<1x8x8xf32>
    %201 = vector.shape_cast %200 : vector<1x8x8xf32> to vector<8x8xf32>
    %c21_136 = arith.constant 21 : index
    %c0_137 = arith.constant 0 : index
    %c0_138 = arith.constant 0 : index
    %202 = vector.load %arg5[%c21_136, %c0_137, %c0_138] : memref<27x1x2048xf32, #tpu.memory_space<vmem>>, vector<1x1x2048xf32>
    %203 = vector.shape_cast %202 : vector<1x1x2048xf32> to vector<1x2048xf32>
    %204 = vector.broadcast %203 : vector<1x2048xf32> to vector<8x2048xf32>
    %205 = arith.mulf %199, %204 : vector<8x2048xf32>
    %cst_139 = arith.constant dense<0.000000e+00> : vector<8x2048xf32>
    %206 = tpu.matmul %201, %205, %cst_139 {dimension_numbers = #tpu.dot_dimension_numbers<[1], [0], [0], [1], [0, 0, 1, 1], [], []>} : vector<8x8xf32>, vector<8x2048xf32>, vector<8x2048xf32> -> vector<8x2048xf32>
    %207 = arith.addf %198, %206 : vector<8x2048xf32>
    %c1920_i32 = arith.constant 1920 : i32
    %208 = tpu.dynamic_rotate %9 by %c1920_i32 dim 1 : vector<8x2048xf32>, i32 -> vector<8x2048xf32>
    %c22 = arith.constant 22 : index
    %c0_140 = arith.constant 0 : index
    %c0_141 = arith.constant 0 : index
    %209 = vector.load %arg4[%c22, %c0_140, %c0_141] : memref<27x8x8xf32, #tpu.memory_space<vmem>>, vector<1x8x8xf32>
    %210 = vector.shape_cast %209 : vector<1x8x8xf32> to vector<8x8xf32>
    %c22_142 = arith.constant 22 : index
    %c0_143 = arith.constant 0 : index
    %c0_144 = arith.constant 0 : index
    %211 = vector.load %arg5[%c22_142, %c0_143, %c0_144] : memref<27x1x2048xf32, #tpu.memory_space<vmem>>, vector<1x1x2048xf32>
    %212 = vector.shape_cast %211 : vector<1x1x2048xf32> to vector<1x2048xf32>
    %213 = vector.broadcast %212 : vector<1x2048xf32> to vector<8x2048xf32>
    %214 = arith.mulf %208, %213 : vector<8x2048xf32>
    %cst_145 = arith.constant dense<0.000000e+00> : vector<8x2048xf32>
    %215 = tpu.matmul %210, %214, %cst_145 {dimension_numbers = #tpu.dot_dimension_numbers<[1], [0], [0], [1], [0, 0, 1, 1], [], []>} : vector<8x8xf32>, vector<8x2048xf32>, vector<8x2048xf32> -> vector<8x2048xf32>
    %216 = arith.addf %207, %215 : vector<8x2048xf32>
    %c1919_i32 = arith.constant 1919 : i32
    %217 = tpu.dynamic_rotate %9 by %c1919_i32 dim 1 : vector<8x2048xf32>, i32 -> vector<8x2048xf32>
    %c23 = arith.constant 23 : index
    %c0_146 = arith.constant 0 : index
    %c0_147 = arith.constant 0 : index
    %218 = vector.load %arg4[%c23, %c0_146, %c0_147] : memref<27x8x8xf32, #tpu.memory_space<vmem>>, vector<1x8x8xf32>
    %219 = vector.shape_cast %218 : vector<1x8x8xf32> to vector<8x8xf32>
    %c23_148 = arith.constant 23 : index
    %c0_149 = arith.constant 0 : index
    %c0_150 = arith.constant 0 : index
    %220 = vector.load %arg5[%c23_148, %c0_149, %c0_150] : memref<27x1x2048xf32, #tpu.memory_space<vmem>>, vector<1x1x2048xf32>
    %221 = vector.shape_cast %220 : vector<1x1x2048xf32> to vector<1x2048xf32>
    %222 = vector.broadcast %221 : vector<1x2048xf32> to vector<8x2048xf32>
    %223 = arith.mulf %217, %222 : vector<8x2048xf32>
    %cst_151 = arith.constant dense<0.000000e+00> : vector<8x2048xf32>
    %224 = tpu.matmul %219, %223, %cst_151 {dimension_numbers = #tpu.dot_dimension_numbers<[1], [0], [0], [1], [0, 0, 1, 1], [], []>} : vector<8x8xf32>, vector<8x2048xf32>, vector<8x2048xf32> -> vector<8x2048xf32>
    %225 = arith.addf %216, %224 : vector<8x2048xf32>
    %c1913_i32 = arith.constant 1913 : i32
    %226 = tpu.dynamic_rotate %9 by %c1913_i32 dim 1 : vector<8x2048xf32>, i32 -> vector<8x2048xf32>
    %c24 = arith.constant 24 : index
    %c0_152 = arith.constant 0 : index
    %c0_153 = arith.constant 0 : index
    %227 = vector.load %arg4[%c24, %c0_152, %c0_153] : memref<27x8x8xf32, #tpu.memory_space<vmem>>, vector<1x8x8xf32>
    %228 = vector.shape_cast %227 : vector<1x8x8xf32> to vector<8x8xf32>
    %c24_154 = arith.constant 24 : index
    %c0_155 = arith.constant 0 : index
    %c0_156 = arith.constant 0 : index
    %229 = vector.load %arg5[%c24_154, %c0_155, %c0_156] : memref<27x1x2048xf32, #tpu.memory_space<vmem>>, vector<1x1x2048xf32>
    %230 = vector.shape_cast %229 : vector<1x1x2048xf32> to vector<1x2048xf32>
    %231 = vector.broadcast %230 : vector<1x2048xf32> to vector<8x2048xf32>
    %232 = arith.mulf %226, %231 : vector<8x2048xf32>
    %cst_157 = arith.constant dense<0.000000e+00> : vector<8x2048xf32>
    %233 = tpu.matmul %228, %232, %cst_157 {dimension_numbers = #tpu.dot_dimension_numbers<[1], [0], [0], [1], [0, 0, 1, 1], [], []>} : vector<8x8xf32>, vector<8x2048xf32>, vector<8x2048xf32> -> vector<8x2048xf32>
    %234 = arith.addf %225, %233 : vector<8x2048xf32>
    %c1912_i32 = arith.constant 1912 : i32
    %235 = tpu.dynamic_rotate %9 by %c1912_i32 dim 1 : vector<8x2048xf32>, i32 -> vector<8x2048xf32>
    %c25 = arith.constant 25 : index
    %c0_158 = arith.constant 0 : index
    %c0_159 = arith.constant 0 : index
    %236 = vector.load %arg4[%c25, %c0_158, %c0_159] : memref<27x8x8xf32, #tpu.memory_space<vmem>>, vector<1x8x8xf32>
    %237 = vector.shape_cast %236 : vector<1x8x8xf32> to vector<8x8xf32>
    %c25_160 = arith.constant 25 : index
    %c0_161 = arith.constant 0 : index
    %c0_162 = arith.constant 0 : index
    %238 = vector.load %arg5[%c25_160, %c0_161, %c0_162] : memref<27x1x2048xf32, #tpu.memory_space<vmem>>, vector<1x1x2048xf32>
    %239 = vector.shape_cast %238 : vector<1x1x2048xf32> to vector<1x2048xf32>
    %240 = vector.broadcast %239 : vector<1x2048xf32> to vector<8x2048xf32>
    %241 = arith.mulf %235, %240 : vector<8x2048xf32>
    %cst_163 = arith.constant dense<0.000000e+00> : vector<8x2048xf32>
    %242 = tpu.matmul %237, %241, %cst_163 {dimension_numbers = #tpu.dot_dimension_numbers<[1], [0], [0], [1], [0, 0, 1, 1], [], []>} : vector<8x8xf32>, vector<8x2048xf32>, vector<8x2048xf32> -> vector<8x2048xf32>
    %243 = arith.addf %234, %242 : vector<8x2048xf32>
    %c1911_i32 = arith.constant 1911 : i32
    %244 = tpu.dynamic_rotate %9 by %c1911_i32 dim 1 : vector<8x2048xf32>, i32 -> vector<8x2048xf32>
    %c26 = arith.constant 26 : index
    %c0_164 = arith.constant 0 : index
    %c0_165 = arith.constant 0 : index
    %245 = vector.load %arg4[%c26, %c0_164, %c0_165] : memref<27x8x8xf32, #tpu.memory_space<vmem>>, vector<1x8x8xf32>
    %246 = vector.shape_cast %245 : vector<1x8x8xf32> to vector<8x8xf32>
    %c26_166 = arith.constant 26 : index
    %c0_167 = arith.constant 0 : index
    %c0_168 = arith.constant 0 : index
    %247 = vector.load %arg5[%c26_166, %c0_167, %c0_168] : memref<27x1x2048xf32, #tpu.memory_space<vmem>>, vector<1x1x2048xf32>
    %248 = vector.shape_cast %247 : vector<1x1x2048xf32> to vector<1x2048xf32>
    %249 = vector.broadcast %248 : vector<1x2048xf32> to vector<8x2048xf32>
    %250 = arith.mulf %244, %249 : vector<8x2048xf32>
    %cst_169 = arith.constant dense<0.000000e+00> : vector<8x2048xf32>
    %251 = tpu.matmul %246, %250, %cst_169 {dimension_numbers = #tpu.dot_dimension_numbers<[1], [0], [0], [1], [0, 0, 1, 1], [], []>} : vector<8x8xf32>, vector<8x2048xf32>, vector<8x2048xf32> -> vector<8x2048xf32>
    %252 = arith.addf %243, %251 : vector<8x2048xf32>
    %c0_170 = arith.constant 0 : index
    %c0_171 = arith.constant 0 : index
    %c0_172 = arith.constant 0 : index
    %253 = vector.load %arg6[%c0_170, %c0_171, %c0_172] : memref<1x8x2048xf32, #tpu.memory_space<vmem>>, vector<1x8x2048xf32>
    %254 = vector.shape_cast %253 : vector<1x8x2048xf32> to vector<8x2048xf32>
    %255 = vector.shape_cast %252 : vector<8x2048xf32> to vector<1x8x2048xf32>
    tpu.vector_store %arg6[%c0_170, %c0_171, %c0_172], %255 {strides = array<i32>} : memref<1x8x2048xf32, #tpu.memory_space<vmem>>, vector<1x8x2048xf32>,
    %cst_173 = arith.constant dense<0.000000e+00> : vector<8xf32>
    %256 = vector.multi_reduction <add>, %252, %cst_173 [1] : vector<8x2048xf32> to vector<8xf32>
    %257 = vector.shape_cast %256 : vector<8xf32> to vector<8x1xf32>
    %c0_174 = arith.constant 0 : index
    %c0_175 = arith.constant 0 : index
    %c0_176 = arith.constant 0 : index
    %258 = vector.load %arg7[%c0_174, %c0_175, %c0_176] : memref<1x8x1xf32, #tpu.memory_space<vmem>>, vector<1x8x1xf32>
    %259 = vector.shape_cast %258 : vector<1x8x1xf32> to vector<8x1xf32>
    %260 = vector.shape_cast %257 : vector<8x1xf32> to vector<1x8x1xf32>
    tpu.vector_store %arg7[%c0_174, %c0_175, %c0_176], %260 {strides = array<i32>} : memref<1x8x1xf32, #tpu.memory_space<vmem>>, vector<1x8x1xf32>,
    %261 = arith.mulf %252, %252 : vector<8x2048xf32>
    %cst_177 = arith.constant dense<0.000000e+00> : vector<8xf32>
    %262 = vector.multi_reduction <add>, %261, %cst_177 [1] : vector<8x2048xf32> to vector<8xf32>
    %263 = vector.shape_cast %262 : vector<8xf32> to vector<8x1xf32>
    %c0_178 = arith.constant 0 : index
    %c0_179 = arith.constant 0 : index
    %c0_180 = arith.constant 0 : index
    %264 = vector.load %arg8[%c0_178, %c0_179, %c0_180] : memref<1x8x1xf32, #tpu.memory_space<vmem>>, vector<1x8x1xf32>
    %265 = vector.shape_cast %264 : vector<1x8x1xf32> to vector<8x1xf32>
    %266 = vector.shape_cast %263 : vector<8x1xf32> to vector<1x8x1xf32>
    tpu.vector_store %arg8[%c0_178, %c0_179, %c0_180], %266 {strides = array<i32>} : memref<1x8x1xf32, #tpu.memory_space<vmem>>, vector<1x8x1xf32>,
    return
  }
  func.func @transform_0(%arg0: i32) -> (i32, i32, i32) {
    %c0_i32 = arith.constant 0 : i32
    %c0_i32_0 = arith.constant 0 : i32
    %c0_i32_1 = arith.constant 0 : i32
    return %arg0, %c0_i32, %c0_i32_0 : i32, i32, i32
  }
  func.func @transform_1(%arg0: i32) -> (i32, i32) {
    %c0_i32 = arith.constant 0 : i32
    %c0_i32_0 = arith.constant 0 : i32
    %c0_i32_1 = arith.constant 0 : i32
    return %c0_i32, %c0_i32_0 : i32, i32
  }
  func.func @transform_2(%arg0: i32) -> (i32, i32) {
    %c0_i32 = arith.constant 0 : i32
    %c0_i32_0 = arith.constant 0 : i32
    %c0_i32_1 = arith.constant 0 : i32
    return %c0_i32, %c0_i32_0 : i32, i32
  }
  func.func @transform_3(%arg0: i32) -> (i32, i32, i32) {
    %c0_i32 = arith.constant 0 : i32
    %c0_i32_0 = arith.constant 0 : i32
    %c0_i32_1 = arith.constant 0 : i32
    %c0_i32_2 = arith.constant 0 : i32
    return %c0_i32, %c0_i32_0, %c0_i32_1 : i32, i32, i32
  }
  func.func @transform_4(%arg0: i32) -> (i32, i32, i32) {
    %c0_i32 = arith.constant 0 : i32
    %c0_i32_0 = arith.constant 0 : i32
    %c0_i32_1 = arith.constant 0 : i32
    %c0_i32_2 = arith.constant 0 : i32
    return %c0_i32, %c0_i32_0, %c0_i32_1 : i32, i32, i32
  }
  func.func @transform_5(%arg0: i32) -> (i32, i32, i32) {
    %c0_i32 = arith.constant 0 : i32
    %c0_i32_0 = arith.constant 0 : i32
    %c0_i32_1 = arith.constant 0 : i32
    return %arg0, %c0_i32, %c0_i32_0 : i32, i32, i32
  }
  func.func @transform_6(%arg0: i32) -> (i32, i32, i32) {
    %c0_i32 = arith.constant 0 : i32
    %c0_i32_0 = arith.constant 0 : i32
    %c0_i32_1 = arith.constant 0 : i32
    return %arg0, %c0_i32, %c0_i32_0 : i32, i32, i32
  }
  func.func @transform_7(%arg0: i32) -> (i32, i32, i32) {
    %c0_i32 = arith.constant 0 : i32
    %c0_i32_0 = arith.constant 0 : i32
    %c0_i32_1 = arith.constant 0 : i32
    return %arg0, %c0_i32, %c0_i32_0 : i32, i32, i32
  }
}

module attributes {stable_mosaic.version = 11 : i64} {
  func.func @_stage4_kernel(%arg0: i32, %arg1: memref<1x32x2048xf32, #tpu.memory_space<vmem>>, %arg2: memref<1x32x2048xf32, #tpu.memory_space<vmem>>, %arg3: memref<32x1xf32, #tpu.memory_space<vmem>>, %arg4: memref<32x1xf32, #tpu.memory_space<vmem>>, %arg5: memref<1x32x2048xf32, #tpu.memory_space<vmem>>) attributes {dimension_semantics = [#tpu.dimension_semantics<parallel>], iteration_bounds = array<i64: 2>, scalar_prefetch = 0 : i64, scratch_operands = 0 : i64, tpu.core_type = #tpu.core_type<tc>, window_params = [{transform_indices = @transform_0, window_bounds = array<i64: 1, 32, 2048>}, {transform_indices = @transform_1, window_bounds = array<i64: 1, 32, 2048>}, {pipeline_mode = #tpu.pipeline_mode<synchronous>, transform_indices = @transform_2, window_bounds = array<i64: 32, 1>}, {pipeline_mode = #tpu.pipeline_mode<synchronous>, transform_indices = @transform_3, window_bounds = array<i64: 32, 1>}, {transform_indices = @transform_4, window_bounds = array<i64: 1, 32, 2048>}]} {
    %c0 = arith.constant 0 : index
    %c0_0 = arith.constant 0 : index
    %c0_1 = arith.constant 0 : index
    %0 = vector.load %arg1[%c0, %c0_0, %c0_1] : memref<1x32x2048xf32, #tpu.memory_space<vmem>>, vector<1x32x2048xf32>
    %1 = vector.shape_cast %0 : vector<1x32x2048xf32> to vector<32x2048xf32>
    %c0_2 = arith.constant 0 : index
    %c0_3 = arith.constant 0 : index
    %2 = vector.load %arg3[%c0_2, %c0_3] : memref<32x1xf32, #tpu.memory_space<vmem>>, vector<32x1xf32>
    %3 = vector.broadcast %2 : vector<32x1xf32> to vector<32x2048xf32>
    %4 = arith.mulf %1, %3 : vector<32x2048xf32>
    %c0_4 = arith.constant 0 : index
    %c0_5 = arith.constant 0 : index
    %5 = vector.load %arg4[%c0_4, %c0_5] : memref<32x1xf32, #tpu.memory_space<vmem>>, vector<32x1xf32>
    %6 = vector.broadcast %5 : vector<32x1xf32> to vector<32x2048xf32>
    %7 = arith.addf %4, %6 : vector<32x2048xf32>
    %c0_6 = arith.constant 0 : index
    %c0_7 = arith.constant 0 : index
    %c0_8 = arith.constant 0 : index
    %8 = vector.load %arg2[%c0_6, %c0_7, %c0_8] : memref<1x32x2048xf32, #tpu.memory_space<vmem>>, vector<1x32x2048xf32>
    %9 = vector.shape_cast %8 : vector<1x32x2048xf32> to vector<32x2048xf32>
    %10 = arith.addf %7, %9 : vector<32x2048xf32>
    %cst = arith.constant 0.000000e+00 : f32
    %11 = vector.broadcast %cst : f32 to vector<32x2048xf32>
    %12 = arith.maximumf %10, %11 : vector<32x2048xf32>
    %c0_9 = arith.constant 0 : index
    %c0_10 = arith.constant 0 : index
    %c0_11 = arith.constant 0 : index
    %13 = vector.load %arg5[%c0_9, %c0_10, %c0_11] : memref<1x32x2048xf32, #tpu.memory_space<vmem>>, vector<1x32x2048xf32>
    %14 = vector.shape_cast %13 : vector<1x32x2048xf32> to vector<32x2048xf32>
    %15 = vector.shape_cast %12 : vector<32x2048xf32> to vector<1x32x2048xf32>
    tpu.vector_store %arg5[%c0_9, %c0_10, %c0_11], %15 {strides = array<i32>} : memref<1x32x2048xf32, #tpu.memory_space<vmem>>, vector<1x32x2048xf32>,
    return
  }
  func.func @transform_0(%arg0: i32) -> (i32, i32, i32) {
    %c0_i32 = arith.constant 0 : i32
    %c0_i32_0 = arith.constant 0 : i32
    %c0_i32_1 = arith.constant 0 : i32
    return %arg0, %c0_i32, %c0_i32_0 : i32, i32, i32
  }
  func.func @transform_1(%arg0: i32) -> (i32, i32, i32) {
    %c0_i32 = arith.constant 0 : i32
    %c0_i32_0 = arith.constant 0 : i32
    %c0_i32_1 = arith.constant 0 : i32
    return %arg0, %c0_i32, %c0_i32_0 : i32, i32, i32
  }
  func.func @transform_2(%arg0: i32) -> (i32, i32) {
    %c0_i32 = arith.constant 0 : i32
    %c0_i32_0 = arith.constant 0 : i32
    %c0_i32_1 = arith.constant 0 : i32
    return %c0_i32, %c0_i32_0 : i32, i32
  }
  func.func @transform_3(%arg0: i32) -> (i32, i32) {
    %c0_i32 = arith.constant 0 : i32
    %c0_i32_0 = arith.constant 0 : i32
    %c0_i32_1 = arith.constant 0 : i32
    return %c0_i32, %c0_i32_0 : i32, i32
  }
  func.func @transform_4(%arg0: i32) -> (i32, i32, i32) {
    %c0_i32 = arith.constant 0 : i32
    %c0_i32_0 = arith.constant 0 : i32
    %c0_i32_1 = arith.constant 0 : i32
    return %arg0, %c0_i32, %c0_i32_0 : i32, i32, i32
  }
}

</mosaic_0001>

<bundles_post_ra>
// kernel: bottleneck_forward.4
= control target key start
LH: loop header
LB: loop body
LE: loop exit
PB: predicated region body
PF: predicated region fallthrough
CT: control target
= control target key end

     0   :  { %s1172_s15 = smov 0   ;;  %s1313_s0 = inlined_call_operand.vmem [shape: f32[2,32,2048], index: 0, kind: input, shape index: {}]   ;;  %s1314_s1 = inlined_call_operand.vmem [shape: f32[8,32], index: 1, kind: input, shape index: {}]   ;;  %s1315_s2 = inlined_call_operand.vmem [shape: f32[2,8,2048], index: 2, kind: output, shape index: {0}]   ;;  %s1316_s3 = inlined_call_operand.vmem [shape: f32[2,8,1], index: 3, kind: output, shape index: {1}]   ;;  %s1317_s4 = inlined_call_operand.vmem [shape: f32[2,8,1], index: 4, kind: output, shape index: {2}]  }
   0x1 LB: > { %s1042_s16 = sadd.s32 4294967295, %s1144_s15   ;;  %p1046_p0 = scmp.ge.s32.totalorder %s1144_s15, 1  ;;  %s1144_s15 = sphi %s1172_s15, %s15_s15  }
   0x2   : > { %p167_p1 = scmp.lt.s32.totalorder %s1144_s15, 3 }
   0x4   : > { %p168_p2 = pnand %p1046_p0, %p167_p1 }
   0x5   : > { %p201_p3 = scmp.lt.s32.totalorder (!%p168_p2), %s1042_s16, 1  ;;  %v1146_v0 = vmov (!%p168_p2), 0.0   ;;  %v1211_v26 = vld [vmem:[%s1314_s1] sm:$0xff] (!%p168_p2)  ;;  %vm284_vm0 = vcmask (!%p168_p2), 261120   ;;  %vm889_vm1 = vcmask (!%p168_p2), 7168  }
   0x6   : > { %171 = sbr.rel (%p168_p2) target bundleno = 419 (0x1a3), region = 28  ;;  %352 = vmatprep.mubr.f32.mxu0 (!%p168_p2), %v1146_v0  ;;  %423 = vmatprep.mubr.f32.mxu1 (!%p168_p2), %v1146_v0 }
   0xd   : > { %s1319_s16 = smov (!%p201_p3, %s1042_s16), 1 }
   0xe   : > { %s1063_s17 = sshll.u32 %s1319_s16, 9  ;;  %s1064_s23 = sshll.u32 %s1319_s16, 7 }
   0xf   : > { %s1188_s20 = scalar_lea.vmem %s1313_s0, %s1063_s17  ;;  %s1285_s26 = scalar_lea.vmem %s1315_s2, %s1064_s23 }
  0x10   : > { %v221_v1 = vld [vmem:[%s1188_s20 + $0x8] sm:$0xff]  ;;  %v220_v3 = vld [vmem:[%s1188_s20] sm:$0xff]  ;;  %v223_v6 = vld [vmem:[%s1188_s20 + $0x18] sm:$0xff]  ;;  %s1051_s27 = sshll.u32 %s1319_s16, 3 }
  0x11   : > { %v237_v2 = vld [vmem:[%s1188_s20 + $0x88] sm:$0xff]  ;;  %v236_v5 = vld [vmem:[%s1188_s20 + $0x80] sm:$0xff]  ;;  %v239_v7 = vld [vmem:[%s1188_s20 + $0x98] sm:$0xff]  ;;  %s214_s30 = scalar_lea.vmem %s1316_s3, %s1051_s27  ;;  %s218_s7 = scalar_lea.vmem %s1317_s4, %s1051_s27 }
  0x12   : > { %v1065_v4 = vpack.c.bf16 %v237_v2, %v221_v1  ;;  %v1067_v8 = vpack.c.bf16 %v236_v5, %v220_v3  ;;  %v1073_v9 = vpack.c.bf16 %v239_v7, %v223_v6  ;;  %v253_v10 = vld [vmem:[%s1188_s20 + $0x108] sm:$0xff]  ;;  %v222_v12 = vld [vmem:[%s1188_s20 + $0x10] sm:$0xff]  ;;  %v252_v15 = vld [vmem:[%s1188_s20 + $0x100] sm:$0xff] }
  0x13   : > { %v269_v11 = vld [vmem:[%s1188_s20 + $0x188] sm:$0xff]  ;;  %v238_v14 = vld [vmem:[%s1188_s20 + $0x90] sm:$0xff]  ;;  %v268_v16 = vld [vmem:[%s1188_s20 + $0x180] sm:$0xff] }
  0x14   : > { %1066 = vmatprep.subr.bf16.mxu0 %v1065_v4  ;;  %v1069_v13 = vpack.c.bf16 %v269_v11, %v253_v10  ;;  %1074 = vmatprep.subr.bf16.mxu1 %v1073_v9  ;;  %v1075_v17 = vpack.c.bf16 %v238_v14, %v222_v12  ;;  %v1071_v18 = vpack.c.bf16 %v268_v16, %v252_v15  ;;  %v255_v19 = vld [vmem:[%s1188_s20 + $0x118] sm:$0xff]  ;;  %v254_v21 = vld [vmem:[%s1188_s20 + $0x110] sm:$0xff]  ;;  %v225_v24 = vld [vmem:[%s1188_s20 + $0x28] sm:$0xff] }
  0x15   : > { %1068 = vmatpush1.bf16.msra.mxu0 %v1067_v8  ;;  %v271_v20 = vld [vmem:[%s1188_s20 + $0x198] sm:$0xff]  ;;  %v270_v23 = vld [vmem:[%s1188_s20 + $0x190] sm:$0xff]  ;;  %v241_v25 = vld [vmem:[%s1188_s20 + $0xa8] sm:$0xff] }
  0x16   : > { %1070 = vmatprep.subr.bf16.mxu0 %v1069_v13  ;;  %v1077_v22 = vpack.c.bf16 %v271_v20, %v255_v19  ;;  %1076 = vmatpush1.bf16.msra.mxu1 %v1075_v17  ;;  %v1079_v27 = vpack.c.bf16 %v270_v23, %v254_v21  ;;  %v1081_v28 = vpack.c.bf16 %v241_v25, %v225_v24  ;;  %v224_v29 = vld [vmem:[%s1188_s20 + $0x20] sm:$0xff]  ;;  %v227_v31 = vld [vmem:[%s1188_s20 + $0x38] sm:$0xff]  ;;  %v257_v33 = vld [vmem:[%s1188_s20 + $0x128] sm:$0xff] }
  0x17   : > { %v240_v30 = vld [vmem:[%s1188_s20 + $0xa0] sm:$0xff]  ;;  %v243_v32 = vld [vmem:[%s1188_s20 + $0xb8] sm:$0xff]  ;;  %v273_v34 = vld [vmem:[%s1188_s20 + $0x1a8] sm:$0xff] }
  0x18   : > { %1078 = vmatprep.subr.bf16.mxu1 %v1077_v22  ;;  %v1083_v35 = vpack.c.bf16 %v240_v30, %v224_v29  ;;  %v1089_v36 = vpack.c.bf16 %v243_v32, %v227_v31  ;;  %v226_v37 = vld [vmem:[%s1188_s20 + $0x30] sm:$0xff]  ;;  %v256_v39 = vld [vmem:[%s1188_s20 + $0x120] sm:$0xff]  ;;  %v1085_v40 = vpack.c.bf16 %v273_v34, %v257_v33  ;;  %v259_v42 = vld [vmem:[%s1188_s20 + $0x138] sm:$0xff] }
  0x19   : > { %1072 = vmatpush1.bf16.msra.mxu0 %v1071_v18  ;;  %v242_v38 = vld [vmem:[%s1188_s20 + $0xb0] sm:$0xff]  ;;  %v272_v41 = vld [vmem:[%s1188_s20 + $0x1a0] sm:$0xff]  ;;  %v275_v43 = vld [vmem:[%s1188_s20 + $0x1b8] sm:$0xff] }
  0x1a   : > { %1082 = vmatprep.subr.bf16.mxu0 %v1081_v28  ;;  %1080 = vmatpush1.bf16.msra.mxu1 %v1079_v27  ;;  %v1091_v44 = vpack.c.bf16 %v242_v38, %v226_v37  ;;  %v229_v45 = vld [vmem:[%s1188_s20 + $0x48] sm:$0xff]  ;;  %v1093_v46 = vpack.c.bf16 %v275_v43, %v259_v42  ;;  %v258_v47 = vld [vmem:[%s1188_s20 + $0x130] sm:$0xff]  ;;  %v1087_v50 = vpack.c.bf16 %v272_v41, %v256_v39  ;;  %v231_v51 = vld [vmem:[%s1188_s20 + $0x58] sm:$0xff] }
  0x1b   : > { %1090 = vmatprep.subr.bf16.mxu1 %v1089_v36  ;;  %v274_v48 = vld [vmem:[%s1188_s20 + $0x1b0] sm:$0xff]  ;;  %v245_v49 = vld [vmem:[%s1188_s20 + $0xc8] sm:$0xff]  ;;  %v247_v52 = vld [vmem:[%s1188_s20 + $0xd8] sm:$0xff] }
  0x1c   : > { %1053 = vmatmul.mubr.msk.f32.vlgmr.msra.gmra.mrb[0].mxu0 %vm284_vm0, %v1211_v26  ;;  %v1097_v53 = vpack.c.bf16 %v245_v49, %v229_v45  ;;  %v228_v54 = vld [vmem:[%s1188_s20 + $0x40] sm:$0xff]  ;;  %v1095_v56 = vpack.c.bf16 %v274_v48, %v258_v47  ;;  %v261_v57 = vld [vmem:[%s1188_s20 + $0x148] sm:$0xff]  ;;  %v1105_v59 = vpack.c.bf16 %v247_v52, %v231_v51  ;;  %v230_v60 = vld [vmem:[%s1188_s20 + $0x50] sm:$0xff] }
  0x1d   : > { %1084 = vmatpush1.bf16.msra.mxu0 %v1083_v35  ;;  %494 = vmatprep.mubr.f32.mxu0 %v1146_v0  ;;  %v244_v55 = vld [vmem:[%s1188_s20 + $0xc0] sm:$0xff]  ;;  %v277_v58 = vld [vmem:[%s1188_s20 + $0x1c8] sm:$0xff]  ;;  %v246_v61 = vld [vmem:[%s1188_s20 + $0xd0] sm:$0xff] }
  0x1e   : > { %1054 = vmatmul.mubr.msk.f32.vlgmr.msra.gmra.mrb[0].mxu1 %vm284_vm0, %v1211_v26  ;;  %1086 = vmatprep.subr.bf16.mxu0 %v1085_v40  ;;  %v1099_v62 = vpack.c.bf16 %v244_v55, %v228_v54  ;;  %v263_v63 = vld [vmem:[%s1188_s20 + $0x158] sm:$0xff]  ;;  %v1101_v2 = vpack.c.bf16 %v277_v58, %v261_v57  ;;  %v260_v3 = vld [vmem:[%s1188_s20 + $0x140] sm:$0xff]  ;;  %v1107_v5 = vpack.c.bf16 %v246_v61, %v230_v60  ;;  %v233_v6 = vld [vmem:[%s1188_s20 + $0x68] sm:$0xff] }
  0x1f   : > { %1092 = vmatpush1.bf16.msra.mxu1 %v1091_v44  ;;  %565 = vmatprep.mubr.f32.mxu1 %v1146_v0  ;;  %v279_v1 = vld [vmem:[%s1188_s20 + $0x1d8] sm:$0xff]  ;;  %v276_v4 = vld [vmem:[%s1188_s20 + $0x1c0] sm:$0xff]  ;;  %v249_v7 = vld [vmem:[%s1188_s20 + $0xe8] sm:$0xff] }
  0x20   : > { %1094 = vmatprep.subr.bf16.mxu1 %v1093_v46  ;;  %v1109_v8 = vpack.c.bf16 %v279_v1, %v263_v63  ;;  %v262_v9 = vld [vmem:[%s1188_s20 + $0x150] sm:$0xff]  ;;  %v1103_v11 = vpack.c.bf16 %v276_v4, %v260_v3  ;;  %v235_v12 = vld [vmem:[%s1188_s20 + $0x78] sm:$0xff]  ;;  %v1113_v14 = vpack.c.bf16 %v249_v7, %v233_v6  ;;  %v232_v15 = vld [vmem:[%s1188_s20 + $0x60] sm:$0xff] }
  0x21   : > { %1088 = vmatpush1.bf16.msra.mxu0 %v1087_v50  ;;  %v278_v10 = vld [vmem:[%s1188_s20 + $0x1d0] sm:$0xff]  ;;  %v251_v13 = vld [vmem:[%s1188_s20 + $0xf8] sm:$0xff]  ;;  %v248_v16 = vld [vmem:[%s1188_s20 + $0xe0] sm:$0xff] }
  0x22   : > { %1098 = vmatprep.subr.bf16.mxu0 %v1097_v53  ;;  %v1111_v17 = vpack.c.bf16 %v278_v10, %v262_v9  ;;  %v265_v18 = vld [vmem:[%s1188_s20 + $0x168] sm:$0xff]  ;;  %v1121_v20 = vpack.c.bf16 %v251_v13, %v235_v12  ;;  %v234_v21 = vld [vmem:[%s1188_s20 + $0x70] sm:$0xff]  ;;  %v1115_v23 = vpack.c.bf16 %v248_v16, %v232_v15  ;;  %v267_v24 = vld [vmem:[%s1188_s20 + $0x178] sm:$0xff] }
  0x23   : > { %1096 = vmatpush1.bf16.msra.mxu1 %v1095_v56  ;;  %v281_v19 = vld [vmem:[%s1188_s20 + $0x1e8] sm:$0xff]  ;;  %v250_v22 = vld [vmem:[%s1188_s20 + $0xf0] sm:$0xff]  ;;  %v283_v25 = vld [vmem:[%s1188_s20 + $0x1f8] sm:$0xff] }
  0x24   : > { %1055 = vmatmul.mubr.msk.f32.vlgmr.msra.gmra.mrb[2].mxu0 %vm284_vm0, %v1211_v26  ;;  %1106 = vmatprep.subr.bf16.mxu1 %v1105_v59  ;;  %v1117_v27 = vpack.c.bf16 %v281_v19, %v265_v18  ;;  %v264_v28 = vld [vmem:[%s1188_s20 + $0x160] sm:$0xff]  ;;  %v1123_v30 = vpack.c.bf16 %v250_v22, %v234_v21  ;;  %v1125_v31 = vpack.c.bf16 %v283_v25, %v267_v24  ;;  %v266_v32 = vld [vmem:[%s1188_s20 + $0x170] sm:$0xff] }
  0x25   : > { %1100 = vmatpush1.bf16.msra.mxu0 %v1099_v62  ;;  %636 = vmatprep.mubr.f32.mxu0 %v1146_v0  ;;  %v280_v29 = vld [vmem:[%s1188_s20 + $0x1e0] sm:$0xff]  ;;  %v282_v33 = vld [vmem:[%s1188_s20 + $0x1f0] sm:$0xff] }
  0x26   : > { %1056 = vmatmul.mubr.msk.f32.vlgmr.msra.gmra.mrb[2].mxu1 %vm284_vm0, %v1211_v26  ;;  %1102 = vmatprep.subr.bf16.mxu0 %v1101_v2  ;;  %v1119_v34 = vpack.c.bf16 %v280_v29, %v264_v28  ;;  %v1127_v35 = vpack.c.bf16 %v282_v33, %v266_v32 }
  0x27   : > { %1108 = vmatpush1.bf16.msra.mxu1 %v1107_v5  ;;  %707 = vmatprep.mubr.f32.mxu1 %v1146_v0 }
  0x28   : > { %1110 = vmatprep.subr.bf16.mxu1 %v1109_v8 }
  0x29   : > { %1104 = vmatpush1.bf16.msra.mxu0 %v1103_v11 }
  0x2a   : > { %1114 = vmatprep.subr.bf16.mxu0 %v1113_v14 }
  0x2b   : > { %1112 = vmatpush1.bf16.msra.mxu1 %v1111_v17 }
  0x2c   : > { %1057 = vmatmul.mubr.msk.f32.vlgmr.msra.gmra.mrb[4].mxu0 %vm284_vm0, %v1211_v26  ;;  %1122 = vmatprep.subr.bf16.mxu1 %v1121_v20 }
  0x2d   : > { %1116 = vmatpush1.bf16.msra.mxu0 %v1115_v23  ;;  %778 = vmatprep.mubr.f32.mxu0 %v1146_v0 }
  0x2e   : > { %1058 = vmatmul.mubr.msk.f32.vlgmr.msra.gmra.mrb[4].mxu1 %vm284_vm0, %v1211_v26  ;;  %1118 = vmatprep.subr.bf16.mxu0 %v1117_v27 }
  0x2f   : > { %1124 = vmatpush1.bf16.msra.mxu1 %v1123_v30  ;;  %849 = vmatprep.mubr.f32.mxu1 %v1146_v0 }
  0x30   : > { %1126 = vmatprep.subr.bf16.mxu1 %v1125_v31 }
  0x31   : > { %1120 = vmatpush1.bf16.msra.mxu0 %v1119_v34 }
  0x33   : > { %1128 = vmatpush1.bf16.msra.mxu1 %v1127_v35 }
  0x34   : > { %1059 = vmatmul.mubr.msk.f32.vlgmr.msra.gmra.mrb[6].mxu0 %vm284_vm0, %v1211_v26 }
  0x36   : > { %1060 = vmatmul.mubr.msk.f32.vlgmr.msra.gmra.mrb[6].mxu1 %vm284_vm0, %v1211_v26 }
  0xef   : > { %v354_v0 = vpop.f32.mrb[0].mxu0 }
  0xf0   : > { %856 = vst [vmem:[%s1285_s26] sm:$0xff] %v354_v0  ;;  %v891_v36 = vmul.f32 %v354_v0, %v354_v0  ;;  %v356_v37 = vpop.f32.mrb[1].mxu0 }
  0xf1   : > { %857 = vst [vmem:[%s1285_s26 + $0x8] sm:$0xff] %v356_v37  ;;  %v872_v38 = vadd.f32 %v356_v37, %v354_v0  ;;  %v892_v39 = vmul.f32 %v356_v37, %v356_v37  ;;  %v425_v40 = vpop.f32.mrb[0].mxu1 }
  0xf2   : > { %858 = vst [vmem:[%s1285_s26 + $0x10] sm:$0xff] %v425_v40  ;;  %v893_v26 = vmul.f32 %v425_v40, %v425_v40  ;;  %v427_v41 = vpop.f32.mrb[1].mxu1 }
  0xf3   : > { %v907_v42 = vadd.f32 %v892_v39, %v891_v36  ;;  %v873_v43 = vadd.f32 %v872_v38, %v425_v40  ;;  %859 = vst [vmem:[%s1285_s26 + $0x18] sm:$0xff] %v427_v41  ;;  %v894_v44 = vmul.f32 %v427_v41, %v427_v41 }
  0xf5   : > { %v908_v45 = vadd.f32 %v907_v42, %v893_v26  ;;  %v874_v46 = vadd.f32 %v873_v43, %v427_v41 }
  0xf7   : > { %v909_v47 = vadd.f32 %v908_v45, %v894_v44  ;;  %v496_v48 = vpop.f32.mrb[2].mxu0 }
  0xf8   : > { %860 = vst [vmem:[%s1285_s26 + $0x20] sm:$0xff] %v496_v48  ;;  %v875_v49 = vadd.f32 %v874_v46, %v496_v48  ;;  %v895_v50 = vmul.f32 %v496_v48, %v496_v48  ;;  %v498_v51 = vpop.f32.mrb[3].mxu0 }
  0xf9   : > { %861 = vst [vmem:[%s1285_s26 + $0x28] sm:$0xff] %v498_v51  ;;  %v896_v52 = vmul.f32 %v498_v51, %v498_v51  ;;  %v567_v53 = vpop.f32.mrb[2].mxu1 }
  0xfa   : > { %v910_v54 = vadd.f32 %v909_v47, %v895_v50  ;;  %v876_v55 = vadd.f32 %v875_v49, %v498_v51  ;;  %862 = vst [vmem:[%s1285_s26 + $0x30] sm:$0xff] %v567_v53  ;;  %v897_v56 = vmul.f32 %v567_v53, %v567_v53  ;;  %v569_v57 = vpop.f32.mrb[3].mxu1 }
  0xfb   : > { %863 = vst [vmem:[%s1285_s26 + $0x38] sm:$0xff] %v569_v57  ;;  %v898_v62 = vmul.f32 %v569_v57, %v569_v57 }
  0xfc   : > { %v911_v58 = vadd.f32 %v910_v54, %v896_v52  ;;  %v877_v59 = vadd.f32 %v876_v55, %v567_v53 }
  0xfe   : > { %v912_v60 = vadd.f32 %v911_v58, %v897_v56  ;;  %v878_v61 = vadd.f32 %v877_v59, %v569_v57 }
  0xff   : > { %v638_v63 = vpop.f32.mrb[4].mxu0 }
 0x100   : > { %v913_v1 = vadd.f32 %v912_v60, %v898_v62  ;;  %864 = vst [vmem:[%s1285_s26 + $0x40] sm:$0xff] %v638_v63  ;;  %v879_v2 = vadd.f32 %v878_v61, %v638_v63  ;;  %v899_v3 = vmul.f32 %v638_v63, %v638_v63  ;;  %v640_v4 = vpop.f32.mrb[5].mxu0 }
 0x101   : > { %865 = vst [vmem:[%s1285_s26 + $0x48] sm:$0xff] %v640_v4  ;;  %v900_v5 = vmul.f32 %v640_v4, %v640_v4  ;;  %v709_v6 = vpop.f32.mrb[4].mxu1 }
 0x102   : > { %v914_v7 = vadd.f32 %v913_v1, %v899_v3  ;;  %v880_v8 = vadd.f32 %v879_v2, %v640_v4  ;;  %866 = vst [vmem:[%s1285_s26 + $0x50] sm:$0xff] %v709_v6  ;;  %v901_v9 = vmul.f32 %v709_v6, %v709_v6  ;;  %v711_v10 = vpop.f32.mrb[5].mxu1 }
 0x103   : > { %867 = vst [vmem:[%s1285_s26 + $0x58] sm:$0xff] %v711_v10  ;;  %v902_v15 = vmul.f32 %v711_v10, %v711_v10 }
 0x104   : > { %v915_v11 = vadd.f32 %v914_v7, %v900_v5  ;;  %v881_v12 = vadd.f32 %v880_v8, %v709_v6 }
 0x106   : > { %v916_v13 = vadd.f32 %v915_v11, %v901_v9  ;;  %v882_v14 = vadd.f32 %v881_v12, %v711_v10 }
 0x107   : > { %v780_v16 = vpop.f32.mrb[6].mxu0 }
 0x108   : > { %v917_v17 = vadd.f32 %v916_v13, %v902_v15  ;;  %868 = vst [vmem:[%s1285_s26 + $0x60] sm:$0xff] %v780_v16  ;;  %v883_v18 = vadd.f32 %v882_v14, %v780_v16  ;;  %v903_v19 = vmul.f32 %v780_v16, %v780_v16  ;;  %v782_v20 = vpop.f32.mrb[7].mxu0 }
 0x109   : > { %869 = vst [vmem:[%s1285_s26 + $0x68] sm:$0xff] %v782_v20  ;;  %v904_v21 = vmul.f32 %v782_v20, %v782_v20  ;;  %v851_v22 = vpop.f32.mrb[6].mxu1 }
 0x10a   : > { %v918_v23 = vadd.f32 %v917_v17, %v903_v19  ;;  %v884_v24 = vadd.f32 %v883_v18, %v782_v20  ;;  %870 = vst [vmem:[%s1285_s26 + $0x70] sm:$0xff] %v851_v22  ;;  %v905_v25 = vmul.f32 %v851_v22, %v851_v22  ;;  %v853_v27 = vpop.f32.mrb[7].mxu1 }
 0x10b   : > { %871 = vst [vmem:[%s1285_s26 + $0x78] sm:$0xff] %v853_v27  ;;  %v906_v30 = vmul.f32 %v853_v27, %v853_v27 }
 0x10c   : > { %v919_v28 = vadd.f32 %v918_v23, %v904_v21  ;;  %v885_v29 = vadd.f32 %v884_v24, %v851_v22 }
 0x10e   : > { %v886_v31 = vadd.f32 %v885_v29, %v853_v27  ;;  %v920_v32 = vadd.f32 %v919_v28, %v905_v25 }
 0x110   : > { %887 = vadd.xlane.f32.xlu0 %v886_v31  ;;  %v921_v33 = vadd.f32 %v920_v32, %v906_v30 }
 0x114   : > { %922 = vadd.xlane.f32.xlu0 %v921_v33 }
 0x19d   : > { %v888_v34 = vpop.xlane.xlu0 %887 }
 0x19e   : > { %890 = vst.msk [vmem:[%s214_s30] sm:$0xff] %vm889_vm1, %v888_v34 }
 0x1a1   : > { %v923_v35 = vpop.xlane.xlu0 %922 }
 0x1a2   : > { %924 = vst.msk [vmem:[%s218_s7] sm:$0xff] %vm889_vm1, %v923_v35 }
 0x1a3 PF: > { %s15_s15 = sadd.s32 1, %s1144_s15  }
 0x1a4   : > { %p12_p4 = scmp.ge.s32.totalorder %s15_s15, 4  }
 0x1a6   :  { %14 = sbr.rel (!%p12_p4) target bundleno = 1 (0x1), region = 82 }

// kernel: bottleneck_forward.6
= control target key start
LH: loop header
LB: loop body
LE: loop exit
PB: predicated region body
PF: predicated region fallthrough
CT: control target
= control target key end

     0   :  { %s1583_s21 = smov 0   ;;  %s1861_s0 = inlined_call_operand.vmem [shape: f32[2,8,2048], index: 0, kind: input, shape index: {}]   ;;  %s1862_s1 = inlined_call_operand.vmem [shape: f32[8,1], index: 1, kind: input, shape index: {}]   ;;  %s1863_s2 = inlined_call_operand.vmem [shape: f32[8,1], index: 2, kind: input, shape index: {}]   ;;  %s1864_s3 = inlined_call_operand.vmem [shape: f32[32,8], index: 3, kind: input, shape index: {}]   ;;  %s1865_s4 = inlined_call_operand.vmem [shape: f32[2,32,2048], index: 4, kind: output, shape index: {0}]   ;;  %s1866_s5 = inlined_call_operand.vmem [shape: f32[2,32,1], index: 5, kind: output, shape index: {1}]   ;;  %s1867_s6 = inlined_call_operand.vmem [shape: f32[2,32,1], index: 6, kind: output, shape index: {2}]  }
   0x1 LB: > { %s1476_s22 = sadd.s32 4294967295, %s1544_s21   ;;  %p1480_p0 = scmp.ge.s32.totalorder %s1544_s21, 1  ;;  %s1544_s21 = sphi %s1583_s21, %s17_s21  }
   0x2   : > { %p217_p1 = scmp.lt.s32.totalorder %s1544_s21, 3 }
   0x4   : > { %p218_p2 = pnand %p1480_p0, %p217_p1 }
   0x5   : > { %v293_v0 = vld [vmem:[%s1862_s1] sm:$0xff] (!%p218_p2)  ;;  %v1546_v1 = vmov (!%p218_p2), 0   ;;  %v1547_v3 = vmov (!%p218_p2), 0.0   ;;  %p257_p3 = scmp.lt.s32.totalorder (!%p218_p2), %s1476_s22, 1  ;;  %vm357_vm0 = vcmask (!%p218_p2), 64512   ;;  %v1653_v47 = vld [vmem:[%s1864_s3 + $0x8] sm:$0xff] (!%p218_p2) }
   0x6   : > { %221 = sbr.rel (%p218_p2) target bundleno = 582 (0x246), region = 36  ;;  %1537 = vset.pattern.permute.xlu0 (!%p218_p2), %v1546_v1  ;;  %v315_v2 = vld [vmem:[%s1863_s2] sm:$0xff] (!%p218_p2)  ;;  %434 = vmatprep.mubr.f32.mxu0 (!%p218_p2), %v1547_v3  ;;  %v1666_v48 = vld [vmem:[%s1864_s3 + $0x10] sm:$0xff] (!%p218_p2)  ;;  %v1681_v53 = vld [vmem:[%s1864_s3 + $0x18] sm:$0xff] (!%p218_p2)  ;;  %vm1214_vm1 = vcmask (!%p218_p2), 7168  }
   0x7   : > { %296 = vperm.xlu0 (!%p218_p2), %1537, %v293_v0   ;;  %523 = vmatprep.mubr.f32.mxu1 (!%p218_p2), %v1547_v3  ;;  %v1642_v38 = vld [vmem:[%s1864_s3] sm:$0xff] (!%p218_p2) }
   0xb   : > { %318 = vperm.xlu0 (!%p218_p2), %1537, %v315_v2  }
   0xd   : > { %s1869_s22 = smov (!%p257_p3, %s1476_s22), 1 }
   0xe   : > { %s1523_s27 = sshll.u32 %s1869_s22, 7  ;;  %s1524_s15 = sshll.u32 %s1869_s22, 9 }
   0xf   : > { %s1605_s30 = scalar_lea.vmem %s1861_s0, %s1523_s27  ;;  %s1777_s18 = scalar_lea.vmem %s1865_s4, %s1524_s15 }
  0x10   : > { %v278_v4 = vld [vmem:[%s1605_s30 + $0x8] sm:$0xff]  ;;  %v280_v5 = vld [vmem:[%s1605_s30 + $0x18] sm:$0xff]  ;;  %v277_v6 = vld [vmem:[%s1605_s30] sm:$0xff]  ;;  %s1525_s19 = sshll.u32 %s1869_s22, 5 }
  0x11   : > { %v279_v7 = vld [vmem:[%s1605_s30 + $0x10] sm:$0xff]  ;;  %v282_v9 = vld [vmem:[%s1605_s30 + $0x28] sm:$0xff]  ;;  %v284_v10 = vld [vmem:[%s1605_s30 + $0x38] sm:$0xff]  ;;  %s271_s24 = scalar_lea.vmem %s1866_s5, %s1525_s19  ;;  %s276_s27 = scalar_lea.vmem %s1867_s6, %s1525_s19 }
  0x12   : > { %v281_v11 = vld [vmem:[%s1605_s30 + $0x20] sm:$0xff]  ;;  %v283_v12 = vld [vmem:[%s1605_s30 + $0x30] sm:$0xff]  ;;  %v286_v13 = vld [vmem:[%s1605_s30 + $0x48] sm:$0xff] }
  0x13   : > { %v288_v14 = vld [vmem:[%s1605_s30 + $0x58] sm:$0xff]  ;;  %v285_v49 = vld [vmem:[%s1605_s30 + $0x40] sm:$0xff]  ;;  %v287_v50 = vld [vmem:[%s1605_s30 + $0x50] sm:$0xff] }
  0x14   : > { %v290_v51 = vld [vmem:[%s1605_s30 + $0x68] sm:$0xff]  ;;  %v292_v52 = vld [vmem:[%s1605_s30 + $0x78] sm:$0xff]  ;;  %v289_v2 = vld [vmem:[%s1605_s30 + $0x60] sm:$0xff] }
  0x86   : > { %v1611_v8 = vpop.permute.xlu0 %296 }
  0x87   : > { %v300_v15 = vmul.f32 %v1611_v8, %v278_v4  ;;  %v302_v16 = vmul.f32 %v1611_v8, %v280_v5  ;;  %v299_v17 = vmul.f32 %v1611_v8, %v277_v6  ;;  %v301_v18 = vmul.f32 %v1611_v8, %v279_v7  ;;  %v291_v4 = vld [vmem:[%s1605_s30 + $0x70] sm:$0xff] }
  0x88   : > { %v304_v19 = vmul.f32 %v1611_v8, %v282_v9  ;;  %v306_v20 = vmul.f32 %v1611_v8, %v284_v10  ;;  %v303_v22 = vmul.f32 %v1611_v8, %v281_v11  ;;  %v305_v23 = vmul.f32 %v1611_v8, %v283_v12 }
  0x89   : > { %v308_v24 = vmul.f32 %v1611_v8, %v286_v13  ;;  %v310_v25 = vmul.f32 %v1611_v8, %v288_v14  ;;  %v307_v54 = vmul.f32 %v1611_v8, %v285_v49  ;;  %v309_v55 = vmul.f32 %v1611_v8, %v287_v50 }
  0x8a   : > { %v1625_v21 = vpop.permute.xlu0 %318  ;;  %v312_v56 = vmul.f32 %v1611_v8, %v290_v51  ;;  %v314_v57 = vmul.f32 %v1611_v8, %v292_v52  ;;  %v311_v5 = vmul.f32 %v1611_v8, %v289_v2  ;;  %v313_v6 = vmul.f32 %v1611_v8, %v291_v4 }
  0x8b   : > { %v322_v26 = vadd.f32 %v1625_v21, %v300_v15  ;;  %v324_v27 = vadd.f32 %v1625_v21, %v302_v16  ;;  %v321_v28 = vadd.f32 %v1625_v21, %v299_v17  ;;  %v323_v29 = vadd.f32 %v1625_v21, %v301_v18 }
  0x8c   : > { %v326_v30 = vadd.f32 %v1625_v21, %v304_v19  ;;  %v328_v31 = vadd.f32 %v1625_v21, %v306_v20  ;;  %v325_v32 = vadd.f32 %v1625_v21, %v303_v22  ;;  %v327_v33 = vadd.f32 %v1625_v21, %v305_v23 }
  0x8d   : > { %v338_v34 = vmax.f32 %v322_v26, 0.0  ;;  %v340_v35 = vmax.f32 %v324_v27, 0.0  ;;  %v337_v36 = vmax.f32 %v321_v28, 0.0  ;;  %v339_v37 = vmax.f32 %v323_v29, 0.0 }
  0x8e   : > { %v330_v39 = vadd.f32 %v1625_v21, %v308_v24  ;;  %v332_v40 = vadd.f32 %v1625_v21, %v310_v25  ;;  %v342_v41 = vmax.f32 %v326_v30, 0.0  ;;  %v344_v42 = vmax.f32 %v328_v31, 0.0 }
  0x8f   : > { %370 = vmatprep.subr.mxu0 %v338_v34  ;;  %459 = vmatprep.subr.mxu1 %v340_v35  ;;  %v341_v43 = vmax.f32 %v325_v32, 0.0  ;;  %v343_v44 = vmax.f32 %v327_v33, 0.0  ;;  %v329_v58 = vadd.f32 %v1625_v21, %v307_v54  ;;  %v331_v59 = vadd.f32 %v1625_v21, %v309_v55 }
  0x90   : > { %371 = vmatpush1.msra.mxu0 %v337_v36  ;;  %460 = vmatpush1.msra.mxu1 %v339_v37  ;;  %v346_v45 = vmax.f32 %v330_v39, 0.0  ;;  %v348_v46 = vmax.f32 %v332_v40, 0.0  ;;  %v334_v60 = vadd.f32 %v1625_v21, %v312_v56  ;;  %v336_v61 = vadd.f32 %v1625_v21, %v314_v57 }
  0x91   : > { %1489 = vmatmul.mubr.msk.f32.vlgmr.msra.gmra.mrb[0].mxu0 %vm357_vm0, %v1642_v38  ;;  %1493 = vmatmul.mubr.msk.f32.vlgmr.msra.gmra.mrb[0].mxu1 %vm357_vm0, %v1642_v38  ;;  %v345_v62 = vmax.f32 %v329_v58, 0.0  ;;  %v347_v63 = vmax.f32 %v331_v59, 0.0  ;;  %v333_v7 = vadd.f32 %v1625_v21, %v311_v5  ;;  %v335_v9 = vadd.f32 %v1625_v21, %v313_v6 }
  0x92   : > { %548 = vmatprep.subr.mxu0 %v342_v41  ;;  %637 = vmatprep.subr.mxu1 %v344_v42  ;;  %v350_v0 = vmax.f32 %v334_v60, 0.0  ;;  %v352_v1 = vmax.f32 %v336_v61, 0.0 }
  0x93   : > { %549 = vmatpush1.msra.mxu0 %v341_v43  ;;  %638 = vmatpush1.msra.mxu1 %v343_v44  ;;  %v349_v10 = vmax.f32 %v333_v7, 0.0  ;;  %v351_v11 = vmax.f32 %v335_v9, 0.0 }
  0x94   : > { %726 = vmatprep.subr.mxu0 %v346_v45  ;;  %815 = vmatprep.subr.mxu1 %v348_v46 }
  0x95   : > { %440 = vmatprep.mubr.f32.mxu0 %v1547_v3  ;;  %529 = vmatprep.mubr.f32.mxu1 %v1547_v3 }
  0x96   : > { %1490 = vmatmul.mubr.msk.f32.gmra.mrb[2].mxu0 %vm357_vm0, %v1653_v47  ;;  %1494 = vmatmul.mubr.msk.f32.gmra.mrb[2].mxu1 %vm357_vm0, %v1653_v47 }
  0x97   : > { %446 = vmatprep.mubr.f32.mxu0 %v1547_v3  ;;  %535 = vmatprep.mubr.f32.mxu1 %v1547_v3 }
  0x9a   : > { %1491 = vmatmul.mubr.msk.f32.gmra.mrb[4].mxu0 %vm357_vm0, %v1666_v48  ;;  %1495 = vmatmul.mubr.msk.f32.gmra.mrb[4].mxu1 %vm357_vm0, %v1666_v48 }
  0x9b   : > { %452 = vmatprep.mubr.f32.mxu0 %v1547_v3  ;;  %541 = vmatprep.mubr.f32.mxu1 %v1547_v3 }
  0x9e   : > { %1492 = vmatmul.mubr.msk.f32.gmra.mrb[6].mxu0 %vm357_vm0, %v1681_v53  ;;  %1496 = vmatmul.mubr.msk.f32.gmra.mrb[6].mxu1 %vm357_vm0, %v1681_v53 }
  0x9f   : > { %612 = vmatprep.mubr.f32.mxu0 %v1547_v3  ;;  %701 = vmatprep.mubr.f32.mxu1 %v1547_v3 }
  0xa2   : > { %1497 = vmatmul.mubr.msk.f32.vlgmr.msra.gmra.mrb[8].mxu0 %vm357_vm0, %v1642_v38  ;;  %1501 = vmatmul.mubr.msk.f32.vlgmr.msra.gmra.mrb[8].mxu1 %vm357_vm0, %v1642_v38 }
  0xa3   : > { %727 = vmatpush1.msra.mxu0 %v345_v62  ;;  %816 = vmatpush1.msra.mxu1 %v347_v63 }
  0xa4   : > { %904 = vmatprep.subr.mxu0 %v350_v0  ;;  %993 = vmatprep.subr.mxu1 %v352_v1 }
  0xa5   : > { %618 = vmatprep.mubr.f32.mxu0 %v1547_v3  ;;  %707 = vmatprep.mubr.f32.mxu1 %v1547_v3 }
  0xa6   : > { %1498 = vmatmul.mubr.msk.f32.gmra.mrb[10].mxu0 %vm357_vm0, %v1653_v47  ;;  %1502 = vmatmul.mubr.msk.f32.gmra.mrb[10].mxu1 %vm357_vm0, %v1653_v47 }
  0xa7   : > { %624 = vmatprep.mubr.f32.mxu0 %v1547_v3  ;;  %713 = vmatprep.mubr.f32.mxu1 %v1547_v3 }
  0xaa   : > { %1499 = vmatmul.mubr.msk.f32.gmra.mrb[12].mxu0 %vm357_vm0, %v1666_v48  ;;  %1503 = vmatmul.mubr.msk.f32.gmra.mrb[12].mxu1 %vm357_vm0, %v1666_v48 }
  0xab   : > { %630 = vmatprep.mubr.f32.mxu0 %v1547_v3  ;;  %719 = vmatprep.mubr.f32.mxu1 %v1547_v3 }
  0xae   : > { %1500 = vmatmul.mubr.msk.f32.gmra.mrb[14].mxu0 %vm357_vm0, %v1681_v53  ;;  %1504 = vmatmul.mubr.msk.f32.gmra.mrb[14].mxu1 %vm357_vm0, %v1681_v53 }
  0xaf   : > { %790 = vmatprep.mubr.f32.mxu0 %v1547_v3  ;;  %879 = vmatprep.mubr.f32.mxu1 %v1547_v3 }
  0xb2   : > { %1505 = vmatmul.mubr.msk.f32.vlgmr.msra.gmra.mrb[16].mxu0 %vm357_vm0, %v1642_v38  ;;  %1509 = vmatmul.mubr.msk.f32.vlgmr.msra.gmra.mrb[16].mxu1 %vm357_vm0, %v1642_v38 }
  0xb3   : > { %905 = vmatpush1.msra.mxu0 %v349_v10  ;;  %994 = vmatpush1.msra.mxu1 %v351_v11 }
  0xb4   : > { %796 = vmatprep.mubr.f32.mxu0 %v1547_v3  ;;  %885 = vmatprep.mubr.f32.mxu1 %v1547_v3 }
  0xb6   : > { %1506 = vmatmul.mubr.msk.f32.gmra.mrb[18].mxu0 %vm357_vm0, %v1653_v47  ;;  %1510 = vmatmul.mubr.msk.f32.gmra.mrb[18].mxu1 %vm357_vm0, %v1653_v47 }
  0xb7   : > { %802 = vmatprep.mubr.f32.mxu0 %v1547_v3  ;;  %891 = vmatprep.mubr.f32.mxu1 %v1547_v3 }
  0xba   : > { %1507 = vmatmul.mubr.msk.f32.gmra.mrb[20].mxu0 %vm357_vm0, %v1666_v48  ;;  %1511 = vmatmul.mubr.msk.f32.gmra.mrb[20].mxu1 %vm357_vm0, %v1666_v48 }
  0xbb   : > { %808 = vmatprep.mubr.f32.mxu0 %v1547_v3  ;;  %897 = vmatprep.mubr.f32.mxu1 %v1547_v3 }
  0xbe   : > { %1508 = vmatmul.mubr.msk.f32.gmra.mrb[22].mxu0 %vm357_vm0, %v1681_v53  ;;  %1512 = vmatmul.mubr.msk.f32.gmra.mrb[22].mxu1 %vm357_vm0, %v1681_v53 }
  0xbf   : > { %968 = vmatprep.mubr.f32.mxu0 %v1547_v3  ;;  %1057 = vmatprep.mubr.f32.mxu1 %v1547_v3 }
  0xc2   : > { %1513 = vmatmul.mubr.msk.f32.vlgmr.msra.gmra.mrb[24].mxu0 %vm357_vm0, %v1642_v38  ;;  %1517 = vmatmul.mubr.msk.f32.vlgmr.msra.gmra.mrb[24].mxu1 %vm357_vm0, %v1642_v38 }
  0xc3   : > { %974 = vmatprep.mubr.f32.mxu0 %v1547_v3  ;;  %1063 = vmatprep.mubr.f32.mxu1 %v1547_v3 }
  0xc6   : > { %1514 = vmatmul.mubr.msk.f32.gmra.mrb[26].mxu0 %vm357_vm0, %v1653_v47  ;;  %1518 = vmatmul.mubr.msk.f32.gmra.mrb[26].mxu1 %vm357_vm0, %v1653_v47 }
  0xc7   : > { %980 = vmatprep.mubr.f32.mxu0 %v1547_v3  ;;  %1069 = vmatprep.mubr.f32.mxu1 %v1547_v3 }
  0xca   : > { %1515 = vmatmul.mubr.msk.f32.gmra.mrb[28].mxu0 %vm357_vm0, %v1666_v48  ;;  %1519 = vmatmul.mubr.msk.f32.gmra.mrb[28].mxu1 %vm357_vm0, %v1666_v48 }
  0xcb   : > { %986 = vmatprep.mubr.f32.mxu0 %v1547_v3  ;;  %1075 = vmatprep.mubr.f32.mxu1 %v1547_v3 }
  0xce   : > { %1516 = vmatmul.mubr.msk.f32.gmra.mrb[30].mxu0 %vm357_vm0, %v1681_v53  ;;  %1520 = vmatmul.mubr.msk.f32.gmra.mrb[30].mxu1 %vm357_vm0, %v1681_v53 }
 0x164   : > { %v436_v8 = vpop.f32.mrb[0].mxu0  ;;  %v525_v12 = vpop.f32.mrb[0].mxu1 }
 0x165   : > { %1082 = vst [vmem:[%s1777_s18] sm:$0xff] %v436_v8  ;;  %v1219_v3 = vmul.f32 %v436_v8, %v436_v8  ;;  %v438_v13 = vpop.f32.mrb[1].mxu0  ;;  %1084 = vst [vmem:[%s1777_s18 + $0x10] sm:$0xff] %v525_v12  ;;  %v527_v14 = vpop.f32.mrb[1].mxu1  ;;  %v1221_v17 = vmul.f32 %v525_v12, %v525_v12 }
 0x166   : > { %1083 = vst [vmem:[%s1777_s18 + $0x8] sm:$0xff] %v438_v13  ;;  %v1146_v15 = vadd.f32 %v438_v13, %v436_v8  ;;  %v1220_v16 = vmul.f32 %v438_v13, %v438_v13  ;;  %1085 = vst [vmem:[%s1777_s18 + $0x18] sm:$0xff] %v527_v14  ;;  %v1222_v20 = vmul.f32 %v527_v14, %v527_v14 }
 0x168   : > { %v1283_v18 = vadd.f32 %v1220_v16, %v1219_v3  ;;  %v1147_v19 = vadd.f32 %v1146_v15, %v525_v12 }
 0x169   : > { %v442_v21 = vpop.f32.mrb[2].mxu0  ;;  %v531_v22 = vpop.f32.mrb[2].mxu1 }
 0x16a   : > { %v1284_v23 = vadd.f32 %v1283_v18, %v1221_v17  ;;  %1098 = vst [vmem:[%s1777_s18 + $0x80] sm:$0xff] %v442_v21  ;;  %v1235_v24 = vmul.f32 %v442_v21, %v442_v21  ;;  %v444_v25 = vpop.f32.mrb[3].mxu0  ;;  %v1148_v26 = vadd.f32 %v1147_v19, %v527_v14  ;;  %1100 = vst [vmem:[%s1777_s18 + $0x90] sm:$0xff] %v531_v22  ;;  %v533_v27 = vpop.f32.mrb[3].mxu1 }
 0x16b   : > { %1099 = vst [vmem:[%s1777_s18 + $0x88] sm:$0xff] %v444_v25  ;;  %v1163_v28 = vadd.f32 %v444_v25, %v442_v21  ;;  %v1236_v29 = vmul.f32 %v444_v25, %v444_v25  ;;  %v1237_v30 = vmul.f32 %v531_v22, %v531_v22  ;;  %1101 = vst [vmem:[%s1777_s18 + $0x98] sm:$0xff] %v533_v27 }
 0x16c   : > { %v1285_v31 = vadd.f32 %v1284_v23, %v1222_v20  ;;  %v1238_v35 = vmul.f32 %v533_v27, %v533_v27 }
 0x16d   : > { %v1300_v32 = vadd.f32 %v1236_v29, %v1235_v24  ;;  %v1164_v33 = vadd.f32 %v1163_v28, %v531_v22  ;;  %v448_v34 = vpop.f32.mrb[4].mxu0  ;;  %v537_v36 = vpop.f32.mrb[4].mxu1 }
 0x16e   : > { %1114 = vst [vmem:[%s1777_s18 + $0x100] sm:$0xff] %v448_v34  ;;  %v1251_v37 = vmul.f32 %v448_v34, %v448_v34  ;;  %v450_v38 = vpop.f32.mrb[5].mxu0  ;;  %1116 = vst [vmem:[%s1777_s18 + $0x110] sm:$0xff] %v537_v36  ;;  %v1253_v39 = vmul.f32 %v537_v36, %v537_v36  ;;  %v539_v40 = vpop.f32.mrb[5].mxu1 }
 0x16f   : > { %v1301_v41 = vadd.f32 %v1300_v32, %v1237_v30  ;;  %1115 = vst [vmem:[%s1777_s18 + $0x108] sm:$0xff] %v450_v38  ;;  %v1180_v42 = vadd.f32 %v450_v38, %v448_v34  ;;  %v1252_v43 = vmul.f32 %v450_v38, %v450_v38  ;;  %v1165_v44 = vadd.f32 %v1164_v33, %v533_v27 }
 0x170   : > { %1117 = vst [vmem:[%s1777_s18 + $0x118] sm:$0xff] %v539_v40  ;;  %v1254_v49 = vmul.f32 %v539_v40, %v539_v40 }
 0x171   : > { %v1317_v45 = vadd.f32 %v1252_v43, %v1251_v37  ;;  %v1302_v46 = vadd.f32 %v1301_v41, %v1238_v35  ;;  %v1181_v47 = vadd.f32 %v1180_v42, %v537_v36  ;;  %v454_v48 = vpop.f32.mrb[6].mxu0  ;;  %v543_v50 = vpop.f32.mrb[6].mxu1 }
 0x172   : > { %1130 = vst [vmem:[%s1777_s18 + $0x180] sm:$0xff] %v454_v48  ;;  %v1267_v51 = vmul.f32 %v454_v48, %v454_v48  ;;  %v456_v52 = vpop.f32.mrb[7].mxu0  ;;  %1132 = vst [vmem:[%s1777_s18 + $0x190] sm:$0xff] %v543_v50  ;;  %v1269_v53 = vmul.f32 %v543_v50, %v543_v50  ;;  %v545_v54 = vpop.f32.mrb[7].mxu1 }
 0x173   : > { %v1318_v55 = vadd.f32 %v1317_v45, %v1253_v39  ;;  %1131 = vst [vmem:[%s1777_s18 + $0x188] sm:$0xff] %v456_v52  ;;  %v1197_v56 = vadd.f32 %v456_v52, %v454_v48  ;;  %v1268_v57 = vmul.f32 %v456_v52, %v456_v52  ;;  %v1182_v58 = vadd.f32 %v1181_v47, %v539_v40 }
 0x174   : > { %1133 = vst [vmem:[%s1777_s18 + $0x198] sm:$0xff] %v545_v54  ;;  %v1270_v63 = vmul.f32 %v545_v54, %v545_v54 }
 0x175   : > { %v1334_v59 = vadd.f32 %v1268_v57, %v1267_v51  ;;  %v1319_v60 = vadd.f32 %v1318_v55, %v1254_v49  ;;  %v1198_v61 = vadd.f32 %v1197_v56, %v543_v50  ;;  %v614_v62 = vpop.f32.mrb[8].mxu0  ;;  %v703_v0 = vpop.f32.mrb[8].mxu1 }
 0x176   : > { %1086 = vst [vmem:[%s1777_s18 + $0x20] sm:$0xff] %v614_v62  ;;  %v1149_v1 = vadd.f32 %v1148_v26, %v614_v62  ;;  %v1223_v2 = vmul.f32 %v614_v62, %v614_v62  ;;  %v616_v4 = vpop.f32.mrb[9].mxu0  ;;  %1088 = vst [vmem:[%s1777_s18 + $0x30] sm:$0xff] %v703_v0  ;;  %v705_v5 = vpop.f32.mrb[9].mxu1  ;;  %v1225_v8 = vmul.f32 %v703_v0, %v703_v0 }
 0x177   : > { %v1335_v6 = vadd.f32 %v1334_v59, %v1269_v53  ;;  %v1199_v7 = vadd.f32 %v1198_v61, %v545_v54  ;;  %1087 = vst [vmem:[%s1777_s18 + $0x28] sm:$0xff] %v616_v4  ;;  %v1224_v9 = vmul.f32 %v616_v4, %v616_v4  ;;  %1089 = vst [vmem:[%s1777_s18 + $0x38] sm:$0xff] %v705_v5 }
 0x178   : > { %v1286_v10 = vadd.f32 %v1285_v31, %v1223_v2  ;;  %v1150_v11 = vadd.f32 %v1149_v1, %v616_v4  ;;  %v1226_v21 = vmul.f32 %v705_v5, %v705_v5 }
 0x179   : > { %v1336_v12 = vadd.f32 %v1335_v6, %v1270_v63  ;;  %v620_v3 = vpop.f32.mrb[10].mxu0  ;;  %v709_v13 = vpop.f32.mrb[10].mxu1 }
 0x17a   : > { %v1287_v14 = vadd.f32 %v1286_v10, %v1224_v9  ;;  %1102 = vst [vmem:[%s1777_s18 + $0xa0] sm:$0xff] %v620_v3  ;;  %v1166_v15 = vadd.f32 %v1165_v44, %v620_v3  ;;  %v1239_v16 = vmul.f32 %v620_v3, %v620_v3  ;;  %v1151_v17 = vadd.f32 %v1150_v11, %v703_v0  ;;  %v622_v18 = vpop.f32.mrb[11].mxu0  ;;  %v711_v19 = vpop.f32.mrb[11].mxu1 }
 0x17b   : > { %1104 = vst [vmem:[%s1777_s18 + $0xb0] sm:$0xff] %v709_v13  ;;  %1103 = vst [vmem:[%s1777_s18 + $0xa8] sm:$0xff] %v622_v18  ;;  %v1240_v20 = vmul.f32 %v622_v18, %v622_v18  ;;  %v1241_v22 = vmul.f32 %v709_v13, %v709_v13  ;;  %v1242_v37 = vmul.f32 %v711_v19, %v711_v19 }
 0x17c   : > { %1105 = vst [vmem:[%s1777_s18 + $0xb8] sm:$0xff] %v711_v19  ;;  %v1303_v23 = vadd.f32 %v1302_v46, %v1239_v16  ;;  %v1288_v24 = vadd.f32 %v1287_v14, %v1225_v8  ;;  %v1167_v25 = vadd.f32 %v1166_v15, %v622_v18  ;;  %v1152_v26 = vadd.f32 %v1151_v17, %v705_v5 }
 0x17d   : > { %v626_v27 = vpop.f32.mrb[12].mxu0  ;;  %v715_v28 = vpop.f32.mrb[12].mxu1 }
 0x17e   : > { %v1304_v29 = vadd.f32 %v1303_v23, %v1240_v20  ;;  %v1289_v30 = vadd.f32 %v1288_v24, %v1226_v21  ;;  %1118 = vst [vmem:[%s1777_s18 + $0x120] sm:$0xff] %v626_v27  ;;  %v1183_v31 = vadd.f32 %v1182_v58, %v626_v27  ;;  %v1255_v32 = vmul.f32 %v626_v27, %v626_v27  ;;  %v628_v33 = vpop.f32.mrb[13].mxu0  ;;  %v717_v34 = vpop.f32.mrb[13].mxu1 }
 0x17f   : > { %1120 = vst [vmem:[%s1777_s18 + $0x130] sm:$0xff] %v715_v28  ;;  %v1168_v35 = vadd.f32 %v1167_v25, %v709_v13  ;;  %1119 = vst [vmem:[%s1777_s18 + $0x128] sm:$0xff] %v628_v33  ;;  %v1256_v36 = vmul.f32 %v628_v33, %v628_v33  ;;  %v1257_v41 = vmul.f32 %v715_v28, %v715_v28 }
 0x180   : > { %1121 = vst [vmem:[%s1777_s18 + $0x138] sm:$0xff] %v717_v34  ;;  %v1320_v38 = vadd.f32 %v1319_v60, %v1255_v32  ;;  %v1305_v39 = vadd.f32 %v1304_v29, %v1241_v22  ;;  %v1184_v40 = vadd.f32 %v1183_v31, %v628_v33  ;;  %v1258_v53 = vmul.f32 %v717_v34, %v717_v34 }
 0x181   : > { %v1169_v42 = vadd.f32 %v1168_v35, %v711_v19  ;;  %v632_v43 = vpop.f32.mrb[14].mxu0  ;;  %v721_v44 = vpop.f32.mrb[14].mxu1 }
 0x182   : > { %v1321_v45 = vadd.f32 %v1320_v38, %v1256_v36  ;;  %v1306_v46 = vadd.f32 %v1305_v39, %v1242_v37  ;;  %1134 = vst [vmem:[%s1777_s18 + $0x1a0] sm:$0xff] %v632_v43  ;;  %v1200_v47 = vadd.f32 %v1199_v7, %v632_v43  ;;  %v1271_v48 = vmul.f32 %v632_v43, %v632_v43  ;;  %v634_v49 = vpop.f32.mrb[15].mxu0  ;;  %v723_v50 = vpop.f32.mrb[15].mxu1 }
 0x183   : > { %1136 = vst [vmem:[%s1777_s18 + $0x1b0] sm:$0xff] %v721_v44  ;;  %v1185_v51 = vadd.f32 %v1184_v40, %v715_v28  ;;  %1135 = vst [vmem:[%s1777_s18 + $0x1a8] sm:$0xff] %v634_v49  ;;  %v1272_v52 = vmul.f32 %v634_v49, %v634_v49  ;;  %v1273_v57 = vmul.f32 %v721_v44, %v721_v44 }
 0x184   : > { %1137 = vst [vmem:[%s1777_s18 + $0x1b8] sm:$0xff] %v723_v50  ;;  %v1337_v54 = vadd.f32 %v1336_v12, %v1271_v48  ;;  %v1322_v55 = vadd.f32 %v1321_v45, %v1257_v41  ;;  %v1201_v56 = vadd.f32 %v1200_v47, %v634_v49  ;;  %v1274_v9 = vmul.f32 %v723_v50, %v723_v50 }
 0x185   : > { %v1186_v58 = vadd.f32 %v1185_v51, %v717_v34  ;;  %v792_v59 = vpop.f32.mrb[16].mxu0  ;;  %v881_v60 = vpop.f32.mrb[16].mxu1 }
 0x186   : > { %v1338_v61 = vadd.f32 %v1337_v54, %v1272_v52  ;;  %v1323_v62 = vadd.f32 %v1322_v55, %v1258_v53  ;;  %v1202_v63 = vadd.f32 %v1201_v56, %v721_v44  ;;  %1090 = vst [vmem:[%s1777_s18 + $0x40] sm:$0xff] %v792_v59  ;;  %v1153_v0 = vadd.f32 %v1152_v26, %v792_v59  ;;  %v794_v1 = vpop.f32.mrb[17].mxu0  ;;  %v883_v2 = vpop.f32.mrb[17].mxu1 }
 0x187   : > { %1092 = vst [vmem:[%s1777_s18 + $0x50] sm:$0xff] %v881_v60  ;;  %v1227_v4 = vmul.f32 %v792_v59, %v792_v59  ;;  %1091 = vst [vmem:[%s1777_s18 + $0x48] sm:$0xff] %v794_v1  ;;  %v1228_v5 = vmul.f32 %v794_v1, %v794_v1  ;;  %v1229_v12 = vmul.f32 %v881_v60, %v881_v60 }
 0x188   : > { %1093 = vst [vmem:[%s1777_s18 + $0x58] sm:$0xff] %v883_v2  ;;  %v1339_v6 = vadd.f32 %v1338_v61, %v1273_v57  ;;  %v1203_v7 = vadd.f32 %v1202_v63, %v723_v50  ;;  %v1154_v10 = vadd.f32 %v1153_v0, %v794_v1  ;;  %v1230_v26 = vmul.f32 %v883_v2, %v883_v2 }
 0x189   : > { %v1290_v11 = vadd.f32 %v1289_v30, %v1227_v4  ;;  %v798_v8 = vpop.f32.mrb[18].mxu0  ;;  %v887_v3 = vpop.f32.mrb[18].mxu1 }
 0x18a   : > { %v1340_v13 = vadd.f32 %v1339_v6, %v1274_v9  ;;  %1106 = vst [vmem:[%s1777_s18 + $0xc0] sm:$0xff] %v798_v8  ;;  %v1170_v14 = vadd.f32 %v1169_v42, %v798_v8  ;;  %v1243_v15 = vmul.f32 %v798_v8, %v798_v8  ;;  %v1155_v16 = vadd.f32 %v1154_v10, %v881_v60  ;;  %v800_v17 = vpop.f32.mrb[19].mxu0  ;;  %v889_v18 = vpop.f32.mrb[19].mxu1 }
 0x18b   : > { %1108 = vst [vmem:[%s1777_s18 + $0xd0] sm:$0xff] %v887_v3  ;;  %v1291_v19 = vadd.f32 %v1290_v11, %v1228_v5  ;;  %1107 = vst [vmem:[%s1777_s18 + $0xc8] sm:$0xff] %v800_v17  ;;  %v1244_v20 = vmul.f32 %v800_v17, %v800_v17  ;;  %v1245_v24 = vmul.f32 %v887_v3, %v887_v3 }
 0x18c   : > { %1109 = vst [vmem:[%s1777_s18 + $0xd8] sm:$0xff] %v889_v18  ;;  %v1307_v21 = vadd.f32 %v1306_v46, %v1243_v15  ;;  %v1171_v22 = vadd.f32 %v1170_v14, %v800_v17  ;;  %v1156_v23 = vadd.f32 %v1155_v16, %v883_v2  ;;  %v1246_v37 = vmul.f32 %v889_v18, %v889_v18 }
 0x18d   : > { %v1292_v25 = vadd.f32 %v1291_v19, %v1229_v12  ;;  %v804_v27 = vpop.f32.mrb[20].mxu0  ;;  %v893_v28 = vpop.f32.mrb[20].mxu1 }
 0x18e   : > { %v1308_v29 = vadd.f32 %v1307_v21, %v1244_v20  ;;  %1122 = vst [vmem:[%s1777_s18 + $0x140] sm:$0xff] %v804_v27  ;;  %v1187_v30 = vadd.f32 %v1186_v58, %v804_v27  ;;  %v1259_v31 = vmul.f32 %v804_v27, %v804_v27  ;;  %v1172_v32 = vadd.f32 %v1171_v22, %v887_v3  ;;  %v806_v33 = vpop.f32.mrb[21].mxu0  ;;  %v895_v34 = vpop.f32.mrb[21].mxu1 }
 0x18f   : > { %1124 = vst [vmem:[%s1777_s18 + $0x150] sm:$0xff] %v893_v28  ;;  %v1293_v35 = vadd.f32 %v1292_v25, %v1230_v26  ;;  %1123 = vst [vmem:[%s1777_s18 + $0x148] sm:$0xff] %v806_v33  ;;  %v1260_v36 = vmul.f32 %v806_v33, %v806_v33  ;;  %v1261_v38 = vmul.f32 %v893_v28, %v893_v28 }
 0x190   : > { %1125 = vst [vmem:[%s1777_s18 + $0x158] sm:$0xff] %v895_v34  ;;  %v1324_v39 = vadd.f32 %v1323_v62, %v1259_v31  ;;  %v1309_v40 = vadd.f32 %v1308_v29, %v1245_v24  ;;  %v1188_v41 = vadd.f32 %v1187_v30, %v806_v33  ;;  %v1173_v42 = vadd.f32 %v1172_v32, %v889_v18 }
 0x191   : > { %v810_v43 = vpop.f32.mrb[22].mxu0  ;;  %v899_v44 = vpop.f32.mrb[22].mxu1  ;;  %v1262_v53 = vmul.f32 %v895_v34, %v895_v34 }
 0x192   : > { %v1325_v45 = vadd.f32 %v1324_v39, %v1260_v36  ;;  %v1310_v46 = vadd.f32 %v1309_v40, %v1246_v37  ;;  %1138 = vst [vmem:[%s1777_s18 + $0x1c0] sm:$0xff] %v810_v43  ;;  %v1204_v47 = vadd.f32 %v1203_v7, %v810_v43  ;;  %v1275_v48 = vmul.f32 %v810_v43, %v810_v43  ;;  %v812_v49 = vpop.f32.mrb[23].mxu0  ;;  %v901_v50 = vpop.f32.mrb[23].mxu1 }
 0x193   : > { %1140 = vst [vmem:[%s1777_s18 + $0x1d0] sm:$0xff] %v899_v44  ;;  %v1189_v51 = vadd.f32 %v1188_v41, %v893_v28  ;;  %1139 = vst [vmem:[%s1777_s18 + $0x1c8] sm:$0xff] %v812_v49  ;;  %v1276_v52 = vmul.f32 %v812_v49, %v812_v49  ;;  %v1277_v57 = vmul.f32 %v899_v44, %v899_v44 }
 0x194   : > { %1141 = vst [vmem:[%s1777_s18 + $0x1d8] sm:$0xff] %v901_v50  ;;  %v1341_v54 = vadd.f32 %v1340_v13, %v1275_v48  ;;  %v1326_v55 = vadd.f32 %v1325_v45, %v1261_v38  ;;  %v1205_v56 = vadd.f32 %v1204_v47, %v812_v49  ;;  %v1278_v9 = vmul.f32 %v901_v50, %v901_v50 }
 0x195   : > { %v1190_v58 = vadd.f32 %v1189_v51, %v895_v34  ;;  %v970_v59 = vpop.f32.mrb[24].mxu0  ;;  %v1059_v60 = vpop.f32.mrb[24].mxu1 }
 0x196   : > { %v1342_v61 = vadd.f32 %v1341_v54, %v1276_v52  ;;  %v1327_v62 = vadd.f32 %v1326_v55, %v1262_v53  ;;  %v1206_v63 = vadd.f32 %v1205_v56, %v899_v44  ;;  %1094 = vst [vmem:[%s1777_s18 + $0x60] sm:$0xff] %v970_v59  ;;  %v1157_v0 = vadd.f32 %v1156_v23, %v970_v59  ;;  %v972_v1 = vpop.f32.mrb[25].mxu0  ;;  %v1061_v2 = vpop.f32.mrb[25].mxu1 }
 0x197   : > { %1096 = vst [vmem:[%s1777_s18 + $0x70] sm:$0xff] %v1059_v60  ;;  %v1231_v4 = vmul.f32 %v970_v59, %v970_v59  ;;  %1095 = vst [vmem:[%s1777_s18 + $0x68] sm:$0xff] %v972_v1  ;;  %v1232_v5 = vmul.f32 %v972_v1, %v972_v1  ;;  %v1233_v12 = vmul.f32 %v1059_v60, %v1059_v60 }
 0x198   : > { %1097 = vst [vmem:[%s1777_s18 + $0x78] sm:$0xff] %v1061_v2  ;;  %v1343_v6 = vadd.f32 %v1342_v61, %v1277_v57  ;;  %v1207_v7 = vadd.f32 %v1206_v63, %v901_v50  ;;  %v1158_v10 = vadd.f32 %v1157_v0, %v972_v1  ;;  %v1234_v27 = vmul.f32 %v1061_v2, %v1061_v2 }
 0x199   : > { %v1294_v11 = vadd.f32 %v1293_v35, %v1231_v4  ;;  %v976_v8 = vpop.f32.mrb[26].mxu0  ;;  %v1065_v3 = vpop.f32.mrb[26].mxu1 }
 0x19a   : > { %v1344_v13 = vadd.f32 %v1343_v6, %v1278_v9  ;;  %1110 = vst [vmem:[%s1777_s18 + $0xe0] sm:$0xff] %v976_v8  ;;  %v1174_v14 = vadd.f32 %v1173_v42, %v976_v8  ;;  %v1247_v15 = vmul.f32 %v976_v8, %v976_v8  ;;  %v978_v16 = vpop.f32.mrb[27].mxu0  ;;  %1112 = vst [vmem:[%s1777_s18 + $0xf0] sm:$0xff] %v1065_v3  ;;  %v1067_v17 = vpop.f32.mrb[27].mxu1 }
 0x19b   : > { %1111 = vst [vmem:[%s1777_s18 + $0xe8] sm:$0xff] %v978_v16  ;;  %v1248_v18 = vmul.f32 %v978_v16, %v978_v16  ;;  %1113 = vst [vmem:[%s1777_s18 + $0xf8] sm:$0xff] %v1067_v17  ;;  %v1159_v19 = vadd.f32 %v1158_v10, %v1059_v60  ;;  %v1295_v20 = vadd.f32 %v1294_v11, %v1232_v5 }
 0x19c   : > { %v1311_v21 = vadd.f32 %v1310_v46, %v1247_v15  ;;  %v1175_v22 = vadd.f32 %v1174_v14, %v978_v16  ;;  %v1249_v24 = vmul.f32 %v1065_v3, %v1065_v3  ;;  %v1250_v43 = vmul.f32 %v1067_v17, %v1067_v17 }
 0x19d   : > { %v982_v23 = vpop.f32.mrb[28].mxu0  ;;  %v1160_v25 = vadd.f32 %v1159_v19, %v1061_v2  ;;  %v1071_v26 = vpop.f32.mrb[28].mxu1  ;;  %v1296_v28 = vadd.f32 %v1295_v20, %v1233_v12 }
 0x19e   : > { %1126 = vst [vmem:[%s1777_s18 + $0x160] sm:$0xff] %v982_v23  ;;  %v1191_v29 = vadd.f32 %v1190_v58, %v982_v23  ;;  %v1263_v30 = vmul.f32 %v982_v23, %v982_v23  ;;  %v984_v31 = vpop.f32.mrb[29].mxu0  ;;  %1128 = vst [vmem:[%s1777_s18 + $0x170] sm:$0xff] %v1071_v26  ;;  %v1176_v32 = vadd.f32 %v1175_v22, %v1065_v3  ;;  %v1073_v33 = vpop.f32.mrb[29].mxu1 }
 0x19f   : > { %1161 = vadd.xlane.f32.xlu1 %v1160_v25  ;;  %1127 = vst [vmem:[%s1777_s18 + $0x168] sm:$0xff] %v984_v31  ;;  %v1264_v34 = vmul.f32 %v984_v31, %v984_v31  ;;  %1129 = vst [vmem:[%s1777_s18 + $0x178] sm:$0xff] %v1073_v33  ;;  %v1297_v35 = vadd.f32 %v1296_v28, %v1234_v27  ;;  %v1312_v36 = vadd.f32 %v1311_v21, %v1248_v18 }
 0x1a0   : > { %v1328_v37 = vadd.f32 %v1327_v62, %v1263_v30  ;;  %v1192_v38 = vadd.f32 %v1191_v29, %v984_v31  ;;  %v1177_v39 = vadd.f32 %v1176_v32, %v1067_v17  ;;  %v1265_v41 = vmul.f32 %v1071_v26, %v1071_v26 }
 0x1a1   : > { %v988_v40 = vpop.f32.mrb[30].mxu0  ;;  %v1077_v42 = vpop.f32.mrb[30].mxu1  ;;  %v1313_v44 = vadd.f32 %v1312_v36, %v1249_v24  ;;  %v1266_v52 = vmul.f32 %v1073_v33, %v1073_v33 }
 0x1a2   : > { %1142 = vst [vmem:[%s1777_s18 + $0x1e0] sm:$0xff] %v988_v40  ;;  %v1208_v45 = vadd.f32 %v1207_v7, %v988_v40  ;;  %v1279_v46 = vmul.f32 %v988_v40, %v988_v40  ;;  %v990_v47 = vpop.f32.mrb[31].mxu0  ;;  %1144 = vst [vmem:[%s1777_s18 + $0x1f0] sm:$0xff] %v1077_v42  ;;  %v1193_v48 = vadd.f32 %v1192_v38, %v1071_v26  ;;  %v1079_v49 = vpop.f32.mrb[31].mxu1 }
 0x1a3   : > { %1178 = vadd.xlane.f32.xlu1 %v1177_v39  ;;  %1143 = vst [vmem:[%s1777_s18 + $0x1e8] sm:$0xff] %v990_v47  ;;  %v1280_v50 = vmul.f32 %v990_v47, %v990_v47  ;;  %1145 = vst [vmem:[%s1777_s18 + $0x1f8] sm:$0xff] %v1079_v49  ;;  %v1314_v51 = vadd.f32 %v1313_v44, %v1250_v43  ;;  %v1329_v53 = vadd.f32 %v1328_v37, %v1264_v34 }
 0x1a4   : > { %v1345_v54 = vadd.f32 %v1344_v13, %v1279_v46  ;;  %v1209_v55 = vadd.f32 %v1208_v45, %v990_v47  ;;  %v1281_v56 = vmul.f32 %v1077_v42, %v1077_v42  ;;  %v1194_v57 = vadd.f32 %v1193_v48, %v1073_v33 }
 0x1a5   : > { %v1330_v58 = vadd.f32 %v1329_v53, %v1265_v41  ;;  %v1282_v60 = vmul.f32 %v1079_v49, %v1079_v49 }
 0x1a6   : > { %v1346_v59 = vadd.f32 %v1345_v54, %v1280_v50  ;;  %1195 = vadd.xlane.f32.xlu0 %v1194_v57  ;;  %v1210_v61 = vadd.f32 %v1209_v55, %v1077_v42 }
 0x1a7   : > { %1298 = vadd.xlane.f32.xlu1 %v1297_v35  ;;  %v1331_v62 = vadd.f32 %v1330_v58, %v1266_v52 }
 0x1a8   : > { %v1211_v63 = vadd.f32 %v1210_v61, %v1079_v49  ;;  %v1347_v0 = vadd.f32 %v1346_v59, %v1281_v56 }
 0x1aa   : > { %v1348_v1 = vadd.f32 %v1347_v0, %v1282_v60 }
 0x1ab   : > { %1315 = vadd.xlane.f32.xlu1 %v1314_v51 }
 0x1af   : > { %1332 = vadd.xlane.f32.xlu1 %v1331_v62 }
 0x1b3   : > { %1212 = vadd.xlane.f32.xlu1 %v1211_v63 }
 0x1b7   : > { %1349 = vadd.xlane.f32.xlu1 %v1348_v1 }
 0x22c   : > { %v1162_v2 = vpop.xlane.xlu1 %1161 }
 0x22d   : > { %1215 = vst.msk [vmem:[%s271_s24] sm:$0xff] %vm1214_vm1, %v1162_v2 }
 0x230   : > { %v1179_v4 = vpop.xlane.xlu1 %1178 }
 0x231   : > { %1216 = vst.msk [vmem:[%s271_s24 + $0x8] sm:$0xff] %vm1214_vm1, %v1179_v4 }
 0x233   : > { %v1196_v5 = vpop.xlane.xlu0 %1195 }
 0x234   : > { %v1299_v6 = vpop.xlane.xlu1 %1298  ;;  %1217 = vst.msk [vmem:[%s271_s24 + $0x10] sm:$0xff] %vm1214_vm1, %v1196_v5 }
 0x235   : > { %1351 = vst.msk [vmem:[%s276_s27] sm:$0xff] %vm1214_vm1, %v1299_v6 }
 0x238   : > { %v1316_v7 = vpop.xlane.xlu1 %1315 }
 0x239   : > { %1352 = vst.msk [vmem:[%s276_s27 + $0x8] sm:$0xff] %vm1214_vm1, %v1316_v7 }
 0x23c   : > { %v1333_v9 = vpop.xlane.xlu1 %1332 }
 0x23d   : > { %1353 = vst.msk [vmem:[%s276_s27 + $0x10] sm:$0xff] %vm1214_vm1, %v1333_v9 }
 0x240   : > { %v1213_v10 = vpop.xlane.xlu1 %1212 }
 0x241   : > { %1218 = vst.msk [vmem:[%s271_s24 + $0x18] sm:$0xff] %vm1214_vm1, %v1213_v10 }
 0x244   : > { %v1350_v11 = vpop.xlane.xlu1 %1349 }
 0x245   : > { %1354 = vst.msk [vmem:[%s276_s27 + $0x18] sm:$0xff] %vm1214_vm1, %v1350_v11 }
 0x246 PF: > { %s17_s21 = sadd.s32 1, %s1544_s21  }
 0x247   : > { %p14_p4 = scmp.ge.s32.totalorder %s17_s21, 4  }
 0x249   :  { %16 = sbr.rel (!%p14_p4) target bundleno = 1 (0x1), region = 90 }

// kernel: bottleneck_forward.7
= control target key start
LH: loop header
LB: loop body
LE: loop exit
PB: predicated region body
PF: predicated region fallthrough
CT: control target
= control target key end

     0   :  { %s842_s15 = smov 0   ;;  %s1173_s0 = inlined_call_operand.vmem [shape: f32[2,32,2048], index: 0, kind: input, shape index: {}]   ;;  %s1174_s1 = inlined_call_operand.vmem [shape: f32[2,32,2048], index: 1, kind: input, shape index: {}]   ;;  %s1175_s2 = inlined_call_operand.vmem [shape: f32[32,1], index: 2, kind: input, shape index: {}]   ;;  %s1176_s3 = inlined_call_operand.vmem [shape: f32[32,1], index: 3, kind: input, shape index: {}]   ;;  %s1177_s4 = inlined_call_operand.vmem [shape: f32[2,32,2048], index: 4, kind: output, shape index: {}]  }
   0x1 LB: > { %s781_s16 = sadd.s32 4294967295, %s814_s15   ;;  %p785_p0 = scmp.ge.s32.totalorder %s814_s15, 1  ;;  %s814_s15 = sphi %s842_s15, %s14_s15  }
   0x2   : > { %p172_p1 = scmp.lt.s32.totalorder %s814_s15, 3 }
   0x4   : > { %p173_p2 = pnand %p785_p0, %p172_p1 }
   0x5   : > { %v284_v0 = vld [vmem:[%s1175_s2 + $0x10] sm:$0xff] (!%p173_p2)  ;;  %v282_v1 = vld [vmem:[%s1175_s2] sm:$0xff] (!%p173_p2)  ;;  %v816_v2 = vmov (!%p173_p2), 0   ;;  %v285_v3 = vld [vmem:[%s1175_s2 + $0x18] sm:$0xff] (!%p173_p2)  ;;  %p203_p3 = scmp.lt.s32.totalorder (!%p173_p2), %s781_s16, 1 }
   0x6   : > { %176 = sbr.rel (%p173_p2) target bundleno = 209 (0xd1), region = 36  ;;  %807 = vset.pattern.permute.xlu1 (!%p173_p2), %v816_v2  ;;  %806 = vset.pattern.permute.xlu0 (!%p173_p2), %v816_v2  ;;  %v283_v4 = vld [vmem:[%s1175_s2 + $0x8] sm:$0xff] (!%p173_p2)  ;;  %v370_v6 = vld [vmem:[%s1176_s3] sm:$0xff] (!%p173_p2)  ;;  %v373_v7 = vld [vmem:[%s1176_s3 + $0x18] sm:$0xff] (!%p173_p2) }
   0x7   : > { %298 = vperm.xlu1 (!%p173_p2), %807, %v284_v0   ;;  %288 = vperm.xlu0 (!%p173_p2), %806, %v282_v1   ;;  %v371_v5 = vld [vmem:[%s1176_s3 + $0x8] sm:$0xff] (!%p173_p2)  ;;  %v372_v8 = vld [vmem:[%s1176_s3 + $0x10] sm:$0xff] (!%p173_p2) }
   0xb   : > { %303 = vperm.xlu1 (!%p173_p2), %807, %v285_v3   ;;  %293 = vperm.xlu0 (!%p173_p2), %806, %v283_v4  }
   0xd   : > { %s1179_s16 = smov (!%p203_p3, %s781_s16), 1 }
   0xe   : > { %s874_s7 = sshll.u32 %s1179_s16, 9 }
   0xf   : > { %381 = vperm.xlu1 %807, %v371_v5   ;;  %376 = vperm.xlu0 %806, %v370_v6   ;;  %s880_s10 = scalar_lea.vmem %s1173_s0, %s874_s7  ;;  %s954_s13 = scalar_lea.vmem %s1174_s1, %s874_s7 }
  0x10   : > { %v218_v9 = vld [vmem:[%s880_s10] sm:$0xff]  ;;  %v219_v10 = vld [vmem:[%s880_s10 + $0x8] sm:$0xff]  ;;  %v220_v11 = vld [vmem:[%s880_s10 + $0x10] sm:$0xff]  ;;  %s976_s17 = scalar_lea.vmem %s1177_s4, %s874_s7 }
  0x11   : > { %v221_v12 = vld [vmem:[%s880_s10 + $0x18] sm:$0xff]  ;;  %v222_v13 = vld [vmem:[%s880_s10 + $0x20] sm:$0xff]  ;;  %v223_v14 = vld [vmem:[%s880_s10 + $0x28] sm:$0xff] }
  0x12   : > { %v224_v15 = vld [vmem:[%s880_s10 + $0x30] sm:$0xff]  ;;  %v225_v16 = vld [vmem:[%s880_s10 + $0x38] sm:$0xff]  ;;  %v226_v17 = vld [vmem:[%s880_s10 + $0x40] sm:$0xff] }
  0x13   : > { %391 = vperm.xlu1 %807, %v373_v7   ;;  %386 = vperm.xlu0 %806, %v372_v8   ;;  %v227_v18 = vld [vmem:[%s880_s10 + $0x48] sm:$0xff]  ;;  %v228_v19 = vld [vmem:[%s880_s10 + $0x50] sm:$0xff]  ;;  %v229_v20 = vld [vmem:[%s880_s10 + $0x58] sm:$0xff] }
  0x14   : > { %v230_v21 = vld [vmem:[%s880_s10 + $0x60] sm:$0xff]  ;;  %v231_v22 = vld [vmem:[%s880_s10 + $0x68] sm:$0xff]  ;;  %v232_v25 = vld [vmem:[%s880_s10 + $0x70] sm:$0xff] }
  0x15   : > { %v233_v26 = vld [vmem:[%s880_s10 + $0x78] sm:$0xff]  ;;  %v234_v27 = vld [vmem:[%s880_s10 + $0x80] sm:$0xff]  ;;  %v235_v32 = vld [vmem:[%s880_s10 + $0x88] sm:$0xff] }
  0x16   : > { %v236_v33 = vld [vmem:[%s880_s10 + $0x90] sm:$0xff]  ;;  %v237_v34 = vld [vmem:[%s880_s10 + $0x98] sm:$0xff]  ;;  %v238_v39 = vld [vmem:[%s880_s10 + $0xa0] sm:$0xff] }
  0x17   : > { %v239_v40 = vld [vmem:[%s880_s10 + $0xa8] sm:$0xff]  ;;  %v240_v41 = vld [vmem:[%s880_s10 + $0xb0] sm:$0xff]  ;;  %v241_v46 = vld [vmem:[%s880_s10 + $0xb8] sm:$0xff] }
  0x18   : > { %v242_v47 = vld [vmem:[%s880_s10 + $0xc0] sm:$0xff]  ;;  %v243_v48 = vld [vmem:[%s880_s10 + $0xc8] sm:$0xff]  ;;  %v244_v55 = vld [vmem:[%s880_s10 + $0xd0] sm:$0xff] }
  0x19   : > { %v245_v56 = vld [vmem:[%s880_s10 + $0xd8] sm:$0xff]  ;;  %v246_v57 = vld [vmem:[%s880_s10 + $0xe0] sm:$0xff]  ;;  %v247_v58 = vld [vmem:[%s880_s10 + $0xe8] sm:$0xff] }
  0x1a   : > { %v248_v59 = vld [vmem:[%s880_s10 + $0xf0] sm:$0xff]  ;;  %v249_v60 = vld [vmem:[%s880_s10 + $0xf8] sm:$0xff] }
  0x86   : > { %v896_v23 = vpop.permute.xlu1 %298  ;;  %v289_v24 = vpop.permute.xlu0 %288 }
  0x87   : > { %v901_v28 = vmul.f32 %v289_v24, %v218_v9  ;;  %v903_v29 = vmul.f32 %v289_v24, %v219_v10  ;;  %v905_v30 = vmul.f32 %v289_v24, %v220_v11  ;;  %v907_v31 = vmul.f32 %v289_v24, %v221_v12 }
  0x88   : > { %v912_v35 = vmul.f32 %v289_v24, %v222_v13  ;;  %v914_v36 = vmul.f32 %v289_v24, %v223_v14  ;;  %v916_v37 = vmul.f32 %v289_v24, %v224_v15  ;;  %v918_v38 = vmul.f32 %v289_v24, %v225_v16  ;;  %v474_v14 = vld [vmem:[%s954_s13 + $0x80] sm:$0xff] }
  0x89   : > { %v923_v42 = vmul.f32 %v289_v24, %v226_v17  ;;  %v925_v43 = vmul.f32 %v289_v24, %v227_v18  ;;  %v927_v44 = vmul.f32 %v289_v24, %v228_v19  ;;  %v929_v45 = vmul.f32 %v289_v24, %v229_v20  ;;  %v475_v19 = vld [vmem:[%s954_s13 + $0x88] sm:$0xff]  ;;  %v476_v20 = vld [vmem:[%s954_s13 + $0x90] sm:$0xff] }
  0x8a   : > { %v934_v49 = vmul.f32 %v289_v24, %v230_v21  ;;  %v936_v50 = vmul.f32 %v289_v24, %v231_v22  ;;  %v938_v51 = vmul.f32 %v289_v24, %v232_v25  ;;  %v940_v52 = vmul.f32 %v289_v24, %v233_v26  ;;  %v942_v53 = vpop.permute.xlu1 %303  ;;  %v294_v54 = vpop.permute.xlu0 %293  ;;  %v477_v21 = vld [vmem:[%s954_s13 + $0x98] sm:$0xff] }
  0x8b   : > { %v322_v61 = vmul.f32 %v294_v54, %v234_v27  ;;  %v323_v62 = vmul.f32 %v294_v54, %v235_v32  ;;  %v324_v63 = vmul.f32 %v294_v54, %v236_v33  ;;  %v325_v0 = vmul.f32 %v294_v54, %v237_v34  ;;  %v478_v27 = vld [vmem:[%s954_s13 + $0xa0] sm:$0xff]  ;;  %v479_v32 = vld [vmem:[%s954_s13 + $0xa8] sm:$0xff]  ;;  %v480_v33 = vld [vmem:[%s954_s13 + $0xb0] sm:$0xff] }
  0x8c   : > { %v326_v1 = vmul.f32 %v294_v54, %v238_v39  ;;  %v327_v2 = vmul.f32 %v294_v54, %v239_v40  ;;  %v328_v3 = vmul.f32 %v294_v54, %v240_v41  ;;  %v329_v4 = vmul.f32 %v294_v54, %v241_v46  ;;  %v481_v46 = vld [vmem:[%s954_s13 + $0xb8] sm:$0xff] }
  0x8d   : > { %v330_v5 = vmul.f32 %v294_v54, %v242_v47  ;;  %v331_v6 = vmul.f32 %v294_v54, %v243_v48  ;;  %v332_v7 = vmul.f32 %v294_v54, %v244_v55  ;;  %v333_v8 = vmul.f32 %v294_v54, %v245_v56  ;;  %v482_v47 = vld [vmem:[%s954_s13 + $0xc0] sm:$0xff]  ;;  %v483_v48 = vld [vmem:[%s954_s13 + $0xc8] sm:$0xff] }
  0x8e   : > { %v334_v9 = vmul.f32 %v294_v54, %v246_v57  ;;  %v335_v10 = vmul.f32 %v294_v54, %v247_v58  ;;  %v336_v11 = vmul.f32 %v294_v54, %v248_v59  ;;  %v337_v12 = vmul.f32 %v294_v54, %v249_v60  ;;  %v382_v13 = vpop.permute.xlu1 %381  ;;  %v484_v58 = vld [vmem:[%s954_s13 + $0xd0] sm:$0xff]  ;;  %v485_v59 = vld [vmem:[%s954_s13 + $0xd8] sm:$0xff]  ;;  %v486_v60 = vld [vmem:[%s954_s13 + $0xe0] sm:$0xff] }
  0x8f   : > { %v410_v15 = vadd.f32 %v382_v13, %v322_v61  ;;  %v411_v16 = vadd.f32 %v382_v13, %v323_v62  ;;  %v412_v17 = vadd.f32 %v382_v13, %v324_v63  ;;  %v413_v18 = vadd.f32 %v382_v13, %v325_v0  ;;  %v487_v61 = vld [vmem:[%s954_s13 + $0xe8] sm:$0xff]  ;;  %v488_v62 = vld [vmem:[%s954_s13 + $0xf0] sm:$0xff]  ;;  %v489_v63 = vld [vmem:[%s954_s13 + $0xf8] sm:$0xff] }
  0x90   : > { %v414_v22 = vadd.f32 %v382_v13, %v326_v1  ;;  %v415_v24 = vadd.f32 %v382_v13, %v327_v2  ;;  %v416_v25 = vadd.f32 %v382_v13, %v328_v3  ;;  %v417_v26 = vadd.f32 %v382_v13, %v329_v4 }
  0x91   : > { %v418_v34 = vadd.f32 %v382_v13, %v330_v5  ;;  %v419_v39 = vadd.f32 %v382_v13, %v331_v6  ;;  %v420_v40 = vadd.f32 %v382_v13, %v332_v7  ;;  %v421_v41 = vadd.f32 %v382_v13, %v333_v8 }
  0x92   : > { %v422_v54 = vadd.f32 %v382_v13, %v334_v9  ;;  %v423_v55 = vadd.f32 %v382_v13, %v335_v10  ;;  %v424_v56 = vadd.f32 %v382_v13, %v336_v11  ;;  %v425_v57 = vadd.f32 %v382_v13, %v337_v12 }
  0x93   : > { %v538_v0 = vadd.f32 %v474_v14, %v410_v15  ;;  %v539_v1 = vadd.f32 %v475_v19, %v411_v16  ;;  %v540_v2 = vadd.f32 %v476_v20, %v412_v17  ;;  %v541_v3 = vadd.f32 %v477_v21, %v413_v18 }
  0x94   : > { %v542_v4 = vadd.f32 %v478_v27, %v414_v22  ;;  %v543_v5 = vadd.f32 %v479_v32, %v415_v24  ;;  %v544_v6 = vadd.f32 %v480_v33, %v416_v25  ;;  %v545_v7 = vadd.f32 %v481_v46, %v417_v26  ;;  %v377_v25 = vpop.permute.xlu0 %376  ;;  %v458_v46 = vld [vmem:[%s954_s13] sm:$0xff] }
  0x95   : > { %v546_v8 = vadd.f32 %v482_v47, %v418_v34  ;;  %v547_v9 = vadd.f32 %v483_v48, %v419_v39  ;;  %v548_v10 = vadd.f32 %v484_v58, %v420_v40  ;;  %v549_v11 = vadd.f32 %v485_v59, %v421_v41  ;;  %v461_v58 = vld [vmem:[%s954_s13 + $0x18] sm:$0xff] }
  0x96   : > { %v550_v12 = vadd.f32 %v486_v60, %v422_v54  ;;  %v551_v13 = vadd.f32 %v487_v61, %v423_v55  ;;  %v552_v14 = vadd.f32 %v488_v62, %v424_v56  ;;  %v553_v15 = vadd.f32 %v489_v63, %v425_v57  ;;  %v459_v56 = vld [vmem:[%s954_s13 + $0x8] sm:$0xff]  ;;  %v460_v57 = vld [vmem:[%s954_s13 + $0x10] sm:$0xff] }
  0x97   : > { %v602_v16 = vmax.f32 %v538_v0, 0.0  ;;  %v603_v17 = vmax.f32 %v539_v1, 0.0  ;;  %v604_v18 = vmax.f32 %v540_v2, 0.0  ;;  %v605_v19 = vmax.f32 %v541_v3, 0.0  ;;  %v463_v60 = vld [vmem:[%s954_s13 + $0x28] sm:$0xff]  ;;  %v464_v61 = vld [vmem:[%s954_s13 + $0x30] sm:$0xff] }
  0x98   : > { %v606_v20 = vmax.f32 %v542_v4, 0.0  ;;  %v607_v21 = vmax.f32 %v543_v5, 0.0  ;;  %v608_v22 = vmax.f32 %v544_v6, 0.0  ;;  %v609_v24 = vmax.f32 %v545_v7, 0.0  ;;  %v466_v0 = vld [vmem:[%s954_s13 + $0x40] sm:$0xff]  ;;  %v467_v1 = vld [vmem:[%s954_s13 + $0x48] sm:$0xff] }
  0x99   : > { %v610_v26 = vmax.f32 %v546_v8, 0.0  ;;  %v611_v27 = vmax.f32 %v547_v9, 0.0  ;;  %v612_v32 = vmax.f32 %v548_v10, 0.0  ;;  %v613_v33 = vmax.f32 %v549_v11, 0.0  ;;  %666 = vst [vmem:[%s976_s17 + $0x80] sm:$0xff] %v602_v16  ;;  %667 = vst [vmem:[%s976_s17 + $0x88] sm:$0xff] %v603_v17 }
  0x9a   : > { %668 = vst [vmem:[%s976_s17 + $0x90] sm:$0xff] %v604_v18  ;;  %669 = vst [vmem:[%s976_s17 + $0x98] sm:$0xff] %v605_v19  ;;  %v614_v34 = vmax.f32 %v550_v12, 0.0  ;;  %v615_v39 = vmax.f32 %v551_v13, 0.0  ;;  %v616_v40 = vmax.f32 %v552_v14, 0.0  ;;  %v617_v41 = vmax.f32 %v553_v15, 0.0 }
  0x9b   : > { %670 = vst [vmem:[%s976_s17 + $0xa0] sm:$0xff] %v606_v20  ;;  %671 = vst [vmem:[%s976_s17 + $0xa8] sm:$0xff] %v607_v21  ;;  %v394_v47 = vadd.f32 %v377_v25, %v901_v28  ;;  %v395_v48 = vadd.f32 %v377_v25, %v903_v29  ;;  %v396_v54 = vadd.f32 %v377_v25, %v905_v30  ;;  %v468_v5 = vld [vmem:[%s954_s13 + $0x50] sm:$0xff]  ;;  %v470_v6 = vld [vmem:[%s954_s13 + $0x60] sm:$0xff] }
  0x9c   : > { %672 = vst [vmem:[%s976_s17 + $0xb0] sm:$0xff] %v608_v22  ;;  %673 = vst [vmem:[%s976_s17 + $0xb8] sm:$0xff] %v609_v24  ;;  %v397_v55 = vadd.f32 %v377_v25, %v907_v31  ;;  %v398_v28 = vadd.f32 %v377_v25, %v912_v35  ;;  %v399_v59 = vadd.f32 %v377_v25, %v914_v36  ;;  %v462_v31 = vld [vmem:[%s954_s13 + $0x20] sm:$0xff]  ;;  %v471_v7 = vld [vmem:[%s954_s13 + $0x68] sm:$0xff] }
  0x9d   : > { %674 = vst [vmem:[%s976_s17 + $0xc0] sm:$0xff] %v610_v26  ;;  %675 = vst [vmem:[%s976_s17 + $0xc8] sm:$0xff] %v611_v27  ;;  %v400_v29 = vadd.f32 %v377_v25, %v916_v37  ;;  %v401_v30 = vadd.f32 %v377_v25, %v918_v38  ;;  %v402_v62 = vadd.f32 %v377_v25, %v923_v42  ;;  %v465_v37 = vld [vmem:[%s954_s13 + $0x38] sm:$0xff]  ;;  %v266_v19 = vld [vmem:[%s880_s10 + $0x180] sm:$0xff] }
  0x9e   : > { %676 = vst [vmem:[%s976_s17 + $0xd0] sm:$0xff] %v612_v32  ;;  %677 = vst [vmem:[%s976_s17 + $0xd8] sm:$0xff] %v613_v33  ;;  %v403_v63 = vadd.f32 %v377_v25, %v925_v43  ;;  %v404_v35 = vadd.f32 %v377_v25, %v927_v44  ;;  %v405_v36 = vadd.f32 %v377_v25, %v929_v45  ;;  %v469_v42 = vld [vmem:[%s954_s13 + $0x58] sm:$0xff]  ;;  %v472_v43 = vld [vmem:[%s954_s13 + $0x70] sm:$0xff] }
  0x9f   : > { %678 = vst [vmem:[%s976_s17 + $0xe0] sm:$0xff] %v614_v34  ;;  %679 = vst [vmem:[%s976_s17 + $0xe8] sm:$0xff] %v615_v39  ;;  %v406_v38 = vadd.f32 %v377_v25, %v934_v49  ;;  %v407_v2 = vadd.f32 %v377_v25, %v936_v50  ;;  %v408_v3 = vadd.f32 %v377_v25, %v938_v51  ;;  %v473_v8 = vld [vmem:[%s954_s13 + $0x78] sm:$0xff]  ;;  %v267_v20 = vld [vmem:[%s880_s10 + $0x188] sm:$0xff] }
  0xa0   : > { %680 = vst [vmem:[%s976_s17 + $0xf0] sm:$0xff] %v616_v40  ;;  %681 = vst [vmem:[%s976_s17 + $0xf8] sm:$0xff] %v617_v41  ;;  %v409_v4 = vadd.f32 %v377_v25, %v940_v52  ;;  %v522_v44 = vadd.f32 %v458_v46, %v394_v47  ;;  %v523_v45 = vadd.f32 %v459_v56, %v395_v48  ;;  %v268_v21 = vld [vmem:[%s880_s10 + $0x190] sm:$0xff]  ;;  %v269_v22 = vld [vmem:[%s880_s10 + $0x198] sm:$0xff] }
  0xa1   : > { %v524_v9 = vadd.f32 %v460_v57, %v396_v54  ;;  %v525_v10 = vadd.f32 %v461_v58, %v397_v55  ;;  %v526_v49 = vadd.f32 %v462_v31, %v398_v28  ;;  %v527_v50 = vadd.f32 %v463_v60, %v399_v59  ;;  %v270_v32 = vld [vmem:[%s880_s10 + $0x1a0] sm:$0xff]  ;;  %v271_v33 = vld [vmem:[%s880_s10 + $0x1a8] sm:$0xff]  ;;  %v272_v34 = vld [vmem:[%s880_s10 + $0x1b0] sm:$0xff] }
  0xa2   : > { %v528_v11 = vadd.f32 %v464_v61, %v400_v29  ;;  %v529_v51 = vadd.f32 %v465_v37, %v401_v30  ;;  %v530_v12 = vadd.f32 %v466_v0, %v402_v62  ;;  %v531_v52 = vadd.f32 %v467_v1, %v403_v63  ;;  %v273_v47 = vld [vmem:[%s880_s10 + $0x1b8] sm:$0xff]  ;;  %v274_v48 = vld [vmem:[%s880_s10 + $0x1c0] sm:$0xff]  ;;  %v275_v58 = vld [vmem:[%s880_s10 + $0x1c8] sm:$0xff] }
  0xa3   : > { %v532_v13 = vadd.f32 %v468_v5, %v404_v35  ;;  %v533_v14 = vadd.f32 %v469_v42, %v405_v36  ;;  %v534_v15 = vadd.f32 %v470_v6, %v406_v38  ;;  %v535_v16 = vadd.f32 %v471_v7, %v407_v2  ;;  %v276_v28 = vld [vmem:[%s880_s10 + $0x1d0] sm:$0xff]  ;;  %v277_v60 = vld [vmem:[%s880_s10 + $0x1d8] sm:$0xff]  ;;  %v278_v61 = vld [vmem:[%s880_s10 + $0x1e0] sm:$0xff]  ;;  %v392_v38 = vpop.permute.xlu1 %391 }
  0xa4   : > { %v536_v17 = vadd.f32 %v472_v43, %v408_v3  ;;  %v537_v18 = vadd.f32 %v473_v8, %v409_v4  ;;  %v586_v24 = vmax.f32 %v522_v44, 0.0  ;;  %v587_v25 = vmax.f32 %v523_v45, 0.0  ;;  %v279_v62 = vld [vmem:[%s880_s10 + $0x1e8] sm:$0xff]  ;;  %v280_v63 = vld [vmem:[%s880_s10 + $0x1f0] sm:$0xff]  ;;  %v281_v35 = vld [vmem:[%s880_s10 + $0x1f8] sm:$0xff] }
  0xa5   : > { %v588_v26 = vmax.f32 %v524_v9, 0.0  ;;  %v589_v27 = vmax.f32 %v525_v10, 0.0  ;;  %v590_v39 = vmax.f32 %v526_v49, 0.0  ;;  %v591_v40 = vmax.f32 %v527_v50, 0.0  ;;  %v506_v10 = vld [vmem:[%s954_s13 + $0x180] sm:$0xff] }
  0xa6   : > { %v592_v41 = vmax.f32 %v528_v11, 0.0  ;;  %v593_v46 = vmax.f32 %v529_v51, 0.0  ;;  %v594_v54 = vmax.f32 %v530_v12, 0.0  ;;  %v595_v55 = vmax.f32 %v531_v52, 0.0  ;;  %650 = vst [vmem:[%s976_s17] sm:$0xff] %v586_v24  ;;  %651 = vst [vmem:[%s976_s17 + $0x8] sm:$0xff] %v587_v25  ;;  %v507_v12 = vld [vmem:[%s954_s13 + $0x188] sm:$0xff] }
  0xa7   : > { %v596_v56 = vmax.f32 %v532_v13, 0.0  ;;  %v597_v57 = vmax.f32 %v533_v14, 0.0  ;;  %652 = vst [vmem:[%s976_s17 + $0x10] sm:$0xff] %v588_v26  ;;  %653 = vst [vmem:[%s976_s17 + $0x18] sm:$0xff] %v589_v27  ;;  %v598_v59 = vmax.f32 %v534_v15, 0.0  ;;  %v599_v29 = vmax.f32 %v535_v16, 0.0 }
  0xa8   : > { %v600_v30 = vmax.f32 %v536_v17, 0.0  ;;  %v601_v31 = vmax.f32 %v537_v18, 0.0  ;;  %654 = vst [vmem:[%s976_s17 + $0x20] sm:$0xff] %v590_v39  ;;  %655 = vst [vmem:[%s976_s17 + $0x28] sm:$0xff] %v591_v40  ;;  %v354_v36 = vmul.f32 %v942_v53, %v266_v19  ;;  %v355_v37 = vmul.f32 %v942_v53, %v267_v20  ;;  %v508_v52 = vld [vmem:[%s954_s13 + $0x190] sm:$0xff]  ;;  %v509_v13 = vld [vmem:[%s954_s13 + $0x198] sm:$0xff] }
  0xa9   : > { %656 = vst [vmem:[%s976_s17 + $0x30] sm:$0xff] %v592_v41  ;;  %657 = vst [vmem:[%s976_s17 + $0x38] sm:$0xff] %v593_v46  ;;  %v356_v0 = vmul.f32 %v942_v53, %v268_v21  ;;  %v357_v1 = vmul.f32 %v942_v53, %v269_v22  ;;  %v358_v2 = vmul.f32 %v942_v53, %v270_v32  ;;  %v510_v18 = vld [vmem:[%s954_s13 + $0x1a0] sm:$0xff]  ;;  %v512_v19 = vld [vmem:[%s954_s13 + $0x1b0] sm:$0xff] }
  0xaa   : > { %658 = vst [vmem:[%s976_s17 + $0x40] sm:$0xff] %v594_v54  ;;  %659 = vst [vmem:[%s976_s17 + $0x48] sm:$0xff] %v595_v55  ;;  %v359_v3 = vmul.f32 %v942_v53, %v271_v33  ;;  %v360_v4 = vmul.f32 %v942_v53, %v272_v34  ;;  %v361_v5 = vmul.f32 %v942_v53, %v273_v47  ;;  %v513_v25 = vld [vmem:[%s954_s13 + $0x1b8] sm:$0xff]  ;;  %v514_v26 = vld [vmem:[%s954_s13 + $0x1c0] sm:$0xff] }
  0xab   : > { %660 = vst [vmem:[%s976_s17 + $0x50] sm:$0xff] %v596_v56  ;;  %661 = vst [vmem:[%s976_s17 + $0x58] sm:$0xff] %v597_v57  ;;  %v362_v42 = vmul.f32 %v942_v53, %v274_v48  ;;  %v363_v6 = vmul.f32 %v942_v53, %v275_v58  ;;  %v364_v7 = vmul.f32 %v942_v53, %v276_v28  ;;  %v515_v27 = vld [vmem:[%s954_s13 + $0x1c8] sm:$0xff]  ;;  %v516_v40 = vld [vmem:[%s954_s13 + $0x1d0] sm:$0xff] }
  0xac   : > { %662 = vst [vmem:[%s976_s17 + $0x60] sm:$0xff] %v598_v59  ;;  %663 = vst [vmem:[%s976_s17 + $0x68] sm:$0xff] %v599_v29  ;;  %v365_v43 = vmul.f32 %v942_v53, %v277_v60  ;;  %v366_v8 = vmul.f32 %v942_v53, %v278_v61  ;;  %v367_v44 = vmul.f32 %v942_v53, %v279_v62  ;;  %v517_v41 = vld [vmem:[%s954_s13 + $0x1d8] sm:$0xff]  ;;  %v518_v46 = vld [vmem:[%s954_s13 + $0x1e0] sm:$0xff] }
  0xad   : > { %664 = vst [vmem:[%s976_s17 + $0x70] sm:$0xff] %v600_v30  ;;  %665 = vst [vmem:[%s976_s17 + $0x78] sm:$0xff] %v601_v31  ;;  %v368_v45 = vmul.f32 %v942_v53, %v280_v63  ;;  %v369_v9 = vmul.f32 %v942_v53, %v281_v35  ;;  %v442_v49 = vadd.f32 %v392_v38, %v354_v36  ;;  %v511_v53 = vld [vmem:[%s954_s13 + $0x1a8] sm:$0xff]  ;;  %v520_v48 = vld [vmem:[%s954_s13 + $0x1f0] sm:$0xff] }
  0xae   : > { %v443_v50 = vadd.f32 %v392_v38, %v355_v37  ;;  %v444_v11 = vadd.f32 %v392_v38, %v356_v0  ;;  %v445_v51 = vadd.f32 %v392_v38, %v357_v1  ;;  %v446_v14 = vadd.f32 %v392_v38, %v358_v2  ;;  %v519_v47 = vld [vmem:[%s954_s13 + $0x1e8] sm:$0xff]  ;;  %v521_v54 = vld [vmem:[%s954_s13 + $0x1f8] sm:$0xff]  ;;  %v250_v0 = vld [vmem:[%s880_s10 + $0x100] sm:$0xff] }
  0xaf   : > { %v447_v15 = vadd.f32 %v392_v38, %v359_v3  ;;  %v448_v16 = vadd.f32 %v392_v38, %v360_v4  ;;  %v449_v17 = vadd.f32 %v392_v38, %v361_v5  ;;  %v450_v20 = vadd.f32 %v392_v38, %v362_v42  ;;  %v251_v1 = vld [vmem:[%s880_s10 + $0x108] sm:$0xff]  ;;  %v253_v2 = vld [vmem:[%s880_s10 + $0x118] sm:$0xff] }
  0xb0   : > { %v451_v21 = vadd.f32 %v392_v38, %v363_v6  ;;  %v452_v22 = vadd.f32 %v392_v38, %v364_v7  ;;  %v453_v24 = vadd.f32 %v392_v38, %v365_v43  ;;  %v454_v32 = vadd.f32 %v392_v38, %v366_v8  ;;  %v254_v6 = vld [vmem:[%s880_s10 + $0x120] sm:$0xff]  ;;  %v255_v7 = vld [vmem:[%s880_s10 + $0x128] sm:$0xff]  ;;  %v256_v43 = vld [vmem:[%s880_s10 + $0x130] sm:$0xff] }
  0xb1   : > { %v455_v33 = vadd.f32 %v392_v38, %v367_v44  ;;  %v456_v34 = vadd.f32 %v392_v38, %v368_v45  ;;  %v457_v39 = vadd.f32 %v392_v38, %v369_v9  ;;  %v570_v55 = vadd.f32 %v506_v10, %v442_v49  ;;  %v252_v38 = vld [vmem:[%s880_s10 + $0x110] sm:$0xff]  ;;  %v257_v10 = vld [vmem:[%s880_s10 + $0x138] sm:$0xff]  ;;  %v258_v49 = vld [vmem:[%s880_s10 + $0x140] sm:$0xff] }
  0xb2   : > { %v571_v56 = vadd.f32 %v507_v12, %v443_v50  ;;  %v572_v57 = vadd.f32 %v508_v52, %v444_v11  ;;  %v573_v58 = vadd.f32 %v509_v13, %v445_v51  ;;  %v574_v28 = vadd.f32 %v510_v18, %v446_v14  ;;  %v259_v52 = vld [vmem:[%s880_s10 + $0x148] sm:$0xff]  ;;  %v260_v13 = vld [vmem:[%s880_s10 + $0x150] sm:$0xff]  ;;  %v261_v18 = vld [vmem:[%s880_s10 + $0x158] sm:$0xff] }
  0xb3   : > { %v575_v59 = vadd.f32 %v511_v53, %v447_v15  ;;  %v576_v29 = vadd.f32 %v512_v19, %v448_v16  ;;  %v577_v30 = vadd.f32 %v513_v25, %v449_v17  ;;  %v578_v31 = vadd.f32 %v514_v26, %v450_v20  ;;  %v262_v53 = vld [vmem:[%s880_s10 + $0x160] sm:$0xff]  ;;  %v263_v19 = vld [vmem:[%s880_s10 + $0x168] sm:$0xff]  ;;  %v264_v20 = vld [vmem:[%s880_s10 + $0x170] sm:$0xff] }
  0xb4   : > { %v579_v60 = vadd.f32 %v515_v27, %v451_v21  ;;  %v580_v61 = vadd.f32 %v516_v40, %v452_v22  ;;  %v581_v62 = vadd.f32 %v517_v41, %v453_v24  ;;  %v582_v63 = vadd.f32 %v518_v46, %v454_v32  ;;  %v265_v21 = vld [vmem:[%s880_s10 + $0x178] sm:$0xff]  ;;  %v387_v27 = vpop.permute.xlu0 %386 }
  0xb5   : > { %v583_v35 = vadd.f32 %v519_v47, %v455_v33  ;;  %v584_v36 = vadd.f32 %v520_v48, %v456_v34  ;;  %v585_v37 = vadd.f32 %v521_v54, %v457_v39  ;;  %v634_v3 = vmax.f32 %v570_v55, 0.0 }
  0xb6   : > { %v635_v4 = vmax.f32 %v571_v56, 0.0  ;;  %v636_v5 = vmax.f32 %v572_v57, 0.0  ;;  %v637_v42 = vmax.f32 %v573_v58, 0.0  ;;  %v638_v8 = vmax.f32 %v574_v28, 0.0  ;;  %v490_v57 = vld [vmem:[%s954_s13 + $0x100] sm:$0xff] }
  0xb7   : > { %v639_v44 = vmax.f32 %v575_v59, 0.0  ;;  %v640_v45 = vmax.f32 %v576_v29, 0.0  ;;  %v641_v9 = vmax.f32 %v577_v30, 0.0  ;;  %v642_v50 = vmax.f32 %v578_v31, 0.0  ;;  %698 = vst [vmem:[%s976_s17 + $0x180] sm:$0xff] %v634_v3  ;;  %v491_v30 = vld [vmem:[%s954_s13 + $0x108] sm:$0xff] }
  0xb8   : > { %v643_v11 = vmax.f32 %v579_v60, 0.0  ;;  %v644_v51 = vmax.f32 %v580_v61, 0.0  ;;  %v645_v12 = vmax.f32 %v581_v62, 0.0  ;;  %699 = vst [vmem:[%s976_s17 + $0x188] sm:$0xff] %v635_v4  ;;  %700 = vst [vmem:[%s976_s17 + $0x190] sm:$0xff] %v636_v5  ;;  %v646_v14 = vmax.f32 %v582_v63, 0.0 }
  0xb9   : > { %701 = vst [vmem:[%s976_s17 + $0x198] sm:$0xff] %v637_v42  ;;  %v647_v15 = vmax.f32 %v583_v35, 0.0  ;;  %v648_v16 = vmax.f32 %v584_v36, 0.0  ;;  %v649_v17 = vmax.f32 %v585_v37, 0.0  ;;  %702 = vst [vmem:[%s976_s17 + $0x1a0] sm:$0xff] %v638_v8  ;;  %v338_v22 = vmul.f32 %v896_v23, %v250_v0  ;;  %v492_v31 = vld [vmem:[%s954_s13 + $0x110] sm:$0xff] }
  0xba   : > { %703 = vst [vmem:[%s976_s17 + $0x1a8] sm:$0xff] %v639_v44  ;;  %704 = vst [vmem:[%s976_s17 + $0x1b0] sm:$0xff] %v640_v45  ;;  %v339_v24 = vmul.f32 %v896_v23, %v251_v1  ;;  %v340_v25 = vmul.f32 %v896_v23, %v252_v38  ;;  %v341_v26 = vmul.f32 %v896_v23, %v253_v2  ;;  %v493_v60 = vld [vmem:[%s954_s13 + $0x118] sm:$0xff]  ;;  %v494_v36 = vld [vmem:[%s954_s13 + $0x120] sm:$0xff] }
  0xbb   : > { %705 = vst [vmem:[%s976_s17 + $0x1b8] sm:$0xff] %v641_v9  ;;  %706 = vst [vmem:[%s976_s17 + $0x1c0] sm:$0xff] %v642_v50  ;;  %v342_v32 = vmul.f32 %v896_v23, %v254_v6  ;;  %v343_v33 = vmul.f32 %v896_v23, %v255_v7  ;;  %v344_v34 = vmul.f32 %v896_v23, %v256_v43  ;;  %v496_v37 = vld [vmem:[%s954_s13 + $0x130] sm:$0xff]  ;;  %v497_v3 = vld [vmem:[%s954_s13 + $0x138] sm:$0xff] }
  0xbc   : > { %707 = vst [vmem:[%s976_s17 + $0x1c8] sm:$0xff] %v643_v11  ;;  %708 = vst [vmem:[%s976_s17 + $0x1d0] sm:$0xff] %v644_v51  ;;  %v345_v39 = vmul.f32 %v896_v23, %v257_v10  ;;  %v346_v40 = vmul.f32 %v896_v23, %v258_v49  ;;  %v347_v41 = vmul.f32 %v896_v23, %v259_v52  ;;  %v498_v4 = vld [vmem:[%s954_s13 + $0x140] sm:$0xff]  ;;  %v499_v5 = vld [vmem:[%s954_s13 + $0x148] sm:$0xff] }
  0xbd   : > { %709 = vst [vmem:[%s976_s17 + $0x1d8] sm:$0xff] %v645_v12  ;;  %710 = vst [vmem:[%s976_s17 + $0x1e0] sm:$0xff] %v646_v14  ;;  %v348_v46 = vmul.f32 %v896_v23, %v260_v13  ;;  %v349_v47 = vmul.f32 %v896_v23, %v261_v18  ;;  %v350_v48 = vmul.f32 %v896_v23, %v262_v53  ;;  %v500_v8 = vld [vmem:[%s954_s13 + $0x150] sm:$0xff]  ;;  %v501_v44 = vld [vmem:[%s954_s13 + $0x158] sm:$0xff] }
  0xbe   : > { %711 = vst [vmem:[%s976_s17 + $0x1e8] sm:$0xff] %v647_v15  ;;  %712 = vst [vmem:[%s976_s17 + $0x1f0] sm:$0xff] %v648_v16  ;;  %v351_v54 = vmul.f32 %v896_v23, %v263_v19  ;;  %v352_v55 = vmul.f32 %v896_v23, %v264_v20  ;;  %v353_v56 = vmul.f32 %v896_v23, %v265_v21  ;;  %v495_v23 = vld [vmem:[%s954_s13 + $0x128] sm:$0xff]  ;;  %v502_v45 = vld [vmem:[%s954_s13 + $0x160] sm:$0xff] }
  0xbf   : > { %713 = vst [vmem:[%s976_s17 + $0x1f8] sm:$0xff] %v649_v17  ;;  %v426_v58 = vadd.f32 %v387_v27, %v338_v22  ;;  %v427_v28 = vadd.f32 %v387_v27, %v339_v24  ;;  %v428_v59 = vadd.f32 %v387_v27, %v340_v25  ;;  %v429_v29 = vadd.f32 %v387_v27, %v341_v26  ;;  %v503_v9 = vld [vmem:[%s954_s13 + $0x168] sm:$0xff]  ;;  %v504_v10 = vld [vmem:[%s954_s13 + $0x170] sm:$0xff]  ;;  %v505_v49 = vld [vmem:[%s954_s13 + $0x178] sm:$0xff] }
  0xc0   : > { %v430_v61 = vadd.f32 %v387_v27, %v342_v32  ;;  %v431_v62 = vadd.f32 %v387_v27, %v343_v33  ;;  %v432_v63 = vadd.f32 %v387_v27, %v344_v34  ;;  %v433_v35 = vadd.f32 %v387_v27, %v345_v39 }
  0xc1   : > { %v434_v0 = vadd.f32 %v387_v27, %v346_v40  ;;  %v435_v1 = vadd.f32 %v387_v27, %v347_v41  ;;  %v436_v38 = vadd.f32 %v387_v27, %v348_v46  ;;  %v437_v2 = vadd.f32 %v387_v27, %v349_v47 }
  0xc2   : > { %v438_v42 = vadd.f32 %v387_v27, %v350_v48  ;;  %v439_v6 = vadd.f32 %v387_v27, %v351_v54  ;;  %v440_v7 = vadd.f32 %v387_v27, %v352_v55  ;;  %v441_v43 = vadd.f32 %v387_v27, %v353_v56 }
  0xc3   : > { %v554_v50 = vadd.f32 %v490_v57, %v426_v58  ;;  %v555_v11 = vadd.f32 %v491_v30, %v427_v28  ;;  %v556_v51 = vadd.f32 %v492_v31, %v428_v59  ;;  %v557_v12 = vadd.f32 %v493_v60, %v429_v29 }
  0xc4   : > { %v558_v52 = vadd.f32 %v494_v36, %v430_v61  ;;  %v559_v13 = vadd.f32 %v495_v23, %v431_v62  ;;  %v560_v14 = vadd.f32 %v496_v37, %v432_v63  ;;  %v561_v15 = vadd.f32 %v497_v3, %v433_v35 }
  0xc5   : > { %v562_v16 = vadd.f32 %v498_v4, %v434_v0  ;;  %v563_v17 = vadd.f32 %v499_v5, %v435_v1  ;;  %v564_v18 = vadd.f32 %v500_v8, %v436_v38  ;;  %v565_v53 = vadd.f32 %v501_v44, %v437_v2 }
  0xc6   : > { %v566_v19 = vadd.f32 %v502_v45, %v438_v42  ;;  %v567_v20 = vadd.f32 %v503_v9, %v439_v6  ;;  %v568_v21 = vadd.f32 %v504_v10, %v440_v7  ;;  %v569_v22 = vadd.f32 %v505_v49, %v441_v43 }
  0xc7   : > { %v618_v24 = vmax.f32 %v554_v50, 0.0  ;;  %v619_v25 = vmax.f32 %v555_v11, 0.0  ;;  %v620_v26 = vmax.f32 %v556_v51, 0.0  ;;  %v621_v27 = vmax.f32 %v557_v12, 0.0 }
  0xc8   : > { %v622_v32 = vmax.f32 %v558_v52, 0.0  ;;  %v623_v33 = vmax.f32 %v559_v13, 0.0  ;;  %v624_v34 = vmax.f32 %v560_v14, 0.0  ;;  %v625_v39 = vmax.f32 %v561_v15, 0.0 }
  0xc9   : > { %v626_v40 = vmax.f32 %v562_v16, 0.0  ;;  %v627_v41 = vmax.f32 %v563_v17, 0.0  ;;  %v628_v46 = vmax.f32 %v564_v18, 0.0  ;;  %v629_v47 = vmax.f32 %v565_v53, 0.0  ;;  %682 = vst [vmem:[%s976_s17 + $0x100] sm:$0xff] %v618_v24  ;;  %683 = vst [vmem:[%s976_s17 + $0x108] sm:$0xff] %v619_v25 }
  0xca   : > { %684 = vst [vmem:[%s976_s17 + $0x110] sm:$0xff] %v620_v26  ;;  %685 = vst [vmem:[%s976_s17 + $0x118] sm:$0xff] %v621_v27  ;;  %v630_v48 = vmax.f32 %v566_v19, 0.0  ;;  %v631_v54 = vmax.f32 %v567_v20, 0.0  ;;  %v632_v55 = vmax.f32 %v568_v21, 0.0  ;;  %v633_v56 = vmax.f32 %v569_v22, 0.0 }
  0xcb   : > { %686 = vst [vmem:[%s976_s17 + $0x120] sm:$0xff] %v622_v32  ;;  %687 = vst [vmem:[%s976_s17 + $0x128] sm:$0xff] %v623_v33 }
  0xcc   : > { %688 = vst [vmem:[%s976_s17 + $0x130] sm:$0xff] %v624_v34  ;;  %689 = vst [vmem:[%s976_s17 + $0x138] sm:$0xff] %v625_v39 }
  0xcd   : > { %690 = vst [vmem:[%s976_s17 + $0x140] sm:$0xff] %v626_v40  ;;  %691 = vst [vmem:[%s976_s17 + $0x148] sm:$0xff] %v627_v41 }
  0xce   : > { %692 = vst [vmem:[%s976_s17 + $0x150] sm:$0xff] %v628_v46  ;;  %693 = vst [vmem:[%s976_s17 + $0x158] sm:$0xff] %v629_v47 }
  0xcf   : > { %694 = vst [vmem:[%s976_s17 + $0x160] sm:$0xff] %v630_v48  ;;  %695 = vst [vmem:[%s976_s17 + $0x168] sm:$0xff] %v631_v54 }
  0xd0   : > { %696 = vst [vmem:[%s976_s17 + $0x170] sm:$0xff] %v632_v55  ;;  %697 = vst [vmem:[%s976_s17 + $0x178] sm:$0xff] %v633_v56 }
  0xd1 PF: > { %s14_s15 = sadd.s32 1, %s814_s15  }
  0xd2   : > { %p11_p4 = scmp.ge.s32.totalorder %s14_s15, 4  }
  0xd4   :  { %13 = sbr.rel (!%p11_p4) target bundleno = 1 (0x1), region = 69 }

// kernel: bottleneck_forward.5
= control target key start
LH: loop header
LB: loop body
LE: loop exit
PB: predicated region body
PF: predicated region fallthrough
CT: control target
= control target key end

     0   :  { %s20355_s24 = smov 0   ;;  %s23593_s0 = inlined_call_operand.vmem [shape: f32[2,8,2048], index: 0, kind: input, shape index: {}]   ;;  %s23594_s1 = inlined_call_operand.vmem [shape: f32[8,1], index: 1, kind: input, shape index: {}]   ;;  %s23595_s2 = inlined_call_operand.vmem [shape: f32[8,1], index: 2, kind: input, shape index: {}]   ;;  %s23596_s3 = inlined_call_operand.vmem [shape: f32[27,8,8], index: 3, kind: input, shape index: {}]   ;;  %s23597_s4 = inlined_call_operand.vmem [shape: f32[27,1,2048], index: 4, kind: input, shape index: {}]   ;;  %s23598_s5 = inlined_call_operand.vmem [shape: f32[2,8,2048], index: 5, kind: output, shape index: {0}]   ;;  %s23599_s6 = inlined_call_operand.vmem [shape: f32[2,8,1], index: 6, kind: output, shape index: {1}]   ;;  %s23600_s7 = inlined_call_operand.vmem [shape: f32[2,8,1], index: 7, kind: output, shape index: {2}]  }
   0x1 LB: > { %s19553_s25 = sadd.s32 4294967295, %s20303_s24   ;;  %p19557_p0 = scmp.ge.s32.totalorder %s20303_s24, 1  ;;  %s20303_s24 = sphi %s20355_s24, %s18_s24  }
   0x2   : > { %p242_p1 = scmp.lt.s32.totalorder %s20303_s24, 3 }
   0x4   : > { %p243_p2 = pnand %p19557_p0, %p242_p1 }
   0x6   : > { %246 = sbr.rel (%p243_p2) target bundleno = 1190 (0x4a6), region = 40 }
   0xd   : > { %v316_v0 = vld [vmem:[%s23594_s1] sm:$0xff]  ;;  %v20305_v1 = vmov 0   ;;  %p282_p3 = scmp.lt.s32.totalorder %s19553_s25, 1  ;;  %s20306_s11 = smov 8   ;;  %v23603_v37 = vmov 0.0   ;;  %vm680_vm1 = vcmask 64512  }
   0xe   : > { %20296 = vset.pattern.permute.xlu0 %v20305_v1  ;;  %v338_v2 = vld [vmem:[%s23595_s2] sm:$0xff]  ;;  %748 = vmatprep.mubr.f32.mxu0 %v23603_v37  ;;  %s20308_s12 = smov 9   ;;  %s20309_s13 = smov 7   ;;  %vm19400_vm9 = vcmask 7168  }
   0xf   : > { %319 = vperm.xlu0 %20296, %v316_v0   ;;  %s24164_s25 = smov (!%p282_p3, %s19553_s25), 1  ;;  %819 = vmatprep.mubr.f32.mxu1 %v23603_v37  ;;  %s20310_s14 = smov 1  }
  0x10   : > { %s19860_s30 = sshll.u32 %s24164_s25, 7  ;;  %s20311_s19 = smov 127  }
  0x11   : > { %s20377_s10 = scalar_lea.vmem %s23593_s0, %s19860_s30  ;;  %s20312_s28 = smov 121  }
  0x12   : > { %v314_v4 = vld [vmem:[%s20377_s10 + $0x70] sm:$0xff]  ;;  %v300_v5 = vld [vmem:[%s20377_s10] sm:$0xff]  ;;  %v315_v7 = vld [vmem:[%s20377_s10 + $0x78] sm:$0xff]  ;;  %s20314_s20 = smov 119   ;;  %s23565_s23 = scalar_lea.vmem %s23598_s5, %s19860_s30 }
  0x13   : > { %341 = vperm.xlu0 %20296, %v338_v2   ;;  %v302_v6 = vld [vmem:[%s20377_s10 + $0x10] sm:$0xff]  ;;  %v304_v15 = vld [vmem:[%s20377_s10 + $0x20] sm:$0xff]  ;;  %v301_v16 = vld [vmem:[%s20377_s10 + $0x8] sm:$0xff]  ;;  %s19562_s30 = sshll.u32 %s24164_s25, 3 }
  0x14   : > { %v306_v23 = vld [vmem:[%s20377_s10 + $0x30] sm:$0xff]  ;;  %v303_v24 = vld [vmem:[%s20377_s10 + $0x18] sm:$0xff]  ;;  %v308_v32 = vld [vmem:[%s20377_s10 + $0x40] sm:$0xff]  ;;  %s299_s9 = scalar_lea.vmem %s23600_s7, %s19562_s30 }
  0x15   : > { %v305_v33 = vld [vmem:[%s20377_s10 + $0x28] sm:$0xff]  ;;  %v310_v40 = vld [vmem:[%s20377_s10 + $0x50] sm:$0xff]  ;;  %v307_v41 = vld [vmem:[%s20377_s10 + $0x38] sm:$0xff] }
  0x16   : > { %v312_v48 = vld [vmem:[%s20377_s10 + $0x60] sm:$0xff]  ;;  %v309_v49 = vld [vmem:[%s20377_s10 + $0x48] sm:$0xff]  ;;  %v311_v56 = vld [vmem:[%s20377_s10 + $0x58] sm:$0xff] }
  0x17   : > { %v313_v62 = vld [vmem:[%s20377_s10 + $0x68] sm:$0xff] }
  0x8e   : > { %v20379_v3 = vpop.permute.xlu0 %319 }
  0x8f   : > { %v336_v8 = vmul.f32 %v20379_v3, %v314_v4  ;;  %v322_v9 = vmul.f32 %v20379_v3, %v300_v5  ;;  %v324_v13 = vmul.f32 %v20379_v3, %v302_v6  ;;  %v337_v14 = vmul.f32 %v20379_v3, %v315_v7 }
  0x90   : > { %v326_v21 = vmul.f32 %v20379_v3, %v304_v15  ;;  %v323_v22 = vmul.f32 %v20379_v3, %v301_v16  ;;  %v328_v29 = vmul.f32 %v20379_v3, %v306_v23  ;;  %v325_v30 = vmul.f32 %v20379_v3, %v303_v24 }
  0x91   : > { %v330_v38 = vmul.f32 %v20379_v3, %v308_v32  ;;  %v327_v39 = vmul.f32 %v20379_v3, %v305_v33  ;;  %v332_v46 = vmul.f32 %v20379_v3, %v310_v40  ;;  %v329_v47 = vmul.f32 %v20379_v3, %v307_v41  ;;  %v20599_v33 = vld [vmem:[%s23596_s3 + $0x8] sm:$0xff] }
  0x92   : > { %v20387_v10 = vpop.permute.xlu0 %341  ;;  %v334_v54 = vmul.f32 %v20379_v3, %v312_v48  ;;  %v331_v55 = vmul.f32 %v20379_v3, %v309_v49  ;;  %v333_v61 = vmul.f32 %v20379_v3, %v311_v56  ;;  %v335_v2 = vmul.f32 %v20379_v3, %v313_v62 }
  0x93   : > { %v358_v11 = vadd.f32 %v20387_v10, %v336_v8  ;;  %v344_v12 = vadd.f32 %v20387_v10, %v322_v9  ;;  %v346_v19 = vadd.f32 %v20387_v10, %v324_v13  ;;  %v359_v20 = vadd.f32 %v20387_v10, %v337_v14  ;;  %v20554_v9 = vld [vmem:[%s23597_s4 + $0x10] sm:$0xff] }
  0x94   : > { %v348_v27 = vadd.f32 %v20387_v10, %v326_v21  ;;  %v345_v28 = vadd.f32 %v20387_v10, %v323_v22  ;;  %v350_v31 = vadd.f32 %v20387_v10, %v328_v29  ;;  %v347_v36 = vadd.f32 %v20387_v10, %v325_v30 }
  0x95   : > { %v20395_v17 = vmax.f32 %v358_v11, 0.0  ;;  %v20397_v18 = vmax.f32 %v344_v12, 0.0  ;;  %v20409_v25 = vmax.f32 %v346_v19, 0.0  ;;  %v20411_v26 = vmax.f32 %v359_v20, 0.0 }
  0x96   : > { %v20424_v34 = vmax.f32 %v348_v27, 0.0  ;;  %v20426_v35 = vmax.f32 %v345_v28, 0.0  ;;  %v20439_v42 = vmax.f32 %v350_v31, 0.0  ;;  %v20441_v43 = vmax.f32 %v347_v36, 0.0 }
  0x97   : > { %23830 = vst [vmem:[#allocation2_spill] sm:$0xff] %v20395_v17  ;;  %23831 = vst [vmem:[#allocation3_spill] sm:$0xff] %v20397_v18  ;;  %556 = vrot.lane.b32.xlu0 %v20395_v17, %s20306_s11  ;;  %528 = vrot.lane.b32.xlu1 %v20397_v18, %s20306_s11  ;;  %v352_v44 = vadd.f32 %v20387_v10, %v330_v38  ;;  %v349_v45 = vadd.f32 %v20387_v10, %v327_v39  ;;  %v408_v3 = vlaneseq }
  0x98   : > { %23832 = vst [vmem:[#allocation4_spill] sm:$0xff] %v20409_v25  ;;  %23833 = vst [vmem:[#allocation5_spill] sm:$0xff] %v20411_v26  ;;  %v354_v52 = vadd.f32 %v20387_v10, %v332_v46  ;;  %v351_v53 = vadd.f32 %v20387_v10, %v329_v47  ;;  %v356_v59 = vadd.f32 %v20387_v10, %v334_v54 }
  0x99   : > { %23834 = vst [vmem:[#allocation6_spill] sm:$0xff] %v20424_v34  ;;  %23835 = vst [vmem:[#allocation7_spill] sm:$0xff] %v20426_v35  ;;  %v20453_v50 = vmax.f32 %v352_v44, 0.0  ;;  %v20455_v51 = vmax.f32 %v349_v45, 0.0  ;;  %v353_v60 = vadd.f32 %v20387_v10, %v331_v55  ;;  %v355_v1 = vadd.f32 %v20387_v10, %v333_v61 }
  0x9a   : > { %23836 = vst [vmem:[#allocation8_spill] sm:$0xff] %v20439_v42  ;;  %23837 = vst [vmem:[#allocation9_spill] sm:$0xff] %v20441_v43  ;;  %v20466_v57 = vmax.f32 %v354_v52, 0.0  ;;  %v20468_v58 = vmax.f32 %v351_v53, 0.0  ;;  %v20478_v63 = vmax.f32 %v356_v59, 0.0  ;;  %v357_v5 = vadd.f32 %v20387_v10, %v335_v2 }
  0x9b   : > { %532 = vrot.lane.b32.xlu0 %v20409_v25, %s20306_s11  ;;  %558 = vrot.lane.b32.xlu1 %v20411_v26, %s20306_s11  ;;  %23838 = vst [vmem:[#allocation10_spill] sm:$0xff] %v20453_v50  ;;  %23839 = vst [vmem:[#allocation11_spill] sm:$0xff] %v20455_v51  ;;  %v20480_v0 = vmax.f32 %v353_v60, 0.0  ;;  %v20488_v4 = vmax.f32 %v355_v1, 0.0  ;;  %v433_v7 = vshrl.u32 %v408_v3, 7  ;;  %v20549_v8 = vand.u32 127, %v408_v3 }
  0x9c   : > { %23840 = vst [vmem:[#allocation12_spill] sm:$0xff] %v20466_v57  ;;  %23841 = vst [vmem:[#allocation13_spill] sm:$0xff] %v20468_v58  ;;  %v20494_v6 = vmax.f32 %v357_v5, 0.0  ;;  %v20649_v60 = vld [vmem:[%s23597_s4 + $0x18] sm:$0xff] }
  0x9d   : > { %23842 = vst [vmem:[#allocation14_spill] sm:$0xff] %v20478_v63  ;;  %23843 = vst [vmem:[#allocation15_spill] sm:$0xff] %v20480_v0  ;;  %v20558_v12 = vsub.s32 1, %v433_v7  ;;  %v20560_v13 = vsub.s32 0, %v433_v7  ;;  %vm560_vm0 = vcmp.lt.s32.totalorder %v20549_v8, 8  ;;  %v20571_v19 = vsub.s32 3, %v433_v7 }
  0x9e   : > { %23844 = vst [vmem:[#allocation16_spill] sm:$0xff] %v20488_v4  ;;  %23845 = vst [vmem:[#allocation17_spill] sm:$0xff] %v20494_v6  ;;  %v20573_v21 = vsub.s32 2, %v433_v7  ;;  %v20594_v30 = vsub.s32 4, %v433_v7  ;;  %v20601_v36 = vsub.s32 5, %v433_v7  ;;  %v20623_v46 = vsub.s32 6, %v433_v7 }
  0x9f   : > { %536 = vrot.lane.b32.xlu0 %v20424_v34, %s20306_s11  ;;  %530 = vrot.lane.b32.xlu1 %v20426_v35, %s20306_s11  ;;  %v591_v14 = vrot.slane %v20554_v9, %v20558_v12  ;;  %v587_v15 = vrot.slane %v20554_v9, %v20560_v13  ;;  %v599_v27 = vrot.slane %v20554_v9, %v20571_v19  ;;  %v20626_v49 = vsub.s32 7, %v433_v7 }
  0xa0   : > { %v595_v29 = vrot.slane %v20554_v9, %v20573_v21  ;;  %v603_v41 = vrot.slane %v20554_v9, %v20594_v30  ;;  %v607_v45 = vrot.slane %v20554_v9, %v20601_v36  ;;  %v611_v55 = vrot.slane %v20554_v9, %v20623_v46 }
  0xa1   : > { %v615_v59 = vrot.slane %v20554_v9, %v20626_v49  ;;  %v619_v3 = vrot.slane %v20649_v60, %v20560_v13  ;;  %v623_v9 = vrot.slane %v20649_v60, %v20558_v12  ;;  %vm410_vm2 = vcmp.lt.s32.totalorder %v20549_v8, 9 }
  0xa2   : > { %vm1855_vm3 = vcmp.lt.s32.totalorder %v20549_v8, 7  ;;  %vm2594_vm4 = vcmp.lt.s32.totalorder %v20549_v8, 1  ;;  %vm4023_vm5 = vcmp.lt.s32.totalorder %v20549_v8, 127  ;;  %vm4762_vm6 = vcmp.lt.s32.totalorder %v20549_v8, 121 }
  0xa3   : > { %540 = vrot.lane.b32.xlu0 %v20439_v42, %s20306_s11  ;;  %534 = vrot.lane.b32.xlu1 %v20441_v43, %s20306_s11  ;;  %vm5501_vm7 = vcmp.lt.s32.totalorder %v20549_v8, 120  ;;  %vm6240_vm8 = vcmp.lt.s32.totalorder %v20549_v8, 119 }
  0xa7   : > { %544 = vrot.lane.b32.xlu0 %v20453_v50, %s20306_s11  ;;  %538 = vrot.lane.b32.xlu1 %v20455_v51, %s20306_s11 }
  0xab   : > { %548 = vrot.lane.b32.xlu0 %v20466_v57, %s20306_s11  ;;  %542 = vrot.lane.b32.xlu1 %v20468_v58, %s20306_s11 }
  0xaf   : > { %552 = vrot.lane.b32.xlu0 %v20478_v63, %s20306_s11  ;;  %546 = vrot.lane.b32.xlu1 %v20480_v0, %s20306_s11 }
  0xb3   : > { %376 = vrot.lane.b32.xlu0 %v20397_v18, %s20308_s12  ;;  %550 = vrot.lane.b32.xlu1 %v20488_v4, %s20306_s11 }
  0xb7   : > { %404 = vrot.lane.b32.xlu0 %v20395_v17, %s20308_s12  ;;  %554 = vrot.lane.b32.xlu1 %v20494_v6, %s20306_s11 }
  0xbb   : > { %380 = vrot.lane.b32.xlu0 %v20409_v25, %s20308_s12  ;;  %406 = vrot.lane.b32.xlu1 %v20411_v26, %s20308_s12 }
  0xbf   : > { %384 = vrot.lane.b32.xlu0 %v20424_v34, %s20308_s12  ;;  %378 = vrot.lane.b32.xlu1 %v20426_v35, %s20308_s12 }
  0xc3   : > { %388 = vrot.lane.b32.xlu0 %v20439_v42, %s20308_s12  ;;  %382 = vrot.lane.b32.xlu1 %v20441_v43, %s20308_s12 }
  0xc7   : > { %392 = vrot.lane.b32.xlu0 %v20453_v50, %s20308_s12  ;;  %386 = vrot.lane.b32.xlu1 %v20455_v51, %s20308_s12 }
  0xcb   : > { %396 = vrot.lane.b32.xlu0 %v20466_v57, %s20308_s12  ;;  %390 = vrot.lane.b32.xlu1 %v20468_v58, %s20308_s12 }
  0xcf   : > { %400 = vrot.lane.b32.xlu0 %v20478_v63, %s20308_s12  ;;  %394 = vrot.lane.b32.xlu1 %v20480_v0, %s20308_s12 }
  0xd3   : > { %1823 = vrot.lane.b32.xlu0 %v20397_v18, %s20309_s13  ;;  %398 = vrot.lane.b32.xlu1 %v20488_v4, %s20308_s12 }
  0xd7   : > { %1851 = vrot.lane.b32.xlu0 %v20395_v17, %s20309_s13  ;;  %402 = vrot.lane.b32.xlu1 %v20494_v6, %s20308_s12 }
  0xdb   : > { %1827 = vrot.lane.b32.xlu0 %v20409_v25, %s20309_s13  ;;  %1853 = vrot.lane.b32.xlu1 %v20411_v26, %s20309_s13 }
  0xdf   : > { %1831 = vrot.lane.b32.xlu0 %v20424_v34, %s20309_s13  ;;  %1825 = vrot.lane.b32.xlu1 %v20426_v35, %s20309_s13 }
  0xe3   : > { %1835 = vrot.lane.b32.xlu0 %v20439_v42, %s20309_s13  ;;  %1829 = vrot.lane.b32.xlu1 %v20441_v43, %s20309_s13 }
  0xe7   : > { %1839 = vrot.lane.b32.xlu0 %v20453_v50, %s20309_s13  ;;  %1833 = vrot.lane.b32.xlu1 %v20455_v51, %s20309_s13 }
  0xeb   : > { %1843 = vrot.lane.b32.xlu0 %v20466_v57, %s20309_s13  ;;  %1837 = vrot.lane.b32.xlu1 %v20468_v58, %s20309_s13 }
  0xef   : > { %1847 = vrot.lane.b32.xlu0 %v20478_v63, %s20309_s13  ;;  %1841 = vrot.lane.b32.xlu1 %v20480_v0, %s20309_s13 }
  0xf3   : > { %2562 = vrot.lane.b32.xlu0 %v20397_v18, %s20310_s14  ;;  %1845 = vrot.lane.b32.xlu1 %v20488_v4, %s20309_s13 }
  0xf7   : > { %2590 = vrot.lane.b32.xlu0 %v20395_v17, %s20310_s14  ;;  %1849 = vrot.lane.b32.xlu1 %v20494_v6, %s20309_s13  ;;  %s20313_s13 = smov 120  }
  0xfb   : > { %2566 = vrot.lane.b32.xlu0 %v20409_v25, %s20310_s14  ;;  %2592 = vrot.lane.b32.xlu1 %v20411_v26, %s20310_s14 }
  0xff   : > { %2570 = vrot.lane.b32.xlu0 %v20424_v34, %s20310_s14  ;;  %2564 = vrot.lane.b32.xlu1 %v20426_v35, %s20310_s14 }
 0x103   : > { %2574 = vrot.lane.b32.xlu0 %v20439_v42, %s20310_s14  ;;  %2568 = vrot.lane.b32.xlu1 %v20441_v43, %s20310_s14 }
 0x107   : > { %2578 = vrot.lane.b32.xlu0 %v20453_v50, %s20310_s14  ;;  %2572 = vrot.lane.b32.xlu1 %v20455_v51, %s20310_s14 }
 0x109   : > { %v20556_v10 = vpop.permute.xlu0 %556  ;;  %v529_v11 = vpop.permute.xlu1 %528 }
 0x10b   : > { %2582 = vrot.lane.b32.xlu0 %v20466_v57, %s20310_s14  ;;  %2576 = vrot.lane.b32.xlu1 %v20468_v58, %s20310_s14 }
 0x10d   : > { %v533_v16 = vpop.permute.xlu0 %532  ;;  %v559_v20 = vpop.permute.xlu1 %558 }
 0x10e   : > { %v20578_v22 = vsel %vm560_vm0, %v20556_v10, %v559_v20  ;;  %v20582_v23 = vsel %vm560_vm0, %v559_v20, %v529_v11 }
 0x10f   : > { %23846 = vst [vmem:[#allocation18_spill] sm:$0xff] %v20578_v22  ;;  %23847 = vst [vmem:[#allocation19_spill] sm:$0xff] %v20582_v23  ;;  %2586 = vrot.lane.b32.xlu0 %v20478_v63, %s20310_s14  ;;  %2580 = vrot.lane.b32.xlu1 %v20480_v0, %s20310_s14  ;;  %v665_v24 = vmul.f32 %v591_v14, %v20582_v23  ;;  %v664_v28 = vmul.f32 %v587_v15, %v20578_v22 }
 0x111   : > { %v537_v31 = vpop.permute.xlu0 %536  ;;  %684 = vmatprep.subr.mxu0 %v665_v24  ;;  %v531_v32 = vpop.permute.xlu1 %530  ;;  %v627_v24 = vrot.slane %v20649_v60, %v20573_v21 }
 0x112   : > { %v20605_v38 = vsel %vm560_vm0, %v529_v11, %v531_v32  ;;  %685 = vmatpush1.msra.mxu0 %v664_v28  ;;  %v20609_v39 = vsel %vm560_vm0, %v531_v32, %v533_v16  ;;  %v631_v28 = vrot.slane %v20649_v60, %v20571_v19 }
 0x113   : > { %23848 = vst [vmem:[#allocation20_spill] sm:$0xff] %v20605_v38  ;;  %23849 = vst [vmem:[#allocation21_spill] sm:$0xff] %v20609_v39  ;;  %3991 = vrot.lane.b32.xlu0 %v20397_v18, %s20311_s19  ;;  %2584 = vrot.lane.b32.xlu1 %v20488_v4, %s20310_s14  ;;  %v667_v40 = vmul.f32 %v599_v27, %v20609_v39  ;;  %v666_v44 = vmul.f32 %v595_v29, %v20605_v38 }
 0x114   : > { %19567 = vmatmul.mubr.msk.f32.vlgmr.msra.gmra.mrb[0].mxu0 %vm680_vm1, %v20599_v33 }
 0x115   : > { %v541_v47 = vpop.permute.xlu0 %540  ;;  %755 = vmatprep.subr.mxu1 %v667_v40  ;;  %v535_v48 = vpop.permute.xlu1 %534  ;;  %890 = vmatprep.mubr.f32.mxu0 %v23603_v37 }
 0x116   : > { %v20630_v52 = vsel %vm560_vm0, %v535_v48, %v537_v31  ;;  %v20634_v53 = vsel %vm560_vm0, %v533_v16, %v535_v48  ;;  %756 = vmatpush1.msra.mxu1 %v666_v44  ;;  %v635_v44 = vrot.slane %v20649_v60, %v20594_v30 }
 0x117   : > { %23850 = vst [vmem:[#allocation22_spill] sm:$0xff] %v20630_v52  ;;  %23851 = vst [vmem:[#allocation23_spill] sm:$0xff] %v20634_v53  ;;  %v668_v54 = vmul.f32 %v603_v41, %v20634_v53  ;;  %4021 = vrot.lane.b32.xlu0 %v20411_v26, %s20311_s19  ;;  %2588 = vrot.lane.b32.xlu1 %v20494_v6, %s20310_s14  ;;  %v669_v56 = vmul.f32 %v607_v45, %v20630_v52 }
 0x118   : > { %19568 = vmatmul.mubr.msk.f32.vlgmr.msra.gmra.mrb[0].mxu1 %vm680_vm1, %v20599_v33 }
 0x119   : > { %v545_v61 = vpop.permute.xlu0 %544  ;;  %v539_v62 = vpop.permute.xlu1 %538  ;;  %961 = vmatprep.mubr.f32.mxu1 %v23603_v37  ;;  %826 = vmatprep.subr.mxu0 %v669_v56 }
 0x11a   : > { %v20656_v1 = vsel %vm560_vm0, %v539_v62, %v541_v47  ;;  %v20660_v2 = vsel %vm560_vm0, %v537_v31, %v539_v62  ;;  %827 = vmatpush1.msra.mxu0 %v668_v54 }
 0x11b   : > { %23852 = vst [vmem:[#allocation24_spill] sm:$0xff] %v20656_v1  ;;  %23853 = vst [vmem:[#allocation25_spill] sm:$0xff] %v20660_v2  ;;  %v670_v5 = vmul.f32 %v611_v55, %v20660_v2  ;;  %3997 = vrot.lane.b32.xlu0 %v20441_v43, %s20311_s19  ;;  %3993 = vrot.lane.b32.xlu1 %v20426_v35, %s20311_s19  ;;  %v671_v7 = vmul.f32 %v615_v59, %v20656_v1  ;;  %v21331_v2 = vld [vmem:[%s23597_s4 + $0x48] sm:$0xff] }
 0x11c   : > { %19569 = vmatmul.mubr.msk.f32.vlgmr.msra.gmra.mrb[2].mxu0 %vm680_vm1, %v20599_v33 }
 0x11d   : > { %v549_v11 = vpop.permute.xlu0 %548  ;;  %v543_v14 = vpop.permute.xlu1 %542  ;;  %1032 = vmatprep.mubr.f32.mxu0 %v23603_v37  ;;  %897 = vmatprep.subr.mxu1 %v671_v7 }
 0x11e   : > { %v20677_v15 = vsel %vm560_vm0, %v543_v14, %v545_v61  ;;  %v20681_v16 = vsel %vm560_vm0, %v541_v47, %v543_v14  ;;  %898 = vmatpush1.msra.mxu1 %v670_v5  ;;  %v639_v47 = vrot.slane %v20649_v60, %v20601_v36  ;;  %v647_v5 = vrot.slane %v20649_v60, %v20626_v49 }
 0x11f   : > { %23854 = vst [vmem:[#allocation26_spill] sm:$0xff] %v20677_v15  ;;  %23855 = vst [vmem:[#allocation27_spill] sm:$0xff] %v20681_v16  ;;  %v672_v20 = vmul.f32 %v619_v3, %v20681_v16  ;;  %4001 = vrot.lane.b32.xlu0 %v20455_v51, %s20311_s19  ;;  %3995 = vrot.lane.b32.xlu1 %v20409_v25, %s20311_s19  ;;  %v673_v27 = vmul.f32 %v623_v9, %v20677_v15  ;;  %v20738_v3 = vld [vmem:[%s23597_s4] sm:$0xff] }
 0x120   : > { %19570 = vmatmul.mubr.msk.f32.vlgmr.msra.gmra.mrb[2].mxu1 %vm680_vm1, %v20599_v33 }
 0x121   : > { %v553_v29 = vpop.permute.xlu0 %552  ;;  %v547_v31 = vpop.permute.xlu1 %546  ;;  %1103 = vmatprep.mubr.f32.mxu1 %v23603_v37  ;;  %968 = vmatprep.subr.mxu0 %v673_v27 }
 0x122   : > { %v20698_v32 = vsel %vm560_vm0, %v547_v31, %v549_v11  ;;  %v20702_v40 = vsel %vm560_vm0, %v545_v61, %v547_v31  ;;  %969 = vmatpush1.msra.mxu0 %v672_v20  ;;  %v643_v61 = vrot.slane %v20649_v60, %v20623_v46  ;;  %v435_v20 = vrot.slane %v20738_v3, %v20560_v13 }
 0x123   : > { %23856 = vst [vmem:[#allocation28_spill] sm:$0xff] %v20698_v32  ;;  %23857 = vst [vmem:[#allocation29_spill] sm:$0xff] %v20702_v40  ;;  %v674_v41 = vmul.f32 %v627_v24, %v20702_v40  ;;  %4005 = vrot.lane.b32.xlu0 %v20468_v58, %s20311_s19  ;;  %3999 = vrot.lane.b32.xlu1 %v20424_v34, %s20311_s19  ;;  %v675_v45 = vmul.f32 %v631_v28, %v20698_v32 }
 0x124   : > { %19571 = vmatmul.mubr.msk.f32.vlgmr.msra.gmra.mrb[4].mxu0 %vm680_vm1, %v20599_v33  ;;  %v439_v24 = vrot.slane %v20738_v3, %v20558_v12 }
 0x125   : > { %v377_v48 = vpop.permute.xlu0 %376  ;;  %v551_v54 = vpop.permute.xlu1 %550  ;;  %1174 = vmatprep.mubr.f32.mxu0 %v23603_v37  ;;  %1039 = vmatprep.subr.mxu1 %v675_v45 }
 0x126   : > { %v20719_v55 = vsel %vm560_vm0, %v551_v54, %v553_v29  ;;  %v20723_v56 = vsel %vm560_vm0, %v549_v11, %v551_v54  ;;  %1040 = vmatpush1.msra.mxu1 %v674_v41 }
 0x127   : > { %23858 = vst [vmem:[#allocation30_spill] sm:$0xff] %v20719_v55  ;;  %23859 = vst [vmem:[#allocation31_spill] sm:$0xff] %v20723_v56  ;;  %v676_v59 = vmul.f32 %v635_v44, %v20723_v56  ;;  %4009 = vrot.lane.b32.xlu0 %v20480_v0, %s20311_s19  ;;  %4003 = vrot.lane.b32.xlu1 %v20439_v42, %s20311_s19  ;;  %v677_v62 = vmul.f32 %v639_v47, %v20719_v55 }
 0x128   : > { %19572 = vmatmul.mubr.msk.f32.vlgmr.msra.gmra.mrb[4].mxu1 %vm680_vm1, %v20599_v33  ;;  %v443_v44 = vrot.slane %v20738_v3, %v20573_v21  ;;  %v447_v47 = vrot.slane %v20738_v3, %v20571_v19 }
 0x129   : > { %v20742_v7 = vpop.permute.xlu0 %404  ;;  %v555_v9 = vpop.permute.xlu1 %554  ;;  %1245 = vmatprep.mubr.f32.mxu1 %v23603_v37  ;;  %1110 = vmatprep.subr.mxu0 %v677_v62 }
 0x12a   : > { %v20748_v11 = vsel %vm560_vm0, %v555_v9, %v20556_v10  ;;  %v20752_v60 = vsel %vm560_vm0, %v553_v29, %v555_v9  ;;  %1111 = vmatpush1.msra.mxu0 %v676_v59  ;;  %v451_v9 = vrot.slane %v20738_v3, %v20594_v30 }
 0x12b   : > { %23860 = vst [vmem:[#allocation32_spill] sm:$0xff] %v20748_v11  ;;  %23861 = vst [vmem:[#allocation33_spill] sm:$0xff] %v20752_v60  ;;  %v678_v14 = vmul.f32 %v643_v61, %v20752_v60  ;;  %4013 = vrot.lane.b32.xlu0 %v20488_v4, %s20311_s19  ;;  %4007 = vrot.lane.b32.xlu1 %v20453_v50, %s20311_s19  ;;  %v679_v10 = vmul.f32 %v647_v5, %v20748_v11  ;;  %v20792_v61 = vld [vmem:[%s23596_s3] sm:$0xff] }
 0x12c   : > { %19573 = vmatmul.mubr.msk.f32.vlgmr.msra.gmra.mrb[6].mxu0 %vm680_vm1, %v20599_v33 }
 0x12d   : > { %v381_v27 = vpop.permute.xlu0 %380  ;;  %v407_v28 = vpop.permute.xlu1 %406  ;;  %1319 = vmatprep.mubr.f32.mxu0 %v23603_v37  ;;  %1181 = vmatprep.subr.mxu1 %v679_v10 }
 0x12e   : > { %v20771_v29 = vsel %vm410_vm2, %v20742_v7, %v407_v28  ;;  %v20775_v31 = vsel %vm410_vm2, %v407_v28, %v377_v48  ;;  %1182 = vmatpush1.msra.mxu1 %v678_v14 }
 0x12f   : > { %23862 = vst [vmem:[#allocation34_spill] sm:$0xff] %v20771_v29  ;;  %v512_v41 = vmul.f32 %v435_v20, %v20771_v29  ;;  %4017 = vrot.lane.b32.xlu0 %v20494_v6, %s20311_s19  ;;  %4011 = vrot.lane.b32.xlu1 %v20466_v57, %s20311_s19  ;;  %v513_v45 = vmul.f32 %v439_v24, %v20775_v31 }
 0x130   : > { %19574 = vmatmul.mubr.msk.f32.vlgmr.msra.gmra.mrb[6].mxu1 %vm680_vm1, %v20599_v33  ;;  %v455_v20 = vrot.slane %v20738_v3, %v20601_v36 }
 0x131   : > { %v385_v54 = vpop.permute.xlu0 %384  ;;  %v379_v59 = vpop.permute.xlu1 %378  ;;  %1390 = vmatprep.mubr.f32.mxu1 %v23603_v37  ;;  %1255 = vmatprep.subr.mxu0 %v513_v45 }
 0x132   : > { %v20797_v62 = vsel %vm410_vm2, %v379_v59, %v381_v27  ;;  %v20801_v5 = vsel %vm410_vm2, %v377_v48, %v379_v59  ;;  %1256 = vmatpush1.msra.mxu0 %v512_v41 }
 0x133   : > { %v514_v33 = vmul.f32 %v443_v44, %v20801_v5  ;;  %4730 = vrot.lane.b32.xlu0 %v20397_v18, %s20312_s28  ;;  %4015 = vrot.lane.b32.xlu1 %v20478_v63, %s20311_s19  ;;  %v515_v14 = vmul.f32 %v447_v47, %v20797_v62  ;;  %v459_v44 = vrot.slane %v20738_v3, %v20623_v46 }
 0x134   : > { %19575 = vmatmul.mubr.msk.f32.vlgmr.msra.gmra.mrb[0].mxu0 %vm680_vm1, %v20792_v61  ;;  %v463_v47 = vrot.slane %v20738_v3, %v20626_v49 }
 0x135   : > { %v389_v48 = vpop.permute.xlu0 %388  ;;  %v383_v10 = vpop.permute.xlu1 %382  ;;  %1461 = vmatprep.mubr.f32.mxu0 %v23603_v37  ;;  %1326 = vmatprep.subr.mxu1 %v515_v14 }
 0x136   : > { %v20818_v24 = vsel %vm410_vm2, %v383_v10, %v385_v54  ;;  %v20822_v28 = vsel %vm410_vm2, %v381_v27, %v383_v10  ;;  %1327 = vmatpush1.msra.mxu1 %v514_v33  ;;  %v20837_v27 = vld [vmem:[%s23597_s4 + $0x8] sm:$0xff] }
 0x137   : > { %v516_v41 = vmul.f32 %v451_v9, %v20822_v28  ;;  %4760 = vrot.lane.b32.xlu0 %v20411_v26, %s20312_s28  ;;  %4019 = vrot.lane.b32.xlu1 %v20395_v17, %s20311_s19  ;;  %v517_v45 = vmul.f32 %v455_v20, %v20818_v24  ;;  %v467_v20 = vrot.slane %v20837_v27, %v20560_v13 }
 0x138   : > { %19576 = vmatmul.mubr.msk.f32.vlgmr.msra.gmra.mrb[0].mxu1 %vm680_vm1, %v20792_v61  ;;  %v475_v11 = vrot.slane %v20837_v27, %v20573_v21  ;;  %v483_v55 = vrot.slane %v20837_v27, %v20594_v30  ;;  %v487_v32 = vrot.slane %v20837_v27, %v20601_v36  ;;  %v491_v60 = vrot.slane %v20837_v27, %v20623_v46 }
 0x139   : > { %v393_v59 = vpop.permute.xlu0 %392  ;;  %v387_v33 = vpop.permute.xlu1 %386  ;;  %1532 = vmatprep.mubr.f32.mxu1 %v23603_v37  ;;  %1397 = vmatprep.subr.mxu0 %v517_v45  ;;  %v471_v45 = vrot.slane %v20837_v27, %v20558_v12  ;;  %v495_v56 = vrot.slane %v20837_v27, %v20626_v49 }
 0x13a   : > { %v20844_v9 = vsel %vm410_vm2, %v387_v33, %v389_v48  ;;  %v20848_v3 = vsel %vm410_vm2, %v385_v54, %v387_v33  ;;  %1398 = vmatpush1.msra.mxu0 %v516_v41 }
 0x13b   : > { %v518_v14 = vmul.f32 %v459_v44, %v20848_v3  ;;  %4736 = vrot.lane.b32.xlu0 %v20441_v43, %s20312_s28  ;;  %4732 = vrot.lane.b32.xlu1 %v20426_v35, %s20312_s28  ;;  %v519_v10 = vmul.f32 %v463_v47, %v20844_v9 }
 0x13c   : > { %19577 = vmatmul.mubr.msk.f32.vlgmr.msra.gmra.mrb[2].mxu0 %vm680_vm1, %v20792_v61 }
 0x13d   : > { %v397_v54 = vpop.permute.xlu0 %396  ;;  %v391_v44 = vpop.permute.xlu1 %390  ;;  %1603 = vmatprep.mubr.f32.mxu0 %v23603_v37  ;;  %1468 = vmatprep.subr.mxu1 %v519_v10  ;;  %v479_v37 = vrot.slane %v20837_v27, %v20571_v19 }
 0x13e   : > { %v20865_v41 = vsel %vm410_vm2, %v391_v44, %v393_v59  ;;  %v20869_v33 = vsel %vm410_vm2, %v389_v48, %v391_v44  ;;  %1469 = vmatpush1.msra.mxu1 %v518_v14  ;;  %v23863_v14 = vmov 0.0  }
 0x13f   : > { %v520_v47 = vmul.f32 %v467_v20, %v20869_v33  ;;  %4740 = vrot.lane.b32.xlu0 %v20455_v51, %s20312_s28  ;;  %4734 = vrot.lane.b32.xlu1 %v20409_v25, %s20312_s28  ;;  %v521_v10 = vmul.f32 %v471_v45, %v20865_v41 }
 0x140   : > { %19578 = vmatmul.mubr.msk.f32.vlgmr.msra.gmra.mrb[2].mxu1 %vm680_vm1, %v20792_v61 }
 0x141   : > { %v401_v48 = vpop.permute.xlu0 %400  ;;  %v395_v20 = vpop.permute.xlu1 %394  ;;  %1674 = vmatprep.mubr.f32.mxu1 %v23863_v14  ;;  %1539 = vmatprep.subr.mxu0 %v521_v10 }
 0x142   : > { %v20886_v44 = vsel %vm410_vm2, %v395_v20, %v397_v54  ;;  %v20890_v22 = vsel %vm410_vm2, %v393_v59, %v395_v20  ;;  %1540 = vmatpush1.msra.mxu0 %v520_v47 }
 0x143   : > { %v522_v45 = vmul.f32 %v475_v11, %v20890_v22  ;;  %4744 = vrot.lane.b32.xlu0 %v20468_v58, %s20312_s28  ;;  %4738 = vrot.lane.b32.xlu1 %v20424_v34, %s20312_s28  ;;  %v523_v10 = vmul.f32 %v479_v37, %v20886_v44 }
 0x144   : > { %19579 = vmatmul.mubr.msk.f32.vlgmr.msra.gmra.mrb[4].mxu0 %vm680_vm1, %v20792_v61 }
 0x145   : > { %v1824_v59 = vpop.permute.xlu0 %1823  ;;  %v399_v11 = vpop.permute.xlu1 %398  ;;  %1745 = vmatprep.mubr.f32.mxu0 %v23863_v14  ;;  %1610 = vmatprep.subr.mxu1 %v523_v10 }
 0x146   : > { %v20907_v47 = vsel %vm410_vm2, %v399_v11, %v401_v48  ;;  %v20911_v20 = vsel %vm410_vm2, %v397_v54, %v399_v11  ;;  %1611 = vmatpush1.msra.mxu1 %v522_v45  ;;  %v20926_v54 = vld [vmem:[%s23597_s4 + $0x20] sm:$0xff] }
 0x147   : > { %v524_v37 = vmul.f32 %v483_v55, %v20911_v20  ;;  %4748 = vrot.lane.b32.xlu0 %v20480_v0, %s20312_s28  ;;  %4742 = vrot.lane.b32.xlu1 %v20439_v42, %s20312_s28  ;;  %v525_v10 = vmul.f32 %v487_v32, %v20907_v47  ;;  %v1890_v1 = vrot.slane %v20926_v54, %v20573_v21 }
 0x148   : > { %19580 = vmatmul.mubr.msk.f32.vlgmr.msra.gmra.mrb[4].mxu1 %vm680_vm1, %v20792_v61  ;;  %v1894_v40 = vrot.slane %v20926_v54, %v20571_v19  ;;  %v1902_v16 = vrot.slane %v20926_v54, %v20601_v36 }
 0x149   : > { %v20930_v55 = vpop.permute.xlu0 %1851  ;;  %v403_v45 = vpop.permute.xlu1 %402  ;;  %1816 = vmatprep.mubr.f32.mxu1 %v23863_v14  ;;  %1681 = vmatprep.subr.mxu0 %v525_v10  ;;  %v1882_v10 = vrot.slane %v20926_v54, %v20560_v13 }
 0x14a   : > { %v20936_v32 = vsel %vm410_vm2, %v403_v45, %v20742_v7  ;;  %v20940_v27 = vsel %vm410_vm2, %v401_v48, %v403_v45  ;;  %1682 = vmatpush1.msra.mxu0 %v524_v37  ;;  %v1886_v48 = vrot.slane %v20926_v54, %v20558_v12 }
 0x14b   : > { %v526_v11 = vmul.f32 %v491_v60, %v20940_v27  ;;  %4752 = vrot.lane.b32.xlu0 %v20488_v4, %s20312_s28  ;;  %4746 = vrot.lane.b32.xlu1 %v20453_v50, %s20312_s28  ;;  %v527_v7 = vmul.f32 %v495_v56, %v20936_v32 }
 0x14c   : > { %19581 = vmatmul.mubr.msk.f32.vlgmr.msra.gmra.mrb[6].mxu0 %vm680_vm1, %v20792_v61 }
 0x14d   : > { %v1828_v60 = vpop.permute.xlu0 %1827  ;;  %v1854_v37 = vpop.permute.xlu1 %1853  ;;  %2042 = vmatprep.mubr.f32.mxu0 %v23863_v14  ;;  %1752 = vmatprep.subr.mxu1 %v527_v7 }
 0x14e   : > { %v20959_v45 = vsel %vm1855_vm3, %v20930_v55, %v1854_v37  ;;  %v20963_v15 = vsel %vm1855_vm3, %v1854_v37, %v1824_v59  ;;  %1753 = vmatpush1.msra.mxu1 %v526_v11  ;;  %v20980_v11 = vld [vmem:[%s23596_s3 + $0x10] sm:$0xff] }
 0x14f   : > { %23864 = vst [vmem:[#allocation35_spill] sm:$0xff] %v20959_v45  ;;  %23865 = vst [vmem:[#allocation36_spill] sm:$0xff] %v20963_v15  ;;  %v1959_v56 = vmul.f32 %v1882_v10, %v20959_v45  ;;  %4756 = vrot.lane.b32.xlu0 %v20494_v6, %s20312_s28  ;;  %4750 = vrot.lane.b32.xlu1 %v20466_v57, %s20312_s28  ;;  %v1960_v7 = vmul.f32 %v1886_v48, %v20963_v15 }
 0x150   : > { %19582 = vmatmul.mubr.msk.f32.vlgmr.msra.gmra.mrb[6].mxu1 %vm680_vm1, %v20792_v61  ;;  %v1898_v15 = vrot.slane %v20926_v54, %v20594_v30 }
 0x151   : > { %v1832_v37 = vpop.permute.xlu0 %1831  ;;  %v1826_v10 = vpop.permute.xlu1 %1825  ;;  %2113 = vmatprep.mubr.f32.mxu1 %v23863_v14  ;;  %1978 = vmatprep.subr.mxu0 %v1960_v7 }
 0x152   : > { %v20985_v45 = vsel %vm1855_vm3, %v1826_v10, %v1828_v60  ;;  %v20989_v48 = vsel %vm1855_vm3, %v1824_v59, %v1826_v10  ;;  %1979 = vmatpush1.msra.mxu0 %v1959_v56 }
 0x153   : > { %23866 = vst [vmem:[#allocation37_spill] sm:$0xff] %v20985_v45  ;;  %23867 = vst [vmem:[#allocation38_spill] sm:$0xff] %v20989_v48  ;;  %v1961_v61 = vmul.f32 %v1890_v1, %v20989_v48  ;;  %5469 = vrot.lane.b32.xlu0 %v20397_v18, %s20313_s13  ;;  %4754 = vrot.lane.b32.xlu1 %v20478_v63, %s20312_s28  ;;  %v1962_v7 = vmul.f32 %v1894_v40, %v20985_v45 }
 0x154   : > { %19586 = vmatmul.mubr.msk.f32.vlgmr.msra.gmra.mrb[0].mxu0 %vm680_vm1, %v20980_v11  ;;  %v1906_v45 = vrot.slane %v20926_v54, %v20623_v46  ;;  %v1910_v48 = vrot.slane %v20926_v54, %v20626_v49 }
 0x155   : > { %v1836_v1 = vpop.permute.xlu0 %1835  ;;  %v1830_v59 = vpop.permute.xlu1 %1829  ;;  %2184 = vmatprep.mubr.f32.mxu0 %v23863_v14  ;;  %2049 = vmatprep.subr.mxu1 %v1962_v7 }
 0x156   : > { %v21006_v56 = vsel %vm1855_vm3, %v1830_v59, %v1832_v37  ;;  %v21010_v10 = vsel %vm1855_vm3, %v1828_v60, %v1830_v59  ;;  %2050 = vmatpush1.msra.mxu1 %v1961_v61  ;;  %v21025_v60 = vld [vmem:[%s23597_s4 + $0x28] sm:$0xff] }
 0x157   : > { %23868 = vst [vmem:[#allocation39_spill] sm:$0xff] %v21006_v56  ;;  %23869 = vst [vmem:[#allocation40_spill] sm:$0xff] %v21010_v10  ;;  %v1963_v40 = vmul.f32 %v1898_v15, %v21010_v10  ;;  %5499 = vrot.lane.b32.xlu0 %v20411_v26, %s20313_s13  ;;  %4758 = vrot.lane.b32.xlu1 %v20395_v17, %s20312_s28  ;;  %v1964_v7 = vmul.f32 %v1902_v16, %v21006_v56  ;;  %s295_s28 = scalar_lea.vmem %s23599_s6, %s19562_s30 }
 0x158   : > { %19587 = vmatmul.mubr.msk.f32.vlgmr.msra.gmra.mrb[0].mxu1 %vm680_vm1, %v20980_v11  ;;  %v1914_v56 = vrot.slane %v21025_v60, %v20560_v13  ;;  %v1918_v10 = vrot.slane %v21025_v60, %v20558_v12 }
 0x159   : > { %v1840_v15 = vpop.permute.xlu0 %1839  ;;  %v1834_v61 = vpop.permute.xlu1 %1833  ;;  %2255 = vmatprep.mubr.f32.mxu1 %v23863_v14  ;;  %2120 = vmatprep.subr.mxu0 %v1964_v7 }
 0x15a   : > { %v21032_v59 = vsel %vm1855_vm3, %v1834_v61, %v1836_v1  ;;  %v21036_v16 = vsel %vm1855_vm3, %v1832_v37, %v1834_v61  ;;  %2121 = vmatpush1.msra.mxu0 %v1963_v40 }
 0x15b   : > { %23870 = vst [vmem:[#allocation41_spill] sm:$0xff] %v21032_v59  ;;  %23871 = vst [vmem:[#allocation42_spill] sm:$0xff] %v21036_v16  ;;  %v1965_v54 = vmul.f32 %v1906_v45, %v21036_v16  ;;  %5475 = vrot.lane.b32.xlu0 %v20441_v43, %s20313_s13  ;;  %5471 = vrot.lane.b32.xlu1 %v20426_v35, %s20313_s13  ;;  %v1966_v7 = vmul.f32 %v1910_v48, %v21032_v59 }
 0x15c   : > { %19588 = vmatmul.mubr.msk.f32.vlgmr.msra.gmra.mrb[2].mxu0 %vm680_vm1, %v20980_v11  ;;  %v1922_v59 = vrot.slane %v21025_v60, %v20573_v21  ;;  %v1926_v16 = vrot.slane %v21025_v60, %v20571_v19 }
 0x15d   : > { %v1844_v37 = vpop.permute.xlu0 %1843  ;;  %v1838_v45 = vpop.permute.xlu1 %1837  ;;  %2326 = vmatprep.mubr.f32.mxu0 %v23863_v14  ;;  %2191 = vmatprep.subr.mxu1 %v1966_v7 }
 0x15e   : > { %v21053_v40 = vsel %vm1855_vm3, %v1838_v45, %v1840_v15  ;;  %v21057_v61 = vsel %vm1855_vm3, %v1836_v1, %v1838_v45  ;;  %2192 = vmatpush1.msra.mxu1 %v1965_v54 }
 0x15f   : > { %23872 = vst [vmem:[#allocation43_spill] sm:$0xff] %v21053_v40  ;;  %23873 = vst [vmem:[#allocation44_spill] sm:$0xff] %v21057_v61  ;;  %v1967_v48 = vmul.f32 %v1914_v56, %v21057_v61  ;;  %5479 = vrot.lane.b32.xlu0 %v20455_v51, %s20313_s13  ;;  %5473 = vrot.lane.b32.xlu1 %v20409_v25, %s20313_s13  ;;  %v1968_v7 = vmul.f32 %v1918_v10, %v21053_v40 }
 0x160   : > { %19589 = vmatmul.mubr.msk.f32.vlgmr.msra.gmra.mrb[2].mxu1 %vm680_vm1, %v20980_v11  ;;  %v1930_v40 = vrot.slane %v21025_v60, %v20594_v30  ;;  %v1934_v61 = vrot.slane %v21025_v60, %v20601_v36 }
 0x161   : > { %v1848_v1 = vpop.permute.xlu0 %1847  ;;  %v1842_v56 = vpop.permute.xlu1 %1841  ;;  %2397 = vmatprep.mubr.f32.mxu1 %v23863_v14  ;;  %2262 = vmatprep.subr.mxu0 %v1968_v7 }
 0x162   : > { %v21074_v54 = vsel %vm1855_vm3, %v1842_v56, %v1844_v37  ;;  %v21078_v45 = vsel %vm1855_vm3, %v1840_v15, %v1842_v56  ;;  %2263 = vmatpush1.msra.mxu0 %v1967_v48 }
 0x163   : > { %23874 = vst [vmem:[#allocation45_spill] sm:$0xff] %v21074_v54  ;;  %23875 = vst [vmem:[#allocation46_spill] sm:$0xff] %v21078_v45  ;;  %v1969_v10 = vmul.f32 %v1922_v59, %v21078_v45  ;;  %5483 = vrot.lane.b32.xlu0 %v20468_v58, %s20313_s13  ;;  %5477 = vrot.lane.b32.xlu1 %v20424_v34, %s20313_s13  ;;  %v1970_v7 = vmul.f32 %v1926_v16, %v21074_v54 }
 0x164   : > { %19590 = vmatmul.mubr.msk.f32.vlgmr.msra.gmra.mrb[4].mxu0 %vm680_vm1, %v20980_v11  ;;  %v1938_v54 = vrot.slane %v21025_v60, %v20623_v46  ;;  %v1942_v45 = vrot.slane %v21025_v60, %v20626_v49 }
 0x165   : > { %v2563_v15 = vpop.permute.xlu0 %2562  ;;  %v1846_v59 = vpop.permute.xlu1 %1845  ;;  %2468 = vmatprep.mubr.f32.mxu0 %v23863_v14  ;;  %2333 = vmatprep.subr.mxu1 %v1970_v7 }
 0x166   : > { %v21095_v48 = vsel %vm1855_vm3, %v1846_v59, %v1848_v1  ;;  %v21099_v56 = vsel %vm1855_vm3, %v1844_v37, %v1846_v59  ;;  %2334 = vmatpush1.msra.mxu1 %v1969_v10  ;;  %v21114_v37 = vld [vmem:[%s23597_s4 + $0x30] sm:$0xff] }
 0x167   : > { %23876 = vst [vmem:[#allocation47_spill] sm:$0xff] %v21095_v48  ;;  %23877 = vst [vmem:[#allocation48_spill] sm:$0xff] %v21099_v56  ;;  %v1971_v16 = vmul.f32 %v1930_v40, %v21099_v56  ;;  %5487 = vrot.lane.b32.xlu0 %v20480_v0, %s20313_s13  ;;  %5481 = vrot.lane.b32.xlu1 %v20439_v42, %s20313_s13  ;;  %v1972_v7 = vmul.f32 %v1934_v61, %v21095_v48 }
 0x168   : > { %19591 = vmatmul.mubr.msk.f32.vlgmr.msra.gmra.mrb[4].mxu1 %vm680_vm1, %v20980_v11  ;;  %v2641_v56 = vrot.slane %v21114_v37, %v20601_v36 }
 0x169   : > { %v21118_v40 = vpop.permute.xlu0 %2590  ;;  %v1850_v10 = vpop.permute.xlu1 %1849  ;;  %2539 = vmatprep.mubr.f32.mxu1 %v23863_v14  ;;  %2404 = vmatprep.subr.mxu0 %v1972_v7  ;;  %v2621_v7 = vrot.slane %v21114_v37, %v20560_v13 }
 0x16a   : > { %v21124_v61 = vsel %vm1855_vm3, %v1850_v10, %v20930_v55  ;;  %v21128_v60 = vsel %vm1855_vm3, %v1848_v1, %v1850_v10  ;;  %2405 = vmatpush1.msra.mxu0 %v1971_v16  ;;  %v2625_v1 = vrot.slane %v21114_v37, %v20558_v12 }
 0x16b   : > { %23878 = vst [vmem:[#allocation49_spill] sm:$0xff] %v21124_v61  ;;  %23879 = vst [vmem:[#allocation50_spill] sm:$0xff] %v21128_v60  ;;  %v1973_v59 = vmul.f32 %v1938_v54, %v21128_v60  ;;  %5491 = vrot.lane.b32.xlu0 %v20488_v4, %s20313_s13  ;;  %5485 = vrot.lane.b32.xlu1 %v20453_v50, %s20313_s13  ;;  %v1974_v55 = vmul.f32 %v1942_v45, %v21124_v61 }
 0x16c   : > { %19592 = vmatmul.mubr.msk.f32.vlgmr.msra.gmra.mrb[6].mxu0 %vm680_vm1, %v20980_v11  ;;  %v2629_v61 = vrot.slane %v21114_v37, %v20573_v21  ;;  %v2633_v60 = vrot.slane %v21114_v37, %v20571_v19 }
 0x16d   : > { %v2567_v54 = vpop.permute.xlu0 %2566  ;;  %v2593_v16 = vpop.permute.xlu1 %2592  ;;  %2781 = vmatprep.mubr.f32.mxu0 %v23863_v14  ;;  %2475 = vmatprep.subr.mxu1 %v1974_v55 }
 0x16e   : > { %v21147_v10 = vsel %vm2594_vm4, %v21118_v40, %v2593_v16  ;;  %v21151_v48 = vsel %vm2594_vm4, %v2593_v16, %v2563_v15  ;;  %2476 = vmatpush1.msra.mxu1 %v1973_v59  ;;  %v21168_v59 = vld [vmem:[%s23596_s3 + $0x18] sm:$0xff] }
 0x16f   : > { %23880 = vst [vmem:[#allocation51_spill] sm:$0xff] %v21147_v10  ;;  %23881 = vst [vmem:[#allocation52_spill] sm:$0xff] %v21151_v48  ;;  %v2698_v45 = vmul.f32 %v2621_v7, %v21147_v10  ;;  %5495 = vrot.lane.b32.xlu0 %v20494_v6, %s20313_s13  ;;  %5489 = vrot.lane.b32.xlu1 %v20466_v57, %s20313_s13  ;;  %v2699_v55 = vmul.f32 %v2625_v1, %v21151_v48 }
 0x170   : > { %19593 = vmatmul.mubr.msk.f32.vlgmr.msra.gmra.mrb[6].mxu1 %vm680_vm1, %v20980_v11  ;;  %v2637_v48 = vrot.slane %v21114_v37, %v20594_v30 }
 0x171   : > { %v2571_v16 = vpop.permute.xlu0 %2570  ;;  %v2565_v7 = vpop.permute.xlu1 %2564  ;;  %2852 = vmatprep.mubr.f32.mxu1 %v23863_v14  ;;  %2717 = vmatprep.subr.mxu0 %v2699_v55 }
 0x172   : > { %v21173_v10 = vsel %vm2594_vm4, %v2565_v7, %v2567_v54  ;;  %v21177_v1 = vsel %vm2594_vm4, %v2563_v15, %v2565_v7  ;;  %2718 = vmatpush1.msra.mxu0 %v2698_v45 }
 0x173   : > { %23882 = vst [vmem:[#allocation53_spill] sm:$0xff] %v21173_v10  ;;  %23883 = vst [vmem:[#allocation54_spill] sm:$0xff] %v21177_v1  ;;  %v2700_v11 = vmul.f32 %v2629_v61, %v21177_v1  ;;  %6208 = vrot.lane.b32.xlu0 %v20397_v18, %s20314_s20  ;;  %5493 = vrot.lane.b32.xlu1 %v20478_v63, %s20313_s13  ;;  %v2701_v55 = vmul.f32 %v2633_v60, %v21173_v10 }
 0x174   : > { %19597 = vmatmul.mubr.msk.f32.vlgmr.msra.gmra.mrb[0].mxu0 %vm680_vm1, %v21168_v59  ;;  %v2645_v10 = vrot.slane %v21114_v37, %v20623_v46  ;;  %v2649_v1 = vrot.slane %v21114_v37, %v20626_v49 }
 0x175   : > { %v2575_v15 = vpop.permute.xlu0 %2574  ;;  %v2569_v61 = vpop.permute.xlu1 %2568  ;;  %2923 = vmatprep.mubr.f32.mxu0 %v23863_v14  ;;  %2788 = vmatprep.subr.mxu1 %v2701_v55 }
 0x176   : > { %v21194_v45 = vsel %vm2594_vm4, %v2569_v61, %v2571_v16  ;;  %v21198_v7 = vsel %vm2594_vm4, %v2567_v54, %v2569_v61  ;;  %2789 = vmatpush1.msra.mxu1 %v2700_v11  ;;  %v21213_v54 = vld [vmem:[%s23597_s4 + $0x38] sm:$0xff] }
 0x177   : > { %23884 = vst [vmem:[#allocation55_spill] sm:$0xff] %v21194_v45  ;;  %23885 = vst [vmem:[#allocation56_spill] sm:$0xff] %v21198_v7  ;;  %v2702_v60 = vmul.f32 %v2637_v48, %v21198_v7  ;;  %6238 = vrot.lane.b32.xlu0 %v20411_v26, %s20314_s20  ;;  %5497 = vrot.lane.b32.xlu1 %v20395_v17, %s20313_s13  ;;  %v2703_v55 = vmul.f32 %v2641_v56, %v21194_v45 }
 0x178   : > { %19598 = vmatmul.mubr.msk.f32.vlgmr.msra.gmra.mrb[0].mxu1 %vm680_vm1, %v21168_v59  ;;  %v2653_v45 = vrot.slane %v21213_v54, %v20560_v13  ;;  %v2657_v7 = vrot.slane %v21213_v54, %v20558_v12 }
 0x179   : > { %v2579_v48 = vpop.permute.xlu0 %2578  ;;  %v2573_v11 = vpop.permute.xlu1 %2572  ;;  %2994 = vmatprep.mubr.f32.mxu1 %v23863_v14  ;;  %2859 = vmatprep.subr.mxu0 %v2703_v55 }
 0x17a   : > { %v21220_v61 = vsel %vm2594_vm4, %v2573_v11, %v2575_v15  ;;  %v21224_v56 = vsel %vm2594_vm4, %v2571_v16, %v2573_v11  ;;  %2860 = vmatpush1.msra.mxu0 %v2702_v60 }
 0x17b   : > { %23886 = vst [vmem:[#allocation57_spill] sm:$0xff] %v21220_v61  ;;  %23887 = vst [vmem:[#allocation58_spill] sm:$0xff] %v21224_v56  ;;  %v2704_v37 = vmul.f32 %v2645_v10, %v21224_v56  ;;  %6214 = vrot.lane.b32.xlu0 %v20441_v43, %s20314_s20  ;;  %6210 = vrot.lane.b32.xlu1 %v20426_v35, %s20314_s20  ;;  %v2705_v55 = vmul.f32 %v2649_v1, %v21220_v61 }
 0x17c   : > { %19599 = vmatmul.mubr.msk.f32.vlgmr.msra.gmra.mrb[2].mxu0 %vm680_vm1, %v21168_v59  ;;  %v2661_v61 = vrot.slane %v21213_v54, %v20573_v21  ;;  %v2665_v56 = vrot.slane %v21213_v54, %v20571_v19 }
 0x17d   : > { %v2583_v16 = vpop.permute.xlu0 %2582  ;;  %v2577_v10 = vpop.permute.xlu1 %2576  ;;  %3065 = vmatprep.mubr.f32.mxu0 %v23863_v14  ;;  %2930 = vmatprep.subr.mxu1 %v2705_v55 }
 0x17e   : > { %v21241_v60 = vsel %vm2594_vm4, %v2577_v10, %v2579_v48  ;;  %v21245_v11 = vsel %vm2594_vm4, %v2575_v15, %v2577_v10  ;;  %2931 = vmatpush1.msra.mxu1 %v2704_v37 }
 0x17f   : > { %23888 = vst [vmem:[#allocation59_spill] sm:$0xff] %v21241_v60  ;;  %23889 = vst [vmem:[#allocation60_spill] sm:$0xff] %v21245_v11  ;;  %v2706_v1 = vmul.f32 %v2653_v45, %v21245_v11  ;;  %6218 = vrot.lane.b32.xlu0 %v20455_v51, %s20314_s20  ;;  %6212 = vrot.lane.b32.xlu1 %v20409_v25, %s20314_s20  ;;  %v2707_v55 = vmul.f32 %v2657_v7, %v21241_v60 }
 0x180   : > { %19600 = vmatmul.mubr.msk.f32.vlgmr.msra.gmra.mrb[2].mxu1 %vm680_vm1, %v21168_v59  ;;  %v2669_v60 = vrot.slane %v21213_v54, %v20594_v30  ;;  %v2677_v11 = vrot.slane %v21213_v54, %v20623_v46 }
 0x181   : > { %v2587_v15 = vpop.permute.xlu0 %2586  ;;  %v2581_v45 = vpop.permute.xlu1 %2580  ;;  %3136 = vmatprep.mubr.f32.mxu1 %v23863_v14  ;;  %3001 = vmatprep.subr.mxu0 %v2707_v55 }
 0x182   : > { %v21262_v37 = vsel %vm2594_vm4, %v2581_v45, %v2583_v16  ;;  %v21266_v10 = vsel %vm2594_vm4, %v2579_v48, %v2581_v45  ;;  %3002 = vmatpush1.msra.mxu0 %v2706_v1  ;;  %v2673_v48 = vrot.slane %v21213_v54, %v20601_v36 }
 0x183   : > { %23890 = vst [vmem:[#allocation61_spill] sm:$0xff] %v21262_v37  ;;  %23891 = vst [vmem:[#allocation62_spill] sm:$0xff] %v21266_v10  ;;  %v2708_v7 = vmul.f32 %v2661_v61, %v21266_v10  ;;  %6222 = vrot.lane.b32.xlu0 %v20468_v58, %s20314_s20  ;;  %6216 = vrot.lane.b32.xlu1 %v20424_v34, %s20314_s20  ;;  %v2709_v55 = vmul.f32 %v2665_v56, %v21262_v37  ;;  %v21283_v61 = vld [vmem:[%s23597_s4 + $0x40] sm:$0xff] }
 0x184   : > { %19601 = vmatmul.mubr.msk.f32.vlgmr.msra.gmra.mrb[4].mxu0 %vm680_vm1, %v21168_v59 }
 0x185   : > { %v21285_v1 = vpop.permute.xlu0 %3991  ;;  %v2585_v45 = vpop.permute.xlu1 %2584  ;;  %3207 = vmatprep.mubr.f32.mxu0 %v23863_v14  ;;  %3072 = vmatprep.subr.mxu1 %v2709_v55  ;;  %v3315_v55 = vrot.slane %v21283_v61, %v20558_v12 }
 0x186   : > { %v21290_v56 = vsel %vm2594_vm4, %v2585_v45, %v2587_v15  ;;  %v21294_v37 = vsel %vm2594_vm4, %v2583_v16, %v2585_v45  ;;  %3073 = vmatpush1.msra.mxu1 %v2708_v7  ;;  %v3311_v16 = vrot.slane %v21283_v61, %v20560_v13 }
 0x187   : > { %23892 = vst [vmem:[#allocation63_spill] sm:$0xff] %v21290_v56  ;;  %23893 = vst [vmem:[#allocation64_spill] sm:$0xff] %v21294_v37  ;;  %v2710_v10 = vmul.f32 %v2669_v60, %v21294_v37  ;;  %6226 = vrot.lane.b32.xlu0 %v20480_v0, %s20314_s20  ;;  %6220 = vrot.lane.b32.xlu1 %v20439_v42, %s20314_s20  ;;  %v2711_v52 = vmul.f32 %v2673_v48, %v21290_v56 }
 0x188   : > { %19602 = vmatmul.mubr.msk.f32.vlgmr.msra.gmra.mrb[4].mxu1 %vm680_vm1, %v21168_v59  ;;  %v2681_v60 = vrot.slane %v21213_v54, %v20626_v49  ;;  %v3331_v37 = vrot.slane %v21283_v61, %v20601_v36  ;;  %v3389_v39 = vmul.f32 %v3315_v55, %v20397_v18  ;;  %v3327_v55 = vrot.slane %v21283_v61, %v20594_v30 }
 0x189   : > { %v21312_v7 = vpop.permute.xlu0 %4021  ;;  %v2589_v45 = vpop.permute.xlu1 %2588  ;;  %3278 = vmatprep.mubr.f32.mxu1 %v23863_v14  ;;  %3143 = vmatprep.subr.mxu0 %v2711_v52  ;;  %v3388_v52 = vmul.f32 %v3311_v16, %v20411_v26 }
 0x18a   : > { %v21320_v48 = vsel %vm2594_vm4, %v2589_v45, %v21118_v40  ;;  %v21324_v56 = vsel %vm2594_vm4, %v2587_v15, %v2589_v45  ;;  %3144 = vmatpush1.msra.mxu0 %v2710_v10  ;;  %v3393_v10 = vmul.f32 %v3331_v37, %v20424_v34  ;;  %v3319_v45 = vrot.slane %v21283_v61, %v20573_v21  ;;  %v21359_v37 = vld [vmem:[%s23596_s3 + $0x20] sm:$0xff] }
 0x18b   : > { %v2712_v54 = vmul.f32 %v2677_v11, %v21324_v56  ;;  %6230 = vrot.lane.b32.xlu0 %v20488_v4, %s20314_s20  ;;  %6224 = vrot.lane.b32.xlu1 %v20453_v50, %s20314_s20  ;;  %v2713_v40 = vmul.f32 %v2681_v60, %v21320_v48  ;;  %v3323_v11 = vrot.slane %v21283_v61, %v20571_v19 }
 0x18c   : > { %19603 = vmatmul.mubr.msk.f32.vlgmr.msra.gmra.mrb[6].mxu0 %vm680_vm1, %v21168_v59  ;;  %3407 = vmatprep.subr.mxu0 %v3389_v39  ;;  %v3347_v60 = vrot.slane %v21331_v2, %v20558_v12  ;;  %v3339_v39 = vrot.slane %v21283_v61, %v20626_v49  ;;  %v3343_v34 = vrot.slane %v21331_v2, %v20560_v13 }
 0x18d   : > { %v21343_v15 = vpop.permute.xlu0 %3997  ;;  %3408 = vmatpush1.msra.mxu0 %v3388_v52  ;;  %3214 = vmatprep.subr.mxu1 %v2713_v40  ;;  %v21350_v16 = vpop.permute.xlu1 %3993  ;;  %v3391_v52 = vmul.f32 %v3323_v11, %v20409_v25  ;;  %v3335_v40 = vrot.slane %v21283_v61, %v20623_v46 }
 0x18e   : > { %3549 = vmatprep.subr.mxu0 %v3393_v10  ;;  %3215 = vmatpush1.msra.mxu1 %v2712_v54  ;;  %v3392_v54 = vmul.f32 %v3327_v55, %v20441_v43  ;;  %v3390_v10 = vmul.f32 %v3319_v45, %v20426_v35  ;;  %v3397_v61 = vmul.f32 %v3347_v60, %v20453_v50 }
 0x18f   : > { %3471 = vmatprep.mubr.f32.mxu0 %v23863_v14  ;;  %6234 = vrot.lane.b32.xlu0 %v20494_v6, %s20314_s20  ;;  %v3395_v11 = vmul.f32 %v3339_v39, %v20439_v42  ;;  %v3363_v55 = vrot.slane %v21331_v2, %v20601_v36  ;;  %v3351_v45 = vrot.slane %v21331_v2, %v20573_v21 }
 0x190   : > { %6228 = vrot.lane.b32.xlu1 %v20466_v57, %s20314_s20  ;;  %19604 = vmatmul.mubr.msk.f32.vlgmr.msra.gmra.mrb[6].mxu1 %vm680_vm1, %v21168_v59  ;;  %v3355_v59 = vrot.slane %v21331_v2, %v20571_v19  ;;  %v3394_v60 = vmul.f32 %v3335_v40, %v20455_v51  ;;  %v3396_v40 = vmul.f32 %v3343_v34, %v20468_v58 }
 0x191   : > { %v21373_v26 = vpop.permute.xlu0 %4001  ;;  %19608 = vmatmul.mubr.msk.f32.vlgmr.msra.gmra.mrb[0].mxu0 %vm680_vm1, %v21359_v37  ;;  %3478 = vmatprep.subr.mxu1 %v3391_v52  ;;  %v3996_v25 = vpop.permute.xlu1 %3995  ;;  %v3359_v52 = vrot.slane %v21331_v2, %v20594_v30  ;;  %v3401_v50 = vmul.f32 %v3363_v55, %v20478_v63  ;;  %v21417_v51 = vsel %vm4023_vm5, %v21285_v1, %v21350_v16 }
 0x192   : > { %3550 = vmatpush1.msra.mxu0 %v3392_v54  ;;  %3479 = vmatpush1.msra.mxu1 %v3390_v10  ;;  %v3371_v54 = vrot.slane %v21331_v2, %v20626_v49  ;;  %v21399_v10 = vld [vmem:[%s23597_s4 + $0x50] sm:$0xff]  ;;  %23894 = vst [vmem:[#allocation65_spill] sm:$0xff] %v21417_v51  ;;  %v3367_v34 = vrot.slane %v21331_v2, %v20623_v46 }
 0x193   : > { %3691 = vmatprep.subr.mxu0 %v3397_v61  ;;  %3620 = vmatprep.subr.mxu1 %v3395_v11  ;;  %v3399_v61 = vmul.f32 %v3355_v59, %v20466_v57  ;;  %v4054_v42 = vrot.slane %v21399_v10, %v20558_v12  ;;  %v3398_v59 = vmul.f32 %v3351_v45, %v20480_v0 }
 0x194   : > { %3542 = vmatprep.mubr.f32.mxu1 %v23863_v14  ;;  %3613 = vmatprep.mubr.f32.mxu0 %v23863_v14  ;;  %v3400_v55 = vmul.f32 %v3359_v52, %v20488_v4  ;;  %v4050_v57 = vrot.slane %v21399_v10, %v20560_v13  ;;  %v4070_v45 = vrot.slane %v21399_v10, %v20601_v36  ;;  %v21439_v52 = vld [vmem:[%s23597_s4 + $0x58] sm:$0xff] }
 0x195   : > { %v21390_v39 = vpop.permute.xlu0 %4005  ;;  %6232 = vrot.lane.b32.xlu1 %v20478_v63, %s20314_s20  ;;  %19609 = vmatmul.mubr.msk.f32.vlgmr.msra.gmra.mrb[0].mxu1 %vm680_vm1, %v21359_v37  ;;  %v4000_v11 = vpop.permute.xlu1 %3999  ;;  %v3402_v4 = vmul.f32 %v3367_v34, %v20494_v6  ;;  %v4066_v0 = vrot.slane %v21399_v10, %v20594_v30 }
 0x196   : > { %19610 = vmatmul.mubr.msk.f32.vlgmr.msra.gmra.mrb[2].mxu0 %vm680_vm1, %v21359_v37  ;;  %3621 = vmatpush1.msra.mxu1 %v3394_v60  ;;  %v3403_v60 = vmul.f32 %v3371_v54, %v20395_v17  ;;  %v21445_v54 = vsel %vm4023_vm5, %v21312_v7, %v21285_v1  ;;  %v21462_v1 = vsel %vm4023_vm5, %v4000_v11, %v21373_v26 }
 0x197   : > { %3692 = vmatpush1.msra.mxu0 %v3396_v40  ;;  %3762 = vmatprep.subr.mxu1 %v3399_v61  ;;  %23895 = vst [vmem:[#allocation66_spill] sm:$0xff] %v21445_v54  ;;  %v21450_v40 = vsel %vm4023_vm5, %v3996_v25, %v21343_v15  ;;  %v4128_v61 = vmul.f32 %v4054_v42, %v21417_v51 }
 0x198   : > { %3833 = vmatprep.subr.mxu0 %v3401_v50  ;;  %3684 = vmatprep.mubr.f32.mxu1 %v23863_v14  ;;  %v4062_v50 = vrot.slane %v21399_v10, %v20571_v19  ;;  %v4078_v42 = vrot.slane %v21399_v10, %v20626_v49  ;;  %v4086_v51 = vrot.slane %v21439_v52, %v20558_v12 }
 0x199   : > { %v21425_v63 = vpop.permute.xlu0 %4009  ;;  %3755 = vmatprep.mubr.f32.mxu0 %v23863_v14  ;;  %6236 = vrot.lane.b32.xlu1 %v20395_v17, %s20314_s20  ;;  %v4004_v2 = vpop.permute.xlu1 %4003  ;;  %v4058_v17 = vrot.slane %v21399_v10, %v20573_v21  ;;  %v4127_v43 = vmul.f32 %v4050_v57, %v21445_v54 }
 0x19a   : > { %19611 = vmatmul.mubr.msk.f32.vlgmr.msra.gmra.mrb[2].mxu1 %vm680_vm1, %v21359_v37  ;;  %19612 = vmatmul.mubr.msk.f32.vlgmr.msra.gmra.mrb[4].mxu0 %vm680_vm1, %v21359_v37  ;;  %v4130_v34 = vmul.f32 %v4062_v50, %v21450_v40  ;;  %v4082_v50 = vrot.slane %v21439_v52, %v20560_v13 }
 0x19b   : > { %3763 = vmatpush1.msra.mxu1 %v3398_v59  ;;  %3834 = vmatpush1.msra.mxu0 %v3400_v55  ;;  %v21475_v59 = vsel %vm4023_vm5, %v21350_v16, %v3996_v25  ;;  %v4132_v25 = vmul.f32 %v4070_v45, %v21462_v1  ;;  %v4074_v16 = vrot.slane %v21399_v10, %v20623_v46 }
 0x19c   : > { %3904 = vmatprep.subr.mxu1 %v3403_v60  ;;  %4146 = vmatprep.subr.mxu0 %v4128_v61  ;;  %23896 = vst [vmem:[#allocation67_spill] sm:$0xff] %v21475_v59  ;;  %v21483_v60 = vsel %vm4023_vm5, %v21343_v15, %v4000_v11  ;;  %v21500_v15 = vsel %vm4023_vm5, %v4004_v2, %v21390_v39  ;;  %v21505_v11 = vld [vmem:[%s23596_s3 + $0x28] sm:$0xff] }
 0x19d   : > { %v4014_v58 = vpop.permute.xlu0 %4013  ;;  %3826 = vmatprep.mubr.f32.mxu1 %v23863_v14  ;;  %3897 = vmatprep.mubr.f32.mxu0 %v23863_v14  ;;  %v4008_v55 = vpop.permute.xlu1 %4007  ;;  %v4094_v61 = vrot.slane %v21439_v52, %v20571_v19  ;;  %v4129_v54 = vmul.f32 %v4058_v17, %v21475_v59  ;;  %v4134_v17 = vmul.f32 %v4078_v42, %v21500_v15 }
 0x19e   : > { %19613 = vmatmul.mubr.msk.f32.vlgmr.msra.gmra.mrb[4].mxu1 %vm680_vm1, %v21359_v37  ;;  %19614 = vmatmul.mubr.msk.f32.vlgmr.msra.gmra.mrb[6].mxu0 %vm680_vm1, %v21359_v37  ;;  %v21493_v57 = vsel %vm4023_vm5, %v4008_v55, %v21425_v63 }
 0x19f   : > { %23897 = vst [vmem:[#allocation68_spill] sm:$0xff] %v21493_v57  ;;  %3905 = vmatpush1.msra.mxu1 %v3402_v4  ;;  %4147 = vmatpush1.msra.mxu0 %v4127_v43  ;;  %v4136_v10 = vmul.f32 %v4086_v51, %v21493_v57  ;;  %v4131_v43 = vmul.f32 %v4066_v0, %v21483_v60 }
 0x1a0   : > { %4217 = vmatprep.subr.mxu1 %v4130_v34  ;;  %4288 = vmatprep.subr.mxu0 %v4132_v25  ;;  %v21517_v4 = vsel %vm4023_vm5, %v21373_v26, %v4004_v2  ;;  %v21524_v51 = vsel %vm4023_vm5, %v21390_v39, %v4008_v55  ;;  %v4090_v0 = vrot.slane %v21439_v52, %v20573_v21 }
 0x1a1   : > { %v4018_v45 = vpop.permute.xlu0 %4017  ;;  %3968 = vmatprep.mubr.f32.mxu1 %v23863_v14  ;;  %4210 = vmatprep.mubr.f32.mxu0 %v23863_v14  ;;  %v4012_v34 = vpop.permute.xlu1 %4011  ;;  %23898 = vst [vmem:[#allocation69_spill] sm:$0xff] %v21524_v51  ;;  %v4133_v55 = vmul.f32 %v4074_v16, %v21517_v4  ;;  %v4135_v42 = vmul.f32 %v4082_v50, %v21524_v51 }
 0x1a2   : > { %19615 = vmatmul.mubr.msk.f32.vlgmr.msra.gmra.mrb[6].mxu1 %vm680_vm1, %v21359_v37  ;;  %19619 = vmatmul.mubr.msk.f32.vlgmr.msra.gmra.mrb[0].mxu0 %vm680_vm1, %v21505_v11  ;;  %v21533_v26 = vsel %vm4023_vm5, %v4012_v34, %v4014_v58  ;;  %v4102_v37 = vrot.slane %v21439_v52, %v20601_v36 }
 0x1a3   : > { %23899 = vst [vmem:[#allocation70_spill] sm:$0xff] %v21533_v26  ;;  %4218 = vmatpush1.msra.mxu1 %v4129_v54  ;;  %4289 = vmatpush1.msra.mxu0 %v4131_v43  ;;  %v4138_v2 = vmul.f32 %v4094_v61, %v21533_v26  ;;  %v4098_v54 = vrot.slane %v21439_v52, %v20594_v30 }
 0x1a4   : > { %4359 = vmatprep.subr.mxu1 %v4134_v17  ;;  %4430 = vmatprep.subr.mxu0 %v4136_v10  ;;  %v21549_v10 = vsel %vm4023_vm5, %v21425_v63, %v4012_v34  ;;  %v4106_v63 = vrot.slane %v21439_v52, %v20623_v46  ;;  %v4110_v34 = vrot.slane %v21439_v52, %v20626_v49 }
 0x1a5   : > { %v4731_v39 = vpop.permute.xlu0 %4730  ;;  %4281 = vmatprep.mubr.f32.mxu1 %v23863_v14  ;;  %4352 = vmatprep.mubr.f32.mxu0 %v23863_v14  ;;  %v4016_v25 = vpop.permute.xlu1 %4015  ;;  %23900 = vst [vmem:[#allocation71_spill] sm:$0xff] %v21549_v10  ;;  %v4137_v17 = vmul.f32 %v4090_v0, %v21549_v10 }
 0x1a6   : > { %19620 = vmatmul.mubr.msk.f32.vlgmr.msra.gmra.mrb[0].mxu1 %vm680_vm1, %v21505_v11  ;;  %19621 = vmatmul.mubr.msk.f32.vlgmr.msra.gmra.mrb[2].mxu0 %vm680_vm1, %v21505_v11  ;;  %v21557_v16 = vsel %vm4023_vm5, %v4016_v25, %v4018_v45  ;;  %v21561_v50 = vsel %vm4023_vm5, %v4014_v58, %v4016_v25 }
 0x1a7   : > { %23901 = vst [vmem:[#allocation72_spill] sm:$0xff] %v21557_v16  ;;  %23902 = vst [vmem:[#allocation73_spill] sm:$0xff] %v21561_v50  ;;  %4360 = vmatpush1.msra.mxu1 %v4133_v55  ;;  %4431 = vmatpush1.msra.mxu0 %v4135_v42  ;;  %v4140_v43 = vmul.f32 %v4102_v37, %v21557_v16  ;;  %v4139_v58 = vmul.f32 %v4098_v54, %v21561_v50  ;;  %v21576_v55 = vld [vmem:[%s23597_s4 + $0x60] sm:$0xff] }
 0x1a8   : > { %4501 = vmatprep.subr.mxu1 %v4138_v2  ;;  %4423 = vmatprep.mubr.f32.mxu1 %v23863_v14  ;;  %v4793_v37 = vrot.slane %v21576_v55, %v20558_v12  ;;  %v4789_v54 = vrot.slane %v21576_v55, %v20560_v13 }
 0x1a9   : > { %v21566_v61 = vpop.permute.xlu0 %4760  ;;  %v4020_v42 = vpop.permute.xlu1 %4019  ;;  %4494 = vmatprep.mubr.f32.mxu0 %v23863_v14  ;;  %4572 = vmatprep.subr.mxu0 %v4140_v43 }
 0x1aa   : > { %19622 = vmatmul.mubr.msk.f32.vlgmr.msra.gmra.mrb[2].mxu1 %vm680_vm1, %v21505_v11  ;;  %v21585_v52 = vsel %vm4023_vm5, %v4020_v42, %v21312_v7  ;;  %v21589_v0 = vsel %vm4023_vm5, %v4018_v45, %v4020_v42  ;;  %19623 = vmatmul.mubr.msk.f32.vlgmr.msra.gmra.mrb[4].mxu0 %vm680_vm1, %v21505_v11  ;;  %v21603_v45 = vsel %vm4762_vm6, %v21566_v61, %v4731_v39 }
 0x1ab   : > { %23903 = vst [vmem:[#allocation74_spill] sm:$0xff] %v21585_v52  ;;  %23904 = vst [vmem:[#allocation75_spill] sm:$0xff] %v21589_v0  ;;  %4502 = vmatpush1.msra.mxu1 %v4137_v17  ;;  %v4141_v2 = vmul.f32 %v4106_v63, %v21589_v0  ;;  %4565 = vmatprep.mubr.f32.mxu1 %v23863_v14  ;;  %v4142_v7 = vmul.f32 %v4110_v34, %v21585_v52 }
 0x1ac   : > { %23905 = vst [vmem:[#allocation76_spill] sm:$0xff] %v21603_v45  ;;  %4573 = vmatpush1.msra.mxu0 %v4139_v58  ;;  %4636 = vmatprep.mubr.f32.mxu0 %v23863_v14  ;;  %v4797_v34 = vrot.slane %v21576_v55, %v20573_v21  ;;  %v4801_v58 = vrot.slane %v21576_v55, %v20571_v19 }
 0x1ad   : > { %v4737_v25 = vpop.permute.xlu0 %4736  ;;  %v4733_v63 = vpop.permute.xlu1 %4732  ;;  %4643 = vmatprep.subr.mxu1 %v4142_v7  ;;  %v4866_v42 = vmul.f32 %v4789_v54, %v21603_v45  ;;  %v4809_v52 = vrot.slane %v21576_v55, %v20601_v36 }
 0x1ae   : > { %v21608_v43 = vsel %vm4762_vm6, %v4731_v39, %v4733_v63  ;;  %19624 = vmatmul.mubr.msk.f32.vlgmr.msra.gmra.mrb[4].mxu1 %vm680_vm1, %v21505_v11  ;;  %19625 = vmatmul.mubr.msk.f32.vlgmr.msra.gmra.mrb[6].mxu0 %vm680_vm1, %v21505_v11 }
 0x1af   : > { %23906 = vst [vmem:[#allocation77_spill] sm:$0xff] %v21608_v43  ;;  %4644 = vmatpush1.msra.mxu1 %v4141_v2  ;;  %v4867_v17 = vmul.f32 %v4793_v37, %v21608_v43  ;;  %4707 = vmatprep.mubr.f32.mxu1 %v23863_v14  ;;  %v21625_v2 = vld [vmem:[%s23596_s3 + $0x30] sm:$0xff]  ;;  %v4805_v43 = vrot.slane %v21576_v55, %v20594_v30 }
 0x1b0   : > { %4949 = vmatprep.mubr.f32.mxu0 %v23863_v14 }
 0x1b1   : > { %v4741_v7 = vpop.permute.xlu0 %4740  ;;  %v4735_v39 = vpop.permute.xlu1 %4734  ;;  %4885 = vmatprep.subr.mxu0 %v4867_v17 }
 0x1b2   : > { %v21629_v37 = vsel %vm4762_vm6, %v4735_v39, %v4737_v25  ;;  %v21633_v54 = vsel %vm4762_vm6, %v4733_v63, %v4735_v39  ;;  %4886 = vmatpush1.msra.mxu0 %v4866_v42  ;;  %19626 = vmatmul.mubr.msk.f32.vlgmr.msra.gmra.mrb[6].mxu1 %vm680_vm1, %v21505_v11  ;;  %v4813_v42 = vrot.slane %v21576_v55, %v20623_v46 }
 0x1b3   : > { %23907 = vst [vmem:[#allocation78_spill] sm:$0xff] %v21629_v37  ;;  %23908 = vst [vmem:[#allocation79_spill] sm:$0xff] %v21633_v54  ;;  %v4868_v17 = vmul.f32 %v4797_v34, %v21633_v54  ;;  %v4869_v45 = vmul.f32 %v4801_v58, %v21629_v37  ;;  %5020 = vmatprep.mubr.f32.mxu1 %v23863_v14  ;;  %19630 = vmatmul.mubr.msk.f32.vlgmr.msra.gmra.mrb[0].mxu0 %vm680_vm1, %v21625_v2 }
 0x1b4   : > { %5091 = vmatprep.mubr.f32.mxu0 %v23863_v14 }
 0x1b5   : > { %v4745_v16 = vpop.permute.xlu0 %4744  ;;  %4956 = vmatprep.subr.mxu1 %v4869_v45  ;;  %v4739_v63 = vpop.permute.xlu1 %4738  ;;  %v4817_v45 = vrot.slane %v21576_v55, %v20626_v49 }
 0x1b6   : > { %v21649_v11 = vsel %vm4762_vm6, %v4739_v63, %v4741_v7  ;;  %v21653_v34 = vsel %vm4762_vm6, %v4737_v25, %v4739_v63  ;;  %4957 = vmatpush1.msra.mxu1 %v4868_v17  ;;  %v19629_v25 = vld [vmem:[%s23597_s4 + $0x68] sm:$0xff] }
 0x1b7   : > { %23909 = vst [vmem:[#allocation80_spill] sm:$0xff] %v21649_v11  ;;  %23910 = vst [vmem:[#allocation81_spill] sm:$0xff] %v21653_v34  ;;  %v4870_v58 = vmul.f32 %v4805_v43, %v21653_v34  ;;  %v4871_v39 = vmul.f32 %v4809_v52, %v21649_v11  ;;  %19631 = vmatmul.mubr.msk.f32.vlgmr.msra.gmra.mrb[0].mxu1 %vm680_vm1, %v21625_v2  ;;  %v4821_v11 = vrot.slane %v19629_v25, %v20560_v13 }
 0x1b8   : > { %5162 = vmatprep.mubr.f32.mxu1 %v23863_v14  ;;  %v4825_v34 = vrot.slane %v19629_v25, %v20558_v12 }
 0x1b9   : > { %v4749_v37 = vpop.permute.xlu0 %4748  ;;  %v4743_v17 = vpop.permute.xlu1 %4742  ;;  %5027 = vmatprep.subr.mxu0 %v4871_v39 }
 0x1ba   : > { %v21669_v43 = vsel %vm4762_vm6, %v4743_v17, %v4745_v16  ;;  %v21673_v52 = vsel %vm4762_vm6, %v4741_v7, %v4743_v17  ;;  %5028 = vmatpush1.msra.mxu0 %v4870_v58 }
 0x1bb   : > { %23911 = vst [vmem:[#allocation82_spill] sm:$0xff] %v21669_v43  ;;  %23912 = vst [vmem:[#allocation83_spill] sm:$0xff] %v21673_v52  ;;  %v4872_v55 = vmul.f32 %v4813_v42, %v21673_v52  ;;  %v4873_v63 = vmul.f32 %v4817_v45, %v21669_v43  ;;  %19632 = vmatmul.mubr.msk.f32.vlgmr.msra.gmra.mrb[2].mxu0 %vm680_vm1, %v21625_v2  ;;  %v4829_v45 = vrot.slane %v19629_v25, %v20573_v21 }
 0x1bc   : > { %5233 = vmatprep.mubr.f32.mxu0 %v23863_v14  ;;  %v4833_v43 = vrot.slane %v19629_v25, %v20571_v19 }
 0x1bd   : > { %v4753_v39 = vpop.permute.xlu0 %4752  ;;  %5098 = vmatprep.subr.mxu1 %v4873_v63  ;;  %v4747_v54 = vpop.permute.xlu1 %4746 }
 0x1be   : > { %v21684_v7 = vsel %vm4762_vm6, %v4747_v54, %v4749_v37  ;;  %v21688_v58 = vsel %vm4762_vm6, %v4745_v16, %v4747_v54  ;;  %5099 = vmatpush1.msra.mxu1 %v4872_v55  ;;  %v4837_v55 = vrot.slane %v19629_v25, %v20594_v30 }
 0x1bf   : > { %23913 = vst [vmem:[#allocation84_spill] sm:$0xff] %v21684_v7  ;;  %23914 = vst [vmem:[#allocation85_spill] sm:$0xff] %v21688_v58  ;;  %v4874_v42 = vmul.f32 %v4821_v11, %v21688_v58  ;;  %v4875_v17 = vmul.f32 %v4825_v34, %v21684_v7  ;;  %19633 = vmatmul.mubr.msk.f32.vlgmr.msra.gmra.mrb[2].mxu1 %vm680_vm1, %v21625_v2  ;;  %v4841_v7 = vrot.slane %v19629_v25, %v20601_v36 }
 0x1c0   : > { %5304 = vmatprep.mubr.f32.mxu1 %v23863_v14 }
 0x1c1   : > { %v4757_v63 = vpop.permute.xlu0 %4756  ;;  %v4751_v52 = vpop.permute.xlu1 %4750  ;;  %5169 = vmatprep.subr.mxu0 %v4875_v17 }
 0x1c2   : > { %v21699_v16 = vsel %vm4762_vm6, %v4751_v52, %v4753_v39  ;;  %v21703_v54 = vsel %vm4762_vm6, %v4749_v37, %v4751_v52  ;;  %5170 = vmatpush1.msra.mxu0 %v4874_v42  ;;  %v4845_v42 = vrot.slane %v19629_v25, %v20623_v46 }
 0x1c3   : > { %23915 = vst [vmem:[#allocation86_spill] sm:$0xff] %v21699_v16  ;;  %23916 = vst [vmem:[#allocation87_spill] sm:$0xff] %v21703_v54  ;;  %v4876_v11 = vmul.f32 %v4829_v45, %v21703_v54  ;;  %v4877_v34 = vmul.f32 %v4833_v43, %v21699_v16  ;;  %19634 = vmatmul.mubr.msk.f32.vlgmr.msra.gmra.mrb[4].mxu0 %vm680_vm1, %v21625_v2  ;;  %v4849_v16 = vrot.slane %v19629_v25, %v20626_v49 }
 0x1c4   : > { %5375 = vmatprep.mubr.f32.mxu0 %v23863_v14 }
 0x1c5   : > { %v5470_v17 = vpop.permute.xlu0 %5469  ;;  %5240 = vmatprep.subr.mxu1 %v4877_v34  ;;  %v4755_v58 = vpop.permute.xlu1 %4754 }
 0x1c6   : > { %v21714_v37 = vsel %vm4762_vm6, %v4755_v58, %v4757_v63  ;;  %v21718_v52 = vsel %vm4762_vm6, %v4753_v39, %v4755_v58  ;;  %5241 = vmatpush1.msra.mxu1 %v4876_v11  ;;  %v19639_v39 = vld [vmem:[%s23597_s4 + $0x70] sm:$0xff] }
 0x1c7   : > { %23917 = vst [vmem:[#allocation88_spill] sm:$0xff] %v21714_v37  ;;  %23918 = vst [vmem:[#allocation89_spill] sm:$0xff] %v21718_v52  ;;  %v4878_v43 = vmul.f32 %v4837_v55, %v21718_v52  ;;  %v4879_v45 = vmul.f32 %v4841_v7, %v21714_v37  ;;  %19635 = vmatmul.mubr.msk.f32.vlgmr.msra.gmra.mrb[4].mxu1 %vm680_vm1, %v21625_v2  ;;  %v5532_v37 = vrot.slane %v19639_v39, %v20558_v12 }
 0x1c8   : > { %5446 = vmatprep.mubr.f32.mxu1 %v23863_v14 }
 0x1c9   : > { %v21726_v34 = vpop.permute.xlu0 %5499  ;;  %v4759_v58 = vpop.permute.xlu1 %4758  ;;  %5311 = vmatprep.subr.mxu0 %v4879_v45  ;;  %v5528_v45 = vrot.slane %v19639_v39, %v20560_v13 }
 0x1ca   : > { %v21736_v7 = vsel %vm4762_vm6, %v4759_v58, %v21566_v61  ;;  %v21740_v25 = vsel %vm4762_vm6, %v4757_v63, %v4759_v58  ;;  %5312 = vmatpush1.msra.mxu0 %v4878_v43  ;;  %v21752_v61 = vsel %vm5501_vm7, %v21726_v34, %v5470_v17  ;;  %v5536_v43 = vrot.slane %v19639_v39, %v20573_v21 }
 0x1cb   : > { %23919 = vst [vmem:[#allocation90_spill] sm:$0xff] %v21736_v7  ;;  %23920 = vst [vmem:[#allocation91_spill] sm:$0xff] %v21740_v25  ;;  %v4880_v11 = vmul.f32 %v4845_v42, %v21740_v25  ;;  %v4881_v55 = vmul.f32 %v4849_v16, %v21736_v7  ;;  %19636 = vmatmul.mubr.msk.f32.vlgmr.msra.gmra.mrb[6].mxu0 %vm680_vm1, %v21625_v2  ;;  %v5540_v58 = vrot.slane %v19639_v39, %v20571_v19 }
 0x1cc   : > { %5688 = vmatprep.mubr.f32.mxu0 %v23863_v14  ;;  %23921 = vst [vmem:[#allocation92_spill] sm:$0xff] %v21752_v61  ;;  %v5605_v7 = vmul.f32 %v5528_v45, %v21752_v61  ;;  %v5544_v61 = vrot.slane %v19639_v39, %v20594_v30 }
 0x1cd   : > { %v5476_v52 = vpop.permute.xlu0 %5475  ;;  %5382 = vmatprep.subr.mxu1 %v4881_v55  ;;  %v5472_v63 = vpop.permute.xlu1 %5471  ;;  %v21767_v55 = vld [vmem:[%s23596_s3 + $0x38] sm:$0xff] }
 0x1ce   : > { %v21756_v16 = vsel %vm5501_vm7, %v5470_v17, %v5472_v63  ;;  %5383 = vmatpush1.msra.mxu1 %v4880_v11 }
 0x1cf   : > { %23922 = vst [vmem:[#allocation93_spill] sm:$0xff] %v21756_v16  ;;  %v5606_v42 = vmul.f32 %v5532_v37, %v21756_v16  ;;  %19637 = vmatmul.mubr.msk.f32.vlgmr.msra.gmra.mrb[6].mxu1 %vm680_vm1, %v21625_v2  ;;  %v5548_v16 = vrot.slane %v19639_v39, %v20601_v36 }
 0x1d0   : > { %5759 = vmatprep.mubr.f32.mxu1 %v23863_v14 }
 0x1d1   : > { %v5480_v25 = vpop.permute.xlu0 %5479  ;;  %v5474_v17 = vpop.permute.xlu1 %5473  ;;  %5624 = vmatprep.subr.mxu0 %v5606_v42 }
 0x1d2   : > { %v21772_v37 = vsel %vm5501_vm7, %v5474_v17, %v5476_v52  ;;  %v21776_v11 = vsel %vm5501_vm7, %v5472_v63, %v5474_v17  ;;  %5625 = vmatpush1.msra.mxu0 %v5605_v7 }
 0x1d3   : > { %23923 = vst [vmem:[#allocation94_spill] sm:$0xff] %v21772_v37  ;;  %23924 = vst [vmem:[#allocation95_spill] sm:$0xff] %v21776_v11  ;;  %v5607_v2 = vmul.f32 %v5536_v43, %v21776_v11  ;;  %v5608_v45 = vmul.f32 %v5540_v58, %v21772_v37  ;;  %19641 = vmatmul.mubr.msk.f32.vlgmr.msra.gmra.mrb[0].mxu0 %vm680_vm1, %v21767_v55  ;;  %v5552_v58 = vrot.slane %v19639_v39, %v20623_v46  ;;  %v19640_v11 = vld [vmem:[%s23597_s4 + $0x78] sm:$0xff] }
 0x1d4   : > { %5830 = vmatprep.mubr.f32.mxu0 %v23863_v14  ;;  %v5556_v37 = vrot.slane %v19639_v39, %v20626_v49 }
 0x1d5   : > { %v5484_v42 = vpop.permute.xlu0 %5483  ;;  %5695 = vmatprep.subr.mxu1 %v5608_v45  ;;  %v5478_v54 = vpop.permute.xlu1 %5477 }
 0x1d6   : > { %v21787_v63 = vsel %vm5501_vm7, %v5478_v54, %v5480_v25  ;;  %v21791_v7 = vsel %vm5501_vm7, %v5476_v52, %v5478_v54  ;;  %5696 = vmatpush1.msra.mxu1 %v5607_v2  ;;  %v5560_v2 = vrot.slane %v19640_v11, %v20560_v13 }
 0x1d7   : > { %23925 = vst [vmem:[#allocation96_spill] sm:$0xff] %v21787_v63  ;;  %23926 = vst [vmem:[#allocation97_spill] sm:$0xff] %v21791_v7  ;;  %v5609_v43 = vmul.f32 %v5544_v61, %v21791_v7  ;;  %v5610_v17 = vmul.f32 %v5548_v16, %v21787_v63  ;;  %19642 = vmatmul.mubr.msk.f32.vlgmr.msra.gmra.mrb[0].mxu1 %vm680_vm1, %v21767_v55  ;;  %v5564_v63 = vrot.slane %v19640_v11, %v20558_v12 }
 0x1d8   : > { %5901 = vmatprep.mubr.f32.mxu1 %v23863_v14 }
 0x1d9   : > { %v5488_v45 = vpop.permute.xlu0 %5487  ;;  %v5482_v54 = vpop.permute.xlu1 %5481  ;;  %5766 = vmatprep.subr.mxu0 %v5610_v17 }
 0x1da   : > { %v21805_v52 = vsel %vm5501_vm7, %v5482_v54, %v5484_v42  ;;  %v21809_v61 = vsel %vm5501_vm7, %v5480_v25, %v5482_v54  ;;  %5767 = vmatpush1.msra.mxu0 %v5609_v43 }
 0x1db   : > { %23927 = vst [vmem:[#allocation98_spill] sm:$0xff] %v21805_v52  ;;  %23928 = vst [vmem:[#allocation99_spill] sm:$0xff] %v21809_v61  ;;  %v5611_v39 = vmul.f32 %v5552_v58, %v21809_v61  ;;  %v5612_v16 = vmul.f32 %v5556_v37, %v21805_v52  ;;  %19643 = vmatmul.mubr.msk.f32.vlgmr.msra.gmra.mrb[2].mxu0 %vm680_vm1, %v21767_v55  ;;  %v5568_v58 = vrot.slane %v19640_v11, %v20573_v21 }
 0x1dc   : > { %5972 = vmatprep.mubr.f32.mxu0 %v23863_v14  ;;  %v5572_v52 = vrot.slane %v19640_v11, %v20571_v19 }
 0x1dd   : > { %v5492_v17 = vpop.permute.xlu0 %5491  ;;  %5837 = vmatprep.subr.mxu1 %v5612_v16  ;;  %v5486_v7 = vpop.permute.xlu1 %5485 }
 0x1de   : > { %v21820_v25 = vsel %vm5501_vm7, %v5486_v7, %v5488_v45  ;;  %v21824_v43 = vsel %vm5501_vm7, %v5484_v42, %v5486_v7  ;;  %5838 = vmatpush1.msra.mxu1 %v5611_v39 }
 0x1df   : > { %23929 = vst [vmem:[#allocation100_spill] sm:$0xff] %v21820_v25  ;;  %23930 = vst [vmem:[#allocation101_spill] sm:$0xff] %v21824_v43  ;;  %v5613_v37 = vmul.f32 %v5560_v2, %v21824_v43  ;;  %v5614_v54 = vmul.f32 %v5564_v63, %v21820_v25  ;;  %19644 = vmatmul.mubr.msk.f32.vlgmr.msra.gmra.mrb[2].mxu1 %vm680_vm1, %v21767_v55  ;;  %v5576_v2 = vrot.slane %v19640_v11, %v20594_v30 }
 0x1e0   : > { %6043 = vmatprep.mubr.f32.mxu1 %v23863_v14  ;;  %v5580_v25 = vrot.slane %v19640_v11, %v20601_v36 }
 0x1e1   : > { %v5496_v16 = vpop.permute.xlu0 %5495  ;;  %v5490_v61 = vpop.permute.xlu1 %5489  ;;  %5908 = vmatprep.subr.mxu0 %v5614_v54 }
 0x1e2   : > { %v21835_v42 = vsel %vm5501_vm7, %v5490_v61, %v5492_v17  ;;  %v21839_v7 = vsel %vm5501_vm7, %v5488_v45, %v5490_v61  ;;  %5909 = vmatpush1.msra.mxu0 %v5613_v37  ;;  %v5584_v37 = vrot.slane %v19640_v11, %v20623_v46 }
 0x1e3   : > { %23931 = vst [vmem:[#allocation102_spill] sm:$0xff] %v21835_v42  ;;  %23932 = vst [vmem:[#allocation103_spill] sm:$0xff] %v21839_v7  ;;  %v5615_v63 = vmul.f32 %v5568_v58, %v21839_v7  ;;  %v5616_v39 = vmul.f32 %v5572_v52, %v21835_v42  ;;  %19645 = vmatmul.mubr.msk.f32.vlgmr.msra.gmra.mrb[4].mxu0 %vm680_vm1, %v21767_v55  ;;  %v5588_v42 = vrot.slane %v19640_v11, %v20626_v49 }
 0x1e4   : > { %6114 = vmatprep.mubr.f32.mxu0 %v23863_v14 }
 0x1e5   : > { %v6209_v54 = vpop.permute.xlu0 %6208  ;;  %5979 = vmatprep.subr.mxu1 %v5616_v39  ;;  %v5494_v43 = vpop.permute.xlu1 %5493 }
 0x1e6   : > { %v21850_v45 = vsel %vm5501_vm7, %v5494_v43, %v5496_v16  ;;  %v21854_v61 = vsel %vm5501_vm7, %v5492_v17, %v5494_v43  ;;  %5980 = vmatpush1.msra.mxu1 %v5615_v63  ;;  %v19650_v17 = vld [vmem:[%s23597_s4 + $0x80] sm:$0xff] }
 0x1e7   : > { %23933 = vst [vmem:[#allocation104_spill] sm:$0xff] %v21850_v45  ;;  %23934 = vst [vmem:[#allocation105_spill] sm:$0xff] %v21854_v61  ;;  %v5617_v52 = vmul.f32 %v5576_v2, %v21854_v61  ;;  %v5618_v58 = vmul.f32 %v5580_v25, %v21850_v45  ;;  %19646 = vmatmul.mubr.msk.f32.vlgmr.msra.gmra.mrb[4].mxu1 %vm680_vm1, %v21767_v55  ;;  %v6271_v45 = vrot.slane %v19650_v17, %v20558_v12 }
 0x1e8   : > { %6185 = vmatprep.mubr.f32.mxu1 %v23863_v14 }
 0x1e9   : > { %v21862_v39 = vpop.permute.xlu0 %6238  ;;  %v5498_v43 = vpop.permute.xlu1 %5497  ;;  %6050 = vmatprep.subr.mxu0 %v5618_v58  ;;  %v6267_v58 = vrot.slane %v19650_v17, %v20560_v13 }
 0x1ea   : > { %v21872_v25 = vsel %vm5501_vm7, %v5498_v43, %v21726_v34  ;;  %v21876_v11 = vsel %vm5501_vm7, %v5496_v16, %v5498_v43  ;;  %6051 = vmatpush1.msra.mxu0 %v5617_v52  ;;  %v21888_v34 = vsel %vm6240_vm8, %v21862_v39, %v6209_v54  ;;  %v6275_v52 = vrot.slane %v19650_v17, %v20573_v21 }
 0x1eb   : > { %23935 = vst [vmem:[#allocation106_spill] sm:$0xff] %v21872_v25  ;;  %23936 = vst [vmem:[#allocation107_spill] sm:$0xff] %v21876_v11  ;;  %v5619_v63 = vmul.f32 %v5584_v37, %v21876_v11  ;;  %v5620_v2 = vmul.f32 %v5588_v42, %v21872_v25  ;;  %19647 = vmatmul.mubr.msk.f32.vlgmr.msra.gmra.mrb[6].mxu0 %vm680_vm1, %v21767_v55  ;;  %v6279_v43 = vrot.slane %v19650_v17, %v20571_v19 }
 0x1ec   : > { %6427 = vmatprep.mubr.f32.mxu0 %v23863_v14  ;;  %23937 = vst [vmem:[#allocation108_spill] sm:$0xff] %v21888_v34  ;;  %v6344_v25 = vmul.f32 %v6267_v58, %v21888_v34  ;;  %v6283_v34 = vrot.slane %v19650_v17, %v20594_v30 }
 0x1ed   : > { %v6215_v61 = vpop.permute.xlu0 %6214  ;;  %6121 = vmatprep.subr.mxu1 %v5620_v2  ;;  %v6211_v16 = vpop.permute.xlu1 %6210  ;;  %v21903_v2 = vld [vmem:[%s23596_s3 + $0x40] sm:$0xff] }
 0x1ee   : > { %v21892_v42 = vsel %vm6240_vm8, %v6209_v54, %v6211_v16  ;;  %6122 = vmatpush1.msra.mxu1 %v5619_v63 }
 0x1ef   : > { %23938 = vst [vmem:[#allocation109_spill] sm:$0xff] %v21892_v42  ;;  %v6345_v37 = vmul.f32 %v6271_v45, %v21892_v42  ;;  %19648 = vmatmul.mubr.msk.f32.vlgmr.msra.gmra.mrb[6].mxu1 %vm680_vm1, %v21767_v55  ;;  %v6287_v42 = vrot.slane %v19650_v17, %v20601_v36 }
 0x1f0   : > { %6498 = vmatprep.mubr.f32.mxu1 %v23863_v14 }
 0x1f1   : > { %v6219_v11 = vpop.permute.xlu0 %6218  ;;  %v6213_v54 = vpop.permute.xlu1 %6212  ;;  %6363 = vmatprep.subr.mxu0 %v6345_v37 }
 0x1f2   : > { %v21908_v45 = vsel %vm6240_vm8, %v6213_v54, %v6215_v61  ;;  %v21912_v63 = vsel %vm6240_vm8, %v6211_v16, %v6213_v54  ;;  %6364 = vmatpush1.msra.mxu0 %v6344_v25 }
 0x1f3   : > { %23939 = vst [vmem:[#allocation110_spill] sm:$0xff] %v21908_v45  ;;  %23940 = vst [vmem:[#allocation111_spill] sm:$0xff] %v21912_v63  ;;  %v6346_v55 = vmul.f32 %v6275_v52, %v21912_v63  ;;  %v6347_v58 = vmul.f32 %v6279_v43, %v21908_v45  ;;  %19652 = vmatmul.mubr.msk.f32.vlgmr.msra.gmra.mrb[0].mxu0 %vm680_vm1, %v21903_v2  ;;  %v6291_v43 = vrot.slane %v19650_v17, %v20623_v46 }
 0x1f4   : > { %6569 = vmatprep.mubr.f32.mxu0 %v23863_v14  ;;  %v6295_v45 = vrot.slane %v19650_v17, %v20626_v49 }
 0x1f5   : > { %v6223_v37 = vpop.permute.xlu0 %6222  ;;  %6434 = vmatprep.subr.mxu1 %v6347_v58  ;;  %v6217_v7 = vpop.permute.xlu1 %6216  ;;  %v21938_v58 = vld [vmem:[%s23597_s4 + $0x88] sm:$0xff] }
 0x1f6   : > { %v21923_v16 = vsel %vm6240_vm8, %v6217_v7, %v6219_v11  ;;  %v21927_v25 = vsel %vm6240_vm8, %v6215_v61, %v6217_v7  ;;  %6435 = vmatpush1.msra.mxu1 %v6346_v55  ;;  %v6327_v63 = vrot.slane %v21938_v58, %v20626_v49 }
 0x1f7   : > { %23941 = vst [vmem:[#allocation112_spill] sm:$0xff] %v21923_v16  ;;  %23942 = vst [vmem:[#allocation113_spill] sm:$0xff] %v21927_v25  ;;  %v6348_v52 = vmul.f32 %v6283_v34, %v21927_v25  ;;  %v6349_v54 = vmul.f32 %v6287_v42, %v21923_v16  ;;  %19653 = vmatmul.mubr.msk.f32.vlgmr.msra.gmra.mrb[0].mxu1 %vm680_vm1, %v21903_v2  ;;  %v6299_v16 = vrot.slane %v21938_v58, %v20560_v13 }
 0x1f8   : > { %6640 = vmatprep.mubr.f32.mxu1 %v23863_v14 }
 0x1f9   : > { %v6221_v7 = vpop.permute.xlu1 %6220  ;;  %6505 = vmatprep.subr.mxu0 %v6349_v54  ;;  %v6227_v17 = vpop.permute.xlu0 %6226  ;;  %v6303_v54 = vrot.slane %v21938_v58, %v20558_v12 }
 0x1fa   : > { %v21943_v61 = vsel %vm6240_vm8, %v6221_v7, %v6223_v37  ;;  %v21947_v34 = vsel %vm6240_vm8, %v6219_v11, %v6221_v7  ;;  %6506 = vmatpush1.msra.mxu0 %v6348_v52 }
 0x1fb   : > { %23943 = vst [vmem:[#allocation114_spill] sm:$0xff] %v21943_v61  ;;  %23944 = vst [vmem:[#allocation115_spill] sm:$0xff] %v21947_v34  ;;  %v6350_v42 = vmul.f32 %v6291_v43, %v21947_v34  ;;  %v6351_v55 = vmul.f32 %v6295_v45, %v21943_v61  ;;  %19654 = vmatmul.mubr.msk.f32.vlgmr.msra.gmra.mrb[2].mxu0 %vm680_vm1, %v21903_v2  ;;  %v6311_v61 = vrot.slane %v21938_v58, %v20571_v19 }
 0x1fc   : > { %6711 = vmatprep.mubr.f32.mxu0 %v23863_v14 }
 0x1fd   : > { %6576 = vmatprep.subr.mxu1 %v6351_v55  ;;  %v6225_v11 = vpop.permute.xlu1 %6224  ;;  %v6307_v55 = vrot.slane %v21938_v58, %v20573_v21  ;;  %v6231_v34 = vpop.permute.xlu0 %6230 }
 0x1fe   : > { %v21960_v52 = vsel %vm6240_vm8, %v6225_v11, %v6227_v17  ;;  %v21964_v45 = vsel %vm6240_vm8, %v6223_v37, %v6225_v11  ;;  %6577 = vmatpush1.msra.mxu1 %v6350_v42 }
 0x1ff   : > { %23945 = vst [vmem:[#allocation116_spill] sm:$0xff] %v21960_v52  ;;  %23946 = vst [vmem:[#allocation117_spill] sm:$0xff] %v21964_v45  ;;  %v6352_v43 = vmul.f32 %v6299_v16, %v21964_v45  ;;  %v6353_v7 = vmul.f32 %v6303_v54, %v21960_v52  ;;  %19655 = vmatmul.mubr.msk.f32.vlgmr.msra.gmra.mrb[2].mxu1 %vm680_vm1, %v21903_v2 }
 0x200   : > { %6782 = vmatprep.mubr.f32.mxu1 %v23863_v14 }
 0x201   : > { %6647 = vmatprep.subr.mxu0 %v6353_v7  ;;  %v6315_v7 = vrot.slane %v21938_v58, %v20594_v30 }
 0x202   : > { %v6229_v37 = vpop.permute.xlu1 %6228  ;;  %6648 = vmatpush1.msra.mxu0 %v6352_v43  ;;  %v19661_v43 = vld [vmem:[%s23597_s4 + $0x90] sm:$0xff] }
 0x203   : > { %v21977_v16 = vsel %vm6240_vm8, %v6229_v37, %v6231_v34  ;;  %v21981_v42 = vsel %vm6240_vm8, %v6227_v17, %v6229_v37  ;;  %19656 = vmatmul.mubr.msk.f32.vlgmr.msra.gmra.mrb[4].mxu0 %vm680_vm1, %v21903_v2  ;;  %v6319_v17 = vrot.slane %v21938_v58, %v20601_v36  ;;  %v6235_v37 = vpop.permute.xlu0 %6234  ;;  %v6977_v25 = vrot.slane %v19661_v43, %v20601_v36 }
 0x204   : > { %23947 = vst [vmem:[#allocation118_spill] sm:$0xff] %v21977_v16  ;;  %23948 = vst [vmem:[#allocation119_spill] sm:$0xff] %v21981_v42  ;;  %v6354_v54 = vmul.f32 %v6307_v55, %v21981_v42  ;;  %v6355_v11 = vmul.f32 %v6311_v61, %v21977_v16  ;;  %6853 = vmatprep.mubr.f32.mxu0 %v23863_v14  ;;  %v6961_v55 = vrot.slane %v19661_v43, %v20558_v12 }
 0x205   : > { %v6957_v61 = vrot.slane %v19661_v43, %v20560_v13  ;;  %v7039_v8 = vmul.f32 %v6977_v25, %v20848_v3 }
 0x206   : > { %6718 = vmatprep.subr.mxu1 %v6355_v11  ;;  %v7035_v26 = vmul.f32 %v6961_v55, %v20801_v5 }
 0x207   : > { %v6233_v52 = vpop.permute.xlu1 %6232  ;;  %6719 = vmatpush1.msra.mxu1 %v6354_v54  ;;  %v6323_v54 = vrot.slane %v21938_v58, %v20623_v46  ;;  %v6969_v58 = vrot.slane %v19661_v43, %v20571_v19 }
 0x208   : > { %v21999_v16 = vsel %vm6240_vm8, %v6233_v52, %v6235_v37  ;;  %v22003_v42 = vsel %vm6240_vm8, %v6231_v34, %v6233_v52  ;;  %19657 = vmatmul.mubr.msk.f32.vlgmr.msra.gmra.mrb[4].mxu1 %vm680_vm1, %v21903_v2  ;;  %v6965_v34 = vrot.slane %v19661_v43, %v20573_v21 }
 0x209   : > { %23949 = vst [vmem:[#allocation120_spill] sm:$0xff] %v21999_v16  ;;  %23950 = vst [vmem:[#allocation121_spill] sm:$0xff] %v22003_v42  ;;  %v6356_v11 = vmul.f32 %v6315_v7, %v22003_v42  ;;  %v6357_v45 = vmul.f32 %v6319_v17, %v21999_v16  ;;  %6924 = vmatprep.mubr.f32.mxu1 %v23863_v14  ;;  %v7034_v7 = vmul.f32 %v6957_v61, %v20775_v31 }
 0x20a   : > { %v6973_v16 = vrot.slane %v19661_v43, %v20594_v30 }
 0x20b   : > { %v6237_v52 = vpop.permute.xlu1 %6236  ;;  %6789 = vmatprep.subr.mxu0 %v6357_v45  ;;  %v22032_v45 = vld [vmem:[%s23597_s4 + $0x98] sm:$0xff] }
 0x20c   : > { %v22021_v42 = vsel %vm6240_vm8, %v6237_v52, %v21862_v39  ;;  %v22025_v17 = vsel %vm6240_vm8, %v6235_v37, %v6237_v52  ;;  %6790 = vmatpush1.msra.mxu0 %v6356_v11  ;;  %v22043_v37 = vld [vmem:[%s23596_s3 + $0x48] sm:$0xff]  ;;  %v6993_v61 = vrot.slane %v22032_v45, %v20558_v12  ;;  %v6985_v11 = vrot.slane %v19661_v43, %v20626_v49 }
 0x20d   : > { %v6358_v55 = vmul.f32 %v6323_v54, %v22025_v17  ;;  %19658 = vmatmul.mubr.msk.f32.vlgmr.msra.gmra.mrb[6].mxu0 %vm680_vm1, %v21903_v2  ;;  %7053 = vmatprep.subr.mxu0 %v7035_v26  ;;  %v6359_v39 = vmul.f32 %v6327_v63, %v22021_v42  ;;  %v6981_v26 = vrot.slane %v19661_v43, %v20623_v46 }
 0x20e   : > { %7054 = vmatpush1.msra.mxu0 %v7034_v7  ;;  %7117 = vmatprep.mubr.f32.mxu0 %v23863_v14  ;;  %v6989_v25 = vrot.slane %v22032_v45, %v20560_v13  ;;  %v7037_v63 = vmul.f32 %v6969_v58, %v20822_v28  ;;  %v7036_v54 = vmul.f32 %v6965_v34, %v20797_v62 }
 0x20f   : > { %7195 = vmatprep.subr.mxu0 %v7039_v8  ;;  %6860 = vmatprep.subr.mxu1 %v6359_v39  ;;  %v7038_v52 = vmul.f32 %v6973_v16, %v20818_v24  ;;  %v7001_v7 = vrot.slane %v22032_v45, %v20571_v19  ;;  %v7043_v43 = vmul.f32 %v6993_v61, %v20890_v22  ;;  %v22067_v16 = vld [vmem:[%s23597_s4 + $0xa0] sm:$0xff] }
 0x210   : > { %6861 = vmatpush1.msra.mxu1 %v6358_v55  ;;  %v7041_v8 = vmul.f32 %v6985_v11, %v20869_v33  ;;  %v7009_v34 = vrot.slane %v22032_v45, %v20601_v36  ;;  %v6997_v58 = vrot.slane %v22032_v45, %v20573_v21  ;;  %v7040_v55 = vmul.f32 %v6981_v26, %v20844_v9 }
 0x211   : > { %19663 = vmatmul.mubr.msk.f32.vlgmr.msra.gmra.mrb[0].mxu0 %vm680_vm1, %v22043_v37  ;;  %19659 = vmatmul.mubr.msk.f32.vlgmr.msra.gmra.mrb[6].mxu1 %vm680_vm1, %v21903_v2  ;;  %v7651_v2 = vrot.slane %v22067_v16, %v20558_v12  ;;  %v7042_v39 = vmul.f32 %v6989_v25, %v20865_v41  ;;  %v7005_v61 = vrot.slane %v22032_v45, %v20594_v30 }
 0x212   : > { %7124 = vmatprep.subr.mxu1 %v7037_v63  ;;  %7196 = vmatpush1.msra.mxu0 %v7038_v52  ;;  %v7045_v11 = vmul.f32 %v7001_v7, %v20911_v20  ;;  %v7047_v63 = vmul.f32 %v7009_v34, %v20940_v27  ;;  %v7017_v26 = vrot.slane %v22032_v45, %v20626_v49 }
 0x213   : > { %7125 = vmatpush1.msra.mxu1 %v7036_v54  ;;  %7337 = vmatprep.subr.mxu0 %v7043_v43  ;;  %v7647_v25 = vrot.slane %v22067_v16, %v20560_v13  ;;  %v7659_v54 = vrot.slane %v22067_v16, %v20571_v19  ;;  %v7044_v52 = vmul.f32 %v6997_v58, %v20886_v44 }
 0x214   : > { %7266 = vmatprep.subr.mxu1 %v7041_v8  ;;  %7188 = vmatprep.mubr.f32.mxu1 %v23863_v14  ;;  %v7046_v43 = vmul.f32 %v7005_v61, %v20907_v47  ;;  %v7013_v7 = vrot.slane %v22032_v45, %v20623_v46  ;;  %v7049_v8 = vmul.f32 %v7017_v26, %v20771_v29  ;;  %v22113_v61 = vld [vmem:[%s23597_s4 + $0xa8] sm:$0xff]  ;;  %v23951_v26 = vld [vmem:[#allocation25_spill] sm:$0xff] }
 0x215   : > { %7259 = vmatprep.mubr.f32.mxu0 %v23863_v14  ;;  %19664 = vmatmul.mubr.msk.f32.vlgmr.msra.gmra.mrb[0].mxu1 %vm680_vm1, %v22043_v37  ;;  %v7725_v34 = vmul.f32 %v7651_v2, %v20605_v38  ;;  %v7667_v58 = vrot.slane %v22067_v16, %v20601_v36  ;;  %v7655_v45 = vrot.slane %v22067_v16, %v20573_v21 }
 0x216   : > { %19665 = vmatmul.mubr.msk.f32.vlgmr.msra.gmra.mrb[2].mxu0 %vm680_vm1, %v22043_v37  ;;  %7267 = vmatpush1.msra.mxu1 %v7040_v55  ;;  %v7663_v55 = vrot.slane %v22067_v16, %v20594_v30  ;;  %v7048_v2 = vmul.f32 %v7013_v7, %v20936_v32  ;;  %v7671_v7 = vrot.slane %v22067_v16, %v20623_v46 }
 0x217   : > { %7338 = vmatpush1.msra.mxu0 %v7042_v39  ;;  %7408 = vmatprep.subr.mxu1 %v7045_v11  ;;  %v7724_v39 = vmul.f32 %v7647_v25, %v20582_v23  ;;  %v7675_v11 = vrot.slane %v22067_v16, %v20626_v49  ;;  %v7729_v25 = vmul.f32 %v7667_v58, %v23951_v26  ;;  %v23953_v58 = vld [vmem:[#allocation22_spill] sm:$0xff]  ;;  %v23954_v16 = vld [vmem:[#allocation27_spill] sm:$0xff] }
 0x218   : > { %7479 = vmatprep.subr.mxu0 %v7047_v63  ;;  %7330 = vmatprep.mubr.f32.mxu1 %v23863_v14  ;;  %v7727_v63 = vmul.f32 %v7659_v54, %v20634_v53  ;;  %v23952_v54 = vld [vmem:[#allocation21_spill] sm:$0xff]  ;;  %v7728_v23 = vmul.f32 %v7663_v55, %v23953_v58  ;;  %v7687_v55 = vrot.slane %v22113_v61, %v20573_v21  ;;  %v23957_v58 = vld [vmem:[#allocation26_spill] sm:$0xff] }
 0x219   : > { %7401 = vmatprep.mubr.f32.mxu0 %v23863_v14  ;;  %19666 = vmatmul.mubr.msk.f32.vlgmr.msra.gmra.mrb[2].mxu1 %vm680_vm1, %v22043_v37  ;;  %v7695_v26 = vrot.slane %v22113_v61, %v20594_v30 }
 0x21a   : > { %19667 = vmatmul.mubr.msk.f32.vlgmr.msra.gmra.mrb[4].mxu0 %vm680_vm1, %v22043_v37  ;;  %7409 = vmatpush1.msra.mxu1 %v7044_v52  ;;  %v7683_v52 = vrot.slane %v22113_v61, %v20558_v12 }
 0x21b   : > { %7480 = vmatpush1.msra.mxu0 %v7046_v43  ;;  %7550 = vmatprep.subr.mxu1 %v7049_v8  ;;  %v22131_v43 = vld [vmem:[%s23596_s3 + $0x50] sm:$0xff]  ;;  %v7679_v8 = vrot.slane %v22113_v61, %v20560_v13 }
 0x21c   : > { %7743 = vmatprep.subr.mxu0 %v7725_v34  ;;  %7472 = vmatprep.mubr.f32.mxu1 %v23863_v14  ;;  %v7726_v34 = vmul.f32 %v7655_v45, %v23952_v54  ;;  %v7699_v45 = vrot.slane %v22113_v61, %v20601_v36 }
 0x21d   : > { %7543 = vmatprep.mubr.f32.mxu0 %v23863_v14  ;;  %19668 = vmatmul.mubr.msk.f32.vlgmr.msra.gmra.mrb[4].mxu1 %vm680_vm1, %v22043_v37  ;;  %v7732_v29 = vmul.f32 %v7679_v8, %v23957_v58  ;;  %v23959_v8 = vld [vmem:[#allocation33_spill] sm:$0xff] }
 0x21e   : > { %19669 = vmatmul.mubr.msk.f32.vlgmr.msra.gmra.mrb[6].mxu0 %vm680_vm1, %v22043_v37  ;;  %7551 = vmatpush1.msra.mxu1 %v7048_v2  ;;  %v7731_v2 = vmul.f32 %v7675_v11, %v23954_v16  ;;  %v22160_v11 = vld [vmem:[%s23597_s4 + $0xb0] sm:$0xff] }
 0x21f   : > { %7744 = vmatpush1.msra.mxu0 %v7724_v39  ;;  %7814 = vmatprep.subr.mxu1 %v7727_v63  ;;  %v7691_v39 = vrot.slane %v22113_v61, %v20571_v19  ;;  %v23955_v63 = vld [vmem:[#allocation29_spill] sm:$0xff]  ;;  %v23960_v16 = vld [vmem:[#allocation28_spill] sm:$0xff] }
 0x220   : > { %7885 = vmatprep.subr.mxu0 %v7729_v25  ;;  %7614 = vmatprep.mubr.f32.mxu1 %v23863_v14  ;;  %v7733_v25 = vmul.f32 %v7683_v52, %v23955_v63  ;;  %v23958_v52 = vld [vmem:[#allocation31_spill] sm:$0xff]  ;;  %v8337_v63 = vrot.slane %v22160_v11, %v20560_v13  ;;  %v7734_v58 = vmul.f32 %v7687_v55, %v23960_v16 }
 0x221   : > { %7807 = vmatprep.mubr.f32.mxu0 %v23863_v14  ;;  %19670 = vmatmul.mubr.msk.f32.vlgmr.msra.gmra.mrb[6].mxu1 %vm680_vm1, %v22043_v37  ;;  %v23956_v37 = vld [vmem:[#allocation24_spill] sm:$0xff]  ;;  %v8345_v55 = vrot.slane %v22160_v11, %v20573_v21 }
 0x222   : > { %19674 = vmatmul.mubr.msk.f32.vlgmr.msra.gmra.mrb[0].mxu0 %vm680_vm1, %v22131_v43  ;;  %7815 = vmatpush1.msra.mxu1 %v7726_v34  ;;  %v7730_v53 = vmul.f32 %v7671_v7, %v23956_v37  ;;  %v7735_v7 = vmul.f32 %v7691_v39, %v23958_v52  ;;  %v7737_v34 = vmul.f32 %v7699_v45, %v23959_v8  ;;  %v23961_v37 = vld [vmem:[#allocation30_spill] sm:$0xff]  ;;  %v23965_v52 = vld [vmem:[#allocation36_spill] sm:$0xff] }
 0x223   : > { %7886 = vmatpush1.msra.mxu0 %v7728_v23  ;;  %7956 = vmatprep.subr.mxu1 %v7731_v2  ;;  %v7707_v23 = vrot.slane %v22113_v61, %v20626_v49  ;;  %v8341_v2 = vrot.slane %v22160_v11, %v20558_v12  ;;  %v7736_v38 = vmul.f32 %v7695_v26, %v23961_v37  ;;  %v23963_v39 = vld [vmem:[#allocation38_spill] sm:$0xff] }
 0x224   : > { %8027 = vmatprep.subr.mxu0 %v7733_v25  ;;  %7878 = vmatprep.mubr.f32.mxu1 %v23863_v14  ;;  %v7703_v25 = vrot.slane %v22113_v61, %v20623_v46  ;;  %v8357_v26 = vrot.slane %v22160_v11, %v20601_v36  ;;  %v8414_v37 = vmul.f32 %v8337_v63, %v23965_v52 }
 0x225   : > { %7949 = vmatprep.mubr.f32.mxu0 %v23863_v14  ;;  %19675 = vmatmul.mubr.msk.f32.vlgmr.msra.gmra.mrb[0].mxu1 %vm680_vm1, %v22131_v43  ;;  %v8415_v45 = vmul.f32 %v8341_v2, %v23963_v39  ;;  %v23967_v2 = vld [vmem:[#allocation42_spill] sm:$0xff]  ;;  %v8361_v52 = vrot.slane %v22160_v11, %v20623_v46 }
 0x226   : > { %19676 = vmatmul.mubr.msk.f32.vlgmr.msra.gmra.mrb[2].mxu0 %vm680_vm1, %v22131_v43  ;;  %7957 = vmatpush1.msra.mxu1 %v7730_v53  ;;  %v8349_v53 = vrot.slane %v22160_v11, %v20571_v19 }
 0x227   : > { %8028 = vmatpush1.msra.mxu0 %v7732_v29  ;;  %8098 = vmatprep.subr.mxu1 %v7735_v7  ;;  %v23962_v29 = vld [vmem:[#allocation18_spill] sm:$0xff]  ;;  %v8353_v7 = vrot.slane %v22160_v11, %v20594_v30 }
 0x228   : > { %8169 = vmatprep.subr.mxu0 %v7737_v34  ;;  %8020 = vmatprep.mubr.f32.mxu1 %v23863_v14  ;;  %v7739_v61 = vmul.f32 %v7707_v23, %v23962_v29  ;;  %v23964_v34 = vld [vmem:[#allocation32_spill] sm:$0xff]  ;;  %v22201_v23 = vld [vmem:[%s23597_s4 + $0xb8] sm:$0xff] }
 0x229   : > { %8091 = vmatprep.mubr.f32.mxu0 %v23863_v14  ;;  %19677 = vmatmul.mubr.msk.f32.vlgmr.msra.gmra.mrb[2].mxu1 %vm680_vm1, %v22131_v43  ;;  %v7738_v8 = vmul.f32 %v7703_v25, %v23964_v34  ;;  %v8419_v25 = vmul.f32 %v8357_v26, %v23967_v2  ;;  %v8369_v39 = vrot.slane %v22201_v23, %v20560_v13  ;;  %v23969_v2 = vld [vmem:[#allocation39_spill] sm:$0xff] }
 0x22a   : > { %19678 = vmatmul.mubr.msk.f32.vlgmr.msra.gmra.mrb[4].mxu0 %vm680_vm1, %v22131_v43  ;;  %8099 = vmatpush1.msra.mxu1 %v7734_v58  ;;  %v23966_v58 = vld [vmem:[#allocation40_spill] sm:$0xff] }
 0x22b   : > { %8170 = vmatpush1.msra.mxu0 %v7736_v38  ;;  %8240 = vmatprep.subr.mxu1 %v7739_v61  ;;  %v8365_v38 = vrot.slane %v22160_v11, %v20626_v49  ;;  %v8417_v63 = vmul.f32 %v8349_v53, %v23966_v58  ;;  %v8373_v61 = vrot.slane %v22201_v23, %v20558_v12  ;;  %v23968_v53 = vld [vmem:[#allocation37_spill] sm:$0xff]  ;;  %v23970_v11 = vld [vmem:[#allocation44_spill] sm:$0xff] }
 0x22c   : > { %8433 = vmatprep.subr.mxu0 %v8415_v45  ;;  %8162 = vmatprep.mubr.f32.mxu1 %v23863_v14  ;;  %v22218_v45 = vld [vmem:[%s23596_s3 + $0x58] sm:$0xff]  ;;  %v8416_v26 = vmul.f32 %v8345_v55, %v23968_v53  ;;  %v8418_v58 = vmul.f32 %v8353_v7, %v23969_v2  ;;  %v8389_v55 = vrot.slane %v22201_v23, %v20601_v36  ;;  %v23973_v53 = vld [vmem:[#allocation43_spill] sm:$0xff] }
 0x22d   : > { %8233 = vmatprep.mubr.f32.mxu0 %v23863_v14  ;;  %19679 = vmatmul.mubr.msk.f32.vlgmr.msra.gmra.mrb[4].mxu1 %vm680_vm1, %v22131_v43  ;;  %v8377_v7 = vrot.slane %v22201_v23, %v20573_v21  ;;  %v23972_v2 = vld [vmem:[#allocation41_spill] sm:$0xff]  ;;  %v8422_v34 = vmul.f32 %v8369_v39, %v23973_v53 }
 0x22e   : > { %19680 = vmatmul.mubr.msk.f32.vlgmr.msra.gmra.mrb[6].mxu0 %vm680_vm1, %v22131_v43  ;;  %8241 = vmatpush1.msra.mxu1 %v7738_v8  ;;  %v8421_v8 = vmul.f32 %v8365_v38, %v23970_v11  ;;  %v8420_v29 = vmul.f32 %v8361_v52, %v23972_v2  ;;  %v8385_v38 = vrot.slane %v22201_v23, %v20594_v30  ;;  %v23974_v52 = vld [vmem:[#allocation48_spill] sm:$0xff]  ;;  %v23976_v11 = vld [vmem:[#allocation45_spill] sm:$0xff]  ;;  %v23977_v2 = vld [vmem:[#allocation47_spill] sm:$0xff] }
 0x22f   : > { %8434 = vmatpush1.msra.mxu0 %v8414_v37  ;;  %8504 = vmatprep.subr.mxu1 %v8417_v63  ;;  %v8381_v37 = vrot.slane %v22201_v23, %v20571_v19  ;;  %v23971_v63 = vld [vmem:[#allocation46_spill] sm:$0xff]  ;;  %v8424_v53 = vmul.f32 %v8377_v7, %v23976_v11 }
 0x230   : > { %8575 = vmatprep.subr.mxu0 %v8419_v25  ;;  %8304 = vmatprep.mubr.f32.mxu1 %v23863_v14  ;;  %v8423_v25 = vmul.f32 %v8373_v61, %v23971_v63  ;;  %v22249_v61 = vld [vmem:[%s23597_s4 + $0xc0] sm:$0xff]  ;;  %v8426_v16 = vmul.f32 %v8385_v38, %v23977_v2 }
 0x231   : > { %8497 = vmatprep.mubr.f32.mxu0 %v23863_v14  ;;  %19681 = vmatmul.mubr.msk.f32.vlgmr.msra.gmra.mrb[6].mxu1 %vm680_vm1, %v22131_v43  ;;  %v8397_v43 = vrot.slane %v22201_v23, %v20626_v49  ;;  %v8425_v39 = vmul.f32 %v8381_v37, %v23974_v52  ;;  %v9027_v63 = vrot.slane %v22249_v61, %v20560_v13  ;;  %v23979_v37 = vld [vmem:[#allocation54_spill] sm:$0xff]  ;;  %v23981_v52 = vld [vmem:[#allocation52_spill] sm:$0xff] }
 0x232   : > { %19685 = vmatmul.mubr.msk.f32.vlgmr.msra.gmra.mrb[0].mxu0 %vm680_vm1, %v22218_v45  ;;  %8505 = vmatpush1.msra.mxu1 %v8416_v26  ;;  %v9047_v7 = vrot.slane %v22249_v61, %v20601_v36  ;;  %v9035_v38 = vrot.slane %v22249_v61, %v20573_v21 }
 0x233   : > { %8576 = vmatpush1.msra.mxu0 %v8418_v58  ;;  %8646 = vmatprep.subr.mxu1 %v8421_v8  ;;  %v23975_v58 = vld [vmem:[#allocation50_spill] sm:$0xff]  ;;  %v9031_v8 = vrot.slane %v22249_v61, %v20558_v12  ;;  %v9104_v2 = vmul.f32 %v9027_v63, %v23981_v52  ;;  %v9051_v52 = vrot.slane %v22249_v61, %v20623_v46 }
 0x234   : > { %8717 = vmatprep.subr.mxu0 %v8423_v25  ;;  %8568 = vmatprep.mubr.f32.mxu1 %v23863_v14  ;;  %v8427_v26 = vmul.f32 %v8389_v55, %v23975_v58  ;;  %v8393_v25 = vrot.slane %v22201_v23, %v20623_v46 }
 0x235   : > { %8639 = vmatprep.mubr.f32.mxu0 %v23863_v14  ;;  %19686 = vmatmul.mubr.msk.f32.vlgmr.msra.gmra.mrb[0].mxu1 %vm680_vm1, %v22218_v45  ;;  %v9105_v55 = vmul.f32 %v9031_v8, %v23979_v37  ;;  %v23983_v8 = vld [vmem:[#allocation58_spill] sm:$0xff] }
 0x236   : > { %19687 = vmatmul.mubr.msk.f32.vlgmr.msra.gmra.mrb[2].mxu0 %vm680_vm1, %v22218_v45  ;;  %8647 = vmatpush1.msra.mxu1 %v8420_v29  ;;  %v9039_v29 = vrot.slane %v22249_v61, %v20571_v19 }
 0x237   : > { %8718 = vmatpush1.msra.mxu0 %v8422_v34  ;;  %8788 = vmatprep.subr.mxu1 %v8425_v39  ;;  %v23978_v34 = vld [vmem:[#allocation35_spill] sm:$0xff]  ;;  %v9043_v39 = vrot.slane %v22249_v61, %v20594_v30 }
 0x238   : > { %8859 = vmatprep.subr.mxu0 %v8427_v26  ;;  %8710 = vmatprep.mubr.f32.mxu1 %v23863_v14  ;;  %v8429_v23 = vmul.f32 %v8397_v43, %v23978_v34  ;;  %v23980_v26 = vld [vmem:[#allocation49_spill] sm:$0xff]  ;;  %v22288_v43 = vld [vmem:[%s23597_s4 + $0xc8] sm:$0xff] }
 0x239   : > { %8781 = vmatprep.mubr.f32.mxu0 %v23863_v14  ;;  %19688 = vmatmul.mubr.msk.f32.vlgmr.msra.gmra.mrb[2].mxu1 %vm680_vm1, %v22218_v45  ;;  %v8428_v58 = vmul.f32 %v8393_v25, %v23980_v26  ;;  %v9109_v25 = vmul.f32 %v9047_v7, %v23983_v8  ;;  %v9059_v37 = vrot.slane %v22288_v43, %v20560_v13  ;;  %v23985_v8 = vld [vmem:[#allocation55_spill] sm:$0xff]  ;;  %v23988_v34 = vld [vmem:[#allocation57_spill] sm:$0xff] }
 0x23a   : > { %19689 = vmatmul.mubr.msk.f32.vlgmr.msra.gmra.mrb[4].mxu0 %vm680_vm1, %v22218_v45  ;;  %8789 = vmatpush1.msra.mxu1 %v8424_v53  ;;  %v23982_v53 = vld [vmem:[#allocation56_spill] sm:$0xff]  ;;  %v23989_v26 = vld [vmem:[#allocation59_spill] sm:$0xff] }
 0x23b   : > { %8860 = vmatpush1.msra.mxu0 %v8426_v16  ;;  %8930 = vmatprep.subr.mxu1 %v8429_v23  ;;  %v9055_v16 = vrot.slane %v22249_v61, %v20626_v49  ;;  %v9107_v63 = vmul.f32 %v9039_v29, %v23982_v53  ;;  %v9063_v23 = vrot.slane %v22288_v43, %v20558_v12  ;;  %v23984_v29 = vld [vmem:[#allocation53_spill] sm:$0xff]  ;;  %v22320_v61 = vld [vmem:[%s23597_s4 + $0xd0] sm:$0xff] }
 0x23c   : > { %9123 = vmatprep.subr.mxu0 %v9105_v55  ;;  %8852 = vmatprep.mubr.f32.mxu1 %v23863_v14  ;;  %v22305_v55 = vld [vmem:[%s23596_s3 + $0x60] sm:$0xff]  ;;  %v9106_v7 = vmul.f32 %v9035_v38, %v23984_v29  ;;  %v9108_v53 = vmul.f32 %v9043_v39, %v23985_v8  ;;  %v9067_v8 = vrot.slane %v22288_v43, %v20573_v21 }
 0x23d   : > { %8923 = vmatprep.mubr.f32.mxu0 %v23863_v14  ;;  %19690 = vmatmul.mubr.msk.f32.vlgmr.msra.gmra.mrb[4].mxu1 %vm680_vm1, %v22218_v45  ;;  %v23987_v39 = vld [vmem:[#allocation62_spill] sm:$0xff]  ;;  %v9110_v29 = vmul.f32 %v9051_v52, %v23988_v34  ;;  %v9112_v11 = vmul.f32 %v9059_v37, %v23989_v26  ;;  %v9087_v52 = vrot.slane %v22288_v43, %v20626_v49 }
 0x23e   : > { %19691 = vmatmul.mubr.msk.f32.vlgmr.msra.gmra.mrb[6].mxu0 %vm680_vm1, %v22218_v45  ;;  %8931 = vmatpush1.msra.mxu1 %v8428_v58  ;;  %v23986_v58 = vld [vmem:[#allocation60_spill] sm:$0xff]  ;;  %v9717_v37 = vrot.slane %v22320_v61, %v20560_v13 }
 0x23f   : > { %9124 = vmatpush1.msra.mxu0 %v9104_v2  ;;  %9194 = vmatprep.subr.mxu1 %v9107_v63  ;;  %v9071_v2 = vrot.slane %v22288_v43, %v20571_v19  ;;  %v9111_v38 = vmul.f32 %v9055_v16, %v23986_v58  ;;  %v9113_v63 = vmul.f32 %v9063_v23, %v23987_v39  ;;  %v23992_v58 = vld [vmem:[#allocation63_spill] sm:$0xff] }
 0x240   : > { %9265 = vmatprep.subr.mxu0 %v9109_v25  ;;  %8994 = vmatprep.mubr.f32.mxu1 %v23863_v14  ;;  %v9079_v25 = vrot.slane %v22288_v43, %v20601_v36  ;;  %v9075_v16 = vrot.slane %v22288_v43, %v20594_v30 }
 0x241   : > { %9187 = vmatprep.mubr.f32.mxu0 %v23863_v14  ;;  %19692 = vmatmul.mubr.msk.f32.vlgmr.msra.gmra.mrb[6].mxu1 %vm680_vm1, %v22218_v45  ;;  %v9721_v45 = vrot.slane %v22320_v61, %v20558_v12 }
 0x242   : > { %19696 = vmatmul.mubr.msk.f32.vlgmr.msra.gmra.mrb[0].mxu0 %vm680_vm1, %v22305_v55  ;;  %9195 = vmatpush1.msra.mxu1 %v9106_v7  ;;  %v9117_v7 = vmul.f32 %v9079_v25, %v21324_v56  ;;  %v9116_v26 = vmul.f32 %v9075_v16, %v23992_v58  ;;  %v9725_v16 = vrot.slane %v22320_v61, %v20573_v21 }
 0x243   : > { %9266 = vmatpush1.msra.mxu0 %v9108_v53  ;;  %9336 = vmatprep.subr.mxu1 %v9111_v38  ;;  %v23990_v53 = vld [vmem:[#allocation64_spill] sm:$0xff]  ;;  %v9729_v38 = vrot.slane %v22320_v61, %v20571_v19  ;;  %v9795_v25 = vmul.f32 %v9721_v45, %v20426_v35 }
 0x244   : > { %9407 = vmatprep.subr.mxu0 %v9113_v63  ;;  %9258 = vmatprep.mubr.f32.mxu1 %v23863_v14  ;;  %v9115_v23 = vmul.f32 %v9071_v2, %v23990_v53  ;;  %v23991_v63 = vld [vmem:[#allocation61_spill] sm:$0xff]  ;;  %v9083_v2 = vrot.slane %v22288_v43, %v20623_v46 }
 0x245   : > { %9329 = vmatprep.mubr.f32.mxu0 %v23863_v14  ;;  %19697 = vmatmul.mubr.msk.f32.vlgmr.msra.gmra.mrb[0].mxu1 %vm680_vm1, %v22305_v55  ;;  %v9114_v39 = vmul.f32 %v9067_v8, %v23991_v63  ;;  %v9737_v8 = vrot.slane %v22320_v61, %v20601_v36  ;;  %v22369_v43 = vld [vmem:[%s23597_s4 + $0xd8] sm:$0xff] }
 0x246   : > { %19698 = vmatmul.mubr.msk.f32.vlgmr.msra.gmra.mrb[2].mxu0 %vm680_vm1, %v22305_v55  ;;  %9337 = vmatpush1.msra.mxu1 %v9110_v29  ;;  %v9118_v45 = vmul.f32 %v9083_v2, %v21320_v48  ;;  %v9753_v2 = vrot.slane %v22369_v43, %v20558_v12 }
 0x247   : > { %9408 = vmatpush1.msra.mxu0 %v9112_v11  ;;  %9478 = vmatprep.subr.mxu1 %v9115_v23  ;;  %v23993_v11 = vld [vmem:[#allocation51_spill] sm:$0xff]  ;;  %v9733_v23 = vrot.slane %v22320_v61, %v20594_v30 }
 0x248   : > { %9549 = vmatprep.subr.mxu0 %v9117_v7  ;;  %9400 = vmatprep.mubr.f32.mxu1 %v23863_v14  ;;  %v9119_v29 = vmul.f32 %v9087_v52, %v23993_v11  ;;  %v23994_v7 = vld [vmem:[#allocation9_spill] sm:$0xff]  ;;  %v9769_v11 = vrot.slane %v22369_v43, %v20601_v36 }
 0x249   : > { %9471 = vmatprep.mubr.f32.mxu0 %v23863_v14  ;;  %19699 = vmatmul.mubr.msk.f32.vlgmr.msra.gmra.mrb[2].mxu1 %vm680_vm1, %v22305_v55  ;;  %v9797_v52 = vmul.f32 %v9729_v38, %v23994_v7  ;;  %v9749_v38 = vrot.slane %v22369_v43, %v20560_v13  ;;  %v9761_v7 = vrot.slane %v22369_v43, %v20571_v19 }
 0x24a   : > { %19700 = vmatmul.mubr.msk.f32.vlgmr.msra.gmra.mrb[4].mxu0 %vm680_vm1, %v22305_v55  ;;  %9479 = vmatpush1.msra.mxu1 %v9114_v39  ;;  %v9745_v39 = vrot.slane %v22320_v61, %v20626_v49 }
 0x24b   : > { %9550 = vmatpush1.msra.mxu0 %v9116_v26  ;;  %9620 = vmatprep.subr.mxu1 %v9119_v29  ;;  %v9794_v26 = vmul.f32 %v9717_v37, %v20397_v18  ;;  %v23995_v29 = vld [vmem:[#allocation11_spill] sm:$0xff]  ;;  %v9741_v18 = vrot.slane %v22320_v61, %v20623_v46  ;;  %v23998_v61 = vld [vmem:[#allocation13_spill] sm:$0xff] }
 0x24c   : > { %9813 = vmatprep.subr.mxu0 %v9795_v25  ;;  %9542 = vmatprep.mubr.f32.mxu1 %v23863_v14  ;;  %v9799_v25 = vmul.f32 %v9737_v8, %v23995_v29  ;;  %v22392_v37 = vld [vmem:[%s23596_s3 + $0x68] sm:$0xff]  ;;  %v23996_v8 = vld [vmem:[#allocation4_spill] sm:$0xff] }
 0x24d   : > { %9613 = vmatprep.mubr.f32.mxu0 %v23863_v14  ;;  %19701 = vmatmul.mubr.msk.f32.vlgmr.msra.gmra.mrb[4].mxu1 %vm680_vm1, %v22305_v55 }
 0x24e   : > { %19702 = vmatmul.mubr.msk.f32.vlgmr.msra.gmra.mrb[6].mxu0 %vm680_vm1, %v22305_v55  ;;  %9621 = vmatpush1.msra.mxu1 %v9118_v45  ;;  %v9796_v45 = vmul.f32 %v9725_v16, %v23996_v8  ;;  %v9757_v16 = vrot.slane %v22369_v43, %v20573_v21 }
 0x24f   : > { %9814 = vmatpush1.msra.mxu0 %v9794_v26  ;;  %9884 = vmatprep.subr.mxu1 %v9797_v52  ;;  %v23997_v26 = vld [vmem:[#allocation6_spill] sm:$0xff]  ;;  %v9801_v52 = vmul.f32 %v9745_v39, %v23998_v61  ;;  %v24000_v39 = vld [vmem:[#allocation8_spill] sm:$0xff]  ;;  %v9807_v61 = vmul.f32 %v9769_v11, %v20494_v6  ;;  %v24005_v6 = vld [vmem:[#allocation5_spill] sm:$0xff] }
 0x250   : > { %9955 = vmatprep.subr.mxu0 %v9799_v25  ;;  %9684 = vmatprep.mubr.f32.mxu1 %v23863_v14  ;;  %v9798_v29 = vmul.f32 %v9733_v23, %v23997_v26  ;;  %v23999_v25 = vld [vmem:[#allocation15_spill] sm:$0xff]  ;;  %v22419_v23 = vld [vmem:[%s23597_s4 + $0xe0] sm:$0xff] }
 0x251   : > { %9877 = vmatprep.mubr.f32.mxu0 %v23863_v14  ;;  %19703 = vmatmul.mubr.msk.f32.vlgmr.msra.gmra.mrb[6].mxu1 %vm680_vm1, %v22305_v55  ;;  %v9803_v35 = vmul.f32 %v9753_v2, %v23999_v25  ;;  %v9765_v55 = vrot.slane %v22369_v43, %v20594_v30  ;;  %v9800_v2 = vmul.f32 %v9741_v18, %v24000_v39  ;;  %v24003_v18 = vld [vmem:[#allocation12_spill] sm:$0xff]  ;;  %v24004_v11 = vld [vmem:[#allocation14_spill] sm:$0xff] }
 0x252   : > { %19707 = vmatmul.mubr.msk.f32.vlgmr.msra.gmra.mrb[0].mxu0 %vm680_vm1, %v22392_v37  ;;  %9885 = vmatpush1.msra.mxu1 %v9796_v45  ;;  %v10411_v26 = vrot.slane %v22419_v23, %v20558_v12  ;;  %v10407_v39 = vrot.slane %v22419_v23, %v20560_v13 }
 0x253   : > { %9956 = vmatpush1.msra.mxu0 %v9798_v29  ;;  %10026 = vmatprep.subr.mxu1 %v9801_v52  ;;  %v24001_v29 = vld [vmem:[#allocation10_spill] sm:$0xff]  ;;  %v24002_v52 = vld [vmem:[#allocation16_spill] sm:$0xff] }
 0x254   : > { %10097 = vmatprep.subr.mxu0 %v9803_v35  ;;  %9948 = vmatprep.mubr.f32.mxu1 %v23863_v14  ;;  %v9802_v45 = vmul.f32 %v9749_v38, %v24001_v29  ;;  %v9777_v35 = vrot.slane %v22369_v43, %v20626_v49  ;;  %v9805_v25 = vmul.f32 %v9761_v7, %v24002_v52 }
 0x255   : > { %10019 = vmatprep.mubr.f32.mxu0 %v23863_v14  ;;  %19708 = vmatmul.mubr.msk.f32.vlgmr.msra.gmra.mrb[0].mxu1 %vm680_vm1, %v22392_v37  ;;  %v9804_v38 = vmul.f32 %v9757_v16, %v24003_v18  ;;  %v9773_v29 = vrot.slane %v22369_v43, %v20623_v46  ;;  %v9806_v7 = vmul.f32 %v9765_v55, %v24004_v11  ;;  %v24006_v55 = vld [vmem:[#allocation2_spill] sm:$0xff] }
 0x256   : > { %19709 = vmatmul.mubr.msk.f32.vlgmr.msra.gmra.mrb[2].mxu0 %vm680_vm1, %v22392_v37  ;;  %10027 = vmatpush1.msra.mxu1 %v9800_v2  ;;  %v9809_v52 = vmul.f32 %v9777_v35, %v24005_v6  ;;  %v10419_v43 = vrot.slane %v22419_v23, %v20571_v19  ;;  %v10415_v16 = vrot.slane %v22419_v23, %v20573_v21 }
 0x257   : > { %10098 = vmatpush1.msra.mxu0 %v9802_v45  ;;  %10168 = vmatprep.subr.mxu1 %v9805_v25  ;;  %v10427_v25 = vrot.slane %v22419_v23, %v20601_v36  ;;  %v9808_v2 = vmul.f32 %v9773_v29, %v24006_v55  ;;  %v24007_v45 = vld [vmem:[#allocation65_spill] sm:$0xff] }
 0x258   : > { %10239 = vmatprep.subr.mxu0 %v9807_v61  ;;  %10090 = vmatprep.mubr.f32.mxu1 %v23863_v14  ;;  %v10485_v61 = vmul.f32 %v10411_v26, %v21475_v59  ;;  %v10484_v35 = vmul.f32 %v10407_v39, %v24007_v45  ;;  %v10423_v26 = vrot.slane %v22419_v23, %v20594_v30  ;;  %v22462_v59 = vld [vmem:[%s23597_s4 + $0xe8] sm:$0xff] }
 0x259   : > { %10161 = vmatprep.mubr.f32.mxu0 %v23863_v14  ;;  %19710 = vmatmul.mubr.msk.f32.vlgmr.msra.gmra.mrb[2].mxu1 %vm680_vm1, %v22392_v37  ;;  %v10487_v39 = vmul.f32 %v10419_v43, %v21483_v60  ;;  %v10489_v29 = vmul.f32 %v10427_v25, %v21517_v4  ;;  %v10439_v45 = vrot.slane %v22462_v59, %v20560_v13 }
 0x25a   : > { %19711 = vmatmul.mubr.msk.f32.vlgmr.msra.gmra.mrb[4].mxu0 %vm680_vm1, %v22392_v37  ;;  %10169 = vmatpush1.msra.mxu1 %v9804_v38  ;;  %v10443_v38 = vrot.slane %v22462_v59, %v20558_v12  ;;  %v10486_v43 = vmul.f32 %v10415_v16, %v21450_v40  ;;  %v10488_v25 = vmul.f32 %v10423_v26, %v21462_v1 }
 0x25b   : > { %10240 = vmatpush1.msra.mxu0 %v9806_v7  ;;  %10310 = vmatprep.subr.mxu1 %v9809_v52  ;;  %v10435_v52 = vrot.slane %v22419_v23, %v20626_v49  ;;  %v22479_v7 = vld [vmem:[%s23596_s3 + $0x70] sm:$0xff]  ;;  %v10459_v16 = vrot.slane %v22462_v59, %v20601_v36  ;;  %v10447_v26 = vrot.slane %v22462_v59, %v20573_v21 }
 0x25c   : > { %10503 = vmatprep.subr.mxu0 %v10485_v61  ;;  %10232 = vmatprep.mubr.f32.mxu1 %v23863_v14  ;;  %v10431_v61 = vrot.slane %v22419_v23, %v20623_v46 }
 0x25d   : > { %10303 = vmatprep.mubr.f32.mxu0 %v23863_v14  ;;  %19712 = vmatmul.mubr.msk.f32.vlgmr.msra.gmra.mrb[4].mxu1 %vm680_vm1, %v22392_v37  ;;  %v10491_v23 = vmul.f32 %v10435_v52, %v21524_v51  ;;  %v10455_v52 = vrot.slane %v22462_v59, %v20594_v30  ;;  %v24009_v51 = vld [vmem:[#allocation72_spill] sm:$0xff] }
 0x25e   : > { %19713 = vmatmul.mubr.msk.f32.vlgmr.msra.gmra.mrb[6].mxu0 %vm680_vm1, %v22392_v37  ;;  %10311 = vmatpush1.msra.mxu1 %v9808_v2  ;;  %v10451_v2 = vrot.slane %v22462_v59, %v20571_v19 }
 0x25f   : > { %10504 = vmatpush1.msra.mxu0 %v10484_v35  ;;  %10574 = vmatprep.subr.mxu1 %v10487_v39  ;;  %v10493_v35 = vmul.f32 %v10443_v38, %v21549_v10  ;;  %v10490_v39 = vmul.f32 %v10431_v61, %v21500_v15  ;;  %v22510_v38 = vld [vmem:[%s23597_s4 + $0xf0] sm:$0xff]  ;;  %v10497_v61 = vmul.f32 %v10459_v16, %v21589_v0 }
 0x260   : > { %10645 = vmatprep.subr.mxu0 %v10489_v29  ;;  %10374 = vmatprep.mubr.f32.mxu1 %v23863_v14  ;;  %v10492_v29 = vmul.f32 %v10439_v45, %v21493_v57  ;;  %v10495_v45 = vmul.f32 %v10451_v2, %v21561_v50  ;;  %v10496_v57 = vmul.f32 %v10455_v52, %v24009_v51  ;;  %v24013_v50 = vld [vmem:[#allocation77_spill] sm:$0xff] }
 0x261   : > { %10567 = vmatprep.mubr.f32.mxu0 %v23863_v14  ;;  %19714 = vmatmul.mubr.msk.f32.vlgmr.msra.gmra.mrb[6].mxu1 %vm680_vm1, %v22392_v37  ;;  %v10467_v37 = vrot.slane %v22462_v59, %v20626_v49  ;;  %v11109_v2 = vrot.slane %v22510_v38, %v20571_v19  ;;  %v11105_v52 = vrot.slane %v22510_v38, %v20573_v21 }
 0x262   : > { %19718 = vmatmul.mubr.msk.f32.vlgmr.msra.gmra.mrb[0].mxu0 %vm680_vm1, %v22479_v7  ;;  %10575 = vmatpush1.msra.mxu1 %v10486_v43  ;;  %v11101_v43 = vrot.slane %v22510_v38, %v20558_v12 }
 0x263   : > { %10646 = vmatpush1.msra.mxu0 %v10488_v25  ;;  %10716 = vmatprep.subr.mxu1 %v10491_v23  ;;  %v10463_v25 = vrot.slane %v22462_v59, %v20623_v46  ;;  %v11097_v23 = vrot.slane %v22510_v38, %v20560_v13  ;;  %v24010_v59 = vld [vmem:[#allocation66_spill] sm:$0xff] }
 0x264   : > { %10787 = vmatprep.subr.mxu0 %v10493_v35  ;;  %10638 = vmatprep.mubr.f32.mxu1 %v23863_v14  ;;  %v24008_v35 = vld [vmem:[#allocation70_spill] sm:$0xff]  ;;  %v10499_v16 = vmul.f32 %v10467_v37, %v24010_v59  ;;  %v22549_v37 = vld [vmem:[%s23597_s4 + $0xf8] sm:$0xff] }
 0x265   : > { %10709 = vmatprep.mubr.f32.mxu0 %v23863_v14  ;;  %19719 = vmatmul.mubr.msk.f32.vlgmr.msra.gmra.mrb[0].mxu1 %vm680_vm1, %v22479_v7  ;;  %v10494_v10 = vmul.f32 %v10447_v26, %v24008_v35  ;;  %v11117_v26 = vrot.slane %v22510_v38, %v20601_v36  ;;  %v11174_v51 = vmul.f32 %v11097_v23, %v24013_v50 }
 0x266   : > { %19720 = vmatmul.mubr.msk.f32.vlgmr.msra.gmra.mrb[2].mxu0 %vm680_vm1, %v22479_v7  ;;  %10717 = vmatpush1.msra.mxu1 %v10490_v39  ;;  %v24011_v39 = vld [vmem:[#allocation79_spill] sm:$0xff]  ;;  %v11121_v50 = vrot.slane %v22510_v38, %v20623_v46 }
 0x267   : > { %10788 = vmatpush1.msra.mxu0 %v10492_v29  ;;  %10858 = vmatprep.subr.mxu1 %v10495_v45  ;;  %v11175_v29 = vmul.f32 %v11101_v43, %v24011_v39  ;;  %v11113_v45 = vrot.slane %v22510_v38, %v20594_v30  ;;  %v11129_v39 = vrot.slane %v22549_v37, %v20560_v13 }
 0x268   : > { %10929 = vmatprep.subr.mxu0 %v10497_v61  ;;  %10780 = vmatprep.mubr.f32.mxu1 %v23863_v14  ;;  %v24012_v61 = vld [vmem:[#allocation74_spill] sm:$0xff] }
 0x269   : > { %10851 = vmatprep.mubr.f32.mxu0 %v23863_v14  ;;  %19721 = vmatmul.mubr.msk.f32.vlgmr.msra.gmra.mrb[2].mxu1 %vm680_vm1, %v22479_v7  ;;  %v10498_v0 = vmul.f32 %v10463_v25, %v24012_v61  ;;  %v24015_v25 = vld [vmem:[#allocation83_spill] sm:$0xff] }
 0x26a   : > { %19722 = vmatmul.mubr.msk.f32.vlgmr.msra.gmra.mrb[4].mxu0 %vm680_vm1, %v22479_v7  ;;  %10859 = vmatpush1.msra.mxu1 %v10494_v10  ;;  %v24014_v10 = vld [vmem:[#allocation81_spill] sm:$0xff]  ;;  %v11179_v23 = vmul.f32 %v11117_v26, %v24015_v25  ;;  %v24017_v25 = vld [vmem:[#allocation80_spill] sm:$0xff] }
 0x26b   : > { %10930 = vmatpush1.msra.mxu0 %v10496_v57  ;;  %11000 = vmatprep.subr.mxu1 %v10499_v16  ;;  %v11125_v57 = vrot.slane %v22510_v38, %v20626_v49  ;;  %v11177_v43 = vmul.f32 %v11109_v2, %v24014_v10  ;;  %v11133_v16 = vrot.slane %v22549_v37, %v20558_v12  ;;  %v24016_v2 = vld [vmem:[#allocation78_spill] sm:$0xff] }
 0x26c   : > { %11193 = vmatprep.subr.mxu0 %v11175_v29  ;;  %10922 = vmatprep.mubr.f32.mxu1 %v23863_v14  ;;  %v22566_v29 = vld [vmem:[%s23596_s3 + $0x78] sm:$0xff]  ;;  %v11176_v26 = vmul.f32 %v11105_v52, %v24016_v2  ;;  %v11178_v10 = vmul.f32 %v11113_v45, %v24017_v25  ;;  %v11149_v52 = vrot.slane %v22549_v37, %v20601_v36  ;;  %v24020_v25 = vld [vmem:[#allocation82_spill] sm:$0xff]  ;;  %v24021_v2 = vld [vmem:[#allocation84_spill] sm:$0xff] }
 0x26d   : > { %10993 = vmatprep.mubr.f32.mxu0 %v23863_v14  ;;  %19723 = vmatmul.mubr.msk.f32.vlgmr.msra.gmra.mrb[4].mxu1 %vm680_vm1, %v22479_v7  ;;  %v11137_v45 = vrot.slane %v22549_v37, %v20573_v21  ;;  %v11180_v59 = vmul.f32 %v11121_v50, %v24020_v25  ;;  %v11182_v61 = vmul.f32 %v11129_v39, %v24021_v2  ;;  %v24022_v50 = vld [vmem:[#allocation89_spill] sm:$0xff]  ;;  %v24025_v25 = vld [vmem:[#allocation88_spill] sm:$0xff] }
 0x26e   : > { %19724 = vmatmul.mubr.msk.f32.vlgmr.msra.gmra.mrb[6].mxu0 %vm680_vm1, %v22479_v7  ;;  %11001 = vmatpush1.msra.mxu1 %v10498_v0  ;;  %v24018_v0 = vld [vmem:[#allocation85_spill] sm:$0xff] }
 0x26f   : > { %11194 = vmatpush1.msra.mxu0 %v11174_v51  ;;  %11264 = vmatprep.subr.mxu1 %v11177_v43  ;;  %v11141_v51 = vrot.slane %v22549_v37, %v20571_v19  ;;  %v11181_v38 = vmul.f32 %v11125_v57, %v24018_v0  ;;  %v24019_v43 = vld [vmem:[#allocation87_spill] sm:$0xff]  ;;  %v11145_v57 = vrot.slane %v22549_v37, %v20594_v30  ;;  %v24024_v0 = vld [vmem:[#allocation86_spill] sm:$0xff] }
 0x270   : > { %11335 = vmatprep.subr.mxu0 %v11179_v23  ;;  %11064 = vmatprep.mubr.f32.mxu1 %v23863_v14  ;;  %v11183_v23 = vmul.f32 %v11133_v16, %v24019_v43  ;;  %v22597_v16 = vld [vmem:[%s23597_s4 + $0x100] sm:$0xff]  ;;  %v11184_v2 = vmul.f32 %v11137_v45, %v24024_v0 }
 0x271   : > { %11257 = vmatprep.mubr.f32.mxu0 %v23863_v14  ;;  %19725 = vmatmul.mubr.msk.f32.vlgmr.msra.gmra.mrb[6].mxu1 %vm680_vm1, %v22479_v7  ;;  %v11157_v7 = vrot.slane %v22549_v37, %v20626_v49  ;;  %v11185_v39 = vmul.f32 %v11141_v51, %v24022_v50  ;;  %v11787_v43 = vrot.slane %v22597_v16, %v20560_v13  ;;  %v24027_v51 = vld [vmem:[#allocation95_spill] sm:$0xff]  ;;  %v24029_v50 = vld [vmem:[#allocation93_spill] sm:$0xff] }
 0x272   : > { %19729 = vmatmul.mubr.msk.f32.vlgmr.msra.gmra.mrb[0].mxu0 %vm680_vm1, %v22566_v29  ;;  %11265 = vmatpush1.msra.mxu1 %v11176_v26  ;;  %v11186_v35 = vmul.f32 %v11145_v57, %v24025_v25  ;;  %v11807_v45 = vrot.slane %v22597_v16, %v20601_v36  ;;  %v11795_v57 = vrot.slane %v22597_v16, %v20573_v21 }
 0x273   : > { %11336 = vmatpush1.msra.mxu0 %v11178_v10  ;;  %11406 = vmatprep.subr.mxu1 %v11181_v38  ;;  %v24023_v10 = vld [vmem:[#allocation91_spill] sm:$0xff]  ;;  %v11791_v38 = vrot.slane %v22597_v16, %v20558_v12  ;;  %v11864_v25 = vmul.f32 %v11787_v43, %v24029_v50  ;;  %v11811_v50 = vrot.slane %v22597_v16, %v20623_v46 }
 0x274   : > { %11477 = vmatprep.subr.mxu0 %v11183_v23  ;;  %11328 = vmatprep.mubr.f32.mxu1 %v23863_v14  ;;  %v11187_v26 = vmul.f32 %v11149_v52, %v24023_v10  ;;  %v11153_v23 = vrot.slane %v22549_v37, %v20623_v46 }
 0x275   : > { %11399 = vmatprep.mubr.f32.mxu0 %v23863_v14  ;;  %19730 = vmatmul.mubr.msk.f32.vlgmr.msra.gmra.mrb[0].mxu1 %vm680_vm1, %v22566_v29  ;;  %v11865_v52 = vmul.f32 %v11791_v38, %v24027_v51  ;;  %v24031_v38 = vld [vmem:[#allocation99_spill] sm:$0xff] }
 0x276   : > { %19731 = vmatmul.mubr.msk.f32.vlgmr.msra.gmra.mrb[2].mxu0 %vm680_vm1, %v22566_v29  ;;  %11407 = vmatpush1.msra.mxu1 %v11180_v59  ;;  %v11799_v59 = vrot.slane %v22597_v16, %v20571_v19 }
 0x277   : > { %11478 = vmatpush1.msra.mxu0 %v11182_v61  ;;  %11548 = vmatprep.subr.mxu1 %v11185_v39  ;;  %v24026_v61 = vld [vmem:[#allocation76_spill] sm:$0xff]  ;;  %v11803_v39 = vrot.slane %v22597_v16, %v20594_v30 }
 0x278   : > { %11619 = vmatprep.subr.mxu0 %v11187_v26  ;;  %11470 = vmatprep.mubr.f32.mxu1 %v23863_v14  ;;  %v11189_v37 = vmul.f32 %v11157_v7, %v24026_v61  ;;  %v24028_v26 = vld [vmem:[#allocation90_spill] sm:$0xff]  ;;  %v22636_v7 = vld [vmem:[%s23597_s4 + $0x108] sm:$0xff] }
 0x279   : > { %11541 = vmatprep.mubr.f32.mxu0 %v23863_v14  ;;  %19732 = vmatmul.mubr.msk.f32.vlgmr.msra.gmra.mrb[2].mxu1 %vm680_vm1, %v22566_v29  ;;  %v11188_v10 = vmul.f32 %v11153_v23, %v24028_v26  ;;  %v11869_v23 = vmul.f32 %v11807_v45, %v24031_v38  ;;  %v11819_v51 = vrot.slane %v22636_v7, %v20560_v13  ;;  %v24033_v38 = vld [vmem:[#allocation96_spill] sm:$0xff] }
 0x27a   : > { %19733 = vmatmul.mubr.msk.f32.vlgmr.msra.gmra.mrb[4].mxu0 %vm680_vm1, %v22566_v29  ;;  %11549 = vmatpush1.msra.mxu1 %v11184_v2  ;;  %v24030_v2 = vld [vmem:[#allocation97_spill] sm:$0xff] }
 0x27b   : > { %11620 = vmatpush1.msra.mxu0 %v11186_v35  ;;  %11690 = vmatprep.subr.mxu1 %v11189_v37  ;;  %v11815_v35 = vrot.slane %v22597_v16, %v20626_v49  ;;  %v11867_v43 = vmul.f32 %v11799_v59, %v24030_v2  ;;  %v11823_v37 = vrot.slane %v22636_v7, %v20558_v12  ;;  %v24032_v59 = vld [vmem:[#allocation94_spill] sm:$0xff]  ;;  %v24034_v16 = vld [vmem:[#allocation101_spill] sm:$0xff] }
 0x27c   : > { %11883 = vmatprep.subr.mxu0 %v11865_v52  ;;  %11612 = vmatprep.mubr.f32.mxu1 %v23863_v14  ;;  %v22653_v52 = vld [vmem:[%s23596_s3 + $0x80] sm:$0xff]  ;;  %v11866_v45 = vmul.f32 %v11795_v57, %v24032_v59  ;;  %v11868_v2 = vmul.f32 %v11803_v39, %v24033_v38  ;;  %v11839_v57 = vrot.slane %v22636_v7, %v20601_v36  ;;  %v24037_v59 = vld [vmem:[#allocation100_spill] sm:$0xff] }
 0x27d   : > { %11683 = vmatprep.mubr.f32.mxu0 %v23863_v14  ;;  %19734 = vmatmul.mubr.msk.f32.vlgmr.msra.gmra.mrb[4].mxu1 %vm680_vm1, %v22566_v29  ;;  %v11827_v39 = vrot.slane %v22636_v7, %v20573_v21  ;;  %v24036_v38 = vld [vmem:[#allocation98_spill] sm:$0xff]  ;;  %v11872_v26 = vmul.f32 %v11819_v51, %v24037_v59 }
 0x27e   : > { %19735 = vmatmul.mubr.msk.f32.vlgmr.msra.gmra.mrb[6].mxu0 %vm680_vm1, %v22566_v29  ;;  %11691 = vmatpush1.msra.mxu1 %v11188_v10  ;;  %v11871_v10 = vmul.f32 %v11815_v35, %v24034_v16  ;;  %v11870_v61 = vmul.f32 %v11811_v50, %v24036_v38  ;;  %v11835_v35 = vrot.slane %v22636_v7, %v20594_v30  ;;  %v24038_v50 = vld [vmem:[#allocation105_spill] sm:$0xff]  ;;  %v24040_v16 = vld [vmem:[#allocation102_spill] sm:$0xff]  ;;  %v24041_v38 = vld [vmem:[#allocation104_spill] sm:$0xff] }
 0x27f   : > { %11884 = vmatpush1.msra.mxu0 %v11864_v25  ;;  %11954 = vmatprep.subr.mxu1 %v11867_v43  ;;  %v11831_v25 = vrot.slane %v22636_v7, %v20571_v19  ;;  %v24035_v43 = vld [vmem:[#allocation103_spill] sm:$0xff]  ;;  %v11874_v59 = vmul.f32 %v11827_v39, %v24040_v16 }
 0x280   : > { %12025 = vmatprep.subr.mxu0 %v11869_v23  ;;  %11754 = vmatprep.mubr.f32.mxu1 %v23863_v14  ;;  %v11873_v23 = vmul.f32 %v11823_v37, %v24035_v43  ;;  %v22684_v37 = vld [vmem:[%s23597_s4 + $0x110] sm:$0xff]  ;;  %v11876_v0 = vmul.f32 %v11835_v35, %v24041_v38 }
 0x281   : > { %11947 = vmatprep.mubr.f32.mxu0 %v23863_v14  ;;  %19736 = vmatmul.mubr.msk.f32.vlgmr.msra.gmra.mrb[6].mxu1 %vm680_vm1, %v22566_v29  ;;  %v11847_v29 = vrot.slane %v22636_v7, %v20626_v49  ;;  %v11875_v51 = vmul.f32 %v11831_v25, %v24038_v50  ;;  %v12477_v43 = vrot.slane %v22684_v37, %v20560_v13  ;;  %v24043_v25 = vld [vmem:[#allocation111_spill] sm:$0xff]  ;;  %v24045_v50 = vld [vmem:[#allocation109_spill] sm:$0xff] }
 0x282   : > { %19740 = vmatmul.mubr.msk.f32.vlgmr.msra.gmra.mrb[0].mxu0 %vm680_vm1, %v22653_v52  ;;  %11955 = vmatpush1.msra.mxu1 %v11866_v45  ;;  %v12497_v39 = vrot.slane %v22684_v37, %v20601_v36  ;;  %v12485_v35 = vrot.slane %v22684_v37, %v20573_v21 }
 0x283   : > { %12026 = vmatpush1.msra.mxu0 %v11868_v2  ;;  %12096 = vmatprep.subr.mxu1 %v11871_v10  ;;  %v24039_v2 = vld [vmem:[#allocation107_spill] sm:$0xff]  ;;  %v12481_v10 = vrot.slane %v22684_v37, %v20558_v12  ;;  %v12554_v38 = vmul.f32 %v12477_v43, %v24045_v50  ;;  %v12501_v50 = vrot.slane %v22684_v37, %v20623_v46 }
 0x284   : > { %12167 = vmatprep.subr.mxu0 %v11873_v23  ;;  %12018 = vmatprep.mubr.f32.mxu1 %v23863_v14  ;;  %v11877_v45 = vmul.f32 %v11839_v57, %v24039_v2  ;;  %v11843_v23 = vrot.slane %v22636_v7, %v20623_v46 }
 0x285   : > { %12089 = vmatprep.mubr.f32.mxu0 %v23863_v14  ;;  %19741 = vmatmul.mubr.msk.f32.vlgmr.msra.gmra.mrb[0].mxu1 %vm680_vm1, %v22653_v52  ;;  %v12555_v57 = vmul.f32 %v12481_v10, %v24043_v25  ;;  %v24047_v10 = vld [vmem:[#allocation115_spill] sm:$0xff] }
 0x286   : > { %19742 = vmatmul.mubr.msk.f32.vlgmr.msra.gmra.mrb[2].mxu0 %vm680_vm1, %v22653_v52  ;;  %12097 = vmatpush1.msra.mxu1 %v11870_v61  ;;  %v12489_v61 = vrot.slane %v22684_v37, %v20571_v19 }
 0x287   : > { %12168 = vmatpush1.msra.mxu0 %v11872_v26  ;;  %12238 = vmatprep.subr.mxu1 %v11875_v51  ;;  %v24042_v26 = vld [vmem:[#allocation92_spill] sm:$0xff]  ;;  %v12493_v51 = vrot.slane %v22684_v37, %v20594_v30 }
 0x288   : > { %12309 = vmatprep.subr.mxu0 %v11877_v45  ;;  %12160 = vmatprep.mubr.f32.mxu1 %v23863_v14  ;;  %v11879_v7 = vmul.f32 %v11847_v29, %v24042_v26  ;;  %v24044_v45 = vld [vmem:[#allocation106_spill] sm:$0xff]  ;;  %v22723_v29 = vld [vmem:[%s23597_s4 + $0x118] sm:$0xff] }
 0x289   : > { %12231 = vmatprep.mubr.f32.mxu0 %v23863_v14  ;;  %19743 = vmatmul.mubr.msk.f32.vlgmr.msra.gmra.mrb[2].mxu1 %vm680_vm1, %v22653_v52  ;;  %v11878_v2 = vmul.f32 %v11843_v23, %v24044_v45  ;;  %v12559_v23 = vmul.f32 %v12497_v39, %v24047_v10  ;;  %v12509_v25 = vrot.slane %v22723_v29, %v20560_v13  ;;  %v24049_v39 = vld [vmem:[#allocation112_spill] sm:$0xff] }
 0x28a   : > { %19744 = vmatmul.mubr.msk.f32.vlgmr.msra.gmra.mrb[4].mxu0 %vm680_vm1, %v22653_v52  ;;  %12239 = vmatpush1.msra.mxu1 %v11874_v59  ;;  %v24046_v59 = vld [vmem:[#allocation113_spill] sm:$0xff]  ;;  %v12558_v10 = vmul.f32 %v12493_v51, %v24049_v39  ;;  %v12517_v51 = vrot.slane %v22723_v29, %v20573_v21  ;;  %v24052_v39 = vld [vmem:[#allocation114_spill] sm:$0xff]  ;;  %v24053_v45 = vld [vmem:[#allocation116_spill] sm:$0xff] }
 0x28b   : > { %12310 = vmatpush1.msra.mxu0 %v11876_v0  ;;  %12380 = vmatprep.subr.mxu1 %v11879_v7  ;;  %v12505_v0 = vrot.slane %v22684_v37, %v20626_v49  ;;  %v12557_v43 = vmul.f32 %v12489_v61, %v24046_v59  ;;  %v12513_v7 = vrot.slane %v22723_v29, %v20558_v12  ;;  %v22749_v61 = vld [vmem:[%s23597_s4 + $0x120] sm:$0xff]  ;;  %v24051_v59 = vld [vmem:[#allocation119_spill] sm:$0xff] }
 0x28c   : > { %12573 = vmatprep.subr.mxu0 %v12555_v57  ;;  %12302 = vmatprep.mubr.f32.mxu1 %v23863_v14  ;;  %v22740_v57 = vld [vmem:[%s23596_s3 + $0x88] sm:$0xff]  ;;  %v12521_v37 = vrot.slane %v22723_v29, %v20571_v19  ;;  %v12562_v16 = vmul.f32 %v12509_v25, %v24053_v45  ;;  %v13167_v25 = vrot.slane %v22749_v61, %v20560_v13 }
 0x28d   : > { %12373 = vmatprep.mubr.f32.mxu0 %v23863_v14  ;;  %19745 = vmatmul.mubr.msk.f32.vlgmr.msra.gmra.mrb[4].mxu1 %vm680_vm1, %v22653_v52  ;;  %v12563_v26 = vmul.f32 %v12513_v7, %v24051_v59 }
 0x28e   : > { %19746 = vmatmul.mubr.msk.f32.vlgmr.msra.gmra.mrb[6].mxu0 %vm680_vm1, %v22653_v52  ;;  %12381 = vmatpush1.msra.mxu1 %v11878_v2  ;;  %v24048_v2 = vld [vmem:[#allocation110_spill] sm:$0xff] }
 0x28f   : > { %12574 = vmatpush1.msra.mxu0 %v12554_v38  ;;  %12644 = vmatprep.subr.mxu1 %v12557_v43  ;;  %v12556_v38 = vmul.f32 %v12485_v35, %v24048_v2  ;;  %v24050_v43 = vld [vmem:[#allocation117_spill] sm:$0xff]  ;;  %v12529_v35 = vrot.slane %v22723_v29, %v20601_v36  ;;  %v12560_v2 = vmul.f32 %v12501_v50, %v24052_v39 }
 0x290   : > { %12715 = vmatprep.subr.mxu0 %v12559_v23  ;;  %12444 = vmatprep.mubr.f32.mxu1 %v23863_v14  ;;  %v12561_v23 = vmul.f32 %v12505_v0, %v24050_v43  ;;  %v12525_v0 = vrot.slane %v22723_v29, %v20594_v30  ;;  %v12537_v50 = vrot.slane %v22723_v29, %v20626_v49  ;;  %v24056_v43 = vld [vmem:[#allocation120_spill] sm:$0xff] }
 0x291   : > { %12637 = vmatprep.mubr.f32.mxu0 %v23863_v14  ;;  %19747 = vmatmul.mubr.msk.f32.vlgmr.msra.gmra.mrb[6].mxu1 %vm680_vm1, %v22653_v52  ;;  %v13171_v52 = vrot.slane %v22749_v61, %v20558_v12  ;;  %v12567_v7 = vmul.f32 %v12529_v35, %v22025_v17 }
 0x292   : > { %19751 = vmatmul.mubr.msk.f32.vlgmr.msra.gmra.mrb[0].mxu0 %vm680_vm1, %v22740_v57  ;;  %12645 = vmatpush1.msra.mxu1 %v12556_v38  ;;  %v13179_v38 = vrot.slane %v22749_v61, %v20571_v19  ;;  %v12566_v45 = vmul.f32 %v12525_v0, %v24056_v43  ;;  %v13183_v0 = vrot.slane %v22749_v61, %v20594_v30 }
 0x293   : > { %12716 = vmatpush1.msra.mxu0 %v12558_v10  ;;  %12786 = vmatprep.subr.mxu1 %v12561_v23  ;;  %v24055_v23 = vld [vmem:[#allocation118_spill] sm:$0xff]  ;;  %v13245_v35 = vmul.f32 %v13171_v52, %v20797_v62  ;;  %v13244_v62 = vmul.f32 %v13167_v25, %v20801_v5  ;;  %v13191_v25 = vrot.slane %v22749_v61, %v20623_v46 }
 0x294   : > { %12857 = vmatprep.subr.mxu0 %v12563_v26  ;;  %12708 = vmatprep.mubr.f32.mxu1 %v23863_v14  ;;  %v24054_v26 = vld [vmem:[#allocation121_spill] sm:$0xff]  ;;  %v12564_v59 = vmul.f32 %v12517_v51, %v24055_v23  ;;  %v13187_v51 = vrot.slane %v22749_v61, %v20601_v36 }
 0x295   : > { %12779 = vmatprep.mubr.f32.mxu0 %v23863_v14  ;;  %19752 = vmatmul.mubr.msk.f32.vlgmr.msra.gmra.mrb[0].mxu1 %vm680_vm1, %v22740_v57  ;;  %v12565_v10 = vmul.f32 %v12521_v37, %v24054_v26  ;;  %v12533_v37 = vrot.slane %v22723_v29, %v20623_v46  ;;  %v13175_v29 = vrot.slane %v22749_v61, %v20573_v21 }
 0x296   : > { %19753 = vmatmul.mubr.msk.f32.vlgmr.msra.gmra.mrb[2].mxu0 %vm680_vm1, %v22740_v57  ;;  %12787 = vmatpush1.msra.mxu1 %v12560_v2 }
 0x297   : > { %12858 = vmatpush1.msra.mxu0 %v12562_v16  ;;  %12928 = vmatprep.subr.mxu1 %v12565_v10  ;;  %v24057_v16 = vld [vmem:[#allocation108_spill] sm:$0xff]  ;;  %v22808_v10 = vld [vmem:[%s23597_s4 + $0x128] sm:$0xff]  ;;  %v12568_v52 = vmul.f32 %v12533_v37, %v22021_v42 }
 0x298   : > { %12999 = vmatprep.subr.mxu0 %v12567_v7  ;;  %12850 = vmatprep.mubr.f32.mxu1 %v23863_v14  ;;  %v12569_v2 = vmul.f32 %v12537_v50, %v24057_v16  ;;  %v13249_v7 = vmul.f32 %v13187_v51, %v20844_v9  ;;  %v13203_v5 = vrot.slane %v22808_v10, %v20558_v12  ;;  %v22827_v50 = vld [vmem:[%s23596_s3 + $0x90] sm:$0xff] }
 0x299   : > { %12921 = vmatprep.mubr.f32.mxu0 %v23863_v14  ;;  %19754 = vmatmul.mubr.msk.f32.vlgmr.msra.gmra.mrb[2].mxu1 %vm680_vm1, %v22740_v57  ;;  %v13199_v37 = vrot.slane %v22808_v10, %v20560_v13  ;;  %v13246_v9 = vmul.f32 %v13175_v29, %v20822_v28  ;;  %v13219_v28 = vrot.slane %v22808_v10, %v20601_v36 }
 0x29a   : > { %19755 = vmatmul.mubr.msk.f32.vlgmr.msra.gmra.mrb[4].mxu0 %vm680_vm1, %v22740_v57  ;;  %12929 = vmatpush1.msra.mxu1 %v12564_v59  ;;  %v13247_v59 = vmul.f32 %v13179_v38, %v20818_v24  ;;  %v22836_v24 = vld [vmem:[%s23597_s4 + $0x130] sm:$0xff]  ;;  %v13248_v38 = vmul.f32 %v13183_v0, %v20848_v3  ;;  %v13207_v3 = vrot.slane %v22808_v10, %v20573_v21 }
 0x29b   : > { %13000 = vmatpush1.msra.mxu0 %v12566_v45  ;;  %13070 = vmatprep.subr.mxu1 %v12569_v2  ;;  %v13195_v45 = vrot.slane %v22749_v61, %v20626_v49  ;;  %v13211_v61 = vrot.slane %v22808_v10, %v20571_v19  ;;  %v13250_v51 = vmul.f32 %v13191_v25, %v20869_v33 }
 0x29c   : > { %13263 = vmatprep.subr.mxu0 %v13245_v35  ;;  %12992 = vmatprep.mubr.f32.mxu1 %v23863_v14  ;;  %v13253_v35 = vmul.f32 %v13203_v5, %v20886_v44  ;;  %v13252_v29 = vmul.f32 %v13199_v37, %v20890_v22  ;;  %v13257_v0 = vmul.f32 %v13219_v28, %v20936_v32  ;;  %v24059_v5 = vld [vmem:[#allocation34_spill] sm:$0xff]  ;;  %v22914_v28 = vld [vmem:[%s23596_s3 + $0x98] sm:$0xff] }
 0x29d   : > { %13063 = vmatprep.mubr.f32.mxu0 %v23863_v14  ;;  %19756 = vmatmul.mubr.msk.f32.vlgmr.msra.gmra.mrb[4].mxu1 %vm680_vm1, %v22740_v57  ;;  %v13251_v2 = vmul.f32 %v13195_v45, %v20865_v41  ;;  %v13215_v41 = vrot.slane %v22808_v10, %v20594_v30  ;;  %v13255_v44 = vmul.f32 %v13211_v61, %v20907_v47  ;;  %v24061_v61 = vld [vmem:[#allocation24_spill] sm:$0xff] }
 0x29e   : > { %19757 = vmatmul.mubr.msk.f32.vlgmr.msra.gmra.mrb[6].mxu0 %vm680_vm1, %v22740_v57  ;;  %13071 = vmatpush1.msra.mxu1 %v12568_v52  ;;  %v13227_v22 = vrot.slane %v22808_v10, %v20626_v49  ;;  %v13857_v33 = vrot.slane %v22836_v24, %v20560_v13  ;;  %v13223_v52 = vrot.slane %v22808_v10, %v20623_v46 }
 0x29f   : > { %13264 = vmatpush1.msra.mxu0 %v13244_v62  ;;  %13334 = vmatprep.subr.mxu1 %v13247_v59  ;;  %v13869_v62 = vrot.slane %v22836_v24, %v20571_v19  ;;  %v13254_v47 = vmul.f32 %v13207_v3, %v20911_v20  ;;  %v13256_v32 = vmul.f32 %v13215_v41, %v20940_v27  ;;  %v24063_v41 = vld [vmem:[#allocation25_spill] sm:$0xff] }
 0x2a0   : > { %13405 = vmatprep.subr.mxu0 %v13249_v7  ;;  %13134 = vmatprep.mubr.f32.mxu1 %v23863_v14  ;;  %v13259_v45 = vmul.f32 %v13227_v22, %v20775_v31  ;;  %v13877_v10 = vrot.slane %v22836_v24, %v20601_v36  ;;  %v13865_v20 = vrot.slane %v22836_v24, %v20573_v21  ;;  %v22895_v7 = vld [vmem:[%s23597_s4 + $0x138] sm:$0xff]  ;;  %v24058_v31 = vld [vmem:[#allocation20_spill] sm:$0xff] }
 0x2a1   : > { %13327 = vmatprep.mubr.f32.mxu0 %v23863_v14  ;;  %19758 = vmatmul.mubr.msk.f32.vlgmr.msra.gmra.mrb[6].mxu1 %vm680_vm1, %v22740_v57  ;;  %v13861_v57 = vrot.slane %v22836_v24, %v20558_v12  ;;  %v13873_v27 = vrot.slane %v22836_v24, %v20594_v30  ;;  %v13258_v25 = vmul.f32 %v13223_v52, %v24059_v5  ;;  %v24069_v5 = vld [vmem:[#allocation32_spill] sm:$0xff] }
 0x2a2   : > { %19762 = vmatmul.mubr.msk.f32.vlgmr.msra.gmra.mrb[0].mxu0 %vm680_vm1, %v22827_v50  ;;  %13335 = vmatpush1.msra.mxu1 %v13246_v9  ;;  %v13885_v37 = vrot.slane %v22836_v24, %v20626_v49  ;;  %v24060_v9 = vld [vmem:[#allocation22_spill] sm:$0xff]  ;;  %v13881_v3 = vrot.slane %v22836_v24, %v20623_v46  ;;  %v13909_v52 = vrot.slane %v22895_v7, %v20601_v36 }
 0x2a3   : > { %13406 = vmatpush1.msra.mxu0 %v13248_v38  ;;  %13476 = vmatprep.subr.mxu1 %v13251_v2  ;;  %v13935_v59 = vmul.f32 %v13861_v57, %v23952_v54  ;;  %v13934_v54 = vmul.f32 %v13857_v33, %v24058_v31  ;;  %v13937_v38 = vmul.f32 %v13869_v62, %v24060_v9  ;;  %v24064_v24 = vld [vmem:[#allocation26_spill] sm:$0xff]  ;;  %v24065_v33 = vld [vmem:[#allocation28_spill] sm:$0xff] }
 0x2a4   : > { %13547 = vmatprep.subr.mxu0 %v13253_v35  ;;  %13398 = vmatprep.mubr.f32.mxu1 %v23863_v14  ;;  %v13939_v2 = vmul.f32 %v13877_v10, %v24061_v61  ;;  %v13893_v35 = vrot.slane %v22895_v7, %v20558_v12  ;;  %v13889_v57 = vrot.slane %v22895_v7, %v20560_v13  ;;  %v24067_v10 = vld [vmem:[#allocation29_spill] sm:$0xff]  ;;  %v24068_v31 = vld [vmem:[#allocation30_spill] sm:$0xff]  ;;  %v24070_v61 = vld [vmem:[#allocation31_spill] sm:$0xff] }
 0x2a5   : > { %13469 = vmatprep.mubr.f32.mxu0 %v23863_v14  ;;  %19763 = vmatmul.mubr.msk.f32.vlgmr.msra.gmra.mrb[0].mxu1 %vm680_vm1, %v22827_v50  ;;  %v13941_v22 = vmul.f32 %v13885_v37, %v24064_v24  ;;  %v13913_v9 = vrot.slane %v22895_v7, %v20623_v46 }
 0x2a6   : > { %19764 = vmatmul.mubr.msk.f32.vlgmr.msra.gmra.mrb[2].mxu0 %vm680_vm1, %v22827_v50  ;;  %13477 = vmatpush1.msra.mxu1 %v13250_v51  ;;  %v24062_v51 = vld [vmem:[#allocation23_spill] sm:$0xff]  ;;  %v13943_v62 = vmul.f32 %v13893_v35, %v24065_v33  ;;  %v24071_v35 = vld [vmem:[#allocation33_spill] sm:$0xff] }
 0x2a7   : > { %13548 = vmatpush1.msra.mxu0 %v13252_v29  ;;  %13618 = vmatprep.subr.mxu1 %v13255_v44  ;;  %v13936_v29 = vmul.f32 %v13865_v20, %v24062_v51  ;;  %v13938_v44 = vmul.f32 %v13873_v27, %v24063_v41  ;;  %v13942_v20 = vmul.f32 %v13889_v57, %v24067_v10  ;;  %v24077_v10 = vld [vmem:[#allocation41_spill] sm:$0xff] }
 0x2a8   : > { %13689 = vmatprep.subr.mxu0 %v13257_v0  ;;  %13540 = vmatprep.mubr.f32.mxu1 %v23863_v14  ;;  %v13901_v0 = vrot.slane %v22895_v7, %v20571_v19  ;;  %v13917_v27 = vrot.slane %v22895_v7, %v20626_v49 }
 0x2a9   : > { %13611 = vmatprep.mubr.f32.mxu0 %v23863_v14  ;;  %19765 = vmatmul.mubr.msk.f32.vlgmr.msra.gmra.mrb[2].mxu1 %vm680_vm1, %v22827_v50 }
 0x2aa   : > { %19766 = vmatmul.mubr.msk.f32.vlgmr.msra.gmra.mrb[4].mxu0 %vm680_vm1, %v22827_v50  ;;  %13619 = vmatpush1.msra.mxu1 %v13254_v47  ;;  %v22937_v47 = vld [vmem:[%s23597_s4 + $0x140] sm:$0xff] }
 0x2ab   : > { %13690 = vmatpush1.msra.mxu0 %v13256_v32  ;;  %13760 = vmatprep.subr.mxu1 %v13259_v45  ;;  %v13905_v32 = vrot.slane %v22895_v7, %v20594_v30  ;;  %v24066_v45 = vld [vmem:[#allocation27_spill] sm:$0xff]  ;;  %v14551_v37 = vrot.slane %v22937_v47, %v20558_v12  ;;  %v14559_v57 = vrot.slane %v22937_v47, %v20571_v19 }
 0x2ac   : > { %13953 = vmatprep.subr.mxu0 %v13935_v59  ;;  %13682 = vmatprep.mubr.f32.mxu1 %v23863_v14  ;;  %v13940_v59 = vmul.f32 %v13881_v3, %v24066_v45  ;;  %v14563_v24 = vrot.slane %v22937_v47, %v20594_v30  ;;  %v24076_v45 = vld [vmem:[#allocation39_spill] sm:$0xff] }
 0x2ad   : > { %13753 = vmatprep.mubr.f32.mxu0 %v23863_v14  ;;  %19767 = vmatmul.mubr.msk.f32.vlgmr.msra.gmra.mrb[4].mxu1 %vm680_vm1, %v22827_v50  ;;  %v13946_v3 = vmul.f32 %v13905_v32, %v24071_v35  ;;  %v14575_v32 = vrot.slane %v22937_v47, %v20626_v49  ;;  %v24081_v35 = vld [vmem:[#allocation45_spill] sm:$0xff] }
 0x2ae   : > { %19768 = vmatmul.mubr.msk.f32.vlgmr.msra.gmra.mrb[6].mxu0 %vm680_vm1, %v22827_v50  ;;  %13761 = vmatpush1.msra.mxu1 %v13258_v25  ;;  %v13947_v25 = vmul.f32 %v13909_v52, %v24069_v5  ;;  %v24075_v52 = vld [vmem:[#allocation38_spill] sm:$0xff] }
 0x2af   : > { %13954 = vmatpush1.msra.mxu0 %v13934_v54  ;;  %14024 = vmatprep.subr.mxu1 %v13937_v38  ;;  %v13945_v54 = vmul.f32 %v13901_v0, %v24068_v31  ;;  %v14547_v38 = vrot.slane %v22937_v47, %v20560_v13  ;;  %v14555_v0 = vrot.slane %v22937_v47, %v20573_v21  ;;  %v23001_v31 = vld [vmem:[%s23596_s3 + $0xa0] sm:$0xff] }
 0x2b0   : > { %14095 = vmatprep.subr.mxu0 %v13939_v2  ;;  %13824 = vmatprep.mubr.f32.mxu1 %v23863_v14 }
 0x2b1   : > { %14017 = vmatprep.mubr.f32.mxu0 %v23863_v14  ;;  %19769 = vmatmul.mubr.msk.f32.vlgmr.msra.gmra.mrb[6].mxu1 %vm680_vm1, %v22827_v50  ;;  %v13897_v50 = vrot.slane %v22895_v7, %v20573_v21  ;;  %v24072_v7 = vld [vmem:[#allocation19_spill] sm:$0xff] }
 0x2b2   : > { %19773 = vmatmul.mubr.msk.f32.vlgmr.msra.gmra.mrb[0].mxu0 %vm680_vm1, %v22914_v28  ;;  %14025 = vmatpush1.msra.mxu1 %v13936_v29  ;;  %v13949_v51 = vmul.f32 %v13917_v27, %v24072_v7  ;;  %v24073_v29 = vld [vmem:[#allocation37_spill] sm:$0xff]  ;;  %v23024_v7 = vld [vmem:[%s23597_s4 + $0x150] sm:$0xff] }
 0x2b3   : > { %14096 = vmatpush1.msra.mxu0 %v13938_v44  ;;  %14166 = vmatprep.subr.mxu1 %v13941_v22  ;;  %v13944_v2 = vmul.f32 %v13897_v50, %v24070_v61  ;;  %v14625_v41 = vmul.f32 %v14551_v37, %v24073_v29  ;;  %v14567_v44 = vrot.slane %v22937_v47, %v20601_v36  ;;  %v24074_v22 = vld [vmem:[#allocation18_spill] sm:$0xff]  ;;  %v24082_v29 = vld [vmem:[#allocation44_spill] sm:$0xff] }
 0x2b4   : > { %14237 = vmatprep.subr.mxu0 %v13943_v62  ;;  %14088 = vmatprep.mubr.f32.mxu1 %v23863_v14  ;;  %v13948_v33 = vmul.f32 %v13913_v9, %v24074_v22  ;;  %v22983_v62 = vld [vmem:[%s23597_s4 + $0x148] sm:$0xff]  ;;  %v14624_v50 = vmul.f32 %v14547_v38, %v24075_v52  ;;  %v24079_v9 = vld [vmem:[#allocation42_spill] sm:$0xff]  ;;  %v24085_v52 = vld [vmem:[#allocation49_spill] sm:$0xff] }
 0x2b5   : > { %14159 = vmatprep.mubr.f32.mxu0 %v23863_v14  ;;  %19774 = vmatmul.mubr.msk.f32.vlgmr.msra.gmra.mrb[0].mxu1 %vm680_vm1, %v22914_v28  ;;  %v14583_v27 = vrot.slane %v22983_v62, %v20558_v12  ;;  %v14579_v5 = vrot.slane %v22983_v62, %v20560_v13  ;;  %v14628_v38 = vmul.f32 %v14563_v24, %v24079_v9  ;;  %v24084_v22 = vld [vmem:[#allocation47_spill] sm:$0xff] }
 0x2b6   : > { %19775 = vmatmul.mubr.msk.f32.vlgmr.msra.gmra.mrb[2].mxu0 %vm680_vm1, %v22914_v28  ;;  %14167 = vmatpush1.msra.mxu1 %v13940_v59  ;;  %v14627_v59 = vmul.f32 %v14559_v57, %v24076_v45  ;;  %v14591_v61 = vrot.slane %v22983_v62, %v20571_v19  ;;  %v14599_v57 = vrot.slane %v22983_v62, %v20601_v36 }
 0x2b7   : > { %14238 = vmatpush1.msra.mxu0 %v13942_v20  ;;  %14308 = vmatprep.subr.mxu1 %v13945_v54  ;;  %v14629_v20 = vmul.f32 %v14567_v44, %v24077_v10  ;;  %v14571_v54 = vrot.slane %v22937_v47, %v20623_v46  ;;  %v24080_v47 = vld [vmem:[#allocation43_spill] sm:$0xff]  ;;  %v24083_v44 = vld [vmem:[#allocation46_spill] sm:$0xff]  ;;  %v14595_v24 = vrot.slane %v22983_v62, %v20594_v30  ;;  %v24086_v10 = vld [vmem:[#allocation48_spill] sm:$0xff] }
 0x2b8   : > { %14379 = vmatprep.subr.mxu0 %v13947_v25  ;;  %14230 = vmatprep.mubr.f32.mxu1 %v23863_v14  ;;  %v24078_v25 = vld [vmem:[#allocation40_spill] sm:$0xff]  ;;  %v14603_v45 = vrot.slane %v22983_v62, %v20623_v46 }
 0x2b9   : > { %14301 = vmatprep.mubr.f32.mxu0 %v23863_v14  ;;  %19776 = vmatmul.mubr.msk.f32.vlgmr.msra.gmra.mrb[2].mxu1 %vm680_vm1, %v22914_v28  ;;  %v14626_v37 = vmul.f32 %v14555_v0, %v24078_v25  ;;  %v14632_v0 = vmul.f32 %v14579_v5, %v24083_v44  ;;  %v15249_v5 = vrot.slane %v23024_v7, %v20571_v19 }
 0x2ba   : > { %19777 = vmatmul.mubr.msk.f32.vlgmr.msra.gmra.mrb[4].mxu0 %vm680_vm1, %v22914_v28  ;;  %14309 = vmatpush1.msra.mxu1 %v13944_v2  ;;  %v14631_v2 = vmul.f32 %v14575_v32, %v24080_v47  ;;  %v15241_v32 = vrot.slane %v23024_v7, %v20558_v12  ;;  %v15253_v47 = vrot.slane %v23024_v7, %v20594_v30 }
 0x2bb   : > { %14380 = vmatpush1.msra.mxu0 %v13946_v3  ;;  %14450 = vmatprep.subr.mxu1 %v13949_v51  ;;  %v14633_v3 = vmul.f32 %v14583_v27, %v24081_v35  ;;  %v14607_v51 = vrot.slane %v22983_v62, %v20626_v49  ;;  %v24087_v27 = vld [vmem:[#allocation50_spill] sm:$0xff] }
 0x2bc   : > { %14643 = vmatprep.subr.mxu0 %v14625_v41  ;;  %14372 = vmatprep.mubr.f32.mxu1 %v23863_v14  ;;  %v14630_v41 = vmul.f32 %v14571_v54, %v24082_v29  ;;  %v14636_v54 = vmul.f32 %v14595_v24, %v24087_v27  ;;  %v24092_v29 = vld [vmem:[#allocation55_spill] sm:$0xff] }
 0x2bd   : > { %14443 = vmatprep.mubr.f32.mxu0 %v23863_v14  ;;  %19778 = vmatmul.mubr.msk.f32.vlgmr.msra.gmra.mrb[4].mxu1 %vm680_vm1, %v22914_v28  ;;  %v23088_v24 = vld [vmem:[%s23596_s3 + $0xa8] sm:$0xff] }
 0x2be   : > { %19779 = vmatmul.mubr.msk.f32.vlgmr.msra.gmra.mrb[6].mxu0 %vm680_vm1, %v22914_v28  ;;  %14451 = vmatpush1.msra.mxu1 %v13948_v33  ;;  %v14635_v33 = vmul.f32 %v14591_v61, %v24084_v22  ;;  %v15245_v61 = vrot.slane %v23024_v7, %v20573_v21  ;;  %v15261_v22 = vrot.slane %v23024_v7, %v20623_v46 }
 0x2bf   : > { %14644 = vmatpush1.msra.mxu0 %v14624_v50  ;;  %14714 = vmatprep.subr.mxu1 %v14627_v59  ;;  %v14637_v50 = vmul.f32 %v14599_v57, %v24085_v52  ;;  %v15237_v59 = vrot.slane %v23024_v7, %v20560_v13  ;;  %v24091_v57 = vld [vmem:[#allocation54_spill] sm:$0xff]  ;;  %v24093_v52 = vld [vmem:[#allocation56_spill] sm:$0xff] }
 0x2c0   : > { %14785 = vmatprep.subr.mxu0 %v14629_v20  ;;  %14514 = vmatprep.mubr.f32.mxu1 %v23863_v14 }
 0x2c1   : > { %14707 = vmatprep.mubr.f32.mxu0 %v23863_v14  ;;  %19780 = vmatmul.mubr.msk.f32.vlgmr.msra.gmra.mrb[6].mxu1 %vm680_vm1, %v22914_v28  ;;  %v14587_v28 = vrot.slane %v22983_v62, %v20573_v21  ;;  %v24088_v62 = vld [vmem:[#allocation36_spill] sm:$0xff] }
 0x2c2   : > { %19784 = vmatmul.mubr.msk.f32.vlgmr.msra.gmra.mrb[0].mxu0 %vm680_vm1, %v23001_v31  ;;  %14715 = vmatpush1.msra.mxu1 %v14626_v37  ;;  %v14639_v25 = vmul.f32 %v14607_v51, %v24088_v62  ;;  %v24089_v37 = vld [vmem:[#allocation53_spill] sm:$0xff]  ;;  %v15265_v51 = vrot.slane %v23024_v7, %v20626_v49 }
 0x2c3   : > { %14786 = vmatpush1.msra.mxu0 %v14628_v38  ;;  %14856 = vmatprep.subr.mxu1 %v14631_v2  ;;  %v14634_v20 = vmul.f32 %v14587_v28, %v24086_v10  ;;  %v15315_v9 = vmul.f32 %v15241_v32, %v24089_v37  ;;  %v15257_v38 = vrot.slane %v23024_v7, %v20601_v36  ;;  %v24090_v2 = vld [vmem:[#allocation35_spill] sm:$0xff]  ;;  %v23103_v7 = vld [vmem:[%s23597_s4 + $0x160] sm:$0xff] }
 0x2c4   : > { %14927 = vmatprep.subr.mxu0 %v14633_v3  ;;  %14778 = vmatprep.mubr.f32.mxu1 %v23863_v14  ;;  %v14638_v35 = vmul.f32 %v14603_v45, %v24090_v2  ;;  %v23070_v3 = vld [vmem:[%s23597_s4 + $0x158] sm:$0xff]  ;;  %v15314_v28 = vmul.f32 %v15237_v59, %v24091_v57  ;;  %v24095_v59 = vld [vmem:[#allocation59_spill] sm:$0xff]  ;;  %v15939_v2 = vrot.slane %v23103_v7, %v20571_v19  ;;  %v24098_v57 = vld [vmem:[#allocation52_spill] sm:$0xff] }
 0x2c5   : > { %14849 = vmatprep.mubr.f32.mxu0 %v23863_v14  ;;  %19785 = vmatmul.mubr.msk.f32.vlgmr.msra.gmra.mrb[0].mxu1 %vm680_vm1, %v23001_v31  ;;  %v15319_v44 = vmul.f32 %v15257_v38, %v23988_v34  ;;  %v15316_v34 = vmul.f32 %v15245_v61, %v24093_v52  ;;  %v15281_v45 = vrot.slane %v23070_v3, %v20571_v19 }
 0x2c6   : > { %19786 = vmatmul.mubr.msk.f32.vlgmr.msra.gmra.mrb[2].mxu0 %vm680_vm1, %v23001_v31  ;;  %14857 = vmatpush1.msra.mxu1 %v14630_v41  ;;  %v15317_v41 = vmul.f32 %v15249_v5, %v24092_v29  ;;  %v15321_v10 = vmul.f32 %v15265_v51, %v24095_v59  ;;  %v15289_v27 = vrot.slane %v23070_v3, %v20601_v36  ;;  %v24096_v5 = vld [vmem:[#allocation60_spill] sm:$0xff] }
 0x2c7   : > { %14928 = vmatpush1.msra.mxu0 %v14632_v0  ;;  %14998 = vmatprep.subr.mxu1 %v14635_v33  ;;  %v15273_v0 = vrot.slane %v23070_v3, %v20558_v12  ;;  %v15269_v33 = vrot.slane %v23070_v3, %v20560_v13  ;;  %v15320_v62 = vmul.f32 %v15261_v22, %v24096_v5 }
 0x2c8   : > { %15069 = vmatprep.subr.mxu0 %v14637_v50  ;;  %14920 = vmatprep.mubr.f32.mxu1 %v23863_v14  ;;  %v24094_v50 = vld [vmem:[#allocation58_spill] sm:$0xff]  ;;  %v15327_v38 = vmul.f32 %v15289_v27, %v21320_v48  ;;  %v15297_v61 = vrot.slane %v23070_v3, %v20626_v49  ;;  %v15943_v29 = vrot.slane %v23103_v7, %v20594_v30 }
 0x2c9   : > { %14991 = vmatprep.mubr.f32.mxu0 %v23863_v14  ;;  %19787 = vmatmul.mubr.msk.f32.vlgmr.msra.gmra.mrb[2].mxu1 %vm680_vm1, %v23001_v31  ;;  %v15318_v32 = vmul.f32 %v15253_v47, %v24094_v50  ;;  %v15927_v47 = vrot.slane %v23103_v7, %v20560_v13  ;;  %v15955_v22 = vrot.slane %v23103_v7, %v20626_v49 }
 0x2ca   : > { %19788 = vmatmul.mubr.msk.f32.vlgmr.msra.gmra.mrb[4].mxu0 %vm680_vm1, %v23001_v31  ;;  %14999 = vmatpush1.msra.mxu1 %v14634_v20  ;;  %v15323_v20 = vmul.f32 %v15273_v0, %v23991_v63  ;;  %v15285_v63 = vrot.slane %v23070_v3, %v20594_v30  ;;  %v15951_v59 = vrot.slane %v23103_v7, %v20623_v46 }
 0x2cb   : > { %15070 = vmatpush1.msra.mxu0 %v14636_v54  ;;  %15140 = vmatprep.subr.mxu1 %v14639_v25  ;;  %v15277_v54 = vrot.slane %v23070_v3, %v20573_v21  ;;  %v24097_v25 = vld [vmem:[#allocation62_spill] sm:$0xff] }
 0x2cc   : > { %15333 = vmatprep.subr.mxu0 %v15315_v9  ;;  %15062 = vmatprep.mubr.f32.mxu1 %v23863_v14  ;;  %v15322_v37 = vmul.f32 %v15269_v33, %v24097_v25  ;;  %v15325_v9 = vmul.f32 %v15281_v45, %v23992_v58  ;;  %v15326_v48 = vmul.f32 %v15285_v63, %v21324_v56  ;;  %v23152_v56 = vld [vmem:[%s23597_s4 + $0x168] sm:$0xff]  ;;  %v24101_v33 = vld [vmem:[#allocation6_spill] sm:$0xff]  ;;  %v23175_v45 = vld [vmem:[%s23596_s3 + $0xb0] sm:$0xff] }
 0x2cd   : > { %15133 = vmatprep.mubr.f32.mxu0 %v23863_v14  ;;  %19789 = vmatmul.mubr.msk.f32.vlgmr.msra.gmra.mrb[4].mxu1 %vm680_vm1, %v23001_v31  ;;  %v15324_v58 = vmul.f32 %v15277_v54, %v23990_v53  ;;  %v15935_v53 = vrot.slane %v23103_v7, %v20573_v21  ;;  %v16007_v52 = vmul.f32 %v15939_v2, %v24101_v33  ;;  %v24104_v54 = vld [vmem:[#allocation11_spill] sm:$0xff]  ;;  %v23198_v63 = vld [vmem:[%s23597_s4 + $0x170] sm:$0xff] }
 0x2ce   : > { %19790 = vmatmul.mubr.msk.f32.vlgmr.msra.gmra.mrb[6].mxu0 %vm680_vm1, %v23001_v31  ;;  %15141 = vmatpush1.msra.mxu1 %v14638_v35  ;;  %v15293_v35 = vrot.slane %v23070_v3, %v20623_v46  ;;  %v15947_v3 = vrot.slane %v23103_v7, %v20601_v36  ;;  %v15971_v5 = vrot.slane %v23152_v56, %v20571_v19 }
 0x2cf   : > { %15334 = vmatpush1.msra.mxu0 %v15314_v28  ;;  %15404 = vmatprep.subr.mxu1 %v15317_v41  ;;  %v15329_v28 = vmul.f32 %v15297_v61, %v24098_v57  ;;  %v24099_v41 = vld [vmem:[#allocation51_spill] sm:$0xff]  ;;  %v15987_v2 = vrot.slane %v23152_v56, %v20626_v49  ;;  %v24108_v57 = vld [vmem:[#allocation16_spill] sm:$0xff] }
 0x2d0   : > { %15475 = vmatprep.subr.mxu0 %v15319_v44  ;;  %15204 = vmatprep.mubr.f32.mxu1 %v23863_v14  ;;  %v24100_v44 = vld [vmem:[#allocation7_spill] sm:$0xff] }
 0x2d1   : > { %15397 = vmatprep.mubr.f32.mxu0 %v23863_v14  ;;  %19791 = vmatmul.mubr.msk.f32.vlgmr.msra.gmra.mrb[6].mxu1 %vm680_vm1, %v23001_v31  ;;  %v15931_v31 = vrot.slane %v23103_v7, %v20558_v12  ;;  %v16004_v0 = vmul.f32 %v15927_v47, %v24100_v44  ;;  %v24105_v7 = vld [vmem:[#allocation10_spill] sm:$0xff]  ;;  %v24107_v61 = vld [vmem:[#allocation15_spill] sm:$0xff]  ;;  %v16625_v44 = vrot.slane %v23198_v63, %v20573_v21 }
 0x2d2   : > { %19795 = vmatmul.mubr.msk.f32.vlgmr.msra.gmra.mrb[0].mxu0 %vm680_vm1, %v23088_v24  ;;  %15405 = vmatpush1.msra.mxu1 %v15316_v34  ;;  %v24102_v34 = vld [vmem:[#allocation8_spill] sm:$0xff] }
 0x2d3   : > { %15476 = vmatpush1.msra.mxu0 %v15318_v32  ;;  %15546 = vmatprep.subr.mxu1 %v15321_v10  ;;  %v16005_v51 = vmul.f32 %v15931_v31, %v23996_v8  ;;  %v15328_v8 = vmul.f32 %v15293_v35, %v24099_v41  ;;  %v16009_v50 = vmul.f32 %v15947_v3, %v24102_v34 }
 0x2d4   : > { %15617 = vmatprep.subr.mxu0 %v15323_v20  ;;  %15468 = vmatprep.mubr.f32.mxu1 %v23863_v14  ;;  %v15963_v32 = vrot.slane %v23152_v56, %v20558_v12  ;;  %v15959_v10 = vrot.slane %v23152_v56, %v20560_v13  ;;  %v24103_v20 = vld [vmem:[#allocation9_spill] sm:$0xff]  ;;  %v16008_v31 = vmul.f32 %v15943_v29, %v24104_v54  ;;  %v24112_v54 = vld [vmem:[#allocation68_spill] sm:$0xff] }
 0x2d5   : > { %15539 = vmatprep.mubr.f32.mxu0 %v23863_v14  ;;  %19796 = vmatmul.mubr.msk.f32.vlgmr.msra.gmra.mrb[0].mxu1 %vm680_vm1, %v23088_v24  ;;  %v16006_v27 = vmul.f32 %v15935_v53, %v24103_v20  ;;  %v16015_v35 = vmul.f32 %v15971_v5, %v24004_v11  ;;  %v16617_v3 = vrot.slane %v23198_v63, %v20560_v13  ;;  %v24109_v11 = vld [vmem:[#allocation17_spill] sm:$0xff]  ;;  %v24110_v53 = vld [vmem:[#allocation3_spill] sm:$0xff]  ;;  %v24113_v5 = vld [vmem:[#allocation70_spill] sm:$0xff] }
 0x2d6   : > { %19797 = vmatmul.mubr.msk.f32.vlgmr.msra.gmra.mrb[2].mxu0 %vm680_vm1, %v23088_v24  ;;  %15547 = vmatpush1.msra.mxu1 %v15320_v62  ;;  %v16011_v62 = vmul.f32 %v15955_v22, %v24105_v7  ;;  %v16013_v25 = vmul.f32 %v15963_v32, %v24003_v18  ;;  %v24106_v18 = vld [vmem:[#allocation13_spill] sm:$0xff]  ;;  %v16012_v47 = vmul.f32 %v15959_v10, %v24107_v61  ;;  %v24117_v61 = vld [vmem:[#allocation74_spill] sm:$0xff] }
 0x2d7   : > { %15618 = vmatpush1.msra.mxu0 %v15322_v37  ;;  %15688 = vmatprep.subr.mxu1 %v15325_v9  ;;  %v15979_v37 = vrot.slane %v23152_v56, %v20601_v36  ;;  %v15975_v9 = vrot.slane %v23152_v56, %v20594_v30  ;;  %v16019_v29 = vmul.f32 %v15987_v2, %v24110_v53  ;;  %v23242_v22 = vld [vmem:[%s23597_s4 + $0x178] sm:$0xff]  ;;  %v24121_v53 = vld [vmem:[#allocation78_spill] sm:$0xff] }
 0x2d8   : > { %15759 = vmatprep.subr.mxu0 %v15327_v38  ;;  %15610 = vmatprep.mubr.f32.mxu1 %v23863_v14  ;;  %v16010_v38 = vmul.f32 %v15951_v59, %v24106_v18  ;;  %v16645_v34 = vrot.slane %v23198_v63, %v20626_v49  ;;  %v16653_v32 = vrot.slane %v23242_v22, %v20558_v12  ;;  %v23262_v59 = vld [vmem:[%s23596_s3 + $0xb8] sm:$0xff]  ;;  %v24116_v18 = vld [vmem:[#allocation72_spill] sm:$0xff] }
 0x2d9   : > { %15681 = vmatprep.mubr.f32.mxu0 %v23863_v14  ;;  %19798 = vmatmul.mubr.msk.f32.vlgmr.msra.gmra.mrb[2].mxu1 %vm680_vm1, %v23088_v24  ;;  %v16641_v10 = vrot.slane %v23198_v63, %v20623_v46  ;;  %v16649_v20 = vrot.slane %v23242_v22, %v20560_v13 }
 0x2da   : > { %19799 = vmatmul.mubr.msk.f32.vlgmr.msra.gmra.mrb[4].mxu0 %vm680_vm1, %v23088_v24  ;;  %15689 = vmatpush1.msra.mxu1 %v15324_v58  ;;  %v16017_v58 = vmul.f32 %v15979_v37, %v24006_v55  ;;  %v16016_v55 = vmul.f32 %v15975_v9, %v24109_v11  ;;  %v16703_v7 = vmul.f32 %v16653_v32, %v24113_v5  ;;  %v24120_v11 = vld [vmem:[#allocation65_spill] sm:$0xff] }
 0x2db   : > { %15760 = vmatpush1.msra.mxu0 %v15326_v48  ;;  %15830 = vmatprep.subr.mxu1 %v15329_v28  ;;  %v16621_v48 = vrot.slane %v23198_v63, %v20558_v12  ;;  %v16677_v9 = vrot.slane %v23242_v22, %v20626_v49 }
 0x2dc   : > { %16023 = vmatprep.subr.mxu0 %v16005_v51  ;;  %15752 = vmatprep.mubr.f32.mxu1 %v23863_v14  ;;  %v15983_v51 = vrot.slane %v23152_v56, %v20623_v46 }
 0x2dd   : > { %15823 = vmatprep.mubr.f32.mxu0 %v23863_v14  ;;  %19800 = vmatmul.mubr.msk.f32.vlgmr.msra.gmra.mrb[4].mxu1 %vm680_vm1, %v23088_v24  ;;  %v16695_v41 = vmul.f32 %v16621_v48, %v21450_v40  ;;  %v24111_v40 = vld [vmem:[#allocation67_spill] sm:$0xff]  ;;  %v24118_v48 = vld [vmem:[#allocation73_spill] sm:$0xff] }
 0x2de   : > { %19801 = vmatmul.mubr.msk.f32.vlgmr.msra.gmra.mrb[6].mxu0 %vm680_vm1, %v23088_v24  ;;  %15831 = vmatpush1.msra.mxu1 %v15328_v8  ;;  %v16637_v8 = vrot.slane %v23198_v63, %v20601_v36  ;;  %v16694_v33 = vmul.f32 %v16617_v3, %v24111_v40  ;;  %v24123_v40 = vld [vmem:[#allocation79_spill] sm:$0xff] }
 0x2df   : > { %16024 = vmatpush1.msra.mxu0 %v16004_v0  ;;  %16094 = vmatprep.subr.mxu1 %v16007_v52  ;;  %v16018_v0 = vmul.f32 %v15983_v51, %v24005_v6  ;;  %v16633_v52 = vrot.slane %v23198_v63, %v20594_v30 }
 0x2e0   : > { %16165 = vmatprep.subr.mxu0 %v16009_v50  ;;  %15894 = vmatprep.mubr.f32.mxu1 %v23863_v14  ;;  %v16699_v50 = vmul.f32 %v16637_v8, %v21500_v15 }
 0x2e1   : > { %16087 = vmatprep.mubr.f32.mxu0 %v23863_v14  ;;  %19802 = vmatmul.mubr.msk.f32.vlgmr.msra.gmra.mrb[6].mxu1 %vm680_vm1, %v23088_v24  ;;  %v15967_v24 = vrot.slane %v23152_v56, %v20573_v21  ;;  %v16629_v56 = vrot.slane %v23198_v63, %v20571_v19  ;;  %v16698_v15 = vmul.f32 %v16633_v52, %v21517_v4  ;;  %v23285_v4 = vld [vmem:[%s23597_s4 + $0x180] sm:$0xff]  ;;  %v24115_v63 = vld [vmem:[#allocation71_spill] sm:$0xff] }
 0x2e2   : > { %19806 = vmatmul.mubr.msk.f32.vlgmr.msra.gmra.mrb[0].mxu0 %vm680_vm1, %v23175_v45  ;;  %16095 = vmatpush1.msra.mxu1 %v16006_v27  ;;  %v16661_v27 = vrot.slane %v23242_v22, %v20571_v19  ;;  %v17311_v2 = vrot.slane %v23285_v4, %v20558_v12  ;;  %v17319_v3 = vrot.slane %v23285_v4, %v20571_v19 }
 0x2e3   : > { %16166 = vmatpush1.msra.mxu0 %v16008_v31  ;;  %16236 = vmatprep.subr.mxu1 %v16011_v62  ;;  %v16014_v28 = vmul.f32 %v15967_v24, %v24108_v57  ;;  %v16697_v6 = vmul.f32 %v16629_v56, %v21462_v1  ;;  %v16696_v1 = vmul.f32 %v16625_v44, %v21483_v60  ;;  %v24122_v44 = vld [vmem:[#allocation66_spill] sm:$0xff] }
 0x2e4   : > { %16307 = vmatprep.subr.mxu0 %v16013_v25  ;;  %16158 = vmatprep.mubr.f32.mxu1 %v23863_v14  ;;  %v16701_v31 = vmul.f32 %v16645_v34, %v24112_v54  ;;  %v16669_v60 = vrot.slane %v23242_v22, %v20601_v36  ;;  %v16665_v62 = vrot.slane %v23242_v22, %v20594_v30  ;;  %v24114_v25 = vld [vmem:[#allocation69_spill] sm:$0xff]  ;;  %v24124_v34 = vld [vmem:[#allocation80_spill] sm:$0xff] }
 0x2e5   : > { %16229 = vmatprep.mubr.f32.mxu0 %v23863_v14  ;;  %19807 = vmatmul.mubr.msk.f32.vlgmr.msra.gmra.mrb[0].mxu1 %vm680_vm1, %v23175_v45  ;;  %v16700_v37 = vmul.f32 %v16641_v10, %v24114_v25  ;;  %v16702_v24 = vmul.f32 %v16649_v20, %v24115_v63  ;;  %v17315_v56 = vrot.slane %v23285_v4, %v20573_v21  ;;  %v23349_v20 = vld [vmem:[%s23596_s3 + $0xc0] sm:$0xff] }
 0x2e6   : > { %19808 = vmatmul.mubr.msk.f32.vlgmr.msra.gmra.mrb[2].mxu0 %vm680_vm1, %v23175_v45  ;;  %16237 = vmatpush1.msra.mxu1 %v16010_v38  ;;  %v16705_v38 = vmul.f32 %v16661_v27, %v24116_v18  ;;  %v17323_v8 = vrot.slane %v23285_v4, %v20594_v30  ;;  %v17335_v52 = vrot.slane %v23285_v4, %v20626_v49  ;;  %v24126_v27 = vld [vmem:[#allocation81_spill] sm:$0xff]  ;;  %v24131_v18 = vld [vmem:[#allocation87_spill] sm:$0xff] }
 0x2e7   : > { %16308 = vmatpush1.msra.mxu0 %v16012_v47  ;;  %16378 = vmatprep.subr.mxu1 %v16015_v35  ;;  %v16707_v47 = vmul.f32 %v16669_v60, %v24117_v61  ;;  %v16673_v35 = vrot.slane %v23242_v22, %v20623_v46  ;;  %v17386_v54 = vmul.f32 %v17315_v56, %v24126_v27  ;;  %v24128_v60 = vld [vmem:[#allocation84_spill] sm:$0xff]  ;;  %v24137_v56 = vld [vmem:[#allocation94_spill] sm:$0xff] }
 0x2e8   : > { %16449 = vmatprep.subr.mxu0 %v16017_v58  ;;  %16300 = vmatprep.mubr.f32.mxu1 %v23863_v14  ;;  %v17307_v58 = vrot.slane %v23285_v4, %v20560_v13 }
 0x2e9   : > { %16371 = vmatprep.mubr.f32.mxu0 %v23863_v14  ;;  %19809 = vmatmul.mubr.msk.f32.vlgmr.msra.gmra.mrb[2].mxu1 %vm680_vm1, %v23175_v45 }
 0x2ea   : > { %19810 = vmatmul.mubr.msk.f32.vlgmr.msra.gmra.mrb[4].mxu0 %vm680_vm1, %v23175_v45  ;;  %16379 = vmatpush1.msra.mxu1 %v16014_v28  ;;  %v24119_v28 = vld [vmem:[#allocation75_spill] sm:$0xff] }
 0x2eb   : > { %16450 = vmatpush1.msra.mxu0 %v16016_v55  ;;  %16520 = vmatprep.subr.mxu1 %v16019_v29  ;;  %v16706_v51 = vmul.f32 %v16665_v62, %v24119_v28  ;;  %v16709_v55 = vmul.f32 %v16677_v9, %v24120_v11  ;;  %v17385_v29 = vmul.f32 %v17311_v2, %v24121_v53  ;;  %v24135_v11 = vld [vmem:[#allocation91_spill] sm:$0xff] }
 0x2ec   : > { %16713 = vmatprep.subr.mxu0 %v16695_v41  ;;  %16442 = vmatprep.mubr.f32.mxu1 %v23863_v14  ;;  %v17327_v41 = vrot.slane %v23285_v4, %v20601_v36 }
 0x2ed   : > { %16513 = vmatprep.mubr.f32.mxu0 %v23863_v14  ;;  %19811 = vmatmul.mubr.msk.f32.vlgmr.msra.gmra.mrb[4].mxu1 %vm680_vm1, %v23175_v45 }
 0x2ee   : > { %19812 = vmatmul.mubr.msk.f32.vlgmr.msra.gmra.mrb[6].mxu0 %vm680_vm1, %v23175_v45  ;;  %16521 = vmatpush1.msra.mxu1 %v16018_v0  ;;  %v16708_v0 = vmul.f32 %v16673_v35, %v24122_v44  ;;  %v24133_v35 = vld [vmem:[#allocation90_spill] sm:$0xff] }
 0x2ef   : > { %16714 = vmatpush1.msra.mxu0 %v16694_v33  ;;  %16784 = vmatprep.subr.mxu1 %v16697_v6  ;;  %v17384_v33 = vmul.f32 %v17307_v58, %v24123_v40  ;;  %v17387_v6 = vmul.f32 %v17319_v3, %v24124_v34  ;;  %v24138_v40 = vld [vmem:[#allocation76_spill] sm:$0xff]  ;;  %v24139_v34 = vld [vmem:[#allocation95_spill] sm:$0xff] }
 0x2f0   : > { %16855 = vmatprep.subr.mxu0 %v16699_v50  ;;  %16584 = vmatprep.mubr.f32.mxu1 %v23863_v14  ;;  %v24125_v50 = vld [vmem:[#allocation82_spill] sm:$0xff] }
 0x2f1   : > { %16777 = vmatprep.mubr.f32.mxu0 %v23863_v14  ;;  %19813 = vmatmul.mubr.msk.f32.vlgmr.msra.gmra.mrb[6].mxu1 %vm680_vm1, %v23175_v45  ;;  %v16657_v45 = vrot.slane %v23242_v22, %v20573_v21  ;;  %v23331_v22 = vld [vmem:[%s23597_s4 + $0x188] sm:$0xff]  ;;  %v17389_v32 = vmul.f32 %v17327_v41, %v24125_v50 }
 0x2f2   : > { %19817 = vmatmul.mubr.msk.f32.vlgmr.msra.gmra.mrb[0].mxu0 %vm680_vm1, %v23262_v59  ;;  %16785 = vmatpush1.msra.mxu1 %v16696_v1  ;;  %v17343_v10 = vrot.slane %v23331_v22, %v20558_v12  ;;  %v17331_v1 = vrot.slane %v23285_v4, %v20623_v46  ;;  %v17391_v4 = vmul.f32 %v17335_v52, %v24128_v60  ;;  %v23418_v52 = vld [vmem:[%s23597_s4 + $0x198] sm:$0xff] }
 0x2f3   : > { %16856 = vmatpush1.msra.mxu0 %v16698_v15  ;;  %16926 = vmatprep.subr.mxu1 %v16701_v31  ;;  %v16704_v57 = vmul.f32 %v16657_v45, %v24118_v48  ;;  %v17339_v15 = vrot.slane %v23331_v22, %v20560_v13  ;;  %v24127_v31 = vld [vmem:[#allocation83_spill] sm:$0xff]  ;;  %v24129_v45 = vld [vmem:[#allocation86_spill] sm:$0xff]  ;;  %v17359_v25 = vrot.slane %v23331_v22, %v20601_v36 }
 0x2f4   : > { %16997 = vmatprep.subr.mxu0 %v16703_v7  ;;  %16848 = vmatprep.mubr.f32.mxu1 %v23863_v14  ;;  %v17388_v5 = vmul.f32 %v17323_v8, %v24127_v31  ;;  %v17351_v7 = vrot.slane %v23331_v22, %v20571_v19  ;;  %v17393_v62 = vmul.f32 %v17343_v10, %v24129_v45 }
 0x2f5   : > { %16919 = vmatprep.mubr.f32.mxu0 %v23863_v14  ;;  %19818 = vmatmul.mubr.msk.f32.vlgmr.msra.gmra.mrb[0].mxu1 %vm680_vm1, %v23262_v59  ;;  %v17355_v63 = vrot.slane %v23331_v22, %v20594_v30  ;;  %v17367_v61 = vrot.slane %v23331_v22, %v20626_v49  ;;  %v17397_v58 = vmul.f32 %v17359_v25, %v24133_v35  ;;  %v24144_v25 = vld [vmem:[#allocation100_spill] sm:$0xff] }
 0x2f6   : > { %19819 = vmatmul.mubr.msk.f32.vlgmr.msra.gmra.mrb[2].mxu0 %vm680_vm1, %v23262_v59  ;;  %16927 = vmatpush1.msra.mxu1 %v16700_v37  ;;  %v23372_v37 = vld [vmem:[%s23597_s4 + $0x190] sm:$0xff]  ;;  %v18033_v27 = vrot.slane %v23418_v52, %v20558_v12  ;;  %v18057_v35 = vrot.slane %v23418_v52, %v20626_v49 }
 0x2f7   : > { %16998 = vmatpush1.msra.mxu0 %v16702_v24  ;;  %17068 = vmatprep.subr.mxu1 %v16705_v38  ;;  %v24130_v24 = vld [vmem:[#allocation85_spill] sm:$0xff]  ;;  %v17392_v38 = vmul.f32 %v17339_v15, %v24131_v18  ;;  %v18001_v48 = vrot.slane %v23372_v37, %v20558_v12  ;;  %v17997_v28 = vrot.slane %v23372_v37, %v20560_v13 }
 0x2f8   : > { %17139 = vmatprep.subr.mxu0 %v16707_v47  ;;  %16990 = vmatprep.mubr.f32.mxu1 %v23863_v14  ;;  %v17390_v9 = vmul.f32 %v17331_v1, %v24130_v24  ;;  %v24132_v47 = vld [vmem:[#allocation88_spill] sm:$0xff]  ;;  %v18009_v53 = vrot.slane %v23372_v37, %v20571_v19  ;;  %v18017_v44 = vrot.slane %v23372_v37, %v20601_v36  ;;  %v24141_v1 = vld [vmem:[#allocation98_spill] sm:$0xff] }
 0x2f9   : > { %17061 = vmatprep.mubr.f32.mxu0 %v23863_v14  ;;  %19820 = vmatmul.mubr.msk.f32.vlgmr.msra.gmra.mrb[2].mxu1 %vm680_vm1, %v23262_v59  ;;  %v17395_v2 = vmul.f32 %v17351_v7, %v24132_v47  ;;  %v18075_v8 = vmul.f32 %v18001_v48, %v24137_v56  ;;  %v18025_v50 = vrot.slane %v23372_v37, %v20626_v49  ;;  %v24142_v7 = vld [vmem:[#allocation97_spill] sm:$0xff]  ;;  %v24147_v47 = vld [vmem:[#allocation103_spill] sm:$0xff] }
 0x2fa   : > { %19821 = vmatmul.mubr.msk.f32.vlgmr.msra.gmra.mrb[4].mxu0 %vm680_vm1, %v23262_v59  ;;  %17069 = vmatpush1.msra.mxu1 %v16704_v57  ;;  %v17363_v57 = vrot.slane %v23331_v22, %v20623_v46  ;;  %v18079_v15 = vmul.f32 %v18017_v44, %v24141_v1  ;;  %v18021_v31 = vrot.slane %v23372_v37, %v20623_v46 }
 0x2fb   : > { %17140 = vmatpush1.msra.mxu0 %v16706_v51  ;;  %17210 = vmatprep.subr.mxu1 %v16709_v55  ;;  %v24134_v51 = vld [vmem:[#allocation89_spill] sm:$0xff]  ;;  %v17396_v55 = vmul.f32 %v17355_v63, %v24135_v11  ;;  %v18049_v24 = vrot.slane %v23418_v52, %v20601_v36  ;;  %v18045_v18 = vrot.slane %v23418_v52, %v20594_v30 }
 0x2fc   : > { %17403 = vmatprep.subr.mxu0 %v17385_v29  ;;  %17132 = vmatprep.mubr.f32.mxu1 %v23863_v14  ;;  %v24136_v29 = vld [vmem:[#allocation77_spill] sm:$0xff] }
 0x2fd   : > { %17203 = vmatprep.mubr.f32.mxu0 %v23863_v14  ;;  %19822 = vmatmul.mubr.msk.f32.vlgmr.msra.gmra.mrb[4].mxu1 %vm680_vm1, %v23262_v59  ;;  %v17399_v41 = vmul.f32 %v17367_v61, %v24136_v29  ;;  %v24151_v29 = vld [vmem:[#allocation107_spill] sm:$0xff] }
 0x2fe   : > { %19823 = vmatmul.mubr.msk.f32.vlgmr.msra.gmra.mrb[6].mxu0 %vm680_vm1, %v23262_v59  ;;  %17211 = vmatpush1.msra.mxu1 %v16708_v0  ;;  %v18005_v0 = vrot.slane %v23372_v37, %v20573_v21 }
 0x2ff   : > { %17404 = vmatpush1.msra.mxu0 %v17384_v33  ;;  %17474 = vmatprep.subr.mxu1 %v17387_v6  ;;  %v17398_v33 = vmul.f32 %v17363_v57, %v24138_v40  ;;  %v18074_v6 = vmul.f32 %v17997_v28, %v24139_v34  ;;  %v24149_v57 = vld [vmem:[#allocation106_spill] sm:$0xff]  ;;  %v24154_v34 = vld [vmem:[#allocation92_spill] sm:$0xff] }
 0x300   : > { %17545 = vmatprep.subr.mxu0 %v17389_v32  ;;  %17274 = vmatprep.mubr.f32.mxu1 %v23863_v14  ;;  %v24140_v32 = vld [vmem:[#allocation96_spill] sm:$0xff]  ;;  %v18076_v60 = vmul.f32 %v18005_v0, %v24142_v7  ;;  %v18087_v28 = vmul.f32 %v18049_v24, %v24149_v57  ;;  %v24153_v0 = vld [vmem:[#allocation110_spill] sm:$0xff] }
 0x301   : > { %17467 = vmatprep.mubr.f32.mxu0 %v23863_v14  ;;  %19824 = vmatmul.mubr.msk.f32.vlgmr.msra.gmra.mrb[6].mxu1 %vm680_vm1, %v23262_v59  ;;  %v17347_v59 = vrot.slane %v23331_v22, %v20573_v21  ;;  %v18013_v22 = vrot.slane %v23372_v37, %v20594_v30  ;;  %v18077_v10 = vmul.f32 %v18009_v53, %v24140_v32  ;;  %v24155_v32 = vld [vmem:[#allocation111_spill] sm:$0xff]  ;;  %v19847_v7 = vld [vmem:[%s23596_s3 + $0xd0] sm:$0xff] }
 0x302   : > { %19828 = vmatmul.mubr.msk.f32.vlgmr.msra.gmra.mrb[0].mxu0 %vm680_vm1, %v23349_v20  ;;  %17475 = vmatpush1.msra.mxu1 %v17386_v54  ;;  %v23436_v54 = vld [vmem:[%s23596_s3 + $0xc8] sm:$0xff]  ;;  %v18081_v37 = vmul.f32 %v18025_v50, %v24144_v25 }
 0x303   : > { %17546 = vmatpush1.msra.mxu0 %v17388_v5  ;;  %17616 = vmatprep.subr.mxu1 %v17391_v4  ;;  %v17394_v3 = vmul.f32 %v17347_v59, %v24134_v51  ;;  %v18029_v5 = vrot.slane %v23418_v52, %v20560_v13  ;;  %v24143_v4 = vld [vmem:[#allocation99_spill] sm:$0xff]  ;;  %v24145_v59 = vld [vmem:[#allocation102_spill] sm:$0xff] }
 0x304   : > { %17687 = vmatprep.subr.mxu0 %v17393_v62  ;;  %17538 = vmatprep.mubr.f32.mxu1 %v23863_v14  ;;  %v18078_v45 = vmul.f32 %v18013_v22, %v24143_v4  ;;  %v18041_v62 = vrot.slane %v23418_v52, %v20571_v19  ;;  %v18083_v63 = vmul.f32 %v18033_v27, %v24145_v59  ;;  %v19849_v50 = vld [vmem:[%s23597_s4 + $0x1a8] sm:$0xff] }
 0x305   : > { %17609 = vmatprep.mubr.f32.mxu0 %v23863_v14  ;;  %19829 = vmatmul.mubr.msk.f32.vlgmr.msra.gmra.mrb[0].mxu1 %vm680_vm1, %v23349_v20  ;;  %v18719_v4 = vrot.slane %v19849_v50, %v20560_v13  ;;  %v24158_v25 = vld [vmem:[#allocation115_spill] sm:$0xff]  ;;  %v18727_v24 = vrot.slane %v19849_v50, %v20573_v21 }
 0x306   : > { %19830 = vmatmul.mubr.msk.f32.vlgmr.msra.gmra.mrb[2].mxu0 %vm680_vm1, %v23349_v20  ;;  %17617 = vmatpush1.msra.mxu1 %v17390_v9  ;;  %v23459_v9 = vld [vmem:[%s23597_s4 + $0x1a0] sm:$0xff] }
 0x307   : > { %17688 = vmatpush1.msra.mxu0 %v17392_v38  ;;  %17758 = vmatprep.subr.mxu1 %v17395_v2  ;;  %v24146_v38 = vld [vmem:[#allocation101_spill] sm:$0xff]  ;;  %v18082_v2 = vmul.f32 %v18029_v5, %v24147_v47  ;;  %v18691_v51 = vrot.slane %v23459_v9, %v20558_v12  ;;  %v18687_v11 = vrot.slane %v23459_v9, %v20560_v13 }
 0x308   : > { %17829 = vmatprep.subr.mxu0 %v17397_v58  ;;  %17680 = vmatprep.mubr.f32.mxu1 %v23863_v14  ;;  %v18080_v61 = vmul.f32 %v18021_v31, %v24146_v38  ;;  %v24148_v58 = vld [vmem:[#allocation104_spill] sm:$0xff]  ;;  %v18699_v56 = vrot.slane %v23459_v9, %v20571_v19  ;;  %v18707_v40 = vrot.slane %v23459_v9, %v20601_v36 }
 0x309   : > { %17751 = vmatprep.mubr.f32.mxu0 %v23863_v14  ;;  %19831 = vmatmul.mubr.msk.f32.vlgmr.msra.gmra.mrb[2].mxu1 %vm680_vm1, %v23349_v20  ;;  %v18085_v48 = vmul.f32 %v18041_v62, %v24148_v58  ;;  %v18765_v22 = vmul.f32 %v18691_v51, %v24153_v0  ;;  %v18715_v1 = vrot.slane %v23459_v9, %v20626_v49 }
 0x30a   : > { %19832 = vmatmul.mubr.msk.f32.vlgmr.msra.gmra.mrb[4].mxu0 %vm680_vm1, %v23349_v20  ;;  %17759 = vmatpush1.msra.mxu1 %v17394_v3  ;;  %v18053_v3 = vrot.slane %v23418_v52, %v20623_v46  ;;  %v18769_v31 = vmul.f32 %v18707_v40, %v24052_v39  ;;  %v18723_v5 = vrot.slane %v19849_v50, %v20558_v12  ;;  %v24159_v39 = vld [vmem:[#allocation116_spill] sm:$0xff] }
 0x30b   : > { %17830 = vmatpush1.msra.mxu0 %v17396_v55  ;;  %17900 = vmatprep.subr.mxu1 %v17399_v41  ;;  %v24150_v55 = vld [vmem:[#allocation105_spill] sm:$0xff]  ;;  %v18086_v41 = vmul.f32 %v18045_v18, %v24151_v29  ;;  %v18731_v12 = vrot.slane %v19849_v50, %v20571_v19  ;;  %v18771_v59 = vmul.f32 %v18715_v1, %v24159_v39  ;;  %v24161_v19 = vld [vmem:[#allocation119_spill] sm:$0xff] }
 0x30c   : > { %18093 = vmatprep.subr.mxu0 %v18075_v8  ;;  %17822 = vmatprep.mubr.f32.mxu1 %v23863_v14  ;;  %v24152_v8 = vld [vmem:[#allocation93_spill] sm:$0xff]  ;;  %v18773_v13 = vmul.f32 %v18723_v5, %v24055_v23  ;;  %v18772_v18 = vmul.f32 %v18719_v4, %v24161_v19  ;;  %v18747_v23 = vrot.slane %v19849_v50, %v20626_v49 }
 0x30d   : > { %17893 = vmatprep.mubr.f32.mxu0 %v23863_v14  ;;  %19833 = vmatmul.mubr.msk.f32.vlgmr.msra.gmra.mrb[4].mxu1 %vm680_vm1, %v23349_v20  ;;  %v18089_v44 = vmul.f32 %v18057_v35, %v24152_v8  ;;  %v18774_v38 = vmul.f32 %v18727_v24, %v24054_v26  ;;  %v24162_v49 = vld [vmem:[#allocation109_spill] sm:$0xff] }
 0x30e   : > { %19834 = vmatmul.mubr.msk.f32.vlgmr.msra.gmra.mrb[6].mxu0 %vm680_vm1, %v23349_v20  ;;  %17901 = vmatpush1.msra.mxu1 %v17398_v33  ;;  %v18695_v33 = vrot.slane %v23459_v9, %v20573_v21 }
 0x30f   : > { %18094 = vmatpush1.msra.mxu0 %v18074_v6  ;;  %18164 = vmatprep.subr.mxu1 %v18077_v10  ;;  %v18088_v6 = vmul.f32 %v18053_v3, %v24154_v34  ;;  %v18764_v10 = vmul.f32 %v18687_v11, %v24155_v32 }
 0x310   : > { %18235 = vmatprep.subr.mxu0 %v18079_v15  ;;  %17964 = vmatprep.mubr.f32.mxu1 %v23863_v14  ;;  %v24156_v15 = vld [vmem:[#allocation112_spill] sm:$0xff] }
 0x311   : > { %18157 = vmatprep.mubr.f32.mxu0 %v23863_v14  ;;  %19835 = vmatmul.mubr.msk.f32.vlgmr.msra.gmra.mrb[6].mxu1 %vm680_vm1, %v23349_v20  ;;  %v18037_v20 = vrot.slane %v23418_v52, %v20573_v21  ;;  %v18703_v52 = vrot.slane %v23459_v9, %v20594_v30  ;;  %v18767_v27 = vmul.f32 %v18699_v56, %v24156_v15 }
 0x312   : > { %19839 = vmatmul.mubr.msk.f32.vlgmr.msra.gmra.mrb[0].mxu0 %vm680_vm1, %v23436_v54  ;;  %18165 = vmatpush1.msra.mxu1 %v18076_v60  ;;  %v18711_v60 = vrot.slane %v23459_v9, %v20623_v46  ;;  %v24160_v9 = vld [vmem:[#allocation117_spill] sm:$0xff] }
 0x313   : > { %18236 = vmatpush1.msra.mxu0 %v18078_v45  ;;  %18306 = vmatprep.subr.mxu1 %v18081_v37  ;;  %v18084_v53 = vmul.f32 %v18037_v20, %v24150_v55  ;;  %v24157_v45 = vld [vmem:[#allocation113_spill] sm:$0xff]  ;;  %v18768_v37 = vmul.f32 %v18703_v52, %v24158_v25 }
 0x314   : > { %18377 = vmatprep.subr.mxu0 %v18083_v63  ;;  %18228 = vmatprep.mubr.f32.mxu1 %v23863_v14  ;;  %v18766_v62 = vmul.f32 %v18695_v33, %v24157_v45  ;;  %v18739_v63 = vrot.slane %v19849_v50, %v20601_v36  ;;  %v18770_v20 = vmul.f32 %v18711_v60, %v24160_v9 }
 0x315   : > { %18299 = vmatprep.mubr.f32.mxu0 %v23863_v14  ;;  %19840 = vmatmul.mubr.msk.f32.vlgmr.msra.gmra.mrb[0].mxu1 %vm680_vm1, %v23436_v54  ;;  %v18775_v36 = vmul.f32 %v18731_v12, %v24056_v43 }
 0x316   : > { %19841 = vmatmul.mubr.msk.f32.vlgmr.msra.gmra.mrb[2].mxu0 %vm680_vm1, %v23436_v54  ;;  %18307 = vmatpush1.msra.mxu1 %v18080_v61  ;;  %v18777_v21 = vmul.f32 %v18739_v63, %v22021_v42  ;;  %v18779_v42 = vmul.f32 %v18747_v23, %v24162_v49 }
 0x317   : > { %18378 = vmatpush1.msra.mxu0 %v18082_v2  ;;  %18448 = vmatprep.subr.mxu1 %v18085_v48 }
 0x318   : > { %18519 = vmatprep.subr.mxu0 %v18087_v28  ;;  %18370 = vmatprep.mubr.f32.mxu1 %v23863_v14 }
 0x319   : > { %18441 = vmatprep.mubr.f32.mxu0 %v23863_v14  ;;  %19842 = vmatmul.mubr.msk.f32.vlgmr.msra.gmra.mrb[2].mxu1 %vm680_vm1, %v23436_v54 }
 0x31a   : > { %19843 = vmatmul.mubr.msk.f32.vlgmr.msra.gmra.mrb[4].mxu0 %vm680_vm1, %v23436_v54  ;;  %18449 = vmatpush1.msra.mxu1 %v18084_v53 }
 0x31b   : > { %18520 = vmatpush1.msra.mxu0 %v18086_v41  ;;  %18590 = vmatprep.subr.mxu1 %v18089_v44 }
 0x31c   : > { %18783 = vmatprep.subr.mxu0 %v18765_v22  ;;  %18512 = vmatprep.mubr.f32.mxu1 %v23863_v14 }
 0x31d   : > { %18583 = vmatprep.mubr.f32.mxu0 %v23863_v14  ;;  %19844 = vmatmul.mubr.msk.f32.vlgmr.msra.gmra.mrb[4].mxu1 %vm680_vm1, %v23436_v54 }
 0x31e   : > { %19845 = vmatmul.mubr.msk.f32.vlgmr.msra.gmra.mrb[6].mxu0 %vm680_vm1, %v23436_v54  ;;  %18591 = vmatpush1.msra.mxu1 %v18088_v6 }
 0x31f   : > { %18784 = vmatpush1.msra.mxu0 %v18764_v10  ;;  %18854 = vmatprep.subr.mxu1 %v18767_v27 }
 0x320   : > { %18925 = vmatprep.subr.mxu0 %v18769_v31  ;;  %18654 = vmatprep.mubr.f32.mxu1 %v23863_v14 }
 0x321   : > { %18847 = vmatprep.mubr.f32.mxu0 %v23863_v14  ;;  %19846 = vmatmul.mubr.msk.f32.vlgmr.msra.gmra.mrb[6].mxu1 %vm680_vm1, %v23436_v54  ;;  %v18735_v54 = vrot.slane %v19849_v50, %v20594_v30  ;;  %v18743_v30 = vrot.slane %v19849_v50, %v20623_v46 }
 0x322   : > { %19850 = vmatmul.mubr.msk.f32.vlgmr.msra.gmra.mrb[0].mxu0 %vm680_vm1, %v19847_v7  ;;  %18855 = vmatpush1.msra.mxu1 %v18766_v62 }
 0x323   : > { %18926 = vmatpush1.msra.mxu0 %v18768_v37  ;;  %18996 = vmatprep.subr.mxu1 %v18771_v59  ;;  %v18776_v61 = vmul.f32 %v18735_v54, %v22025_v17  ;;  %v18778_v46 = vmul.f32 %v18743_v30, %v24057_v16 }
 0x324   : > { %19067 = vmatprep.subr.mxu0 %v18773_v13  ;;  %18918 = vmatprep.mubr.f32.mxu1 %v23863_v14 }
 0x325   : > { %18989 = vmatprep.mubr.f32.mxu0 %v23863_v14  ;;  %19851 = vmatmul.mubr.msk.f32.vlgmr.msra.gmra.mrb[0].mxu1 %vm680_vm1, %v19847_v7 }
 0x326   : > { %19852 = vmatmul.mubr.msk.f32.vlgmr.msra.gmra.mrb[2].mxu0 %vm680_vm1, %v19847_v7  ;;  %18997 = vmatpush1.msra.mxu1 %v18770_v20 }
 0x327   : > { %19068 = vmatpush1.msra.mxu0 %v18772_v18  ;;  %19138 = vmatprep.subr.mxu1 %v18775_v36 }
 0x328   : > { %19209 = vmatprep.subr.mxu0 %v18777_v21  ;;  %19060 = vmatprep.mubr.f32.mxu1 %v23863_v14 }
 0x329   : > { %19131 = vmatprep.mubr.f32.mxu0 %v23863_v14  ;;  %19853 = vmatmul.mubr.msk.f32.vlgmr.msra.gmra.mrb[2].mxu1 %vm680_vm1, %v19847_v7 }
 0x32a   : > { %19854 = vmatmul.mubr.msk.f32.vlgmr.msra.gmra.mrb[4].mxu0 %vm680_vm1, %v19847_v7  ;;  %19139 = vmatpush1.msra.mxu1 %v18774_v38 }
 0x32b   : > { %19210 = vmatpush1.msra.mxu0 %v18776_v61  ;;  %19280 = vmatprep.subr.mxu1 %v18779_v42 }
 0x32c   : > { %19202 = vmatprep.mubr.f32.mxu1 %v23863_v14  ;;  %19273 = vmatprep.mubr.f32.mxu0 %v23863_v14 }
 0x32d   : > { %19855 = vmatmul.mubr.msk.f32.vlgmr.msra.gmra.mrb[4].mxu1 %vm680_vm1, %v19847_v7 }
 0x32e   : > { %19856 = vmatmul.mubr.msk.f32.vlgmr.msra.gmra.mrb[6].mxu0 %vm680_vm1, %v19847_v7  ;;  %19281 = vmatpush1.msra.mxu1 %v18778_v46 }
 0x32f   : > { %19344 = vmatprep.mubr.f32.mxu1 %v23863_v14 }
 0x331   : > { %19857 = vmatmul.mubr.msk.f32.vlgmr.msra.gmra.mrb[6].mxu1 %vm680_vm1, %v19847_v7 }
 0x3f5   : > { %v18849_v17 = vpop.f32.mrb[0].mxu0 }
 0x3f6   : > { %19367 = vst [vmem:[%s23565_s23] sm:$0xff] %v18849_v17  ;;  %v19402_v43 = vmul.f32 %v18849_v17, %v18849_v17  ;;  %v18851_v26 = vpop.f32.mrb[1].mxu0 }
 0x3f7   : > { %19368 = vst [vmem:[%s23565_s23 + $0x8] sm:$0xff] %v18851_v26  ;;  %v19383_v14 = vadd.f32 %v18851_v26, %v18849_v17  ;;  %v19403_v16 = vmul.f32 %v18851_v26, %v18851_v26 }
 0x3f8   : > { %v18920_v2 = vpop.f32.mrb[0].mxu1 }
 0x3f9   : > { %v19418_v47 = vadd.f32 %v19403_v16, %v19402_v43  ;;  %v18991_v35 = vpop.f32.mrb[2].mxu0  ;;  %19369 = vst [vmem:[%s23565_s23 + $0x10] sm:$0xff] %v18920_v2  ;;  %v19384_v58 = vadd.f32 %v19383_v14, %v18920_v2  ;;  %v19404_v48 = vmul.f32 %v18920_v2, %v18920_v2  ;;  %v18922_v57 = vpop.f32.mrb[1].mxu1 }
 0x3fa   : > { %19371 = vst [vmem:[%s23565_s23 + $0x20] sm:$0xff] %v18991_v35  ;;  %v18993_v28 = vpop.f32.mrb[3].mxu0  ;;  %19370 = vst [vmem:[%s23565_s23 + $0x18] sm:$0xff] %v18922_v57  ;;  %v19405_v51 = vmul.f32 %v18922_v57, %v18922_v57  ;;  %v19406_v29 = vmul.f32 %v18991_v35, %v18991_v35 }
 0x3fb   : > { %19372 = vst [vmem:[%s23565_s23 + $0x28] sm:$0xff] %v18993_v28  ;;  %v19419_v3 = vadd.f32 %v19418_v47, %v19404_v48  ;;  %v19385_v11 = vadd.f32 %v19384_v58, %v18922_v57  ;;  %v19407_v22 = vmul.f32 %v18993_v28, %v18993_v28 }
 0x3fc   : > { %v19062_v55 = vpop.f32.mrb[2].mxu1 }
 0x3fd   : > { %v19133_v53 = vpop.f32.mrb[4].mxu0  ;;  %v19420_v41 = vadd.f32 %v19419_v3, %v19405_v51  ;;  %v19386_v56 = vadd.f32 %v19385_v11, %v18991_v35  ;;  %19373 = vst [vmem:[%s23565_s23 + $0x30] sm:$0xff] %v19062_v55  ;;  %v19064_v8 = vpop.f32.mrb[3].mxu1  ;;  %v19408_v50 = vmul.f32 %v19062_v55, %v19062_v55 }
 0x3fe   : > { %19375 = vst [vmem:[%s23565_s23 + $0x40] sm:$0xff] %v19133_v53  ;;  %v19135_v44 = vpop.f32.mrb[5].mxu0  ;;  %19374 = vst [vmem:[%s23565_s23 + $0x38] sm:$0xff] %v19064_v8  ;;  %v19409_v27 = vmul.f32 %v19064_v8, %v19064_v8  ;;  %v19410_v5 = vmul.f32 %v19133_v53, %v19133_v53 }
 0x3ff   : > { %19376 = vst [vmem:[%s23565_s23 + $0x48] sm:$0xff] %v19135_v44  ;;  %v19387_v0 = vadd.f32 %v19386_v56, %v18993_v28  ;;  %v19421_v40 = vadd.f32 %v19420_v41, %v19406_v29  ;;  %v19411_v62 = vmul.f32 %v19135_v44, %v19135_v44 }
 0x400   : > { %v19204_v33 = vpop.f32.mrb[4].mxu1 }
 0x401   : > { %v19275_v52 = vpop.f32.mrb[6].mxu0  ;;  %v19422_v34 = vadd.f32 %v19421_v40, %v19407_v22  ;;  %v19388_v6 = vadd.f32 %v19387_v0, %v19062_v55  ;;  %19377 = vst [vmem:[%s23565_s23 + $0x50] sm:$0xff] %v19204_v33  ;;  %v19206_v32 = vpop.f32.mrb[5].mxu1  ;;  %v19412_v39 = vmul.f32 %v19204_v33, %v19204_v33 }
 0x402   : > { %19379 = vst [vmem:[%s23565_s23 + $0x60] sm:$0xff] %v19275_v52  ;;  %v19277_v10 = vpop.f32.mrb[7].mxu0  ;;  %19378 = vst [vmem:[%s23565_s23 + $0x58] sm:$0xff] %v19206_v32  ;;  %v19413_v63 = vmul.f32 %v19206_v32, %v19206_v32  ;;  %v19414_v24 = vmul.f32 %v19275_v52, %v19275_v52 }
 0x403   : > { %19380 = vst [vmem:[%s23565_s23 + $0x68] sm:$0xff] %v19277_v10  ;;  %v19423_v1 = vadd.f32 %v19422_v34, %v19408_v50  ;;  %v19389_v15 = vadd.f32 %v19388_v6, %v19064_v8  ;;  %v19415_v18 = vmul.f32 %v19277_v10, %v19277_v10 }
 0x404   : > { %v19346_v31 = vpop.f32.mrb[6].mxu1 }
 0x405   : > { %v19424_v7 = vadd.f32 %v19423_v1, %v19409_v27  ;;  %v19390_v60 = vadd.f32 %v19389_v15, %v19133_v53  ;;  %19381 = vst [vmem:[%s23565_s23 + $0x70] sm:$0xff] %v19346_v31  ;;  %v19348_v4 = vpop.f32.mrb[7].mxu1  ;;  %v19416_v23 = vmul.f32 %v19346_v31, %v19346_v31 }
 0x406   : > { %19382 = vst [vmem:[%s23565_s23 + $0x78] sm:$0xff] %v19348_v4  ;;  %v19417_v61 = vmul.f32 %v19348_v4, %v19348_v4 }
 0x407   : > { %v19391_v45 = vadd.f32 %v19390_v60, %v19135_v44  ;;  %v19425_v25 = vadd.f32 %v19424_v7, %v19410_v5 }
 0x409   : > { %v19426_v37 = vadd.f32 %v19425_v25, %v19411_v62  ;;  %v19392_v12 = vadd.f32 %v19391_v45, %v19204_v33 }
 0x40b   : > { %v19427_v59 = vadd.f32 %v19426_v37, %v19412_v39  ;;  %v19393_v13 = vadd.f32 %v19392_v12, %v19206_v32 }
 0x40d   : > { %v19428_v9 = vadd.f32 %v19427_v59, %v19413_v63  ;;  %v19394_v20 = vadd.f32 %v19393_v13, %v19275_v52 }
 0x40f   : > { %v19395_v19 = vadd.f32 %v19394_v20, %v19277_v10  ;;  %v19429_v54 = vadd.f32 %v19428_v9, %v19414_v24 }
 0x411   : > { %v19430_v36 = vadd.f32 %v19429_v54, %v19415_v18  ;;  %v19396_v21 = vadd.f32 %v19395_v19, %v19346_v31 }
 0x413   : > { %v19431_v30 = vadd.f32 %v19430_v36, %v19416_v23  ;;  %v19397_v38 = vadd.f32 %v19396_v21, %v19348_v4 }
 0x415   : > { %v19432_v49 = vadd.f32 %v19431_v30, %v19417_v61  ;;  %19398 = vadd.xlane.f32.xlu0 %v19397_v38 }
 0x417   : > { %19433 = vadd.xlane.f32.xlu1 %v19432_v49 }
 0x4a2   : > { %v19399_v42 = vpop.xlane.xlu0 %19398 }
 0x4a3   : > { %19401 = vst.msk [vmem:[%s295_s28] sm:$0xff] %vm19400_vm9, %v19399_v42 }
 0x4a4   : > { %v19434_v46 = vpop.xlane.xlu1 %19433 }
 0x4a5   : > { %19435 = vst.msk [vmem:[%s299_s9] sm:$0xff] %vm19400_vm9, %v19434_v46 }
 0x4a6 PF: > { %s18_s24 = sadd.s32 1, %s20303_s24  }
 0x4a7   : > { %p15_p4 = scmp.ge.s32.totalorder %s18_s24, 4  }
 0x4a9   :  { %17 = sbr.rel (!%p15_p4) target bundleno = 1 (0x1), region = 146 }

</bundles_post_ra>
